<compile_context>
chip_gen: v5e
topology: v5e:2x2
jax: 0.10.0
libtpu: 0.0.40
codegen_flags: <defaults>
</compile_context>

<pallas_src>
import jax
import jax.numpy as jnp
from jax import lax
from jax.experimental import pallas as pl
from jax.experimental.pallas import tpu as pltpu
import numpy as np


# ----------------------------- helpers -------------------------------------

def _round_up(x, m):
    return ((x + m - 1) // m) * m


def _pick_tile_rows(H, W, target=256):
    """Output rows per grid step: ~target output pixels per MXU matmul, TH | H,
    and TH*W a multiple of 8 (sublane-aligned flattened output block)."""
    best, best_score = H, None
    for th in range(1, H + 1):
        if H % th:
            continue
        if (th * W) % 8 and th != H:
            continue
        score = abs(th * W - target)
        if best_score is None or score < best_score:
            best, best_score = th, score
    return best


# ----------------------------- fused Pallas kernel --------------------------

def _make_basic_block_kernel(W, Cp, TH):
    M1 = (TH + 2) * W   # conv1 pixels per step (incl. one halo row each side)
    M2 = TH * W         # conv2 / output pixels per step

    def kernel(x_ref, w1_ref, b1_ref, w2_ref, b2_ref, out_ref, mid_ref, acc_ref):
        # x_ref  : (H+4, Wp, Cp)  bf16  SAME-padded NHWC input (2 pad rows each
        #                               side, 1 pad col left), channels -> Cp
        # w1_ref : (9, Cp, Cp)    bf16  per-tap conv1 weights, bn1 scale folded
        # b1_ref : (1, Cp)        f32   bn1 folded bias
        # w2_ref : (9, Cp, Cp)    bf16  per-tap conv2 weights, bn2 scale folded
        # b2_ref : (1, Cp)        f32   bn2 folded bias
        # out_ref: (TH*W, Cp)     f32   lane-dense output tile
        # mid_ref: (TH+2, Wp, Cp) bf16  conv1 output (+halo rows), zero side pads
        # acc_ref: (M1, Cp)       f32   matmul accumulator (shared by both stages)
        h = pl.program_id(1)
        row0 = h * TH                       # first image row of this tile

        # Zero only the two side-pad columns conv2 reads (col 0 and col W+1);
        # the interior is fully rewritten below every step.  NOT gated on a
        # program_id: under "parallel" sharding each core has its own scratch.
        mid_ref[:, pl.ds(0, 1), :] = jnp.zeros((TH + 2, 1, Cp), jnp.bfloat16)
        mid_ref[:, pl.ds(W + 1, 1), :] = jnp.zeros((TH + 2, 1, Cp), jnp.bfloat16)

        b1 = b1_ref[...]
        b2 = b2_ref[...]

        # ---- stage 1: conv1 + bn1 + relu over TH+2 rows (halo recompute) -----
        # conv1 output at image row (row0-1+i) reads padded-input rows
        # row0+i+kh and cols kw..kw+W-1.
        for t in range(9):
            kh, kw = divmod(t, 3)
            win = x_ref[pl.ds(row0 + kh, TH + 2), pl.ds(kw, W), :]
            d = jnp.dot(win.reshape(M1, Cp), w1_ref[t],
                        preferred_element_type=jnp.float32)
            if t == 0:
                acc_ref[...] = d
            else:
                acc_ref[...] += d
        y1 = jnp.maximum(acc_ref[...] + b1, 0.0)
        mid_ref[:, pl.ds(1, W), :] = y1.astype(jnp.bfloat16).reshape(TH + 2, W, Cp)

        # Halo rows outside the image must be zero (conv2 SAME zero padding).
        @pl.when(h == 0)
        def _():
            mid_ref[pl.ds(0, 1), pl.ds(1, W), :] = jnp.zeros((1, W, Cp), jnp.bfloat16)

        @pl.when(h == pl.num_programs(1) - 1)
        def _():
            mid_ref[pl.ds(TH + 1, 1), pl.ds(1, W), :] = jnp.zeros((1, W, Cp), jnp.bfloat16)

        # ---- stage 2: conv2 + bn2 + residual + relu ---------------------------
        for t in range(9):
            kh, kw = divmod(t, 3)
            win = mid_ref[pl.ds(kh, TH), pl.ds(kw, W), :]
            d = jnp.dot(win.reshape(M2, Cp), w2_ref[t],
                        preferred_element_type=jnp.float32)
            if t == 0:
                acc_ref[pl.ds(0, M2), :] = d
            else:
                acc_ref[pl.ds(0, M2), :] += d
        # residual = x at this tile's pixels (bf16 centre window of the padded input)
        res = x_ref[pl.ds(row0 + 2, TH), pl.ds(1, W), :].astype(jnp.float32)
        y2 = acc_ref[pl.ds(0, M2), :] + b2 + res.reshape(M2, Cp)
        out_ref[...] = jnp.maximum(y2, 0.0)

    return kernel


# ----------------------------- wrapper --------------------------------------

def basic_block_forward(x_nchw, params):
    """BasicBlock.forward (stride=1, downsample=None); x in PyTorch NCHW."""
    x = jnp.transpose(x_nchw, (0, 2, 3, 1)).astype(jnp.float32)    # NCHW -> NHWC
    N, H, W, C = x.shape
    Cout = params["w1"].shape[-1]
    assert Cout == C, "stride=1 BasicBlock requires inplanes == planes"

    Cp = _round_up(Cout, 128)              # lane-dense channel dim
    TH = _pick_tile_rows(H, W)             # output rows per grid step
    num_h = H // TH
    Wp = _round_up(W + 2, 16)              # sublane-aligned padded width (bf16)

    # SAME-padded bf16 NHWC input: 2 zero rows top/bottom (conv1 halo recompute),
    # 1 zero col left + alignment cols right, channels zero-padded to Cp.
    xpad = jnp.pad(
        x, ((0, 0), (2, 2), (1, Wp - W - 1), (0, Cp - C))).astype(jnp.bfloat16)

    # Fold BN scale into the conv weights; per-tap (Cp, Cp) bf16 matrices.
    w1 = (params["w1"] * params["scale1"]).reshape(9, C, Cout)
    w1 = jnp.pad(w1, ((0, 0), (0, Cp - C), (0, Cp - Cout))).astype(jnp.bfloat16)
    b1 = jnp.pad(params["bias1"], (0, Cp - Cout)).reshape(1, Cp).astype(jnp.float32)
    w2 = (params["w2"] * params["scale2"]).reshape(9, Cout, Cout)
    w2 = jnp.pad(w2, ((0, 0), (0, Cp - Cout), (0, Cp - Cout))).astype(jnp.bfloat16)
    b2 = jnp.pad(params["bias2"], (0, Cp - Cout)).reshape(1, Cp).astype(jnp.float32)

    kernel = _make_basic_block_kernel(W, Cp, TH)

    out_p = pl.pallas_call(
        kernel,
        out_shape=jax.ShapeDtypeStruct((N, H * W, Cp), jnp.float32),
        grid_spec=pltpu.PrefetchScalarGridSpec(
            num_scalar_prefetch=0,
            grid=(N, num_h),
            in_specs=[
                # full padded image per step (stays VMEM-resident across the
                # inner h axis since its block index only depends on n)
                pl.BlockSpec((None, H + 4, Wp, Cp), lambda n, h: (n, 0, 0, 0)),
                pl.BlockSpec((9, Cp, Cp), lambda n, h: (0, 0, 0)),
                pl.BlockSpec((1, Cp), lambda n, h: (0, 0)),
                pl.BlockSpec((9, Cp, Cp), lambda n, h: (0, 0, 0)),
                pl.BlockSpec((1, Cp), lambda n, h: (0, 0)),
            ],
            out_specs=pl.BlockSpec((None, TH * W, Cp), lambda n, h: (n, h, 0)),
            scratch_shapes=[
                pltpu.VMEM((TH + 2, Wp, Cp), jnp.bfloat16),      # mid (conv1 out)
                pltpu.VMEM(((TH + 2) * W, Cp), jnp.float32),     # matmul accumulator
            ],
        ),
        compiler_params=pltpu.CompilerParams(
            dimension_semantics=("parallel", "parallel"),
            vmem_limit_bytes=32 * 1024 * 1024),
    )(xpad, w1, b1, w2, b2)

    out = out_p[:, :, :Cout].reshape(N, H, W, Cout)
    return jnp.transpose(out, (0, 3, 1, 2))                        # NHWC -> NCHW


# ----------------------------- param init -----------------------------------

def init_params(key, inplanes, planes, eps=1e-5):
    ks = jax.random.split(key, 10)
    # conv weights: (3,3,Cin,Cout)  (PyTorch OIHW -> HWIO)
    w1 = jax.random.normal(ks[0], (3, 3, inplanes, planes), jnp.float32) * 0.1
    w2 = jax.random.normal(ks[1], (3, 3, planes, planes), jnp.float32) * 0.1
    # BatchNorm (eval-mode) parameters, folded to scale/bias.
    gamma1 = 1.0 + 0.1 * jax.random.normal(ks[2], (planes,), jnp.float32)
    beta1 = 0.1 * jax.random.normal(ks[3], (planes,), jnp.float32)
    mean1 = 0.1 * jax.random.normal(ks[4], (planes,), jnp.float32)
    var1 = jnp.abs(jax.random.normal(ks[5], (planes,), jnp.float32)) + 0.5
    gamma2 = 1.0 + 0.1 * jax.random.normal(ks[6], (planes,), jnp.float32)
    beta2 = 0.1 * jax.random.normal(ks[7], (planes,), jnp.float32)
    mean2 = 0.1 * jax.random.normal(ks[8], (planes,), jnp.float32)
    var2 = jnp.abs(jax.random.normal(ks[9], (planes,), jnp.float32)) + 0.5

    scale1 = gamma1 / jnp.sqrt(var1 + eps)
    bias1 = beta1 - mean1 * scale1
    scale2 = gamma2 / jnp.sqrt(var2 + eps)
    bias2 = beta2 - mean2 * scale2
    return dict(w1=w1, w2=w2, scale1=scale1, bias1=bias1,
                scale2=scale2, bias2=bias2)


# ----------------------------- reference (plain JAX, f32) -------------------

def basic_block_reference(x_nchw, p):
    x = jnp.transpose(x_nchw, (0, 2, 3, 1)).astype(jnp.float32)
    dn = ("NHWC", "HWIO", "NHWC")
    out = lax.conv_general_dilated(x, p["w1"], (1, 1), "SAME", dimension_numbers=dn)
    out = jnp.maximum(out * p["scale1"] + p["bias1"], 0.0)
    out = lax.conv_general_dilated(out, p["w2"], (1, 1), "SAME", dimension_numbers=dn)
    out = out * p["scale2"] + p["bias2"]
    out = jnp.maximum(out + x, 0.0)
    return jnp.transpose(out, (0, 3, 1, 2))


# ----------------------------- main ------------------------------------------

if __name__ == "__main__":
    key = jax.random.PRNGKey(0)
    kx, kp, kx2 = jax.random.split(key, 3)

    # primary small test: N=2, inplanes=planes=4, 16x16, stride=1
    N, C, H, W = 2, 4, 16, 16
    x = jax.random.normal(kx, (N, C, H, W), jnp.float32)        # PyTorch NCHW input
    params = init_params(kp, C, C)

    out = jax.block_until_ready(basic_block_forward(x, params))
    ref = jax.block_until_ready(basic_block_reference(x, params))
    # bf16 matmul operands / bf16 input & intermediate (f32 accumulation and
    # epilogue) => loosened tolerance vs. the pure-f32 reference.
    np.testing.assert_allclose(np.asarray(out), np.asarray(ref),
                               rtol=5e-2, atol=5e-2)
    assert out.shape == (N, C, H, W) and out.dtype == jnp.float32

    # second case exercising the H-tile grid axis (2 row-tiles, halo recompute)
    x2 = jax.random.normal(kx2, (1, C, 32, 16), jnp.float32)
    out2 = jax.block_until_ready(basic_block_forward(x2, params))
    ref2 = jax.block_until_ready(basic_block_reference(x2, params))
    np.testing.assert_allclose(np.asarray(out2), np.asarray(ref2),
                               rtol=5e-2, atol=5e-2)

    print("KERNEL_OK")
</pallas_src>

<mosaic_0001>
module attributes {stable_mosaic.version = 11 : i64} {
  func.func @kernel(%arg0: i32, %arg1: i32, %arg2: memref<1x20x32x128xbf16, #tpu.memory_space<vmem>>, %arg3: memref<9x128x128xbf16, #tpu.memory_space<vmem>>, %arg4: memref<1x128xf32, #tpu.memory_space<vmem>>, %arg5: memref<9x128x128xbf16, #tpu.memory_space<vmem>>, %arg6: memref<1x128xf32, #tpu.memory_space<vmem>>, %arg7: memref<1x256x128xf32, #tpu.memory_space<vmem>>, %arg8: memref<18x32x128xbf16, #tpu.memory_space<vmem>>, %arg9: memref<288x128xf32, #tpu.memory_space<vmem>>) attributes {dimension_semantics = [#tpu.dimension_semantics<parallel>, #tpu.dimension_semantics<parallel>], iteration_bounds = array<i64: 2, 1>, scalar_prefetch = 0 : i64, scratch_operands = 2 : i64, tpu.core_type = #tpu.core_type<tc>, window_params = [{transform_indices = @transform_0, window_bounds = array<i64: 1, 20, 32, 128>}, {pipeline_mode = #tpu.pipeline_mode<synchronous>, transform_indices = @transform_1, window_bounds = array<i64: 9, 128, 128>}, {pipeline_mode = #tpu.pipeline_mode<synchronous>, transform_indices = @transform_2, window_bounds = array<i64: 1, 128>}, {pipeline_mode = #tpu.pipeline_mode<synchronous>, transform_indices = @transform_3, window_bounds = array<i64: 9, 128, 128>}, {pipeline_mode = #tpu.pipeline_mode<synchronous>, transform_indices = @transform_4, window_bounds = array<i64: 1, 128>}, {transform_indices = @transform_5, window_bounds = array<i64: 1, 256, 128>}]} {
    %c16_i32 = arith.constant 16 : i32
    %0 = arith.muli %arg1, %c16_i32 : i32
    %cst = arith.constant 0.000000e+00 : bf16
    %1 = vector.broadcast %cst : bf16 to vector<18x1x128xbf16>
    %c0 = arith.constant 0 : index
    %c0_0 = arith.constant 0 : index
    %c0_1 = arith.constant 0 : index
    %2 = vector.load %arg8[%c0, %c0_0, %c0_1] : memref<18x32x128xbf16, #tpu.memory_space<vmem>>, vector<18x1x128xbf16>
    tpu.vector_store %arg8[%c0, %c0_0, %c0_1], %1 {strides = array<i32>} : memref<18x32x128xbf16, #tpu.memory_space<vmem>>, vector<18x1x128xbf16>,
    %cst_2 = arith.constant 0.000000e+00 : bf16
    %3 = vector.broadcast %cst_2 : bf16 to vector<18x1x128xbf16>
    %c0_3 = arith.constant 0 : index
    %c17 = arith.constant 17 : index
    %c0_4 = arith.constant 0 : index
    %4 = vector.load %arg8[%c0_3, %c17, %c0_4] : memref<18x32x128xbf16, #tpu.memory_space<vmem>>, vector<18x1x128xbf16>
    tpu.vector_store %arg8[%c0_3, %c17, %c0_4], %3 {strides = array<i32>} : memref<18x32x128xbf16, #tpu.memory_space<vmem>>, vector<18x1x128xbf16>,
    %c0_5 = arith.constant 0 : index
    %c0_6 = arith.constant 0 : index
    %5 = vector.load %arg4[%c0_5, %c0_6] : memref<1x128xf32, #tpu.memory_space<vmem>>, vector<1x128xf32>
    %c0_7 = arith.constant 0 : index
    %c0_8 = arith.constant 0 : index
    %6 = vector.load %arg6[%c0_7, %c0_8] : memref<1x128xf32, #tpu.memory_space<vmem>>, vector<1x128xf32>
    %c0_i32 = arith.constant 0 : i32
    %7 = arith.addi %0, %c0_i32 : i32
    %c0_9 = arith.constant 0 : index
    %8 = arith.index_cast %7 : i32 to index
    %c0_10 = arith.constant 0 : index
    %c0_11 = arith.constant 0 : index
    %9 = vector.load %arg2[%c0_9, %8, %c0_10, %c0_11] : memref<1x20x32x128xbf16, #tpu.memory_space<vmem>>, vector<1x18x16x128xbf16>
    %10 = vector.shape_cast %9 : vector<1x18x16x128xbf16> to vector<18x16x128xbf16>
    %11 = vector.shape_cast %10 : vector<18x16x128xbf16> to vector<288x128xbf16>
    %c0_12 = arith.constant 0 : index
    %c0_13 = arith.constant 0 : index
    %c0_14 = arith.constant 0 : index
    %12 = vector.load %arg3[%c0_12, %c0_13, %c0_14] : memref<9x128x128xbf16, #tpu.memory_space<vmem>>, vector<1x128x128xbf16>
    %13 = vector.shape_cast %12 : vector<1x128x128xbf16> to vector<128x128xbf16>
    %cst_15 = arith.constant dense<0.000000e+00> : vector<288x128xf32>
    %14 = tpu.matmul %11, %13, %cst_15 {dimension_numbers = #tpu.dot_dimension_numbers<[1], [0], [0], [1], [0, 0, 1, 1], [], []>} : vector<288x128xbf16>, vector<128x128xbf16>, vector<288x128xf32> -> vector<288x128xf32>
    %c0_16 = arith.constant 0 : index
    %c0_17 = arith.constant 0 : index
    %15 = vector.load %arg9[%c0_16, %c0_17] : memref<288x128xf32, #tpu.memory_space<vmem>>, vector<288x128xf32>
    tpu.vector_store %arg9[%c0_16, %c0_17], %14 {strides = array<i32>} : memref<288x128xf32, #tpu.memory_space<vmem>>, vector<288x128xf32>,
    %c0_i32_18 = arith.constant 0 : i32
    %16 = arith.addi %0, %c0_i32_18 : i32
    %c0_19 = arith.constant 0 : index
    %17 = arith.index_cast %16 : i32 to index
    %c1 = arith.constant 1 : index
    %c0_20 = arith.constant 0 : index
    %18 = vector.load %arg2[%c0_19, %17, %c1, %c0_20] : memref<1x20x32x128xbf16, #tpu.memory_space<vmem>>, vector<1x18x16x128xbf16>
    %19 = vector.shape_cast %18 : vector<1x18x16x128xbf16> to vector<18x16x128xbf16>
    %20 = vector.shape_cast %19 : vector<18x16x128xbf16> to vector<288x128xbf16>
    %c1_21 = arith.constant 1 : index
    %c0_22 = arith.constant 0 : index
    %c0_23 = arith.constant 0 : index
    %21 = vector.load %arg3[%c1_21, %c0_22, %c0_23] : memref<9x128x128xbf16, #tpu.memory_space<vmem>>, vector<1x128x128xbf16>
    %22 = vector.shape_cast %21 : vector<1x128x128xbf16> to vector<128x128xbf16>
    %cst_24 = arith.constant dense<0.000000e+00> : vector<288x128xf32>
    %23 = tpu.matmul %20, %22, %cst_24 {dimension_numbers = #tpu.dot_dimension_numbers<[1], [0], [0], [1], [0, 0, 1, 1], [], []>} : vector<288x128xbf16>, vector<128x128xbf16>, vector<288x128xf32> -> vector<288x128xf32>
    %c0_25 = arith.constant 0 : index
    %c0_26 = arith.constant 0 : index
    %24 = vector.load %arg9[%c0_25, %c0_26] : memref<288x128xf32, #tpu.memory_space<vmem>>, vector<288x128xf32>
    %25 = arith.addf %24, %23 : vector<288x128xf32>
    %c0_27 = arith.constant 0 : index
    %c0_28 = arith.constant 0 : index
    %26 = vector.load %arg9[%c0_27, %c0_28] : memref<288x128xf32, #tpu.memory_space<vmem>>, vector<288x128xf32>
    tpu.vector_store %arg9[%c0_27, %c0_28], %25 {strides = array<i32>} : memref<288x128xf32, #tpu.memory_space<vmem>>, vector<288x128xf32>,
    %c0_i32_29 = arith.constant 0 : i32
    %27 = arith.addi %0, %c0_i32_29 : i32
    %c0_30 = arith.constant 0 : index
    %28 = arith.index_cast %27 : i32 to index
    %c2 = arith.constant 2 : index
    %c0_31 = arith.constant 0 : index
    %29 = vector.load %arg2[%c0_30, %28, %c2, %c0_31] : memref<1x20x32x128xbf16, #tpu.memory_space<vmem>>, vector<1x18x16x128xbf16>
    %30 = vector.shape_cast %29 : vector<1x18x16x128xbf16> to vector<18x16x128xbf16>
    %31 = vector.shape_cast %30 : vector<18x16x128xbf16> to vector<288x128xbf16>
    %c2_32 = arith.constant 2 : index
    %c0_33 = arith.constant 0 : index
    %c0_34 = arith.constant 0 : index
    %32 = vector.load %arg3[%c2_32, %c0_33, %c0_34] : memref<9x128x128xbf16, #tpu.memory_space<vmem>>, vector<1x128x128xbf16>
    %33 = vector.shape_cast %32 : vector<1x128x128xbf16> to vector<128x128xbf16>
    %cst_35 = arith.constant dense<0.000000e+00> : vector<288x128xf32>
    %34 = tpu.matmul %31, %33, %cst_35 {dimension_numbers = #tpu.dot_dimension_numbers<[1], [0], [0], [1], [0, 0, 1, 1], [], []>} : vector<288x128xbf16>, vector<128x128xbf16>, vector<288x128xf32> -> vector<288x128xf32>
    %c0_36 = arith.constant 0 : index
    %c0_37 = arith.constant 0 : index
    %35 = vector.load %arg9[%c0_36, %c0_37] : memref<288x128xf32, #tpu.memory_space<vmem>>, vector<288x128xf32>
    %36 = arith.addf %35, %34 : vector<288x128xf32>
    %c0_38 = arith.constant 0 : index
    %c0_39 = arith.constant 0 : index
    %37 = vector.load %arg9[%c0_38, %c0_39] : memref<288x128xf32, #tpu.memory_space<vmem>>, vector<288x128xf32>
    tpu.vector_store %arg9[%c0_38, %c0_39], %36 {strides = array<i32>} : memref<288x128xf32, #tpu.memory_space<vmem>>, vector<288x128xf32>,
    %c1_i32 = arith.constant 1 : i32
    %38 = arith.addi %0, %c1_i32 : i32
    %c0_40 = arith.constant 0 : index
    %39 = arith.index_cast %38 : i32 to index
    %c0_41 = arith.constant 0 : index
    %c0_42 = arith.constant 0 : index
    %40 = vector.load %arg2[%c0_40, %39, %c0_41, %c0_42] : memref<1x20x32x128xbf16, #tpu.memory_space<vmem>>, vector<1x18x16x128xbf16>
    %41 = vector.shape_cast %40 : vector<1x18x16x128xbf16> to vector<18x16x128xbf16>
    %42 = vector.shape_cast %41 : vector<18x16x128xbf16> to vector<288x128xbf16>
    %c3 = arith.constant 3 : index
    %c0_43 = arith.constant 0 : index
    %c0_44 = arith.constant 0 : index
    %43 = vector.load %arg3[%c3, %c0_43, %c0_44] : memref<9x128x128xbf16, #tpu.memory_space<vmem>>, vector<1x128x128xbf16>
    %44 = vector.shape_cast %43 : vector<1x128x128xbf16> to vector<128x128xbf16>
    %cst_45 = arith.constant dense<0.000000e+00> : vector<288x128xf32>
    %45 = tpu.matmul %42, %44, %cst_45 {dimension_numbers = #tpu.dot_dimension_numbers<[1], [0], [0], [1], [0, 0, 1, 1], [], []>} : vector<288x128xbf16>, vector<128x128xbf16>, vector<288x128xf32> -> vector<288x128xf32>
    %c0_46 = arith.constant 0 : index
    %c0_47 = arith.constant 0 : index
    %46 = vector.load %arg9[%c0_46, %c0_47] : memref<288x128xf32, #tpu.memory_space<vmem>>, vector<288x128xf32>
    %47 = arith.addf %46, %45 : vector<288x128xf32>
    %c0_48 = arith.constant 0 : index
    %c0_49 = arith.constant 0 : index
    %48 = vector.load %arg9[%c0_48, %c0_49] : memref<288x128xf32, #tpu.memory_space<vmem>>, vector<288x128xf32>
    tpu.vector_store %arg9[%c0_48, %c0_49], %47 {strides = array<i32>} : memref<288x128xf32, #tpu.memory_space<vmem>>, vector<288x128xf32>,
    %c1_i32_50 = arith.constant 1 : i32
    %49 = arith.addi %0, %c1_i32_50 : i32
    %c0_51 = arith.constant 0 : index
    %50 = arith.index_cast %49 : i32 to index
    %c1_52 = arith.constant 1 : index
    %c0_53 = arith.constant 0 : index
    %51 = vector.load %arg2[%c0_51, %50, %c1_52, %c0_53] : memref<1x20x32x128xbf16, #tpu.memory_space<vmem>>, vector<1x18x16x128xbf16>
    %52 = vector.shape_cast %51 : vector<1x18x16x128xbf16> to vector<18x16x128xbf16>
    %53 = vector.shape_cast %52 : vector<18x16x128xbf16> to vector<288x128xbf16>
    %c4 = arith.constant 4 : index
    %c0_54 = arith.constant 0 : index
    %c0_55 = arith.constant 0 : index
    %54 = vector.load %arg3[%c4, %c0_54, %c0_55] : memref<9x128x128xbf16, #tpu.memory_space<vmem>>, vector<1x128x128xbf16>
    %55 = vector.shape_cast %54 : vector<1x128x128xbf16> to vector<128x128xbf16>
    %cst_56 = arith.constant dense<0.000000e+00> : vector<288x128xf32>
    %56 = tpu.matmul %53, %55, %cst_56 {dimension_numbers = #tpu.dot_dimension_numbers<[1], [0], [0], [1], [0, 0, 1, 1], [], []>} : vector<288x128xbf16>, vector<128x128xbf16>, vector<288x128xf32> -> vector<288x128xf32>
    %c0_57 = arith.constant 0 : index
    %c0_58 = arith.constant 0 : index
    %57 = vector.load %arg9[%c0_57, %c0_58] : memref<288x128xf32, #tpu.memory_space<vmem>>, vector<288x128xf32>
    %58 = arith.addf %57, %56 : vector<288x128xf32>
    %c0_59 = arith.constant 0 : index
    %c0_60 = arith.constant 0 : index
    %59 = vector.load %arg9[%c0_59, %c0_60] : memref<288x128xf32, #tpu.memory_space<vmem>>, vector<288x128xf32>
    tpu.vector_store %arg9[%c0_59, %c0_60], %58 {strides = array<i32>} : memref<288x128xf32, #tpu.memory_space<vmem>>, vector<288x128xf32>,
    %c1_i32_61 = arith.constant 1 : i32
    %60 = arith.addi %0, %c1_i32_61 : i32
    %c0_62 = arith.constant 0 : index
    %61 = arith.index_cast %60 : i32 to index
    %c2_63 = arith.constant 2 : index
    %c0_64 = arith.constant 0 : index
    %62 = vector.load %arg2[%c0_62, %61, %c2_63, %c0_64] : memref<1x20x32x128xbf16, #tpu.memory_space<vmem>>, vector<1x18x16x128xbf16>
    %63 = vector.shape_cast %62 : vector<1x18x16x128xbf16> to vector<18x16x128xbf16>
    %64 = vector.shape_cast %63 : vector<18x16x128xbf16> to vector<288x128xbf16>
    %c5 = arith.constant 5 : index
    %c0_65 = arith.constant 0 : index
    %c0_66 = arith.constant 0 : index
    %65 = vector.load %arg3[%c5, %c0_65, %c0_66] : memref<9x128x128xbf16, #tpu.memory_space<vmem>>, vector<1x128x128xbf16>
    %66 = vector.shape_cast %65 : vector<1x128x128xbf16> to vector<128x128xbf16>
    %cst_67 = arith.constant dense<0.000000e+00> : vector<288x128xf32>
    %67 = tpu.matmul %64, %66, %cst_67 {dimension_numbers = #tpu.dot_dimension_numbers<[1], [0], [0], [1], [0, 0, 1, 1], [], []>} : vector<288x128xbf16>, vector<128x128xbf16>, vector<288x128xf32> -> vector<288x128xf32>
    %c0_68 = arith.constant 0 : index
    %c0_69 = arith.constant 0 : index
    %68 = vector.load %arg9[%c0_68, %c0_69] : memref<288x128xf32, #tpu.memory_space<vmem>>, vector<288x128xf32>
    %69 = arith.addf %68, %67 : vector<288x128xf32>
    %c0_70 = arith.constant 0 : index
    %c0_71 = arith.constant 0 : index
    %70 = vector.load %arg9[%c0_70, %c0_71] : memref<288x128xf32, #tpu.memory_space<vmem>>, vector<288x128xf32>
    tpu.vector_store %arg9[%c0_70, %c0_71], %69 {strides = array<i32>} : memref<288x128xf32, #tpu.memory_space<vmem>>, vector<288x128xf32>,
    %c2_i32 = arith.constant 2 : i32
    %71 = arith.addi %0, %c2_i32 : i32
    %c0_72 = arith.constant 0 : index
    %72 = arith.index_cast %71 : i32 to index
    %c0_73 = arith.constant 0 : index
    %c0_74 = arith.constant 0 : index
    %73 = vector.load %arg2[%c0_72, %72, %c0_73, %c0_74] : memref<1x20x32x128xbf16, #tpu.memory_space<vmem>>, vector<1x18x16x128xbf16>
    %74 = vector.shape_cast %73 : vector<1x18x16x128xbf16> to vector<18x16x128xbf16>
    %75 = vector.shape_cast %74 : vector<18x16x128xbf16> to vector<288x128xbf16>
    %c6 = arith.constant 6 : index
    %c0_75 = arith.constant 0 : index
    %c0_76 = arith.constant 0 : index
    %76 = vector.load %arg3[%c6, %c0_75, %c0_76] : memref<9x128x128xbf16, #tpu.memory_space<vmem>>, vector<1x128x128xbf16>
    %77 = vector.shape_cast %76 : vector<1x128x128xbf16> to vector<128x128xbf16>
    %cst_77 = arith.constant dense<0.000000e+00> : vector<288x128xf32>
    %78 = tpu.matmul %75, %77, %cst_77 {dimension_numbers = #tpu.dot_dimension_numbers<[1], [0], [0], [1], [0, 0, 1, 1], [], []>} : vector<288x128xbf16>, vector<128x128xbf16>, vector<288x128xf32> -> vector<288x128xf32>
    %c0_78 = arith.constant 0 : index
    %c0_79 = arith.constant 0 : index
    %79 = vector.load %arg9[%c0_78, %c0_79] : memref<288x128xf32, #tpu.memory_space<vmem>>, vector<288x128xf32>
    %80 = arith.addf %79, %78 : vector<288x128xf32>
    %c0_80 = arith.constant 0 : index
    %c0_81 = arith.constant 0 : index
    %81 = vector.load %arg9[%c0_80, %c0_81] : memref<288x128xf32, #tpu.memory_space<vmem>>, vector<288x128xf32>
    tpu.vector_store %arg9[%c0_80, %c0_81], %80 {strides = array<i32>} : memref<288x128xf32, #tpu.memory_space<vmem>>, vector<288x128xf32>,
    %c2_i32_82 = arith.constant 2 : i32
    %82 = arith.addi %0, %c2_i32_82 : i32
    %c0_83 = arith.constant 0 : index
    %83 = arith.index_cast %82 : i32 to index
    %c1_84 = arith.constant 1 : index
    %c0_85 = arith.constant 0 : index
    %84 = vector.load %arg2[%c0_83, %83, %c1_84, %c0_85] : memref<1x20x32x128xbf16, #tpu.memory_space<vmem>>, vector<1x18x16x128xbf16>
    %85 = vector.shape_cast %84 : vector<1x18x16x128xbf16> to vector<18x16x128xbf16>
    %86 = vector.shape_cast %85 : vector<18x16x128xbf16> to vector<288x128xbf16>
    %c7 = arith.constant 7 : index
    %c0_86 = arith.constant 0 : index
    %c0_87 = arith.constant 0 : index
    %87 = vector.load %arg3[%c7, %c0_86, %c0_87] : memref<9x128x128xbf16, #tpu.memory_space<vmem>>, vector<1x128x128xbf16>
    %88 = vector.shape_cast %87 : vector<1x128x128xbf16> to vector<128x128xbf16>
    %cst_88 = arith.constant dense<0.000000e+00> : vector<288x128xf32>
    %89 = tpu.matmul %86, %88, %cst_88 {dimension_numbers = #tpu.dot_dimension_numbers<[1], [0], [0], [1], [0, 0, 1, 1], [], []>} : vector<288x128xbf16>, vector<128x128xbf16>, vector<288x128xf32> -> vector<288x128xf32>
    %c0_89 = arith.constant 0 : index
    %c0_90 = arith.constant 0 : index
    %90 = vector.load %arg9[%c0_89, %c0_90] : memref<288x128xf32, #tpu.memory_space<vmem>>, vector<288x128xf32>
    %91 = arith.addf %90, %89 : vector<288x128xf32>
    %c0_91 = arith.constant 0 : index
    %c0_92 = arith.constant 0 : index
    %92 = vector.load %arg9[%c0_91, %c0_92] : memref<288x128xf32, #tpu.memory_space<vmem>>, vector<288x128xf32>
    tpu.vector_store %arg9[%c0_91, %c0_92], %91 {strides = array<i32>} : memref<288x128xf32, #tpu.memory_space<vmem>>, vector<288x128xf32>,
    %c2_i32_93 = arith.constant 2 : i32
    %93 = arith.addi %0, %c2_i32_93 : i32
    %c0_94 = arith.constant 0 : index
    %94 = arith.index_cast %93 : i32 to index
    %c2_95 = arith.constant 2 : index
    %c0_96 = arith.constant 0 : index
    %95 = vector.load %arg2[%c0_94, %94, %c2_95, %c0_96] : memref<1x20x32x128xbf16, #tpu.memory_space<vmem>>, vector<1x18x16x128xbf16>
    %96 = vector.shape_cast %95 : vector<1x18x16x128xbf16> to vector<18x16x128xbf16>
    %97 = vector.shape_cast %96 : vector<18x16x128xbf16> to vector<288x128xbf16>
    %c8 = arith.constant 8 : index
    %c0_97 = arith.constant 0 : index
    %c0_98 = arith.constant 0 : index
    %98 = vector.load %arg3[%c8, %c0_97, %c0_98] : memref<9x128x128xbf16, #tpu.memory_space<vmem>>, vector<1x128x128xbf16>
    %99 = vector.shape_cast %98 : vector<1x128x128xbf16> to vector<128x128xbf16>
    %cst_99 = arith.constant dense<0.000000e+00> : vector<288x128xf32>
    %100 = tpu.matmul %97, %99, %cst_99 {dimension_numbers = #tpu.dot_dimension_numbers<[1], [0], [0], [1], [0, 0, 1, 1], [], []>} : vector<288x128xbf16>, vector<128x128xbf16>, vector<288x128xf32> -> vector<288x128xf32>
    %c0_100 = arith.constant 0 : index
    %c0_101 = arith.constant 0 : index
    %101 = vector.load %arg9[%c0_100, %c0_101] : memref<288x128xf32, #tpu.memory_space<vmem>>, vector<288x128xf32>
    %102 = arith.addf %101, %100 : vector<288x128xf32>
    %c0_102 = arith.constant 0 : index
    %c0_103 = arith.constant 0 : index
    %103 = vector.load %arg9[%c0_102, %c0_103] : memref<288x128xf32, #tpu.memory_space<vmem>>, vector<288x128xf32>
    tpu.vector_store %arg9[%c0_102, %c0_103], %102 {strides = array<i32>} : memref<288x128xf32, #tpu.memory_space<vmem>>, vector<288x128xf32>,
    %c0_104 = arith.constant 0 : index
    %c0_105 = arith.constant 0 : index
    %104 = vector.load %arg9[%c0_104, %c0_105] : memref<288x128xf32, #tpu.memory_space<vmem>>, vector<288x128xf32>
    %105 = vector.broadcast %5 : vector<1x128xf32> to vector<288x128xf32>
    %106 = arith.addf %104, %105 : vector<288x128xf32>
    %cst_106 = arith.constant 0.000000e+00 : f32
    %107 = vector.broadcast %cst_106 : f32 to vector<288x128xf32>
    %108 = arith.maximumf %106, %107 : vector<288x128xf32>
    %109 = arith.truncf %108 : vector<288x128xf32> to vector<288x128xbf16>
    %110 = vector.shape_cast %109 : vector<288x128xbf16> to vector<18x16x128xbf16>
    %c0_107 = arith.constant 0 : index
    %c1_108 = arith.constant 1 : index
    %c0_109 = arith.constant 0 : index
    %111 = vector.load %arg8[%c0_107, %c1_108, %c0_109] : memref<18x32x128xbf16, #tpu.memory_space<vmem>>, vector<18x16x128xbf16>
    tpu.vector_store %arg8[%c0_107, %c1_108, %c0_109], %110 {strides = array<i32>} : memref<18x32x128xbf16, #tpu.memory_space<vmem>>, vector<18x16x128xbf16>,
    %c0_i32_110 = arith.constant 0 : i32
    %112 = arith.cmpi eq, %arg1, %c0_i32_110 : i32
    %113 = arith.extui %112 : i1 to i32
    %c0_i32_111 = arith.constant 0 : i32
    %114 = arith.cmpi ne, %113, %c0_i32_111 : i32
    scf.if %114 {
      %cst_221 = arith.constant 0.000000e+00 : bf16
      %203 = vector.broadcast %cst_221 : bf16 to vector<1x16x128xbf16>
      %c0_222 = arith.constant 0 : index
      %c1_223 = arith.constant 1 : index
      %c0_224 = arith.constant 0 : index
      %204 = vector.load %arg8[%c0_222, %c1_223, %c0_224] : memref<18x32x128xbf16, #tpu.memory_space<vmem>>, vector<1x16x128xbf16>
      tpu.vector_store %arg8[%c0_222, %c1_223, %c0_224], %203 {strides = array<i32>} : memref<18x32x128xbf16, #tpu.memory_space<vmem>>, vector<1x16x128xbf16>,
    } else {
    }
    %c0_i32_112 = arith.constant 0 : i32
    %115 = arith.cmpi eq, %arg1, %c0_i32_112 : i32
    %116 = arith.extui %115 : i1 to i32
    %c0_i32_113 = arith.constant 0 : i32
    %117 = arith.cmpi ne, %116, %c0_i32_113 : i32
    scf.if %117 {
      %cst_221 = arith.constant 0.000000e+00 : bf16
      %203 = vector.broadcast %cst_221 : bf16 to vector<1x16x128xbf16>
      %c17_222 = arith.constant 17 : index
      %c1_223 = arith.constant 1 : index
      %c0_224 = arith.constant 0 : index
      %204 = vector.load %arg8[%c17_222, %c1_223, %c0_224] : memref<18x32x128xbf16, #tpu.memory_space<vmem>>, vector<1x16x128xbf16>
      tpu.vector_store %arg8[%c17_222, %c1_223, %c0_224], %203 {strides = array<i32>} : memref<18x32x128xbf16, #tpu.memory_space<vmem>>, vector<1x16x128xbf16>,
    } else {
    }
    %c0_114 = arith.constant 0 : index
    %c0_115 = arith.constant 0 : index
    %c0_116 = arith.constant 0 : index
    %118 = vector.load %arg8[%c0_114, %c0_115, %c0_116] : memref<18x32x128xbf16, #tpu.memory_space<vmem>>, vector<16x16x128xbf16>
    %119 = vector.shape_cast %118 : vector<16x16x128xbf16> to vector<256x128xbf16>
    %c0_117 = arith.constant 0 : index
    %c0_118 = arith.constant 0 : index
    %c0_119 = arith.constant 0 : index
    %120 = vector.load %arg5[%c0_117, %c0_118, %c0_119] : memref<9x128x128xbf16, #tpu.memory_space<vmem>>, vector<1x128x128xbf16>
    %121 = vector.shape_cast %120 : vector<1x128x128xbf16> to vector<128x128xbf16>
    %cst_120 = arith.constant dense<0.000000e+00> : vector<256x128xf32>
    %122 = tpu.matmul %119, %121, %cst_120 {dimension_numbers = #tpu.dot_dimension_numbers<[1], [0], [0], [1], [0, 0, 1, 1], [], []>} : vector<256x128xbf16>, vector<128x128xbf16>, vector<256x128xf32> -> vector<256x128xf32>
    %c0_121 = arith.constant 0 : index
    %c0_122 = arith.constant 0 : index
    %123 = vector.load %arg9[%c0_121, %c0_122] : memref<288x128xf32, #tpu.memory_space<vmem>>, vector<256x128xf32>
    tpu.vector_store %arg9[%c0_121, %c0_122], %122 {strides = array<i32>} : memref<288x128xf32, #tpu.memory_space<vmem>>, vector<256x128xf32>,
    %c0_123 = arith.constant 0 : index
    %c1_124 = arith.constant 1 : index
    %c0_125 = arith.constant 0 : index
    %124 = vector.load %arg8[%c0_123, %c1_124, %c0_125] : memref<18x32x128xbf16, #tpu.memory_space<vmem>>, vector<16x16x128xbf16>
    %125 = vector.shape_cast %124 : vector<16x16x128xbf16> to vector<256x128xbf16>
    %c1_126 = arith.constant 1 : index
    %c0_127 = arith.constant 0 : index
    %c0_128 = arith.constant 0 : index
    %126 = vector.load %arg5[%c1_126, %c0_127, %c0_128] : memref<9x128x128xbf16, #tpu.memory_space<vmem>>, vector<1x128x128xbf16>
    %127 = vector.shape_cast %126 : vector<1x128x128xbf16> to vector<128x128xbf16>
    %cst_129 = arith.constant dense<0.000000e+00> : vector<256x128xf32>
    %128 = tpu.matmul %125, %127, %cst_129 {dimension_numbers = #tpu.dot_dimension_numbers<[1], [0], [0], [1], [0, 0, 1, 1], [], []>} : vector<256x128xbf16>, vector<128x128xbf16>, vector<256x128xf32> -> vector<256x128xf32>
    %c0_130 = arith.constant 0 : index
    %c0_131 = arith.constant 0 : index
    %129 = vector.load %arg9[%c0_130, %c0_131] : memref<288x128xf32, #tpu.memory_space<vmem>>, vector<256x128xf32>
    %130 = arith.addf %129, %128 : vector<256x128xf32>
    %c0_132 = arith.constant 0 : index
    %c0_133 = arith.constant 0 : index
    %131 = vector.load %arg9[%c0_132, %c0_133] : memref<288x128xf32, #tpu.memory_space<vmem>>, vector<256x128xf32>
    tpu.vector_store %arg9[%c0_132, %c0_133], %130 {strides = array<i32>} : memref<288x128xf32, #tpu.memory_space<vmem>>, vector<256x128xf32>,
    %c0_134 = arith.constant 0 : index
    %c2_135 = arith.constant 2 : index
    %c0_136 = arith.constant 0 : index
    %132 = vector.load %arg8[%c0_134, %c2_135, %c0_136] : memref<18x32x128xbf16, #tpu.memory_space<vmem>>, vector<16x16x128xbf16>
    %133 = vector.shape_cast %132 : vector<16x16x128xbf16> to vector<256x128xbf16>
    %c2_137 = arith.constant 2 : index
    %c0_138 = arith.constant 0 : index
    %c0_139 = arith.constant 0 : index
    %134 = vector.load %arg5[%c2_137, %c0_138, %c0_139] : memref<9x128x128xbf16, #tpu.memory_space<vmem>>, vector<1x128x128xbf16>
    %135 = vector.shape_cast %134 : vector<1x128x128xbf16> to vector<128x128xbf16>
    %cst_140 = arith.constant dense<0.000000e+00> : vector<256x128xf32>
    %136 = tpu.matmul %133, %135, %cst_140 {dimension_numbers = #tpu.dot_dimension_numbers<[1], [0], [0], [1], [0, 0, 1, 1], [], []>} : vector<256x128xbf16>, vector<128x128xbf16>, vector<256x128xf32> -> vector<256x128xf32>
    %c0_141 = arith.constant 0 : index
    %c0_142 = arith.constant 0 : index
    %137 = vector.load %arg9[%c0_141, %c0_142] : memref<288x128xf32, #tpu.memory_space<vmem>>, vector<256x128xf32>
    %138 = arith.addf %137, %136 : vector<256x128xf32>
    %c0_143 = arith.constant 0 : index
    %c0_144 = arith.constant 0 : index
    %139 = vector.load %arg9[%c0_143, %c0_144] : memref<288x128xf32, #tpu.memory_space<vmem>>, vector<256x128xf32>
    tpu.vector_store %arg9[%c0_143, %c0_144], %138 {strides = array<i32>} : memref<288x128xf32, #tpu.memory_space<vmem>>, vector<256x128xf32>,
    %c1_145 = arith.constant 1 : index
    %c0_146 = arith.constant 0 : index
    %c0_147 = arith.constant 0 : index
    %140 = vector.load %arg8[%c1_145, %c0_146, %c0_147] : memref<18x32x128xbf16, #tpu.memory_space<vmem>>, vector<16x16x128xbf16>
    %141 = vector.shape_cast %140 : vector<16x16x128xbf16> to vector<256x128xbf16>
    %c3_148 = arith.constant 3 : index
    %c0_149 = arith.constant 0 : index
    %c0_150 = arith.constant 0 : index
    %142 = vector.load %arg5[%c3_148, %c0_149, %c0_150] : memref<9x128x128xbf16, #tpu.memory_space<vmem>>, vector<1x128x128xbf16>
    %143 = vector.shape_cast %142 : vector<1x128x128xbf16> to vector<128x128xbf16>
    %cst_151 = arith.constant dense<0.000000e+00> : vector<256x128xf32>
    %144 = tpu.matmul %141, %143, %cst_151 {dimension_numbers = #tpu.dot_dimension_numbers<[1], [0], [0], [1], [0, 0, 1, 1], [], []>} : vector<256x128xbf16>, vector<128x128xbf16>, vector<256x128xf32> -> vector<256x128xf32>
    %c0_152 = arith.constant 0 : index
    %c0_153 = arith.constant 0 : index
    %145 = vector.load %arg9[%c0_152, %c0_153] : memref<288x128xf32, #tpu.memory_space<vmem>>, vector<256x128xf32>
    %146 = arith.addf %145, %144 : vector<256x128xf32>
    %c0_154 = arith.constant 0 : index
    %c0_155 = arith.constant 0 : index
    %147 = vector.load %arg9[%c0_154, %c0_155] : memref<288x128xf32, #tpu.memory_space<vmem>>, vector<256x128xf32>
    tpu.vector_store %arg9[%c0_154, %c0_155], %146 {strides = array<i32>} : memref<288x128xf32, #tpu.memory_space<vmem>>, vector<256x128xf32>,
    %c1_156 = arith.constant 1 : index
    %c1_157 = arith.constant 1 : index
    %c0_158 = arith.constant 0 : index
    %148 = vector.load %arg8[%c1_156, %c1_157, %c0_158] : memref<18x32x128xbf16, #tpu.memory_space<vmem>>, vector<16x16x128xbf16>
    %149 = vector.shape_cast %148 : vector<16x16x128xbf16> to vector<256x128xbf16>
    %c4_159 = arith.constant 4 : index
    %c0_160 = arith.constant 0 : index
    %c0_161 = arith.constant 0 : index
    %150 = vector.load %arg5[%c4_159, %c0_160, %c0_161] : memref<9x128x128xbf16, #tpu.memory_space<vmem>>, vector<1x128x128xbf16>
    %151 = vector.shape_cast %150 : vector<1x128x128xbf16> to vector<128x128xbf16>
    %cst_162 = arith.constant dense<0.000000e+00> : vector<256x128xf32>
    %152 = tpu.matmul %149, %151, %cst_162 {dimension_numbers = #tpu.dot_dimension_numbers<[1], [0], [0], [1], [0, 0, 1, 1], [], []>} : vector<256x128xbf16>, vector<128x128xbf16>, vector<256x128xf32> -> vector<256x128xf32>
    %c0_163 = arith.constant 0 : index
    %c0_164 = arith.constant 0 : index
    %153 = vector.load %arg9[%c0_163, %c0_164] : memref<288x128xf32, #tpu.memory_space<vmem>>, vector<256x128xf32>
    %154 = arith.addf %153, %152 : vector<256x128xf32>
    %c0_165 = arith.constant 0 : index
    %c0_166 = arith.constant 0 : index
    %155 = vector.load %arg9[%c0_165, %c0_166] : memref<288x128xf32, #tpu.memory_space<vmem>>, vector<256x128xf32>
    tpu.vector_store %arg9[%c0_165, %c0_166], %154 {strides = array<i32>} : memref<288x128xf32, #tpu.memory_space<vmem>>, vector<256x128xf32>,
    %c1_167 = arith.constant 1 : index
    %c2_168 = arith.constant 2 : index
    %c0_169 = arith.constant 0 : index
    %156 = vector.load %arg8[%c1_167, %c2_168, %c0_169] : memref<18x32x128xbf16, #tpu.memory_space<vmem>>, vector<16x16x128xbf16>
    %157 = vector.shape_cast %156 : vector<16x16x128xbf16> to vector<256x128xbf16>
    %c5_170 = arith.constant 5 : index
    %c0_171 = arith.constant 0 : index
    %c0_172 = arith.constant 0 : index
    %158 = vector.load %arg5[%c5_170, %c0_171, %c0_172] : memref<9x128x128xbf16, #tpu.memory_space<vmem>>, vector<1x128x128xbf16>
    %159 = vector.shape_cast %158 : vector<1x128x128xbf16> to vector<128x128xbf16>
    %cst_173 = arith.constant dense<0.000000e+00> : vector<256x128xf32>
    %160 = tpu.matmul %157, %159, %cst_173 {dimension_numbers = #tpu.dot_dimension_numbers<[1], [0], [0], [1], [0, 0, 1, 1], [], []>} : vector<256x128xbf16>, vector<128x128xbf16>, vector<256x128xf32> -> vector<256x128xf32>
    %c0_174 = arith.constant 0 : index
    %c0_175 = arith.constant 0 : index
    %161 = vector.load %arg9[%c0_174, %c0_175] : memref<288x128xf32, #tpu.memory_space<vmem>>, vector<256x128xf32>
    %162 = arith.addf %161, %160 : vector<256x128xf32>
    %c0_176 = arith.constant 0 : index
    %c0_177 = arith.constant 0 : index
    %163 = vector.load %arg9[%c0_176, %c0_177] : memref<288x128xf32, #tpu.memory_space<vmem>>, vector<256x128xf32>
    tpu.vector_store %arg9[%c0_176, %c0_177], %162 {strides = array<i32>} : memref<288x128xf32, #tpu.memory_space<vmem>>, vector<256x128xf32>,
    %c2_178 = arith.constant 2 : index
    %c0_179 = arith.constant 0 : index
    %c0_180 = arith.constant 0 : index
    %164 = vector.load %arg8[%c2_178, %c0_179, %c0_180] : memref<18x32x128xbf16, #tpu.memory_space<vmem>>, vector<16x16x128xbf16>
    %165 = vector.shape_cast %164 : vector<16x16x128xbf16> to vector<256x128xbf16>
    %c6_181 = arith.constant 6 : index
    %c0_182 = arith.constant 0 : index
    %c0_183 = arith.constant 0 : index
    %166 = vector.load %arg5[%c6_181, %c0_182, %c0_183] : memref<9x128x128xbf16, #tpu.memory_space<vmem>>, vector<1x128x128xbf16>
    %167 = vector.shape_cast %166 : vector<1x128x128xbf16> to vector<128x128xbf16>
    %cst_184 = arith.constant dense<0.000000e+00> : vector<256x128xf32>
    %168 = tpu.matmul %165, %167, %cst_184 {dimension_numbers = #tpu.dot_dimension_numbers<[1], [0], [0], [1], [0, 0, 1, 1], [], []>} : vector<256x128xbf16>, vector<128x128xbf16>, vector<256x128xf32> -> vector<256x128xf32>
    %c0_185 = arith.constant 0 : index
    %c0_186 = arith.constant 0 : index
    %169 = vector.load %arg9[%c0_185, %c0_186] : memref<288x128xf32, #tpu.memory_space<vmem>>, vector<256x128xf32>
    %170 = arith.addf %169, %168 : vector<256x128xf32>
    %c0_187 = arith.constant 0 : index
    %c0_188 = arith.constant 0 : index
    %171 = vector.load %arg9[%c0_187, %c0_188] : memref<288x128xf32, #tpu.memory_space<vmem>>, vector<256x128xf32>
    tpu.vector_store %arg9[%c0_187, %c0_188], %170 {strides = array<i32>} : memref<288x128xf32, #tpu.memory_space<vmem>>, vector<256x128xf32>,
    %c2_189 = arith.constant 2 : index
    %c1_190 = arith.constant 1 : index
    %c0_191 = arith.constant 0 : index
    %172 = vector.load %arg8[%c2_189, %c1_190, %c0_191] : memref<18x32x128xbf16, #tpu.memory_space<vmem>>, vector<16x16x128xbf16>
    %173 = vector.shape_cast %172 : vector<16x16x128xbf16> to vector<256x128xbf16>
    %c7_192 = arith.constant 7 : index
    %c0_193 = arith.constant 0 : index
    %c0_194 = arith.constant 0 : index
    %174 = vector.load %arg5[%c7_192, %c0_193, %c0_194] : memref<9x128x128xbf16, #tpu.memory_space<vmem>>, vector<1x128x128xbf16>
    %175 = vector.shape_cast %174 : vector<1x128x128xbf16> to vector<128x128xbf16>
    %cst_195 = arith.constant dense<0.000000e+00> : vector<256x128xf32>
    %176 = tpu.matmul %173, %175, %cst_195 {dimension_numbers = #tpu.dot_dimension_numbers<[1], [0], [0], [1], [0, 0, 1, 1], [], []>} : vector<256x128xbf16>, vector<128x128xbf16>, vector<256x128xf32> -> vector<256x128xf32>
    %c0_196 = arith.constant 0 : index
    %c0_197 = arith.constant 0 : index
    %177 = vector.load %arg9[%c0_196, %c0_197] : memref<288x128xf32, #tpu.memory_space<vmem>>, vector<256x128xf32>
    %178 = arith.addf %177, %176 : vector<256x128xf32>
    %c0_198 = arith.constant 0 : index
    %c0_199 = arith.constant 0 : index
    %179 = vector.load %arg9[%c0_198, %c0_199] : memref<288x128xf32, #tpu.memory_space<vmem>>, vector<256x128xf32>
    tpu.vector_store %arg9[%c0_198, %c0_199], %178 {strides = array<i32>} : memref<288x128xf32, #tpu.memory_space<vmem>>, vector<256x128xf32>,
    %c2_200 = arith.constant 2 : index
    %c2_201 = arith.constant 2 : index
    %c0_202 = arith.constant 0 : index
    %180 = vector.load %arg8[%c2_200, %c2_201, %c0_202] : memref<18x32x128xbf16, #tpu.memory_space<vmem>>, vector<16x16x128xbf16>
    %181 = vector.shape_cast %180 : vector<16x16x128xbf16> to vector<256x128xbf16>
    %c8_203 = arith.constant 8 : index
    %c0_204 = arith.constant 0 : index
    %c0_205 = arith.constant 0 : index
    %182 = vector.load %arg5[%c8_203, %c0_204, %c0_205] : memref<9x128x128xbf16, #tpu.memory_space<vmem>>, vector<1x128x128xbf16>
    %183 = vector.shape_cast %182 : vector<1x128x128xbf16> to vector<128x128xbf16>
    %cst_206 = arith.constant dense<0.000000e+00> : vector<256x128xf32>
    %184 = tpu.matmul %181, %183, %cst_206 {dimension_numbers = #tpu.dot_dimension_numbers<[1], [0], [0], [1], [0, 0, 1, 1], [], []>} : vector<256x128xbf16>, vector<128x128xbf16>, vector<256x128xf32> -> vector<256x128xf32>
    %c0_207 = arith.constant 0 : index
    %c0_208 = arith.constant 0 : index
    %185 = vector.load %arg9[%c0_207, %c0_208] : memref<288x128xf32, #tpu.memory_space<vmem>>, vector<256x128xf32>
    %186 = arith.addf %185, %184 : vector<256x128xf32>
    %c0_209 = arith.constant 0 : index
    %c0_210 = arith.constant 0 : index
    %187 = vector.load %arg9[%c0_209, %c0_210] : memref<288x128xf32, #tpu.memory_space<vmem>>, vector<256x128xf32>
    tpu.vector_store %arg9[%c0_209, %c0_210], %186 {strides = array<i32>} : memref<288x128xf32, #tpu.memory_space<vmem>>, vector<256x128xf32>,
    %c2_i32_211 = arith.constant 2 : i32
    %188 = arith.addi %0, %c2_i32_211 : i32
    %c0_212 = arith.constant 0 : index
    %189 = arith.index_cast %188 : i32 to index
    %c1_213 = arith.constant 1 : index
    %c0_214 = arith.constant 0 : index
    %190 = vector.load %arg2[%c0_212, %189, %c1_213, %c0_214] : memref<1x20x32x128xbf16, #tpu.memory_space<vmem>>, vector<1x16x16x128xbf16>
    %191 = vector.shape_cast %190 : vector<1x16x16x128xbf16> to vector<16x16x128xbf16>
    %192 = arith.extf %191 : vector<16x16x128xbf16> to vector<16x16x128xf32>
    %c0_215 = arith.constant 0 : index
    %c0_216 = arith.constant 0 : index
    %193 = vector.load %arg9[%c0_215, %c0_216] : memref<288x128xf32, #tpu.memory_space<vmem>>, vector<256x128xf32>
    %194 = vector.broadcast %6 : vector<1x128xf32> to vector<256x128xf32>
    %195 = arith.addf %193, %194 : vector<256x128xf32>
    %196 = vector.shape_cast %192 : vector<16x16x128xf32> to vector<256x128xf32>
    %197 = arith.addf %195, %196 : vector<256x128xf32>
    %cst_217 = arith.constant 0.000000e+00 : f32
    %198 = vector.broadcast %cst_217 : f32 to vector<256x128xf32>
    %199 = arith.maximumf %197, %198 : vector<256x128xf32>
    %c0_218 = arith.constant 0 : index
    %c0_219 = arith.constant 0 : index
    %c0_220 = arith.constant 0 : index
    %200 = vector.load %arg7[%c0_218, %c0_219, %c0_220] : memref<1x256x128xf32, #tpu.memory_space<vmem>>, vector<1x256x128xf32>
    %201 = vector.shape_cast %200 : vector<1x256x128xf32> to vector<256x128xf32>
    %202 = vector.shape_cast %199 : vector<256x128xf32> to vector<1x256x128xf32>
    tpu.vector_store %arg7[%c0_218, %c0_219, %c0_220], %202 {strides = array<i32>} : memref<1x256x128xf32, #tpu.memory_space<vmem>>, vector<1x256x128xf32>,
    return
  }
  func.func @transform_0(%arg0: i32, %arg1: i32) -> (i32, i32, i32, i32) {
    %c0_i32 = arith.constant 0 : i32
    %c0_i32_0 = arith.constant 0 : i32
    %c0_i32_1 = arith.constant 0 : i32
    %c0_i32_2 = arith.constant 0 : i32
    return %arg0, %c0_i32, %c0_i32_0, %c0_i32_1 : i32, i32, i32, i32
  }
  func.func @transform_1(%arg0: i32, %arg1: i32) -> (i32, i32, i32) {
    %c0_i32 = arith.constant 0 : i32
    %c0_i32_0 = arith.constant 0 : i32
    %c0_i32_1 = arith.constant 0 : i32
    %c0_i32_2 = arith.constant 0 : i32
    return %c0_i32, %c0_i32_0, %c0_i32_1 : i32, i32, i32
  }
  func.func @transform_2(%arg0: i32, %arg1: i32) -> (i32, i32) {
    %c0_i32 = arith.constant 0 : i32
    %c0_i32_0 = arith.constant 0 : i32
    %c0_i32_1 = arith.constant 0 : i32
    return %c0_i32, %c0_i32_0 : i32, i32
  }
  func.func @transform_3(%arg0: i32, %arg1: i32) -> (i32, i32, i32) {
    %c0_i32 = arith.constant 0 : i32
    %c0_i32_0 = arith.constant 0 : i32
    %c0_i32_1 = arith.constant 0 : i32
    %c0_i32_2 = arith.constant 0 : i32
    return %c0_i32, %c0_i32_0, %c0_i32_1 : i32, i32, i32
  }
  func.func @transform_4(%arg0: i32, %arg1: i32) -> (i32, i32) {
    %c0_i32 = arith.constant 0 : i32
    %c0_i32_0 = arith.constant 0 : i32
    %c0_i32_1 = arith.constant 0 : i32
    return %c0_i32, %c0_i32_0 : i32, i32
  }
  func.func @transform_5(%arg0: i32, %arg1: i32) -> (i32, i32, i32) {
    %c0_i32 = arith.constant 0 : i32
    %c0_i32_0 = arith.constant 0 : i32
    return %arg0, %arg1, %c0_i32 : i32, i32, i32
  }
}

</mosaic_0001>

<bundles_post_ra>
// kernel: tpu_custom_call.1
= control target key start
LH: loop header
LB: loop body
LE: loop exit
PB: predicated region body
PF: predicated region fallthrough
CT: control target
= control target key end

     0   :  { %s17440_s0 = inlined_call_operand.hbm [shape: bf16[2,20,32,128], index: 0, kind: input, shape index: {}]   ;;  %s17441_s1 = inlined_call_operand.hbm [shape: bf16[9,128,128], index: 1, kind: input, shape index: {}]   ;;  %s17442_s2 = inlined_call_operand.vmem [shape: f32[1,128], index: 2, kind: input, shape index: {}]   ;;  %s17443_s3 = inlined_call_operand.hbm [shape: bf16[9,128,128], index: 3, kind: input, shape index: {}]   ;;  %s17444_s4 = inlined_call_operand.vmem [shape: f32[1,128], index: 4, kind: input, shape index: {}]   ;;  %s17445_s5 = inlined_call_operand.hbm [shape: f32[2,256,128], index: 5, kind: output, shape index: {}]  }
   0x1   :  { %17449 = sst [smem:[#allocation55_spill]] %s17441_s1 }
   0x2   :  { %17450 = sst [smem:[#allocation56_spill]] %s17443_s3 }
   0x3   :  { %10 = vsyncpa [#allocation5], 0 }
   0x4   :  { %12 = vsyncpa [#allocation5 + $0x1], 0 }
   0x5   :  { %13 = vsyncpa [#allocation8], 0 }
   0x6   :  { %14 = vsyncpa [#allocation6], 0 }
   0x7   :  { %16 = vsyncpa [#allocation6 + $0x1], 0  ;;  %s14000_s18 = smov 0   ;;  %s14002_s19 = smov 0  }
   0x8   :  { %s14004_s20 = smov 0   ;;  %s14006_s21 = smov 0  }
   0x9   :  { %s14008_s22 = smov 0   ;;  %s14010_s23 = smov 0  }
   0xa LB: > { %s11908_s24 = sadd.s32 4294967295, %s13961_s23   ;;  %s11909_s25 = sadd.s32 4294967294, %s13961_s23   ;;  %s13961_s23 = sphi %s14010_s23, %s22_s23   ;;  %s13957_s22 = sphi %s14008_s22, %s17726_s22   ;;  %s13953_s21 = sphi %s14006_s21, %s17725_s21   ;;  %s13949_s20 = sphi %s14004_s20, %s17724_s20   ;;  %s13945_s19 = sphi %s14002_s19, %s17723_s19   ;;  %s13941_s18 = sphi %s14000_s18, %s17722_s18  }
   0xb   : > { %p54_p0 = scmp.ne.s32.totalorder %s13945_s19, %s13941_s18  ;;  %p14034_p1 = scmp.eq.s32.totalorder %s11908_s24, 0 }
   0xc   : > { %p14038_p2 = scmp.eq.s32.totalorder %s11908_s24, 1  ;;  %p170_p3 = scmp.eq.s32.totalorder %s11909_s25, 1 }
   0xd   : > { %p14044_p4 = por %p14034_p1, %p54_p0  ;;  %p11910_p5 = scmp.ge.s32.totalorder %s13961_s23, 1 }
   0xe   : > { %p14049_p6 = por %p170_p3, %p54_p0  ;;  %p177_p7 = scmp.lt.s32.totalorder %s13961_s23, 3 }
   0xf   : > { %s17455_s1 = sld [smem:[#allocation55_spill]]  ;;  %s13963_s9 = smov [#allocation7]  }
  0x10   : > { %p14057_p8 = pnand %p11910_p5, %p177_p7  ;;  %s190_s10 = sshll.u32 %s13963_s9, 4  ;;  %s191_s10 = int_to_ptr.vmem [resolvable:$true] %s190_s10 }
  0x11   : > { %p11913_p11 = scmp.ge.s32.totalorder %s13961_s23, 2  ;;  %s17457_s3 = sld [smem:[#allocation56_spill]] }
  0x12   : > { %p13704_p9 = pneg %p14057_p8  ;;  %s17446_s14 = smov 64  }
  0x13   : > { %s17447_s15 = smov 4   ;;  %s13966_s16 = smov [#allocation9]  }
  0x14   : > { %p13705_p10 = pnand %p13704_p9, %p14034_p1  ;;  %s207_s17 = sshll.u32 %s13966_s16, 4  ;;  %s208_s17 = int_to_ptr.vmem [resolvable:$true] %s207_s17 }
  0x15   : > { %s188_s7 = sshll.u32 %s17455_s1, 4  ;;  %s34_s24 = sadd.s32 1, %s13957_s22  ;;  %s189_s7 = int_to_ptr.hbm [resolvable:$true] %s188_s7 }
  0x16   : > { %13707 = dma.hbm_to_vmem [thread:$0]  (!%p13705_p10), %s189_s7, 9216, %s191_s10, [#allocation8], %s17446_s14, %s17446_s14, %s17447_s15  }
  0x17   : > { %s205_s13 = sshll.u32 %s17457_s3, 4  ;;  %s41_s25 = sadd.s32 1, %s13949_s20  ;;  %s206_s13 = int_to_ptr.hbm [resolvable:$true] %s205_s13 }
  0x18   : > { %13710 = dma.hbm_to_vmem [thread:$0]  (!%p13705_p10), %s206_s13, 9216, %s208_s17, [#allocation8], %s17446_s14, %s17446_s14, %s17447_s15  }
  0x19   : > { %p36_p12 = scmp.ge.s32.totalorder %s34_s24, 2  ;;  %p48_p13 = scmp.ne.s32.totalorder %s13949_s20, %s13945_s19 }
  0x1a   : > { %p49_p0 = scmp.eq.s32.totalorder %s13961_s23, 0  ;;  %p13721_p3 = scmp.lt.s32.totalorder %s13961_s23, 2 }
  0x1b   : > { %s17728_s24 = smov (%p36_p12, %s34_s24), 0  ;;  %p14085_p7 = por %p14038_p2, %p48_p13 }
  0x1c   : > { %p50_p5 = por %p49_p0, %p48_p13  ;;  %s38_s6 = ssub.s32 %s13957_s22, %s17728_s24 }
  0x1d   : > { %s224_s7 = sand.u32 1, %s13949_s20   ;;  %p39_p9 = scmp.eq.s32.totalorder %s38_s6, 0 }
  0x1e   : > { %s13689_s9 = smul.u32 320, %s224_s7  ;;  %p13712_p10 = pnand %p13721_p3, %p50_p5 }
  0x1f   : > { %s14093_s10 = scalar_select %p39_p9, %s13949_s20, %s41_s25  }
  0x20   : > { %s13690_s11 = smul.u32 320, %s13957_s22  ;;  %s228_s12 = scalar_lea.vmem [#allocation4], %s13689_s9 }
  0x21   : > { %s236_s13 = sshll.u32 %s228_s12, 4  ;;  %s225_s15 = scalar_lea.sflag [#allocation5], %s224_s7  ;;  %s237_s13 = int_to_ptr.vmem [resolvable:$true] %s236_s13 }
  0x22   : > { %s233_s14 = scalar_lea.hbm %s17440_s0, %s13690_s11  ;;  %s17459_s1 = smov 4  }
  0x23   : > { %s234_s27 = sshll.u32 %s233_s14, 4  ;;  %s17460_s3 = smov 64   ;;  %s235_s27 = int_to_ptr.hbm [resolvable:$true] %s234_s27 }
  0x24   : > { %13714 = dma.hbm_to_vmem [thread:$0]  (!%p13712_p10), %s235_s27, 5120, %s237_s13, %s225_s15, %s17460_s3, %s17460_s3, %s17459_s1  }
  0x25   : > { %248 = sbr.rel (%p14057_p8) target bundleno = 1851 (0x73b), region = 40 }
  0x2a   : > { %s14105_s25 = sand.u32 1, %s13945_s19  }
  0x2b   : > { %s13691_s6 = smul.u32 320, %s14105_s25  ;;  %s251_s9 = scalar_lea.sflag [#allocation5], %s14105_s25 }
  0x2d   : > { %s14109_s11 = scalar_lea.vmem [#allocation4], %s13691_s6 }
  0x2e   : > { %13928 = dma.done.wait (%p14044_p4), %s251_s9, 5120  }
  0x2f   : > { %13930 = vsyncadd (%p14044_p4), %s251_s9, 4294962176 }
  0x30   : > { %13932 = dma.done.wait (%p14034_p1), [#allocation8], 18432  }
  0x31   : > { %13934 = vsyncadd (%p14034_p1), [#allocation8], 4294948864  ;;  %v13371_v0 = vld [vmem:[#allocation7 + $0x38] sm:$0xff]  ;;  %v13370_v2 = vld [vmem:[#allocation7 + $0x30] sm:$0xff]  ;;  %vm810_vm0 = vsmask.f32 3328 }
  0x32   : > { %v13379_v1 = vld [vmem:[#allocation7 + $0x78] sm:$0xff]  ;;  %621 = vmatpush.bf16.msra.mxu0 %v13371_v0  ;;  %v13378_v3 = vld [vmem:[#allocation7 + $0x70] sm:$0xff]  ;;  %v756_v4 = vld [vmem:[%s14109_s11] sm:$0xf]  ;;  %vm811_vm1 = vsmask.f32 7440 }
  0x33   : > { %1382 = vmatpush.bf16.msra.mxu1 %v13379_v1  ;;  %13673 = vmatpush.bf16.msra.mxu3 %v13379_v1  ;;  %v13369_v5 = vld [vmem:[#allocation7 + $0x28] sm:$0xff]  ;;  %v757_v7 = vld [vmem:[%s14109_s11 + $0x4] sm:$0xf]  ;;  %v814_v8 = vshrl.u32 %v756_v4, 16  ;;  %v817_v9 = vshll.u32 %v756_v4, 16  ;;  %v14122_v13 = vld [vmem:[#allocation7 + $0xb8] sm:$0xff] }
  0x34   : > { %v13377_v6 = vld [vmem:[#allocation7 + $0x68] sm:$0xff]  ;;  %v823_v10 = vshll.u32 %v757_v7, 16  ;;  %v827_v11 = vshrl.u32 %v757_v7, 16  ;;  %v789_v12 = vld [vmem:[%s14109_s11 + $0xb0] sm:$0xf]  ;;  %13681 = vmatpush.bf16.msra.mxu2 %v14122_v13  ;;  %v13368_v19 = vld [vmem:[#allocation7 + $0x20] sm:$0xff] }
  0x35   : > { %v790_v14 = vld [vmem:[%s14109_s11 + $0xb4] sm:$0xf]  ;;  %v816_v15 = vrot.slane %v814_v8, 4  ;;  %v819_v16 = vrot.slane %v817_v9, 5  ;;  %v1078_v18 = vshrl.u32 %v789_v12, 16  ;;  %v13376_v20 = vld [vmem:[#allocation7 + $0x60] sm:$0xff]  ;;  %vm14133_vm2 = vmor %vm810_vm0, %vm811_vm1 }
  0x36   : > { %622 = vmatpush.bf16.msra.mxu0 %v13370_v2  ;;  %v14125_v17 = vrot.slane %v823_v10, 5  ;;  %v829_v21 = vrot.slane %v827_v11, 4  ;;  %v1081_v22 = vshll.u32 %v789_v12, 16  ;;  %v1087_v23 = vshll.u32 %v790_v14, 16  ;;  %v758_v25 = vld [vmem:[%s14109_s11 + $0x8] sm:$0x1] }
  0x37   : > { %1383 = vmatpush.bf16.msra.mxu1 %v13378_v3  ;;  %13674 = vmatpush.bf16.msra.mxu3 %v13378_v3  ;;  %v1091_v24 = vshrl.u32 %v790_v14, 16  ;;  %v1080_v26 = vrot.slane %v1078_v18, 4  ;;  %v791_v27 = vld [vmem:[%s14109_s11 + $0xb8] sm:$0x1]  ;;  %v820_v33 = vor.u32 %v819_v16, %v816_v15  ;;  %v833_v35 = vshll.u32 %v758_v25, 16  ;;  %v13366_v39 = vld [vmem:[#allocation7 + $0x10] sm:$0xff] }
  0x38   : > { %v1083_v28 = vrot.slane %v1081_v22, 5  ;;  %v1089_v29 = vrot.slane %v1087_v23, 5  ;;  %v13367_v31 = vld [vmem:[#allocation7 + $0x18] sm:$0xff]  ;;  %v830_v34 = vor.u32 %v829_v21, %v14125_v17  ;;  %v1097_v38 = vshll.u32 %v791_v27, 16  ;;  %v759_v40 = vld [vmem:[%s14109_s11 + $0x10] sm:$0xf] }
  0x39   : > { %v1093_v30 = vrot.slane %v1091_v24, 4  ;;  %v13375_v32 = vld [vmem:[#allocation7 + $0x58] sm:$0xff]  ;;  %v13374_v41 = vld [vmem:[#allocation7 + $0x50] sm:$0xff]  ;;  %v821_v42 = vrot.slane %v820_v33, 4  ;;  %v835_v44 = vrot.slane %v833_v35, 5  ;;  %v838_v51 = vshrl.u32 %v759_v40, 16 }
  0x3a   : > { %623 = vmatpush.bf16.msra.mxu0 %v13369_v5  ;;  %v1084_v36 = vor.u32 %v1083_v28, %v1080_v26  ;;  %v831_v43 = vrot.slane %v830_v34, 4  ;;  %v760_v45 = vld [vmem:[%s14109_s11 + $0x14] sm:$0xf]  ;;  %v1099_v49 = vrot.slane %v1097_v38, 5  ;;  %v792_v50 = vld [vmem:[%s14109_s11 + $0xc0] sm:$0xf] }
  0x3b   : > { %1384 = vmatpush.bf16.msra.mxu1 %v13377_v6  ;;  %13675 = vmatpush.bf16.msra.mxu3 %v13377_v6  ;;  %v1094_v37 = vor.u32 %v1093_v30, %v1089_v29  ;;  %v841_v52 = vshll.u32 %v759_v40, 16  ;;  %v793_v53 = vld [vmem:[%s14109_s11 + $0xc4] sm:$0xf]  ;;  %v847_v54 = vshll.u32 %v760_v45, 16  ;;  %v851_v55 = vshrl.u32 %v760_v45, 16  ;;  %v13365_v56 = vld [vmem:[#allocation7 + $0x8] sm:$0xff] }
  0x3c   : > { %v1085_v47 = vrot.slane %v1084_v36, 4  ;;  %v13373_v57 = vld [vmem:[#allocation7 + $0x48] sm:$0xff]  ;;  %v826_v58 = vsel %vm14133_vm2, %v821_v42, %v14125_v17  ;;  %v836_v59 = vsel %vm14133_vm2, %v831_v43, %v835_v44  ;;  %v1102_v60 = vshrl.u32 %v792_v50, 16  ;;  %v13364_v8 = vld [vmem:[#allocation7] sm:$0xff]  ;;  %v761_v12 = vld [vmem:[%s14109_s11 + $0x18] sm:$0x1] }
  0x3d   : > { %v1095_v48 = vrot.slane %v1094_v37, 4  ;;  %v1105_v61 = vshll.u32 %v792_v50, 16  ;;  %v1111_v0 = vshll.u32 %v793_v53, 16  ;;  %v1115_v1 = vshrl.u32 %v793_v53, 16  ;;  %v13372_v9 = vld [vmem:[#allocation7 + $0x40] sm:$0xff]  ;;  %v13386_v38 = vld [vmem:[#allocation7 + $0xb0] sm:$0xff] }
  0x3e   : > { %624 = vmatpush.bf16.msra.mxu0 %v13368_v19  ;;  %v1090_v62 = vsel %vm14133_vm2, %v1085_v47, %v1089_v29  ;;  %v840_v2 = vrot.slane %v838_v51, 4  ;;  %v843_v3 = vrot.slane %v841_v52, 5  ;;  %v1262_v4 = vunpack.c.l.b16 %v826_v58  ;;  %v794_v19 = vld [vmem:[%s14109_s11 + $0xc8] sm:$0x1]  ;;  %v762_v26 = vld [vmem:[%s14109_s11 + $0x20] sm:$0xf]  ;;  %13682 = vmatpush.bf16.msra.mxu2 %v13386_v38 }
  0x3f   : > { %1385 = vmatpush.bf16.msra.mxu1 %v13376_v20  ;;  %13676 = vmatpush.bf16.msra.mxu3 %v13376_v20  ;;  %v1100_v63 = vsel %vm14133_vm2, %v1095_v48, %v1099_v49  ;;  %v1263_v5 = vunpack.c.l.b16 %v836_v59  ;;  %v849_v6 = vrot.slane %v847_v54, 5  ;;  %v853_v7 = vrot.slane %v851_v55, 4  ;;  %v13346_v20 = vld [vmem:[%s14109_s11] sm:$0xff]  ;;  %v795_v40 = vld [vmem:[%s14109_s11 + $0xd0] sm:$0xf]  ;;  %s11918_s12 = sshll.u32 %s14105_s25, 8 }
  0x40   : > { %v1284_v10 = vunpack.c.l.b16 %v1090_v62  ;;  %v1285_v11 = vunpack.c.l.b16 %v1100_v63  ;;  %v1104_v14 = vrot.slane %v1102_v60, 4  ;;  %v1107_v15 = vrot.slane %v1105_v61, 5  ;;  %v763_v29 = vld [vmem:[%s14109_s11 + $0x24] sm:$0xf]  ;;  %v764_v52 = vld [vmem:[%s14109_s11 + $0x28] sm:$0x1] }
  0x41   : > { %v1113_v16 = vrot.slane %v1111_v0, 5  ;;  %v1117_v17 = vrot.slane %v1115_v1, 4  ;;  %v844_v18 = vor.u32 %v843_v3, %v840_v2  ;;  %v1298_v21 = vpack.c.b16 %v1263_v5, %v1262_v4  ;;  %v797_v3 = vld [vmem:[%s14109_s11 + $0xd8] sm:$0x1]  ;;  %v13347_v4 = vld [vmem:[%s14109_s11 + $0x10] sm:$0xff]  ;;  %s17078_s13 = scalar_lea.vmem [#allocation10], %s11918_s12 }
  0x42   : > { %625 = vmatpush.bf16.msra.mxu0 %v13367_v31  ;;  %v854_v22 = vor.u32 %v853_v7, %v849_v6  ;;  %v857_v23 = vshll.u32 %v761_v12, 16  ;;  %v1309_v24 = vpack.c.b16 %v1285_v11, %v1284_v10  ;;  %v1108_v25 = vor.u32 %v1107_v15, %v1104_v14  ;;  %v765_v14 = vld [vmem:[%s14109_s11 + $0x30] sm:$0xf]  ;;  %v766_v15 = vld [vmem:[%s14109_s11 + $0x34] sm:$0xf]  ;;  %s13592_s27 = sshll.u32 %s13953_s21, 8 }
  0x43   : > { %1386 = vmatpush.bf16.msra.mxu1 %v13375_v32  ;;  %13677 = vmatpush.bf16.msra.mxu3 %v13375_v32  ;;  %v1118_v27 = vor.u32 %v1117_v17, %v1113_v16  ;;  %v1121_v28 = vshll.u32 %v794_v19, 16  ;;  %v845_v30 = vrot.slane %v844_v18, 4  ;;  %v862_v33 = vshrl.u32 %v762_v26, 16  ;;  %v798_v17 = vld [vmem:[%s14109_s11 + $0xe0] sm:$0xf]  ;;  %s11792_s1 = sshll.u32 %s17078_s13, 4  ;;  %s11793_s1 = int_to_ptr.vmem [resolvable:$true] %s11792_s1 }
  0x44   : > { %v855_v31 = vrot.slane %v854_v22, 4  ;;  %v859_v32 = vrot.slane %v857_v23, 5  ;;  %v865_v34 = vshll.u32 %v762_v26, 16  ;;  %v1109_v35 = vrot.slane %v1108_v25, 4  ;;  %v799_v18 = vld [vmem:[%s14109_s11 + $0xe4] sm:$0xf] }
  0x45   : > { %v871_v36 = vshll.u32 %v763_v29, 16  ;;  %v875_v37 = vshrl.u32 %v763_v29, 16  ;;  %v850_v42 = vsel %vm14133_vm2, %v845_v30, %v849_v6  ;;  %v864_v44 = vrot.slane %v862_v33, 4  ;;  %s11778_s21 = scalar_lea.sflag [#allocation6], %s14105_s25  ;;  %s13895_s15 = scalar_lea.hbm %s17445_s5, 512 }
  0x46   : > { %626 = vmatpush.bf16.msra.mxu0 %v13366_v39  ;;  %v1119_v39 = vrot.slane %v1118_v27, 4  ;;  %v860_v43 = vsel %vm14133_vm2, %v855_v31, %v859_v32  ;;  %v867_v45 = vrot.slane %v865_v34, 5  ;;  %v1114_v47 = vsel %vm14133_vm2, %v1109_v35, %v1113_v16 }
  0x47   : > { %1387 = vmatpush.bf16.msra.mxu1 %v13374_v41  ;;  %13678 = vmatpush.bf16.msra.mxu3 %v13374_v41  ;;  %v796_v41 = vld [vmem:[%s14109_s11 + $0xd4] sm:$0xf]  ;;  %v873_v48 = vrot.slane %v871_v36, 5  ;;  %v877_v49 = vrot.slane %v875_v37, 4  ;;  %v1126_v50 = vshrl.u32 %v795_v40, 16  ;;  %v1129_v53 = vshll.u32 %v795_v40, 16 }
  0x48   : > { %v1135_v54 = vshll.u32 %v796_v41, 16  ;;  %v1139_v55 = vshrl.u32 %v796_v41, 16  ;;  %v1286_v58 = vunpack.c.l.b16 %v1114_v47  ;;  %v868_v60 = vor.u32 %v867_v45, %v864_v44  ;;  %v800_v45 = vld [vmem:[%s14109_s11 + $0xe8] sm:$0x1] }
  0x49   : > { %v878_v61 = vor.u32 %v877_v49, %v873_v48  ;;  %v881_v62 = vshll.u32 %v764_v52, 16  ;;  %v1128_v63 = vrot.slane %v1126_v50, 4  ;;  %v1131_v0 = vrot.slane %v1129_v53, 5  ;;  %v13348_v50 = vld [vmem:[%s14109_s11 + $0x20] sm:$0xff] }
  0x4a   : > { %627 = vmatpush.bf16.msra.mxu0 %v13365_v56  ;;  %v1264_v56 = vunpack.c.l.b16 %v850_v42  ;;  %v1137_v1 = vrot.slane %v1135_v54, 5  ;;  %v1141_v2 = vrot.slane %v1139_v55, 4  ;;  %v869_v7 = vrot.slane %v868_v60, 4 }
  0x4b   : > { %1388 = vmatpush.bf16.msra.mxu1 %v13373_v57  ;;  %13679 = vmatpush.bf16.msra.mxu3 %v13373_v57  ;;  %v1265_v57 = vunpack.c.l.b16 %v860_v43  ;;  %v1132_v10 = vor.u32 %v1131_v0, %v1128_v63  ;;  %v1145_v12 = vshll.u32 %v797_v3, 16  ;;  %v886_v23 = vshrl.u32 %v765_v14, 16  ;;  %v13385_v63 = vld [vmem:[#allocation7 + $0xa8] sm:$0xff]  ;;  %v769_v0 = vld [vmem:[%s14109_s11 + $0x44] sm:$0xf] }
  0x4c   : > { %v1142_v11 = vor.u32 %v1141_v2, %v1137_v1  ;;  %v874_v16 = vsel %vm14133_vm2, %v869_v7, %v873_v48  ;;  %v895_v25 = vshll.u32 %v766_v15, 16  ;;  %v899_v26 = vshrl.u32 %v766_v15, 16  ;;  %v801_v3 = vld [vmem:[%s14109_s11 + $0xf0] sm:$0xf]  ;;  %13683 = vmatpush.bf16.msra.mxu2 %v13385_v63 }
  0x4d   : > { %v1299_v5 = vpack.c.b16 %v1265_v57, %v1264_v56  ;;  %v1147_v22 = vrot.slane %v1145_v12, 5  ;;  %v1150_v27 = vshrl.u32 %v798_v17, 16  ;;  %v1159_v29 = vshll.u32 %v799_v18, 16 }
  0x4e   : > { %628 = vmatpush.bf16.msra.mxu0 %v13364_v8  ;;  %v883_v8 = vrot.slane %v881_v62, 5  ;;  %v1163_v30 = vshrl.u32 %v799_v18, 16  ;;  %v1266_v31 = vunpack.c.l.b16 %v874_v16  ;;  %v888_v35 = vrot.slane %v886_v23, 4 }
  0x4f   : > { %1389 = vmatpush.bf16.msra.mxu1 %v13372_v9  ;;  %13680 = vmatpush.bf16.msra.mxu3 %v13372_v9  ;;  %v879_v9 = vrot.slane %v878_v61, 4  ;;  %v897_v37 = vrot.slane %v895_v25, 5  ;;  %v1161_v41 = vrot.slane %v1159_v29, 5  ;;  %v1169_v54 = vshll.u32 %v800_v45, 16  ;;  %v770_v25 = vld [vmem:[%s14109_s11 + $0x48] sm:$0x1] }
  0x50   : > { %v1165_v42 = vrot.slane %v1163_v30, 4  ;;  %v1177_v12 = vshll.u32 %v801_v3, 16  ;;  %v803_v30 = vld [vmem:[%s14109_s11 + $0xf8] sm:$0x1]  ;;  %vm1697_vm3 = vcmask 1042432   ;;  %vm1698_vm4 = vcmask 1046532  }
  0x51   : > { %629 = vmatmul.bf16.vlgmr.msra.gmra.mxu0 %v13346_v20  ;;  %v884_v19 = vsel %vm14133_vm2, %v879_v9, %v883_v8  ;;  %v1133_v20 = vrot.slane %v1132_v10, 4  ;;  %v1171_v62 = vrot.slane %v1169_v54, 5  ;;  %v919_v9 = vshll.u32 %v769_v0, 16  ;;  %v13412_v54 = vld [vmem:[#allocation7 + $0xf0] sm:$0xff]  ;;  %vm14226_vm5 = vmor %vm1697_vm3, %vm1698_vm4 }
  0x52   : > { %1963 = vmatpush.bf16.msrb.mxu0 %v14122_v13  ;;  %1390 = vmatmul.bf16.vlgmr.msra.gmra.mxu1 %v1298_v21  ;;  %v1123_v13 = vrot.slane %v1121_v28, 5  ;;  %v1143_v21 = vrot.slane %v1142_v11, 4  ;;  %v1153_v28 = vshll.u32 %v798_v17, 16  ;;  %v1267_v32 = vunpack.c.l.b16 %v884_v19 }
  0x53   : > { %1445 = vmatmul.bf16.vlgmr.msra.gmra.mxu3 %v1309_v24  ;;  %v889_v24 = vshll.u32 %v765_v14, 16  ;;  %v1138_v33 = vsel %vm14133_vm2, %v1133_v20, %v1137_v1  ;;  %v1166_v53 = vor.u32 %v1165_v42, %v1161_v41  ;;  %v923_v10 = vshrl.u32 %v769_v0, 16 }
  0x54   : > { %v1124_v51 = vsel %vm14133_vm2, %v1119_v39, %v1123_v13  ;;  %v1148_v34 = vsel %vm14133_vm2, %v1143_v21, %v1147_v22  ;;  %v767_v39 = vld [vmem:[%s14109_s11 + $0x38] sm:$0x1]  ;;  %v1152_v13 = vrot.slane %v1150_v27, 4  ;;  %v1155_v40 = vrot.slane %v1153_v28, 5 }
  0x55   : > { %v1287_v59 = vunpack.c.l.b16 %v1124_v51  ;;  %v891_v36 = vrot.slane %v889_v24, 5  ;;  %v1288_v43 = vunpack.c.l.b16 %v1138_v33  ;;  %v1289_v44 = vunpack.c.l.b16 %v1148_v34 }
  0x56   : > { %1964 = vmatpush.bf16.msrb.mxu0 %v13386_v38  ;;  %v901_v38 = vrot.slane %v899_v26, 4  ;;  %v1300_v47 = vpack.c.b16 %v1267_v32, %v1266_v31  ;;  %v905_v49 = vshll.u32 %v767_v39, 16  ;;  %v1156_v52 = vor.u32 %v1155_v40, %v1152_v13  ;;  %v13349_v31 = vld [vmem:[%s14109_s11 + $0x30] sm:$0xff] }
  0x57   : > { %v1310_v6 = vpack.c.b16 %v1287_v59, %v1286_v58  ;;  %v892_v48 = vor.u32 %v891_v36, %v888_v35  ;;  %v1311_v55 = vpack.c.b16 %v1289_v44, %v1288_v43  ;;  %v768_v58 = vld [vmem:[%s14109_s11 + $0x40] sm:$0xf]  ;;  %v1167_v61 = vrot.slane %v1166_v53, 4  ;;  %v771_v36 = vld [vmem:[%s14109_s11 + $0x50] sm:$0xf]  ;;  %v13413_v44 = vld [vmem:[#allocation7 + $0xf8] sm:$0xff] }
  0x58   : > { %v902_v51 = vor.u32 %v901_v38, %v897_v37  ;;  %v907_v57 = vrot.slane %v905_v49, 5  ;;  %v1157_v60 = vrot.slane %v1156_v52, 4  ;;  %v910_v1 = vshrl.u32 %v768_v58, 16  ;;  %v772_v40 = vld [vmem:[%s14109_s11 + $0x54] sm:$0xf]  ;;  %v13384_v49 = vld [vmem:[#allocation7 + $0xa0] sm:$0xff]  ;;  %2383 = vmatpush.bf16.msrb.mxu3 %v13413_v44 }
  0x59   : > { %v893_v56 = vrot.slane %v892_v48, 4  ;;  %v913_v2 = vshll.u32 %v768_v58, 16  ;;  %v1172_v8 = vsel %vm14133_vm2, %v1167_v61, %v1171_v62  ;;  %v1174_v11 = vshrl.u32 %v801_v3, 16  ;;  %v804_v43 = vld [vmem:[%s14109_s11 + $0x100] sm:$0xf]  ;;  %13684 = vmatpush.bf16.msra.mxu2 %v13384_v49 }
  0x5a   : > { %v903_v59 = vrot.slane %v902_v51, 4  ;;  %1965 = vmatpush.bf16.msrb.mxu0 %v13385_v63  ;;  %v1162_v7 = vsel %vm14133_vm2, %v1157_v60, %v1161_v41  ;;  %v912_v14 = vrot.slane %v910_v1, 4  ;;  %v1291_v21 = vunpack.c.l.b16 %v1172_v8  ;;  %v805_v48 = vld [vmem:[%s14109_s11 + $0x104] sm:$0xf]  ;;  %v1610_v44 = vld [vmem:[%s14109_s11 + $0x70] sm:$0xe] }
  0x5b   : > { %v915_v15 = vrot.slane %v913_v2, 5  ;;  %v1290_v20 = vunpack.c.l.b16 %v1162_v7  ;;  %v921_v22 = vrot.slane %v919_v9, 5  ;;  %v925_v23 = vrot.slane %v923_v10, 4  ;;  %v773_v10 = vld [vmem:[%s14109_s11 + $0x58] sm:$0x1] }
  0x5c   : > { %v1176_v24 = vrot.slane %v1174_v11, 4  ;;  %v1179_v27 = vrot.slane %v1177_v12, 5  ;;  %v929_v35 = vshll.u32 %v770_v25, 16  ;;  %v1193_v13 = vshll.u32 %v803_v30, 16  ;;  %2384 = vmatpush.bf16.msrb.mxu3 %v13412_v54  ;;  %v806_v12 = vld [vmem:[%s14109_s11 + $0x108] sm:$0x1] }
  0x5d   : > { %v916_v26 = vor.u32 %v915_v15, %v912_v14  ;;  %v1312_v33 = vpack.c.b16 %v1291_v21, %v1290_v20  ;;  %v926_v34 = vor.u32 %v925_v23, %v921_v22  ;;  %v934_v41 = vshrl.u32 %v771_v36, 16  ;;  %v13350_v23 = vld [vmem:[%s14109_s11 + $0x40] sm:$0xff] }
  0x5e   : > { %v1180_v38 = vor.u32 %v1179_v27, %v1176_v24  ;;  %v937_v42 = vshll.u32 %v771_v36, 16  ;;  %v1195_v53 = vrot.slane %v1193_v13, 5  ;;  %v1201_v58 = vshll.u32 %v804_v43, 16  ;;  %1966 = vmatpush.bf16.msrb.mxu0 %v13384_v49  ;;  %v1612_v49 = vld [vmem:[%s14109_s11 + $0x78] sm:$0x1] }
  0x5f   : > { %v927_v45 = vrot.slane %v926_v34, 4  ;;  %v936_v60 = vrot.slane %v934_v41, 4  ;;  %v1207_v62 = vshll.u32 %v805_v48, 16  ;;  %v1211_v63 = vshrl.u32 %v805_v48, 16  ;;  %v13381_v41 = vld [vmem:[#allocation7 + $0x88] sm:$0xff] }
  0x60   : > { %v1181_v51 = vrot.slane %v1180_v38, 4  ;;  %v939_v61 = vrot.slane %v937_v42, 5  ;;  %v1203_v8 = vrot.slane %v1201_v58, 5  ;;  %v953_v20 = vshll.u32 %v773_v10, 16  ;;  %v13382_v38 = vld [vmem:[#allocation7 + $0x90] sm:$0xff] }
  0x61   : > { %634 = vmatmul.bf16.gmra.mxu0 %v13347_v4  ;;  %v802_v4 = vld [vmem:[%s14109_s11 + $0xf4] sm:$0xf]  ;;  %v14211_v14 = vrot.slane %v1207_v62, 5  ;;  %v1213_v15 = vrot.slane %v1211_v63, 4  ;;  %vm295_vm6 = vcmask 1040384   ;;  %vm6335_vm11 = vcmask 1043456  }
  0x62   : > { %1395 = vmatmul.bf16.gmra.mxu1 %v1299_v5  ;;  %v898_v5 = vsel %vm14133_vm2, %v893_v56, %v897_v37  ;;  %v1183_v16 = vshll.u32 %v802_v4, 16  ;;  %v1187_v17 = vshrl.u32 %v802_v4, 16  ;;  %v917_v37 = vrot.slane %v916_v26, 4  ;;  %v13411_v4 = vld [vmem:[#allocation7 + $0xe8] sm:$0xff]  ;;  %v808_v48 = vld [vmem:[%s14109_s11 + $0x114] sm:$0xf] }
  0x63   : > { %1450 = vmatmul.bf16.gmra.mxu3 %v1310_v6  ;;  %v908_v6 = vsel %vm14133_vm2, %v903_v59, %v907_v57  ;;  %v1268_v18 = vunpack.c.l.b16 %v898_v5  ;;  %v947_v56 = vshrl.u32 %v772_v40, 16  ;;  %v1198_v57 = vshrl.u32 %v804_v43, 16  ;;  %v13383_v59 = vld [vmem:[#allocation7 + $0x98] sm:$0xff]  ;;  %v13408_v43 = vld [vmem:[#allocation7 + $0xd0] sm:$0xff] }
  0x64   : > { %v1269_v19 = vunpack.c.l.b16 %v908_v6  ;;  %v1185_v28 = vrot.slane %v1183_v16, 5  ;;  %v1189_v29 = vrot.slane %v1187_v17, 4  ;;  %13685 = vmatpush.bf16.msra.mxu2 %v13383_v59  ;;  %1967 = vmatpush.bf16.msrb.mxu0 %v13383_v59  ;;  %v940_v11 = vor.u32 %v939_v61, %v936_v60 }
  0x65   : > { %v949_v6 = vrot.slane %v947_v56, 4  ;;  %v1200_v7 = vrot.slane %v1198_v57, 4  ;;  %2385 = vmatpush.bf16.msrb.mxu3 %v13411_v4  ;;  %v1214_v26 = vor.u32 %v1213_v15, %v14211_v14  ;;  %v1754_v56 = vrot.slane %v1612_v49, 5  ;;  %v809_v15 = vld [vmem:[%s14109_s11 + $0x118] sm:$0x1] }
  0x66   : > { %v1301_v32 = vpack.c.b16 %v1269_v19, %v1268_v18  ;;  %v1190_v39 = vor.u32 %v1189_v29, %v1185_v28  ;;  %v1186_v2 = vsel %vm14133_vm2, %v1181_v51, %v1185_v28  ;;  %v13410_v18 = vld [vmem:[#allocation7 + $0xe0] sm:$0xff]  ;;  %v941_v25 = vrot.slane %v940_v11, 4 }
  0x67   : > { %v1292_v16 = vunpack.c.l.b16 %v1186_v2  ;;  %v1204_v21 = vor.u32 %v1203_v8, %v1200_v7  ;;  %v774_v28 = vld [vmem:[%s14109_s11 + $0x60] sm:$0xf]  ;;  %v775_v29 = vld [vmem:[%s14109_s11 + $0x64] sm:$0xf]  ;;  %v12062_v51 = vrot.slane %v1610_v44, 9  ;;  %v1231_v62 = vshll.u32 %v808_v48, 16 }
  0x68   : > { %v1191_v52 = vrot.slane %v1190_v39, 4  ;;  %v958_v36 = vshrl.u32 %v774_v28, 16  ;;  %v13409_v39 = vld [vmem:[#allocation7 + $0xd8] sm:$0xff]  ;;  %v961_v13 = vshll.u32 %v774_v28, 16  ;;  %v971_v42 = vshrl.u32 %v775_v29, 16  ;;  %13686 = vmatpush.bf16.msra.mxu2 %v13382_v38  ;;  %1968 = vmatpush.bf16.msrb.mxu0 %v13382_v38 }
  0x69   : > { %2386 = vmatpush.bf16.msrb.mxu3 %v13410_v18  ;;  %v1235_v63 = vshrl.u32 %v808_v48, 16  ;;  %v776_v8 = vld [vmem:[%s14109_s11 + $0x68] sm:$0x1]  ;;  %vm296_vm7 = vsmask.f32 256  ;;  %vm11568_vm15 = vcmask 1046528  }
  0x6a   : > { %v1196_v3 = vsel %vm14133_vm2, %v1191_v52, %v1195_v53  ;;  %v960_v61 = vrot.slane %v958_v36, 4  ;;  %v1613_v36 = vld [vmem:[%s14109_s11 + $0x80] sm:$0xe]  ;;  %v1615_v38 = vld [vmem:[%s14109_s11 + $0x88] sm:$0x1]  ;;  %vm15588_vm8 = vmand %vm295_vm6, %vm296_vm7 }
  0x6b   : > { %v1293_v17 = vunpack.c.l.b16 %v1196_v3  ;;  %v963_v3 = vrot.slane %v961_v13, 5  ;;  %v12063_v13 = vrot.slane %v1613_v36, 9  ;;  %v782_v36 = vld [vmem:[%s14109_s11 + $0x88] sm:$0x1]  ;;  %vm352_vm9 = vsmask.f32 7938 }
  0x6c   : > { %13687 = vmatpush.bf16.msra.mxu2 %v13381_v41  ;;  %1969 = vmatpush.bf16.msrb.mxu0 %v13381_v41  ;;  %v1761_v41 = vrot.slane %v1615_v38, 5  ;;  %vm15619_vm10 = vmand %vm295_vm6, %vm352_vm9  ;;  %vm5973_vm13 = vsmask.f32 4368 }
  0x6d   : > { %v1313_v27 = vpack.c.b16 %v1293_v17, %v1292_v16  ;;  %2387 = vmatpush.bf16.msrb.mxu3 %v13409_v39  ;;  %v1233_v16 = vrot.slane %v1231_v62, 5  ;;  %v1237_v17 = vrot.slane %v1235_v63, 4  ;;  %vm15660_vm12 = vmand %vm6335_vm11, %vm352_vm9 }
  0x6e   : > { %vm15675_vm14 = vmor %vm296_vm7, %vm5973_vm13 }
  0x6f   : > { %v1238_v28 = vor.u32 %v1237_v17, %v1233_v16 }
  0x71   : > { %639 = vmatmul.bf16.gmra.mxu0 %v13348_v50  ;;  %v922_v50 = vsel %vm14133_vm2, %v917_v37, %v921_v22  ;;  %v1217_v22 = vshll.u32 %v806_v12, 16  ;;  %v807_v37 = vld [vmem:[%s14109_s11 + $0x110] sm:$0xf]  ;;  %2388 = vmatpush.bf16.msrb.mxu3 %v13408_v43  ;;  %v1239_v39 = vrot.slane %v1238_v28, 4 }
  0x72   : > { %1400 = vmatmul.bf16.gmra.mxu1 %v1300_v47  ;;  %v931_v47 = vrot.slane %v929_v35, 5  ;;  %v1270_v1 = vunpack.c.l.b16 %v922_v50  ;;  %v1215_v35 = vrot.slane %v1214_v26, 4  ;;  %v1222_v54 = vshrl.u32 %v807_v37, 16 }
  0x73   : > { %1455 = vmatmul.bf16.gmra.mxu3 %v1311_v55  ;;  %v943_v55 = vshll.u32 %v772_v40, 16  ;;  %v967_v40 = vshll.u32 %v775_v29, 16  ;;  %v1241_v26 = vshll.u32 %v809_v15, 16 }
  0x74   : > { %v932_v0 = vsel %vm14133_vm2, %v927_v45, %v931_v47  ;;  %v1611_v45 = vld [vmem:[%s14109_s11 + $0x74] sm:$0xf] }
  0x75   : > { %v945_v5 = vrot.slane %v943_v55, 5  ;;  %v1271_v9 = vunpack.c.l.b16 %v932_v0  ;;  %v1751_v52 = vrot.slane %v1611_v45, 5  ;;  %v1225_v55 = vshll.u32 %v807_v37, 16  ;;  %v13380_v0 = vld [vmem:[#allocation7 + $0x80] sm:$0xff] }
  0x76   : > { %v969_v4 = vrot.slane %v967_v40, 5  ;;  %13688 = vmatpush.bf16.msra.mxu2 %v13380_v0  ;;  %1970 = vmatpush.bf16.msrb.mxu0 %v13380_v0  ;;  %v1614_v37 = vld [vmem:[%s14109_s11 + $0x84] sm:$0xf] }
  0x77   : > { %v950_v19 = vor.u32 %v949_v6, %v945_v5  ;;  %v1302_v24 = vpack.c.b16 %v1271_v9, %v1270_v1  ;;  %v946_v34 = vsel %vm14133_vm2, %v941_v25, %v945_v5  ;;  %v1752_v59 = vsel %vm14226_vm5, %v12062_v51, %v1751_v52  ;;  %v13407_v1 = vld [vmem:[#allocation7 + $0xc8] sm:$0xff] }
  0x78   : > { %v1272_v53 = vunpack.c.l.b16 %v946_v34  ;;  %v1753_v60 = vrot.slane %v1751_v52, 4  ;;  %v1857_v2 = vunpack.c.l.b16 %v1752_v59  ;;  %v973_v5 = vrot.slane %v971_v42, 4  ;;  %2389 = vmatpush.bf16.msrb.mxu3 %v13407_v1  ;;  %v777_v34 = vld [vmem:[%s14109_s11 + $0x70] sm:$0xf]  ;;  %v779_v1 = vld [vmem:[%s14109_s11 + $0x78] sm:$0x1] }
  0x79   : > { %v951_v30 = vrot.slane %v950_v19, 4  ;;  %v1224_v9 = vrot.slane %v1222_v54, 4  ;;  %v1227_v10 = vrot.slane %v1225_v55, 5  ;;  %v13406_v19 = vld [vmem:[#allocation7 + $0xc0] sm:$0xff]  ;;  %v1758_v40 = vrot.slane %v1614_v37, 5 }
  0x7a   : > { %v1755_v6 = vsel %vm14226_vm5, %v1753_v60, %v1754_v56  ;;  %v982_v42 = vshrl.u32 %v777_v34, 16  ;;  %v985_v43 = vshll.u32 %v777_v34, 16 }
  0x7b   : > { %v1858_v11 = vunpack.c.l.b16 %v1755_v6  ;;  %v1228_v25 = vor.u32 %v1227_v10, %v1224_v9  ;;  %v1760_v48 = vrot.slane %v1758_v40, 4 }
  0x7c   : > { %2390 = vmatpush.bf16.msrb.mxu3 %v13406_v19  ;;  %v984_v56 = vrot.slane %v982_v42, 4 }
  0x7d   : > { %v1886_v18 = vpack.c.b16 %v1858_v11, %v1857_v2  ;;  %v1762_v55 = vsel %vm14226_vm5, %v1760_v48, %v1761_v41 }
  0x7f   : > { %2006 = vmatmul.bf16.vlgmr.msra.gmra.mxu2 %v1886_v18  ;;  %v1617_v18 = vld [vmem:[%s14109_s11 + $0x94] sm:$0xf] }
  0x81   : > { %644 = vmatmul.bf16.gmra.mxu0 %v13349_v31  ;;  %v955_v31 = vrot.slane %v953_v20, 5  ;;  %v964_v20 = vor.u32 %v963_v3, %v960_v61 }
  0x82   : > { %1405 = vmatmul.bf16.gmra.mxu1 %v1301_v32  ;;  %v1205_v32 = vrot.slane %v1204_v21, 4  ;;  %v974_v21 = vor.u32 %v973_v5, %v969_v4 }
  0x83   : > { %1460 = vmatmul.bf16.gmra.mxu3 %v1312_v33  ;;  %v1219_v33 = vrot.slane %v1217_v22, 5  ;;  %v956_v47 = vsel %vm14133_vm2, %v951_v30, %v955_v31  ;;  %v977_v22 = vshll.u32 %v776_v8, 16  ;;  %v965_v29 = vrot.slane %v964_v20, 4 }
  0x84   : > { %v1210_v57 = vsel %vm14133_vm2, %v1205_v32, %v14211_v14  ;;  %v1273_v7 = vunpack.c.l.b16 %v956_v47  ;;  %v975_v30 = vrot.slane %v974_v21, 4  ;;  %v1229_v32 = vrot.slane %v1228_v25, 4 }
  0x85   : > { %v1220_v58 = vsel %vm14133_vm2, %v1215_v35, %v1219_v33  ;;  %v1294_v12 = vunpack.c.l.b16 %v1210_v57  ;;  %v979_v31 = vrot.slane %v977_v22, 5  ;;  %v1243_v33 = vrot.slane %v1241_v26, 5  ;;  %v778_v35 = vld [vmem:[%s14109_s11 + $0x74] sm:$0xf] }
  0x86   : > { %v1295_v14 = vunpack.c.l.b16 %v1220_v58  ;;  %v991_v44 = vshll.u32 %v778_v35, 16  ;;  %v995_v45 = vshrl.u32 %v778_v35, 16  ;;  %v1759_v47 = vsel %vm14226_vm5, %v12063_v13, %v1758_v40  ;;  %v13353_v40 = vld [vmem:[%s14109_s11 + $0x70] sm:$0xff] }
  0x87   : > { %v970_v49 = vsel %vm14133_vm2, %v965_v29, %v969_v4  ;;  %v980_v51 = vsel %vm14133_vm2, %v975_v30, %v979_v31  ;;  %v1859_v52 = vunpack.c.l.b16 %v1759_v47  ;;  %v1244_v54 = vsel %vm14133_vm2, %v1239_v39, %v1243_v33  ;;  %v13352_v4 = vld [vmem:[%s14109_s11 + $0x60] sm:$0xff] }
  0x88   : > { %v987_v57 = vrot.slane %v985_v43, 5  ;;  %v1860_v58 = vunpack.c.l.b16 %v1762_v55  ;;  %v1274_v59 = vunpack.c.l.b16 %v970_v49  ;;  %v1275_v60 = vunpack.c.l.b16 %v980_v51  ;;  %v783_v49 = vld [vmem:[%s14109_s11 + $0x90] sm:$0xf]  ;;  %v784_v51 = vld [vmem:[%s14109_s11 + $0x94] sm:$0xf] }
  0x89   : > { %v993_v61 = vrot.slane %v991_v44, 5  ;;  %v997_v62 = vrot.slane %v995_v45, 4  ;;  %v1297_v0 = vunpack.c.l.b16 %v1244_v54  ;;  %v1765_v22 = vrot.slane %v1617_v18, 5  ;;  %v13388_v44 = vld [vmem:[%s14109_s11 + $0x10] sm:$0xff]  ;;  %v1620_v55 = vld [vmem:[%s14109_s11 + $0xa4] sm:$0xf] }
  0x8a   : > { %v1887_v2 = vpack.c.b16 %v1860_v58, %v1859_v52  ;;  %v988_v3 = vor.u32 %v987_v57, %v984_v56  ;;  %v1304_v5 = vpack.c.b16 %v1275_v60, %v1274_v59  ;;  %v1025_v43 = vshll.u32 %v782_v36, 16  ;;  %v1619_v60 = vld [vmem:[%s14109_s11 + $0xa0] sm:$0xe] }
  0x8b   : > { %v998_v6 = vor.u32 %v997_v62, %v993_v61  ;;  %v1767_v26 = vrot.slane %v1765_v22, 4  ;;  %v1033_v54 = vshll.u32 %v783_v49, 16  ;;  %v1039_v57 = vshll.u32 %v784_v51, 16 }
  0x8c   : > { %v989_v9 = vrot.slane %v988_v3, 4  ;;  %v1027_v48 = vrot.slane %v1025_v43, 5  ;;  %v1043_v58 = vshrl.u32 %v784_v51, 16  ;;  %v1772_v59 = vrot.slane %v1620_v55, 5  ;;  %v788_v55 = vld [vmem:[%s14109_s11 + $0xa8] sm:$0x1] }
  0x8d   : > { %v999_v10 = vrot.slane %v998_v6, 4  ;;  %v12065_v62 = vrot.slane %v1619_v60, 9 }
  0x8e   : > { %v994_v15 = vsel %vm14133_vm2, %v989_v9, %v993_v61  ;;  %v1621_v61 = vld [vmem:[%s14109_s11 + $0xa8] sm:$0x1]  ;;  %v1045_v6 = vrot.slane %v1043_v58, 4  ;;  %v785_v9 = vld [vmem:[%s14109_s11 + $0x98] sm:$0x1]  ;;  %v13355_v58 = vld [vmem:[%s14109_s11 + $0x90] sm:$0xff] }
  0x8f   : > { %2011 = vmatmul.bf16.gmra.mxu2 %v1887_v2  ;;  %v1276_v28 = vunpack.c.l.b16 %v994_v15  ;;  %v13354_v15 = vld [vmem:[%s14109_s11 + $0x80] sm:$0xff]  ;;  %v1049_v18 = vshll.u32 %v785_v9, 16 }
  0x91   : > { %649 = vmatmul.bf16.gmra.mxu0 %v13350_v23  ;;  %v13351_v23 = vld [vmem:[%s14109_s11 + $0x50] sm:$0xff] }
  0x92   : > { %1410 = vmatmul.bf16.gmra.mxu1 %v1302_v24  ;;  %v1303_v24 = vpack.c.b16 %v1273_v7, %v1272_v53  ;;  %v1234_v53 = vsel %vm14133_vm2, %v1229_v32, %v1233_v16  ;;  %v1001_v7 = vshll.u32 %v779_v1, 16 }
  0x93   : > { %1465 = vmatmul.bf16.gmra.mxu3 %v1313_v27  ;;  %v1314_v27 = vpack.c.b16 %v1295_v14, %v1294_v12  ;;  %v1296_v63 = vunpack.c.l.b16 %v1234_v53  ;;  %v780_v12 = vld [vmem:[%s14109_s11 + $0x80] sm:$0xf]  ;;  %v781_v14 = vld [vmem:[%s14109_s11 + $0x84] sm:$0xf]  ;;  %v1030_v53 = vshrl.u32 %v783_v49, 16 }
  0x94   : > { %v1003_v11 = vrot.slane %v1001_v7, 5  ;;  %v1006_v16 = vshrl.u32 %v780_v12, 16  ;;  %v1009_v17 = vshll.u32 %v780_v12, 16  ;;  %v1015_v20 = vshll.u32 %v781_v14, 16 }
  0x95   : > { %v1315_v8 = vpack.c.b16 %v1297_v0, %v1296_v63  ;;  %v1019_v21 = vshrl.u32 %v781_v14, 16  ;;  %v1774_v63 = vrot.slane %v1772_v59, 4  ;;  %v1775_v0 = vrot.slane %v1621_v61, 5 }
  0x96   : > { %v1004_v19 = vsel %vm14133_vm2, %v999_v10, %v1003_v11  ;;  %v1008_v30 = vrot.slane %v1006_v16, 4  ;;  %v1011_v31 = vrot.slane %v1009_v17, 5  ;;  %v1017_v32 = vrot.slane %v1015_v20, 5 }
  0x97   : > { %v1277_v29 = vunpack.c.l.b16 %v1004_v19  ;;  %v1021_v33 = vrot.slane %v1019_v21, 4  ;;  %v1032_v3 = vrot.slane %v1030_v53, 4  ;;  %v1773_v7 = vsel %vm14226_vm5, %v12065_v62, %v1772_v59  ;;  %v13389_v21 = vld [vmem:[%s14109_s11 + $0x20] sm:$0xff]  ;;  %v13390_v62 = vld [vmem:[%s14109_s11 + $0x30] sm:$0xff] }
  0x98   : > { %v1012_v39 = vor.u32 %v1011_v31, %v1008_v30  ;;  %v1863_v10 = vunpack.c.l.b16 %v1773_v7 }
  0x99   : > { %v1305_v41 = vpack.c.b16 %v1277_v29, %v1276_v28  ;;  %v1022_v42 = vor.u32 %v1021_v33, %v1017_v32  ;;  %v1623_v29 = vld [vmem:[%s14109_s11 + $0xb4] sm:$0xf] }
  0x9a   : > { %v1013_v45 = vrot.slane %v1012_v39, 4  ;;  %v1622_v39 = vld [vmem:[%s14109_s11 + $0xb0] sm:$0xe] }
  0x9b   : > { %v1023_v47 = vrot.slane %v1022_v42, 4 }
  0x9c   : > { %v1018_v52 = vsel %vm14133_vm2, %v1013_v45, %v1017_v32 }
  0x9d   : > { %v1028_v56 = vsel %vm14133_vm2, %v1023_v47, %v1027_v48  ;;  %v1278_v1 = vunpack.c.l.b16 %v1018_v52 }
  0x9e   : > { %v1279_v2 = vunpack.c.l.b16 %v1028_v56 }
  0xa0   : > { %v1306_v16 = vpack.c.b16 %v1279_v2, %v1278_v1  ;;  %v1073_v1 = vshll.u32 %v788_v55, 16 }
  0xa1   : > { %654 = vmatmul.bf16.gmra.mxu0 %v13351_v23  ;;  %v1616_v23 = vld [vmem:[%s14109_s11 + $0x90] sm:$0xe] }
  0xa2   : > { %1415 = vmatmul.bf16.gmra.mxu1 %v1303_v24  ;;  %v1618_v24 = vld [vmem:[%s14109_s11 + $0x98] sm:$0x1]  ;;  %v12064_v25 = vrot.slane %v1616_v23, 9 }
  0xa3   : > { %1470 = vmatmul.bf16.gmra.mxu3 %v1314_v27  ;;  %v1768_v27 = vrot.slane %v1618_v24, 5 }
  0xa4   : > { %v1766_v34 = vsel %vm14226_vm5, %v12064_v25, %v1765_v22  ;;  %v1051_v25 = vrot.slane %v1049_v18, 5 }
  0xa5   : > { %v1769_v35 = vsel %vm14226_vm5, %v1767_v26, %v1768_v27  ;;  %v1861_v37 = vunpack.c.l.b16 %v1766_v34  ;;  %v786_v26 = vld [vmem:[%s14109_s11 + $0xa0] sm:$0xf]  ;;  %v787_v27 = vld [vmem:[%s14109_s11 + $0xa4] sm:$0xf]  ;;  %v1779_v34 = vrot.slane %v1623_v29, 5 }
  0xa6   : > { %v1862_v38 = vunpack.c.l.b16 %v1769_v35  ;;  %v1054_v32 = vshrl.u32 %v786_v26, 16  ;;  %v1057_v33 = vshll.u32 %v786_v26, 16 }
  0xa8   : > { %v1888_v13 = vpack.c.b16 %v1862_v38, %v1861_v37  ;;  %v1063_v37 = vshll.u32 %v787_v27, 16  ;;  %v1067_v38 = vshrl.u32 %v787_v27, 16  ;;  %v1056_v45 = vrot.slane %v1054_v32, 4 }
  0xa9   : > { %v1059_v47 = vrot.slane %v1057_v33, 5  ;;  %v13391_v33 = vld [vmem:[%s14109_s11 + $0x40] sm:$0xff] }
  0xaa   : > { %2016 = vmatmul.bf16.gmra.mxu2 %v1888_v13  ;;  %v1624_v13 = vld [vmem:[%s14109_s11 + $0xb8] sm:$0x1]  ;;  %v1065_v51 = vrot.slane %v1063_v37, 5  ;;  %v1069_v52 = vrot.slane %v1067_v38, 4  ;;  %v1629_v37 = vld [vmem:[%s14109_s11 + $0xd4] sm:$0xf] }
  0xab   : > { %v1782_v42 = vrot.slane %v1624_v13, 5 }
  0xb1   : > { %659 = vmatmul.bf16.gmra.mxu0 %v13352_v4  ;;  %v1035_v4 = vrot.slane %v1033_v54, 5 }
  0xb2   : > { %1420 = vmatmul.bf16.gmra.mxu1 %v1304_v5  ;;  %v1041_v5 = vrot.slane %v1039_v57, 5 }
  0xb3   : > { %1475 = vmatmul.bf16.gmra.mxu3 %v1315_v8  ;;  %v1776_v8 = vsel %vm14226_vm5, %v1774_v63, %v1775_v0  ;;  %v1036_v12 = vor.u32 %v1035_v4, %v1032_v3  ;;  %v1060_v63 = vor.u32 %v1059_v47, %v1056_v45  ;;  %v1070_v0 = vor.u32 %v1069_v52, %v1065_v51 }
  0xb4   : > { %v1864_v11 = vunpack.c.l.b16 %v1776_v8  ;;  %v1046_v17 = vor.u32 %v1045_v6, %v1041_v5  ;;  %v1626_v6 = vld [vmem:[%s14109_s11 + $0xc4] sm:$0xf] }
  0xb5   : > { %v1037_v23 = vrot.slane %v1036_v12, 4  ;;  %v1061_v3 = vrot.slane %v1060_v63, 4  ;;  %v1071_v4 = vrot.slane %v1070_v0, 4  ;;  %v1786_v8 = vrot.slane %v1626_v6, 5 }
  0xb6   : > { %v1889_v14 = vpack.c.b16 %v1864_v11, %v1863_v10  ;;  %v1047_v24 = vrot.slane %v1046_v17, 4 }
  0xb7   : > { %v1042_v28 = vsel %vm14133_vm2, %v1037_v23, %v1041_v5  ;;  %v1075_v5 = vrot.slane %v1073_v1, 5  ;;  %v1066_v11 = vsel %vm14133_vm2, %v1061_v3, %v1065_v51  ;;  %v1788_v17 = vrot.slane %v1786_v8, 4  ;;  %v1631_v1 = vld [vmem:[%s14109_s11 + $0xe0] sm:$0xe]  ;;  %v1633_v3 = vld [vmem:[%s14109_s11 + $0xe8] sm:$0x1] }
  0xb8   : > { %v1052_v31 = vsel %vm14133_vm2, %v1047_v24, %v1051_v25  ;;  %v1280_v43 = vunpack.c.l.b16 %v1042_v28  ;;  %v13356_v28 = vld [vmem:[%s14109_s11 + $0xa0] sm:$0xff]  ;;  %v1803_v6 = vrot.slane %v1633_v3, 5  ;;  %v1639_v3 = vld [vmem:[%s14109_s11 + $0x108] sm:$0x1] }
  0xb9   : > { %v1076_v12 = vsel %vm14133_vm2, %v1071_v4, %v1075_v5  ;;  %v12069_v4 = vrot.slane %v1631_v1, 9  ;;  %v1637_v1 = vld [vmem:[%s14109_s11 + $0x100] sm:$0xe] }
  0xba   : > { %2021 = vmatmul.bf16.gmra.mxu2 %v1889_v14  ;;  %v1625_v14 = vld [vmem:[%s14109_s11 + $0xc0] sm:$0xe] }
  0xc1   : > { %664 = vmatmul.bf16.gmra.mxu0 %v13353_v40  ;;  %v12066_v40 = vrot.slane %v1622_v39, 9  ;;  %v1793_v39 = vrot.slane %v1629_v37, 5 }
  0xc2   : > { %1425 = vmatmul.bf16.gmra.mxu1 %v1305_v41  ;;  %v1781_v41 = vrot.slane %v1779_v34, 4 }
  0xc3   : > { %2391 = vmatmul.bf16.vlgmr.msrb.gmra.mxu3 %v13388_v44  ;;  %v1281_v44 = vunpack.c.l.b16 %v1052_v31  ;;  %v1780_v48 = vsel %vm14226_vm5, %v12066_v40, %v1779_v34 }
  0xc4   : > { %v1783_v49 = vsel %vm14226_vm5, %v1781_v41, %v1782_v42  ;;  %v1865_v53 = vunpack.c.l.b16 %v1780_v48  ;;  %v1628_v41 = vld [vmem:[%s14109_s11 + $0xd0] sm:$0xe]  ;;  %v1630_v42 = vld [vmem:[%s14109_s11 + $0xd8] sm:$0x1] }
  0xc5   : > { %v1866_v54 = vunpack.c.l.b16 %v1783_v49  ;;  %v1307_v59 = vpack.c.b16 %v1281_v44, %v1280_v43  ;;  %v12068_v43 = vrot.slane %v1628_v41, 9  ;;  %v1795_v44 = vrot.slane %v1793_v39, 4 }
  0xc6   : > { %v1796_v45 = vrot.slane %v1630_v42, 5 }
  0xc7   : > { %v1890_v56 = vpack.c.b16 %v1866_v54, %v1865_v53  ;;  %v1794_v47 = vsel %vm14226_vm5, %v12068_v43, %v1793_v39  ;;  %v13357_v54 = vld [vmem:[%s14109_s11 + $0xb0] sm:$0xff] }
  0xc8   : > { %v1797_v48 = vsel %vm14226_vm5, %v1795_v44, %v1796_v45  ;;  %v1869_v49 = vunpack.c.l.b16 %v1794_v47  ;;  %v13359_v47 = vld [vmem:[%s14109_s11 + $0xd0] sm:$0xff] }
  0xc9   : > { %v1870_v51 = vunpack.c.l.b16 %v1797_v48 }
  0xca   : > { %2026 = vmatmul.bf16.gmra.mxu2 %v1890_v56 }
  0xcb   : > { %v1892_v52 = vpack.c.b16 %v1870_v51, %v1869_v49  ;;  %v13394_v51 = vld [vmem:[%s14109_s11 + $0x70] sm:$0xff] }
  0xce   : > { %v630_v19 = vpop.f32.mrf.mxu0 }
  0xcf   : > { %v1391_v20 = vpop.f32.mrf.mxu1 }
  0xd0   : > { %v14293_v22 = vadd.f32 %v1391_v20, %v630_v19  ;;  %v1282_v19 = vunpack.c.l.b16 %v1066_v11  ;;  %v1283_v20 = vunpack.c.l.b16 %v1076_v12 }
  0xd1   : > { %669 = vmatmul.bf16.gmra.mxu0 %v13354_v15  ;;  %v1627_v15 = vld [vmem:[%s14109_s11 + $0xc8] sm:$0x1] }
  0xd2   : > { %1430 = vmatmul.bf16.gmra.mxu1 %v1306_v16  ;;  %v12067_v16 = vrot.slane %v1625_v14, 9  ;;  %v1789_v18 = vrot.slane %v1627_v15, 5  ;;  %v1308_v29 = vpack.c.b16 %v1283_v20, %v1282_v19  ;;  %v13393_v20 = vld [vmem:[%s14109_s11 + $0x60] sm:$0xff] }
  0xd3   : > { %2396 = vmatmul.bf16.gmra.mxu3 %v13389_v21 }
  0xd4   : > { %v1787_v21 = vsel %vm14226_vm5, %v12067_v16, %v1786_v8  ;;  %v1790_v23 = vsel %vm14226_vm5, %v1788_v17, %v1789_v18  ;;  %v13358_v17 = vld [vmem:[%s14109_s11 + $0xc0] sm:$0xff] }
  0xd5   : > { %v1867_v24 = vunpack.c.l.b16 %v1787_v21  ;;  %v1868_v25 = vunpack.c.l.b16 %v1790_v23  ;;  %v1635_v23 = vld [vmem:[%s14109_s11 + $0xf4] sm:$0xf] }
  0xd6   : > { %v14300_v30 = vpop.f32.mrf.mxu3  ;;  %v14304_v35 = vpop.f32.mrf.mxu0 }
  0xd7   : > { %v14306_v36 = vpop.f32.mrf.mxu1  ;;  %v1891_v26 = vpack.c.b16 %v1868_v25, %v1867_v24  ;;  %v1807_v25 = vrot.slane %v1635_v23, 5 }
  0xda   : > { %2031 = vmatmul.bf16.gmra.mxu2 %v1891_v26 }
  0xde   : > { %v14315_v57 = vpop.f32.mrf.mxu3  ;;  %v635_v60 = vpop.f32.mrf.mxu0 }
  0xdf   : > { %v1396_v61 = vpop.f32.mrf.mxu1 }
  0xe0   : > { %v14319_v2 = vadd.f32 %v1396_v61, %v635_v60  ;;  %v1632_v60 = vld [vmem:[%s14109_s11 + $0xe4] sm:$0xf] }
  0xe1   : > { %674 = vmatmul.bf16.gmra.mxu0 %v13355_v58  ;;  %v13392_v58 = vld [vmem:[%s14109_s11 + $0x50] sm:$0xff] }
  0xe2   : > { %1435 = vmatmul.bf16.gmra.mxu1 %v1307_v59 }
  0xe3   : > { %2401 = vmatmul.bf16.gmra.mxu3 %v13390_v62  ;;  %v1800_v62 = vrot.slane %v1632_v60, 5 }
  0xe5   : > { %v1802_v5 = vrot.slane %v1800_v62, 4  ;;  %v1801_v8 = vsel %vm14226_vm5, %v12069_v4, %v1800_v62  ;;  %v12071_v4 = vrot.slane %v1637_v1, 9 }
  0xe6   : > { %v14322_v7 = vpop.f32.mrf.mxu3  ;;  %v14324_v9 = vpop.f32.mrf.mxu0  ;;  %v1871_v12 = vunpack.c.l.b16 %v1801_v8 }
  0xe7   : > { %v14326_v10 = vpop.f32.mrf.mxu1  ;;  %v1804_v11 = vsel %vm14226_vm5, %v1802_v5, %v1803_v6  ;;  %v1817_v6 = vrot.slane %v1639_v3, 5 }
  0xe8   : > { %v1872_v14 = vunpack.c.l.b16 %v1804_v11 }
  0xea   : > { %2036 = vmatmul.bf16.gmra.mxu2 %v1892_v52  ;;  %v1893_v15 = vpack.c.b16 %v1872_v14, %v1871_v12 }
  0xee   : > { %v14338_v27 = vpop.f32.mrf.mxu3  ;;  %v640_v31 = vpop.f32.mrf.mxu0 }
  0xef   : > { %v1401_v32 = vpop.f32.mrf.mxu1 }
  0xf0   : > { %v14342_v34 = vadd.f32 %v1401_v32, %v640_v31  ;;  %v1636_v31 = vld [vmem:[%s14109_s11 + $0xf8] sm:$0x1] }
  0xf1   : > { %679 = vmatmul.bf16.gmra.mxu0 %v13356_v28  ;;  %v1810_v37 = vrot.slane %v1636_v31, 5 }
  0xf2   : > { %1440 = vmatmul.bf16.gmra.mxu1 %v1308_v29  ;;  %v1634_v29 = vld [vmem:[%s14109_s11 + $0xf0] sm:$0xe] }
  0xf3   : > { %2406 = vmatmul.bf16.gmra.mxu3 %v13391_v33  ;;  %v12070_v32 = vrot.slane %v1634_v29, 9  ;;  %v1809_v33 = vrot.slane %v1807_v25, 4 }
  0xf5   : > { %v1808_v39 = vsel %vm14226_vm5, %v12070_v32, %v1807_v25  ;;  %v1811_v41 = vsel %vm14226_vm5, %v1809_v33, %v1810_v37  ;;  %v13395_v25 = vld [vmem:[%s14109_s11 + $0x80] sm:$0xff]  ;;  %v1641_v32 = vld [vmem:[%s14109_s11 + $0x114] sm:$0xf] }
  0xf6   : > { %v14345_v38 = vpop.f32.mrf.mxu3  ;;  %v14347_v13 = vpop.f32.mrf.mxu0  ;;  %v1873_v42 = vunpack.c.l.b16 %v1808_v39  ;;  %v1874_v43 = vunpack.c.l.b16 %v1811_v41  ;;  %v1821_v37 = vrot.slane %v1641_v32, 5 }
  0xf7   : > { %v14349_v40 = vpop.f32.mrf.mxu1 }
  0xf8   : > { %v1894_v44 = vpack.c.b16 %v1874_v43, %v1873_v42  ;;  %v1640_v42 = vld [vmem:[%s14109_s11 + $0x110] sm:$0xe]  ;;  %v1642_v43 = vld [vmem:[%s14109_s11 + $0x118] sm:$0x1] }
  0xfa   : > { %2041 = vmatmul.bf16.gmra.mxu2 %v1893_v15 }
  0xfe   : > { %v14357_v53 = vpop.f32.mrf.mxu3  ;;  %v645_v55 = vpop.f32.mrf.mxu0 }
  0xff   : > { %v1406_v56 = vpop.f32.mrf.mxu1 }
 0x100   : > { %v14361_v59 = vadd.f32 %v1406_v56, %v645_v55  ;;  %v1638_v55 = vld [vmem:[%s14109_s11 + $0x104] sm:$0xf] }
 0x101   : > { %684 = vmatmul.bf16.gmra.mxu0 %v13357_v54 }
 0x102   : > { %v2007_v54 = vpop.f32.mrf.mxu2 }
 0x103   : > { %2411 = vmatmul.bf16.gmra.mxu3 %v13392_v58  ;;  %v1814_v58 = vrot.slane %v1638_v55, 5 }
 0x105   : > { %v1816_v5 = vrot.slane %v1814_v58, 4  ;;  %v1815_v11 = vsel %vm14226_vm5, %v12071_v4, %v1814_v58 }
 0x106   : > { %v14364_v61 = vpop.f32.mrf.mxu3  ;;  %v14366_v63 = vpop.f32.mrf.mxu0  ;;  %v1875_v14 = vunpack.c.l.b16 %v1815_v11 }
 0x107   : > { %17465 = vst [vmem:[#allocation14_spill] sm:$0xff] %v14366_v63  ;;  %v14368_v0 = vpop.f32.mrf.mxu1  ;;  %v1818_v12 = vsel %vm14226_vm5, %v1816_v5, %v1817_v6  ;;  %v13361_v5 = vld [vmem:[%s14109_s11 + $0xf0] sm:$0xff] }
 0x108   : > { %17466 = vst [vmem:[#allocation15_spill] sm:$0xff] %v14368_v0  ;;  %v1876_v15 = vunpack.c.l.b16 %v1818_v12  ;;  %v13396_v12 = vld [vmem:[%s14109_s11 + $0x90] sm:$0xff]  ;;  %v13471_v0 = vld [vmem:[#allocation7 + $0x238] sm:$0xff] }
 0x10a   : > { %2046 = vmatmul.bf16.gmra.mxu2 %v1894_v44  ;;  %v14410_v8 = vpop.f32.mrf.mxu2  ;;  %v12072_v44 = vrot.slane %v1640_v42, 9 }
 0x10e   : > { %v14376_v16 = vpop.f32.mrf.mxu3  ;;  %v650_v18 = vpop.f32.mrf.mxu0 }
 0x10f   : > { %17467 = vst [vmem:[#allocation16_spill] sm:$0xff] %v14376_v16  ;;  %v1411_v19 = vpop.f32.mrf.mxu1 }
 0x110   : > { %v14380_v21 = vadd.f32 %v1411_v19, %v650_v18  ;;  %v13360_v19 = vld [vmem:[%s14109_s11 + $0xe0] sm:$0xff] }
 0x111   : > { %689 = vmatmul.bf16.gmra.mxu0 %v13358_v17  ;;  %v1895_v17 = vpack.c.b16 %v1876_v15, %v1875_v14 }
 0x112   : > { %17468 = vst [vmem:[#allocation17_spill] sm:$0xff] %v14380_v21  ;;  %v2012_v31 = vpop.f32.mrf.mxu2 }
 0x113   : > { %2416 = vmatmul.bf16.gmra.mxu3 %v13393_v20 }
 0x116   : > { %v14383_v24 = vpop.f32.mrf.mxu3  ;;  %v14385_v26 = vpop.f32.mrf.mxu0 }
 0x117   : > { %17469 = vst [vmem:[#allocation18_spill] sm:$0xff] %v14385_v26  ;;  %v14387_v28 = vpop.f32.mrf.mxu1  ;;  %v1600_v26 = vld [vmem:[%s14109_s11 + $0x38] sm:$0x1] }
 0x118   : > { %17470 = vst [vmem:[#allocation19_spill] sm:$0xff] %v14387_v28  ;;  %v1598_v28 = vld [vmem:[%s14109_s11 + $0x30] sm:$0xe] }
 0x11a   : > { %2051 = vmatmul.bf16.gmra.mxu2 %v1895_v17 }
 0x11e   : > { %v14395_v45 = vpop.f32.mrf.mxu3  ;;  %v655_v48 = vpop.f32.mrf.mxu0 }
 0x11f   : > { %17471 = vst [vmem:[#allocation20_spill] sm:$0xff] %v14395_v45  ;;  %v1416_v49 = vpop.f32.mrf.mxu1 }
 0x120   : > { %v14399_v52 = vadd.f32 %v1416_v49, %v655_v48  ;;  %v1824_v48 = vrot.slane %v1642_v43, 5  ;;  %v14431_v49 = vpop.f32.mrf.mxu2 }
 0x121   : > { %694 = vmatmul.bf16.gmra.mxu0 %v13359_v47  ;;  %v1823_v47 = vrot.slane %v1821_v37, 4 }
 0x122   : > { %17472 = vst [vmem:[#allocation21_spill] sm:$0xff] %v14399_v52  ;;  %v1595_v52 = vld [vmem:[%s14109_s11 + $0x20] sm:$0xe] }
 0x123   : > { %2421 = vmatmul.bf16.gmra.mxu3 %v13394_v51  ;;  %v1822_v51 = vsel %vm14226_vm5, %v12072_v44, %v1821_v37  ;;  %v1825_v55 = vsel %vm14226_vm5, %v1823_v47, %v1824_v48  ;;  %v13362_v37 = vld [vmem:[%s14109_s11 + $0x100] sm:$0xff] }
 0x124   : > { %v1877_v58 = vunpack.c.l.b16 %v1822_v51  ;;  %v1878_v1 = vunpack.c.l.b16 %v1825_v55  ;;  %v13421_v51 = vld [vmem:[#allocation7 + $0x138] sm:$0xff] }
 0x125   : > { %3213 = vmatpush.bf16.msra.mxu0 %v13421_v51 }
 0x126   : > { %v14402_v56 = vpop.f32.mrf.mxu3  ;;  %v14404_v60 = vpop.f32.mrf.mxu0  ;;  %v1896_v3 = vpack.c.b16 %v1878_v1, %v1877_v58 }
 0x127   : > { %17473 = vst [vmem:[#allocation22_spill] sm:$0xff] %v14404_v60  ;;  %v14406_v62 = vpop.f32.mrf.mxu1  ;;  %v1594_v60 = vld [vmem:[%s14109_s11 + $0x18] sm:$0x1] }
 0x128   : > { %17474 = vst [vmem:[#allocation23_spill] sm:$0xff] %v14406_v62  ;;  %v1592_v62 = vld [vmem:[%s14109_s11 + $0x10] sm:$0xe] }
 0x12a   : > { %2056 = vmatmul.bf16.gmra.mxu2 %v1896_v3  ;;  %v1590_v3 = vld [vmem:[%s14109_s11 + $0x4] sm:$0xf] }
 0x12d   : > { %v2017_v17 = vpop.f32.mrf.mxu2 }
 0x12e   : > { %v14416_v18 = vpop.f32.mrf.mxu3  ;;  %v660_v20 = vpop.f32.mrf.mxu0 }
 0x12f   : > { %17475 = vst [vmem:[#allocation24_spill] sm:$0xff] %v14416_v18  ;;  %v1421_v23 = vpop.f32.mrf.mxu1 }
 0x130   : > { %v14420_v29 = vadd.f32 %v1421_v23, %v660_v20 }
 0x131   : > { %699 = vmatmul.bf16.gmra.mxu0 %v13360_v19 }
 0x132   : > { %17476 = vst [vmem:[#allocation25_spill] sm:$0xff] %v14420_v29 }
 0x133   : > { %2426 = vmatmul.bf16.gmra.mxu3 %v13395_v25 }
 0x135   : > { %v14449_v25 = vpop.f32.mrf.mxu2 }
 0x136   : > { %v14423_v33 = vpop.f32.mrf.mxu3  ;;  %v14425_v39 = vpop.f32.mrf.mxu0 }
 0x137   : > { %17477 = vst [vmem:[#allocation26_spill] sm:$0xff] %v14425_v39  ;;  %v14427_v41 = vpop.f32.mrf.mxu1  ;;  %v13399_v39 = vld [vmem:[%s14109_s11 + $0xc0] sm:$0xff] }
 0x138   : > { %17478 = vst [vmem:[#allocation27_spill] sm:$0xff] %v14427_v41 }
 0x13d   : > { %v2022_v48 = vpop.f32.mrf.mxu2 }
 0x13e   : > { %v14437_v4 = vpop.f32.mrf.mxu3  ;;  %v665_v6 = vpop.f32.mrf.mxu0 }
 0x13f   : > { %17479 = vst [vmem:[#allocation28_spill] sm:$0xff] %v14437_v4  ;;  %v1426_v11 = vpop.f32.mrf.mxu1 }
 0x140   : > { %v1531_v14 = vadd.f32 %v1426_v11, %v665_v6 }
 0x141   : > { %704 = vmatmul.bf16.gmra.mxu0 %v13361_v5 }
 0x142   : > { %v14441_v15 = vadd.f32 %v2007_v54, %v1531_v14  ;;  %v13397_v54 = vld [vmem:[%s14109_s11 + $0xa0] sm:$0xff]  ;;  %v13398_v14 = vld [vmem:[%s14109_s11 + $0xb0] sm:$0xff] }
 0x143   : > { %2431 = vmatmul.bf16.gmra.mxu3 %v13396_v12 }
 0x145   : > { %v14464_v5 = vpop.f32.mrf.mxu2 }
 0x146   : > { %v14443_v19 = vpop.f32.mrf.mxu3  ;;  %v14445_v20 = vpop.f32.mrf.mxu0 }
 0x147   : > { %17480 = vst [vmem:[#allocation29_spill] sm:$0xff] %v14443_v19  ;;  %v14447_v23 = vpop.f32.mrf.mxu1 }
 0x14d   : > { %v2027_v4 = vpop.f32.mrf.mxu2 }
 0x14e   : > { %v14451_v32 = vpop.f32.mrf.mxu3  ;;  %v670_v42 = vpop.f32.mrf.mxu0 }
 0x14f   : > { %17481 = vst [vmem:[#allocation30_spill] sm:$0xff] %v14451_v32  ;;  %v1431_v43 = vpop.f32.mrf.mxu1 }
 0x150   : > { %v1533_v44 = vadd.f32 %v1431_v43, %v670_v42  ;;  %v1589_v43 = vld [vmem:[%s14109_s11] sm:$0xe] }
 0x151   : > { %709 = vmatmul.bf16.gmra.mxu0 %v13362_v37  ;;  %v1702_v37 = vrot.slane %v1590_v3, 5 }
 0x152   : > { %v14455_v47 = vadd.f32 %v2012_v31, %v1533_v44  ;;  %v13363_v31 = vld [vmem:[%s14109_s11 + $0x110] sm:$0xff] }
 0x153   : > { %2436 = vmatmul.bf16.gmra.mxu3 %v13397_v54  ;;  %v1591_v54 = vld [vmem:[%s14109_s11 + $0x8] sm:$0x1]  ;;  %v13420_v44 = vld [vmem:[#allocation7 + $0x130] sm:$0xff]  ;;  %v1704_v32 = vrot.slane %v1702_v37, 4 }
 0x154   : > { %v1705_v19 = vrot.slane %v1591_v54, 5  ;;  %3214 = vmatpush.bf16.msra.mxu0 %v13420_v44  ;;  %v13419_v54 = vld [vmem:[#allocation7 + $0x128] sm:$0xff] }
 0x156   : > { %v14457_v55 = vpop.f32.mrf.mxu3  ;;  %v14459_v58 = vpop.f32.mrf.mxu0 }
 0x157   : > { %17482 = vst [vmem:[#allocation31_spill] sm:$0xff] %v14457_v55  ;;  %v14461_v1 = vpop.f32.mrf.mxu1  ;;  %v12055_v55 = vrot.slane %v1589_v43, 9 }
 0x158   : > { %3215 = vmatpush.bf16.msra.mxu0 %v13419_v54 }
 0x15e   : > { %v14466_v6 = vpop.f32.mrf.mxu3  ;;  %v675_v11 = vpop.f32.mrf.mxu0 }
 0x15f   : > { %17483 = vst [vmem:[#allocation32_spill] sm:$0xff] %v14466_v6  ;;  %v1436_v12 = vpop.f32.mrf.mxu1 }
 0x160   : > { %v1535_v42 = vadd.f32 %v1436_v12, %v675_v11 }
 0x161   : > { %714 = vmatmul.bf16.gmra.mxu0 %v13363_v31  ;;  %v1706_v31 = vsel %vm14226_vm5, %v1704_v32, %v1705_v19  ;;  %v12056_v19 = vrot.slane %v1592_v62, 9  ;;  %v1596_v62 = vld [vmem:[%s14109_s11 + $0x24] sm:$0xf] }
 0x162   : > { %v14472_v51 = vadd.f32 %v2017_v17, %v1535_v42  ;;  %v1703_v17 = vsel %vm14226_vm5, %v12055_v55, %v1702_v37  ;;  %v1844_v12 = vunpack.c.l.b16 %v1706_v31  ;;  %v14490_v55 = vpop.f32.mrf.mxu2 }
 0x163   : > { %2441 = vmatmul.bf16.gmra.mxu3 %v13398_v14  ;;  %v1843_v11 = vunpack.c.l.b16 %v1703_v17  ;;  %v1593_v14 = vld [vmem:[%s14109_s11 + $0x14] sm:$0xf]  ;;  %v1712_v17 = vrot.slane %v1594_v60, 5 }
 0x164   : > { %v1709_v29 = vrot.slane %v1593_v14, 5  ;;  %v13418_v14 = vld [vmem:[#allocation7 + $0x120] sm:$0xff] }
 0x165   : > { %v1879_v43 = vpack.c.b16 %v1844_v12, %v1843_v11  ;;  %3216 = vmatpush.bf16.msra.mxu0 %v13418_v14 }
 0x166   : > { %v14474_v6 = vpop.f32.mrf.mxu3  ;;  %v14476_v41 = vpop.f32.mrf.mxu0  ;;  %v1711_v32 = vrot.slane %v1709_v29, 4 }
 0x167   : > { %17484 = vst [vmem:[#allocation33_spill] sm:$0xff] %v14474_v6  ;;  %v14478_v3 = vpop.f32.mrf.mxu1 }
 0x168   : > { %v1713_v12 = vsel %vm14226_vm5, %v1711_v32, %v1712_v17  ;;  %v12057_v32 = vrot.slane %v1595_v52, 9  ;;  %v13417_v52 = vld [vmem:[#allocation7 + $0x118] sm:$0xff] }
 0x169   : > { %3217 = vmatpush.bf16.msra.mxu0 %v13417_v52  ;;  %v1602_v52 = vld [vmem:[%s14109_s11 + $0x44] sm:$0xf] }
 0x16e   : > { %v14485_v42 = vpop.f32.mrf.mxu3  ;;  %v680_v44 = vpop.f32.mrf.mxu0 }
 0x16f   : > { %17485 = vst [vmem:[#allocation34_spill] sm:$0xff] %v14485_v42  ;;  %v1441_v6 = vpop.f32.mrf.mxu1 }
 0x170   : > { %v1537_v18 = vadd.f32 %v1441_v6, %v680_v44  ;;  %v1710_v6 = vsel %vm14226_vm5, %v12056_v19, %v1709_v29  ;;  %v13400_v44 = vld [vmem:[%s14109_s11 + $0xd0] sm:$0xff]  ;;  %v1597_v29 = vld [vmem:[%s14109_s11 + $0x28] sm:$0x1] }
 0x171   : > { %1971 = vmatmul.bf16.vlgmr.msrb.gmra.mxu0 %v1879_v43 }
 0x172   : > { %v14492_v37 = vadd.f32 %v2022_v48, %v1537_v18  ;;  %v1845_v18 = vunpack.c.l.b16 %v1710_v6  ;;  %v1846_v48 = vunpack.c.l.b16 %v1713_v12  ;;  %v1719_v6 = vrot.slane %v1597_v29, 5  ;;  %v13401_v29 = vld [vmem:[%s14109_s11 + $0xe0] sm:$0xff] }
 0x173   : > { %2446 = vmatmul.bf16.gmra.mxu3 %v13399_v39  ;;  %v2032_v39 = vpop.f32.mrf.mxu2 }
 0x174   : > { %v1880_v60 = vpack.c.b16 %v1846_v48, %v1845_v18 }
 0x176   : > { %v14494_v31 = vpop.f32.mrf.mxu3  ;;  %v14496_v11 = vpop.f32.mrf.mxu0 }
 0x177   : > { %17486 = vst [vmem:[#allocation35_spill] sm:$0xff] %v14494_v31  ;;  %v1716_v31 = vrot.slane %v1596_v62, 5  ;;  %v1599_v62 = vld [vmem:[%s14109_s11 + $0x34] sm:$0xf] }
 0x179   : > { %v1718_v17 = vrot.slane %v1716_v31, 4 }
 0x17b   : > { %v14511_v12 = vpop.f32.mrf.mxu2 }
 0x17e   : > { %v14503_v43 = vpop.f32.mrf.mxu3  ;;  %v685_v54 = vpop.f32.mrf.mxu0 }
 0x17f   : > { %17487 = vst [vmem:[#allocation36_spill] sm:$0xff] %v14503_v43  ;;  %v1539_v42 = vadd.f32 %v14300_v30, %v685_v54  ;;  %v1717_v30 = vsel %vm14226_vm5, %v12057_v32, %v1716_v31  ;;  %v1723_v43 = vrot.slane %v1599_v62, 5  ;;  %v12058_v32 = vrot.slane %v1598_v28, 9 }
 0x181   : > { %v14509_v19 = vadd.f32 %v2027_v4, %v1539_v42  ;;  %1976 = vmatmul.bf16.gmra.mxu0 %v1880_v60  ;;  %v1720_v4 = vsel %vm14226_vm5, %v1718_v17, %v1719_v6  ;;  %v1847_v42 = vunpack.c.l.b16 %v1717_v30  ;;  %v1725_v17 = vrot.slane %v1723_v43, 4 }
 0x182   : > { %v1848_v48 = vunpack.c.l.b16 %v1720_v4  ;;  %v1726_v6 = vrot.slane %v1600_v26, 5 }
 0x183   : > { %2451 = vmatmul.bf16.gmra.mxu3 %v13400_v44 }
 0x184   : > { %v1881_v54 = vpack.c.b16 %v1848_v48, %v1847_v42  ;;  %v1727_v42 = vsel %vm14226_vm5, %v1725_v17, %v1726_v6  ;;  %v13463_v17 = vld [vmem:[#allocation7 + $0x1f8] sm:$0xff] }
 0x185   : > { %v1850_v28 = vunpack.c.l.b16 %v1727_v42  ;;  %5041 = vmatpush.bf16.msra.mxu3 %v13463_v17  ;;  %v1605_v17 = vld [vmem:[%s14109_s11 + $0x54] sm:$0xf] }
 0x186   : > { %v14513_v14 = vpop.f32.mrf.mxu3  ;;  %v14515_v18 = vpop.f32.mrf.mxu0 }
 0x187   : > { %17488 = vst [vmem:[#allocation37_spill] sm:$0xff] %v14513_v14  ;;  %v2037_v14 = vpop.f32.mrf.mxu2 }
 0x18e   : > { %v14522_v60 = vpop.f32.mrf.mxu3  ;;  %v690_v44 = vpop.f32.mrf.mxu0 }
 0x18f   : > { %17489 = vst [vmem:[#allocation38_spill] sm:$0xff] %v14522_v60  ;;  %v1541_v45 = vadd.f32 %v14322_v7, %v690_v44  ;;  %v1724_v7 = vsel %vm14226_vm5, %v12058_v32, %v1723_v43  ;;  %v13402_v44 = vld [vmem:[%s14109_s11 + $0xf0] sm:$0xff]  ;;  %v1601_v60 = vld [vmem:[%s14109_s11 + $0x40] sm:$0xe]  ;;  %v1603_v43 = vld [vmem:[%s14109_s11 + $0x48] sm:$0x1] }
 0x190   : > { %v1849_v48 = vunpack.c.l.b16 %v1724_v7  ;;  %v13455_v32 = vld [vmem:[#allocation7 + $0x1b8] sm:$0xff]  ;;  %v12059_v7 = vrot.slane %v1601_v60, 9  ;;  %v13415_v60 = vld [vmem:[#allocation7 + $0x108] sm:$0xff] }
 0x191   : > { %v14528_v31 = vadd.f32 %v2032_v39, %v1541_v45  ;;  %1981 = vmatmul.bf16.gmra.mxu0 %v1881_v54  ;;  %v13416_v45 = vld [vmem:[#allocation7 + $0x110] sm:$0xff]  ;;  %v14538_v39 = vpop.f32.mrf.mxu2  ;;  %4211 = vmatpush.bf16.msrb.mxu2 %v13455_v32  ;;  %v13461_v32 = vld [vmem:[#allocation7 + $0x1e8] sm:$0xff] }
 0x192   : > { %3218 = vmatpush.bf16.msra.mxu0 %v13416_v45  ;;  %v1882_v62 = vpack.c.b16 %v1850_v28, %v1849_v48  ;;  %v1733_v45 = vrot.slane %v1603_v43, 5  ;;  %v13429_v48 = vld [vmem:[#allocation7 + $0x178] sm:$0xff]  ;;  %v13454_v28 = vld [vmem:[#allocation7 + $0x1b0] sm:$0xff] }
 0x193   : > { %2456 = vmatmul.bf16.gmra.mxu3 %v13401_v29  ;;  %v1730_v29 = vrot.slane %v1602_v52, 5  ;;  %3791 = vmatpush.bf16.msrb.mxu1 %v13429_v48  ;;  %v13427_v48 = vld [vmem:[#allocation7 + $0x168] sm:$0xff] }
 0x195   : > { %v1732_v42 = vrot.slane %v1730_v29, 4  ;;  %4212 = vmatpush.bf16.msrb.mxu2 %v13454_v28  ;;  %v13460_v28 = vld [vmem:[#allocation7 + $0x1e0] sm:$0xff] }
 0x196   : > { %v14530_v30 = vpop.f32.mrf.mxu3  ;;  %v14532_v4 = vpop.f32.mrf.mxu0  ;;  %3219 = vmatpush.bf16.msra.mxu0 %v13415_v60  ;;  %v1737_v60 = vrot.slane %v1605_v17, 5  ;;  %v13450_v17 = vld [vmem:[#allocation7 + $0x190] sm:$0xff] }
 0x197   : > { %17490 = vst [vmem:[#allocation39_spill] sm:$0xff] %v14530_v30 }
 0x199   : > { %v2042_v6 = vpop.f32.mrf.mxu2 }
 0x19e   : > { %v14541_v26 = vpop.f32.mrf.mxu3  ;;  %v695_v54 = vpop.f32.mrf.mxu0 }
 0x19f   : > { %17491 = vst [vmem:[#allocation40_spill] sm:$0xff] %v14541_v26  ;;  %v1543_v30 = vadd.f32 %v14345_v38, %v695_v54  ;;  %v13462_v38 = vld [vmem:[#allocation7 + $0x1f0] sm:$0xff]  ;;  %v13453_v54 = vld [vmem:[#allocation7 + $0x1a8] sm:$0xff] }
 0x1a0   : > { %5042 = vmatpush.bf16.msra.mxu3 %v13462_v38  ;;  %4213 = vmatpush.bf16.msrb.mxu2 %v13453_v54  ;;  %v1606_v54 = vld [vmem:[%s14109_s11 + $0x58] sm:$0x1] }
 0x1a1   : > { %v14547_v21 = vadd.f32 %v2037_v14, %v1543_v30  ;;  %1986 = vmatmul.bf16.gmra.mxu0 %v1882_v62  ;;  %v1731_v14 = vsel %vm14226_vm5, %v12059_v7, %v1730_v29  ;;  %v1734_v30 = vsel %vm14226_vm5, %v1732_v42, %v1733_v45  ;;  %v13428_v62 = vld [vmem:[#allocation7 + $0x170] sm:$0xff]  ;;  %v13452_v29 = vld [vmem:[#allocation7 + $0x1a0] sm:$0xff]  ;;  %v14558_v7 = vpop.f32.mrf.mxu2 }
 0x1a2   : > { %v1852_v43 = vunpack.c.l.b16 %v1734_v30  ;;  %3792 = vmatpush.bf16.msrb.mxu1 %v13428_v62  ;;  %17493 = vst [vmem:[#allocation42_spill] sm:$0xff] %v14558_v7  ;;  %v1604_v30 = vld [vmem:[%s14109_s11 + $0x50] sm:$0xe]  ;;  %v13459_v7 = vld [vmem:[#allocation7 + $0x1d8] sm:$0xff] }
 0x1a3   : > { %2461 = vmatmul.bf16.gmra.mxu3 %v13402_v44  ;;  %v1851_v44 = vunpack.c.l.b16 %v1731_v14  ;;  %v13403_v14 = vld [vmem:[%s14109_s11 + $0x100] sm:$0xff] }
 0x1a4   : > { %5043 = vmatpush.bf16.msra.mxu3 %v13461_v32  ;;  %4214 = vmatpush.bf16.msrb.mxu2 %v13452_v29  ;;  %v13451_v32 = vld [vmem:[#allocation7 + $0x198] sm:$0xff]  ;;  %v13414_v29 = vld [vmem:[#allocation7 + $0x100] sm:$0xff] }
 0x1a5   : > { %v1883_v45 = vpack.c.b16 %v1852_v43, %v1851_v44  ;;  %v12060_v44 = vrot.slane %v1604_v30, 9  ;;  %v1739_v43 = vrot.slane %v1737_v60, 4  ;;  %3220 = vmatpush.bf16.msra.mxu0 %v13414_v29  ;;  %v1532_v30 = vadd.f32 %v14447_v23, %v14445_v20 }
 0x1a6   : > { %v14549_v26 = vpop.f32.mrf.mxu3  ;;  %v14551_v52 = vpop.f32.mrf.mxu0  ;;  %3793 = vmatpush.bf16.msrb.mxu1 %v13427_v48  ;;  %v1740_v48 = vrot.slane %v1606_v54, 5  ;;  %v13457_v54 = vld [vmem:[#allocation7 + $0x1c8] sm:$0xff] }
 0x1a7   : > { %17492 = vst [vmem:[#allocation41_spill] sm:$0xff] %v14549_v26  ;;  %v13426_v26 = vld [vmem:[#allocation7 + $0x160] sm:$0xff]  ;;  %v2113_v29 = vadd.f32 %v14410_v8, %v1532_v30 }
 0x1a8   : > { %5044 = vmatpush.bf16.msra.mxu3 %v13460_v28  ;;  %4215 = vmatpush.bf16.msrb.mxu2 %v13451_v32  ;;  %v13458_v28 = vld [vmem:[#allocation7 + $0x1d0] sm:$0xff] }
 0x1a9   : > { %v12332_v32 = vld [vmem:[%s14109_s11 + $0x14] sm:$0xf]  ;;  %5619 = vmatpush.bf16.msrb.mxu0 %v13471_v0  ;;  %v1534_v0 = vadd.f32 %v14461_v1, %v14459_v58 }
 0x1aa   : > { %3794 = vmatpush.bf16.msrb.mxu1 %v13426_v26 }
 0x1ac   : > { %5045 = vmatpush.bf16.msra.mxu3 %v13459_v7  ;;  %v1741_v7 = vsel %vm14226_vm5, %v1739_v43, %v1740_v48  ;;  %4216 = vmatpush.bf16.msrb.mxu2 %v13450_v17  ;;  %v13448_v43 = vld [vmem:[#allocation7 + $0x180] sm:$0xff]  ;;  %v3530_v48 = vrot.slane %v12332_v32, 5  ;;  %v12331_v17 = vld [vmem:[%s14109_s11 + $0x10] sm:$0xe] }
 0x1ad   : > { %v13430_v32 = vld [vmem:[%s14109_s11 + $0x20] sm:$0xff] }
 0x1ae   : > { %v14560_v42 = vpop.f32.mrf.mxu3  ;;  %v700_v38 = vpop.f32.mrf.mxu0  ;;  %v3532_v8 = vrot.slane %v3530_v48, 4 }
 0x1af   : > { %17494 = vst [vmem:[#allocation43_spill] sm:$0xff] %v14560_v42  ;;  %v1545_v62 = vadd.f32 %v14364_v61, %v700_v38  ;;  %v13425_v42 = vld [vmem:[#allocation7 + $0x158] sm:$0xff]  ;;  %v1738_v38 = vsel %vm14226_vm5, %v12060_v44, %v1737_v60  ;;  %v1608_v60 = vld [vmem:[%s14109_s11 + $0x64] sm:$0xf]  ;;  %v13423_v44 = vld [vmem:[#allocation7 + $0x148] sm:$0xff] }
 0x1b0   : > { %3795 = vmatpush.bf16.msrb.mxu1 %v13425_v42  ;;  %5046 = vmatpush.bf16.msra.mxu3 %v13458_v28  ;;  %v13449_v42 = vld [vmem:[#allocation7 + $0x188] sm:$0xff]  ;;  %v12333_v28 = vld [vmem:[%s14109_s11 + $0x18] sm:$0x1] }
 0x1b1   : > { %v14566_v16 = vadd.f32 %v2042_v6, %v1545_v62  ;;  %1991 = vmatmul.bf16.gmra.mxu0 %v1883_v45  ;;  %v2047_v45 = vpop.f32.mrf.mxu2  ;;  %v1854_v62 = vunpack.c.l.b16 %v1741_v7  ;;  %4217 = vmatpush.bf16.msrb.mxu2 %v13449_v42  ;;  %v13404_v42 = vld [vmem:[%s14109_s11 + $0x110] sm:$0xff] }
 0x1b3   : > { %17495 = vst [vmem:[#allocation44_spill] sm:$0xff] %v14566_v16  ;;  %2466 = vmatmul.bf16.gmra.mxu3 %v13403_v14  ;;  %v13424_v14 = vld [vmem:[#allocation7 + $0x150] sm:$0xff]  ;;  %v12576_v16 = vld [vmem:[%s14109_s11 + $0x24] sm:$0xf] }
 0x1b4   : > { %3796 = vmatpush.bf16.msrb.mxu1 %v13424_v14  ;;  %5047 = vmatpush.bf16.msra.mxu3 %v13457_v54  ;;  %v1744_v54 = vrot.slane %v1608_v60, 5 }
 0x1b5   : > { %4218 = vmatpush.bf16.msrb.mxu2 %v13448_v43  ;;  %v12246_v43 = vld [vmem:[%s14109_s11 + $0x14] sm:$0xf] }
 0x1b6   : > { %v2427_v61 = vpop.f32.mrf.mxu3  ;;  %v14571_v26 = vpop.f32.mrf.mxu0 }
 0x1b7   : > { %v14569_v6 = vadd.f32 %v2427_v61, %v14441_v15  ;;  %17497 = vst [vmem:[#allocation46_spill] sm:$0xff] %v14571_v26  ;;  %v1853_v15 = vunpack.c.l.b16 %v1738_v38  ;;  %v13456_v61 = vld [vmem:[#allocation7 + $0x1c0] sm:$0xff]  ;;  %v12385_v38 = vrot.slane %v12331_v17, 9  ;;  %v1609_v26 = vld [vmem:[%s14109_s11 + $0x68] sm:$0x1]  ;;  %v3533_v17 = vrot.slane %v12333_v28, 5 }
 0x1b8   : > { %3797 = vmatpush.bf16.msrb.mxu1 %v13423_v44  ;;  %5048 = vmatpush.bf16.msra.mxu3 %v13456_v61  ;;  %v1747_v61 = vrot.slane %v1609_v26, 5 }
 0x1b9   : > { %17496 = vst [vmem:[#allocation45_spill] sm:$0xff] %v14569_v6  ;;  %v1884_v23 = vpack.c.b16 %v1854_v62, %v1853_v15  ;;  %v1607_v6 = vld [vmem:[%s14109_s11 + $0x60] sm:$0xe]  ;;  %v3531_v62 = vsel %vm14226_vm5, %v12385_v38, %v3530_v48  ;;  %v14593_v44 = vpop.f32.mrf.mxu2  ;;  %4219 = vmatmul.bf16.vlgmr.msrb.gmra.mxu2 %v13430_v32  ;;  %v3534_v48 = vsel %vm14226_vm5, %v3532_v8, %v3533_v17 }
 0x1ba   : > { %v13422_v15 = vld [vmem:[#allocation7 + $0x140] sm:$0xff]  ;;  %17499 = vst [vmem:[#allocation48_spill] sm:$0xff] %v14593_v44  ;;  %v3672_v28 = vunpack.c.l.b16 %v3534_v48 }
 0x1bc   : > { %3798 = vmatpush.bf16.msrb.mxu1 %v13422_v15 }
 0x1be   : > { %v2429_v20 = vpop.f32.mrf.mxu3  ;;  %v705_v14 = vpop.f32.mrf.mxu0 }
 0x1bf   : > { %v14584_v7 = vadd.f32 %v2429_v20, %v2113_v29  ;;  %v1547_v30 = vadd.f32 %v14383_v24, %v705_v14  ;;  %v12245_v29 = vld [vmem:[%s14109_s11 + $0x10] sm:$0xf]  ;;  %v12575_v20 = vld [vmem:[%s14109_s11 + $0x20] sm:$0xf]  ;;  %v12061_v24 = vrot.slane %v1607_v6, 9  ;;  %v1746_v14 = vrot.slane %v1744_v54, 4 }
 0x1c0   : > { %v2645_v38 = vshrl.u32 %v12245_v29, 16  ;;  %v2648_v44 = vshll.u32 %v12245_v29, 16  ;;  %v4476_v32 = vshll.u32 %v12575_v20, 16 }
 0x1c1   : > { %17498 = vst [vmem:[#allocation47_spill] sm:$0xff] %v14584_v7  ;;  %v14596_v60 = vadd.f32 %v2047_v45, %v1547_v30  ;;  %1996 = vmatmul.bf16.gmra.mxu0 %v1884_v23  ;;  %v3671_v7 = vunpack.c.l.b16 %v3531_v62  ;;  %v2654_v45 = vshll.u32 %v12246_v43, 16  ;;  %v2658_v30 = vshrl.u32 %v12246_v43, 16 }
 0x1c2   : > { %v4473_v23 = vshrl.u32 %v12575_v20, 16  ;;  %v4482_v62 = vshll.u32 %v12576_v16, 16  ;;  %v1745_v8 = vsel %vm14226_vm5, %v12061_v24, %v1744_v54  ;;  %v1748_v29 = vsel %vm14226_vm5, %v1746_v14, %v1747_v61  ;;  %v12247_v54 = vld [vmem:[%s14109_s11 + $0x18] sm:$0x1]  ;;  %v2052_v61 = vpop.f32.mrf.mxu2 }
 0x1c3   : > { %17500 = vst [vmem:[#allocation49_spill] sm:$0xff] %v14596_v60  ;;  %2471 = vmatmul.bf16.gmra.mxu3 %v13404_v42  ;;  %v4486_v42 = vshrl.u32 %v12576_v16, 16  ;;  %v3707_v6 = vpack.c.b16 %v3672_v28, %v3671_v7  ;;  %v2647_v17 = vrot.slane %v2645_v38, 4  ;;  %v2650_v16 = vrot.slane %v2648_v44, 5  ;;  %v12577_v28 = vld [vmem:[%s14109_s11 + $0x28] sm:$0x1] }
 0x1c4   : > { %v14614_v7 = vrot.slane %v2654_v45, 5  ;;  %v4478_v43 = vrot.slane %v4476_v32, 5  ;;  %v1855_v20 = vunpack.c.l.b16 %v1745_v8  ;;  %v1856_v48 = vunpack.c.l.b16 %v1748_v29 }
 0x1c5   : > { %3799 = vmatmul.bf16.vlgmr.msrb.gmra.mxu1 %v3707_v6  ;;  %v14617_v24 = vrot.slane %v4482_v62, 5  ;;  %v4488_v14 = vrot.slane %v4486_v42, 4  ;;  %v2651_v58 = vor.u32 %v2650_v16, %v2647_v17  ;;  %v2115_v44 = vadd.f32 %v14431_v49, %v1534_v0  ;;  %v12336_v42 = vld [vmem:[%s14109_s11 + $0x28] sm:$0x1]  ;;  %v13405_v17 = vld [vmem:[%s14109_s11 + $0x120] sm:$0xff]  ;;  %v13431_v16 = vld [vmem:[%s14109_s11 + $0x30] sm:$0xff] }
 0x1c6   : > { %v2432_v60 = vpop.f32.mrf.mxu3  ;;  %v14606_v15 = vpop.f32.mrf.mxu0  ;;  %v2664_v45 = vshll.u32 %v12247_v54, 16  ;;  %v1885_v6 = vpack.c.b16 %v1856_v48, %v1855_v20  ;;  %v4492_v8 = vshll.u32 %v12577_v28, 16  ;;  %v3540_v48 = vrot.slane %v12336_v42, 5 }
 0x1c7   : > { %v14604_v26 = vadd.f32 %v2432_v60, %v14455_v47  ;;  %17502 = vst [vmem:[#allocation51_spill] sm:$0xff] %v14606_v15  ;;  %v2660_v47 = vrot.slane %v2658_v30, 4  ;;  %v4475_v60 = vrot.slane %v4473_v23, 4  ;;  %v12334_v23 = vld [vmem:[%s14109_s11 + $0x20] sm:$0xe]  ;;  %v4489_v62 = vor.u32 %v4488_v14, %v14617_v24 }
 0x1c8   : > { %v12386_v29 = vrot.slane %v12334_v23, 9  ;;  %v2652_v0 = vrot.slane %v2651_v58, 4  ;;  %v4494_v28 = vrot.slane %v4492_v8, 5  ;;  %v12249_v58 = vld [vmem:[%s14109_s11 + $0x24] sm:$0xf] }
 0x1c9   : > { %17501 = vst [vmem:[#allocation50_spill] sm:$0xff] %v14604_v26  ;;  %v12335_v26 = vld [vmem:[%s14109_s11 + $0x24] sm:$0xf]  ;;  %v2661_v38 = vor.u32 %v2660_v47, %v14614_v7  ;;  %v4479_v30 = vor.u32 %v4478_v43, %v4475_v60  ;;  %v2666_v43 = vrot.slane %v2664_v45, 5  ;;  %v4490_v14 = vrot.slane %v4489_v62, 4  ;;  %4224 = vmatmul.bf16.gmra.mxu2 %v13431_v16 }
 0x1ca   : > { %v3537_v1 = vrot.slane %v12335_v26, 5  ;;  %v12578_v23 = vld [vmem:[%s14109_s11 + $0x30] sm:$0xf]  ;;  %v2678_v16 = vshll.u32 %v12249_v58, 16 }
 0x1cb   : > { %v2662_v60 = vrot.slane %v2661_v38, 4  ;;  %v4480_v20 = vrot.slane %v4479_v30, 4  ;;  %v14640_v38 = vpop.f32.mrf.mxu2  ;;  %v4495_v62 = vsel %vm14133_vm2, %v4490_v14, %v4494_v28  ;;  %v12250_v14 = vld [vmem:[%s14109_s11 + $0x28] sm:$0x1] }
 0x1cc   : > { %v3539_v26 = vrot.slane %v3537_v1, 4  ;;  %v3538_v47 = vsel %vm14226_vm5, %v12386_v29, %v3537_v1 }
 0x1cd   : > { %v2667_v45 = vsel %vm14133_vm2, %v2662_v60, %v2666_v43  ;;  %v4485_v30 = vsel %vm14133_vm2, %v4480_v20, %v14617_v24  ;;  %v1536_v60 = vadd.f32 %v14478_v3, %v14476_v41 }
 0x1ce   : > { %v2434_v32 = vpop.f32.mrf.mxu3  ;;  %v710_v63 = vpop.f32.mrf.mxu0  ;;  %v3094_v20 = vunpack.c.l.b16 %v2667_v45  ;;  %v12337_v45 = vld [vmem:[%s14109_s11 + $0x30] sm:$0xe] }
 0x1cf   : > { %v14626_v15 = vadd.f32 %v2434_v32, %v2115_v44  ;;  %v1549_v49 = vadd.f32 %v14402_v56, %v710_v63  ;;  %v3673_v44 = vunpack.c.l.b16 %v3538_v47  ;;  %v12248_v63 = vld [vmem:[%s14109_s11 + $0x20] sm:$0xf]  ;;  %v3541_v56 = vsel %vm14226_vm5, %v3539_v26, %v3540_v48  ;;  %v12579_v32 = vld [vmem:[%s14109_s11 + $0x34] sm:$0xf] }
 0x1d0   : > { %v3674_v1 = vunpack.c.l.b16 %v3541_v56  ;;  %v2669_v8 = vshrl.u32 %v12248_v63, 16  ;;  %v2672_v42 = vshll.u32 %v12248_v63, 16  ;;  %v2682_v26 = vshrl.u32 %v12249_v58, 16 }
 0x1d1   : > { %17503 = vst [vmem:[#allocation52_spill] sm:$0xff] %v14626_v15  ;;  %v14633_v54 = vadd.f32 %v2052_v61, %v1549_v49  ;;  %2001 = vmatmul.bf16.gmra.mxu0 %v1885_v6  ;;  %v2657_v61 = vsel %vm14133_vm2, %v2652_v0, %v14614_v7  ;;  %v4497_v49 = vshrl.u32 %v12578_v23, 16  ;;  %v4500_v0 = vshll.u32 %v12578_v23, 16  ;;  %v12338_v23 = vld [vmem:[%s14109_s11 + $0x34] sm:$0xf]  ;;  %v13432_v15 = vld [vmem:[%s14109_s11 + $0x40] sm:$0xff] }
 0x1d2   : > { %v3708_v29 = vpack.c.b16 %v3674_v1, %v3673_v44  ;;  %v4506_v24 = vshll.u32 %v12579_v32, 16  ;;  %v4510_v47 = vshrl.u32 %v12579_v32, 16  ;;  %v3093_v43 = vunpack.c.l.b16 %v2657_v61  ;;  %v12580_v1 = vld [vmem:[%s14109_s11 + $0x38] sm:$0x1] }
 0x1d3   : > { %2476 = vmatmul.bf16.gmra.mxu3 %v13405_v17  ;;  %v4921_v48 = vunpack.c.l.b16 %v4485_v30  ;;  %v2671_v28 = vrot.slane %v2669_v8, 4  ;;  %v2674_v44 = vrot.slane %v2672_v42, 5  ;;  %v14661_v63 = vrot.slane %v2678_v16, 5  ;;  %v12339_v16 = vld [vmem:[%s14109_s11 + $0x38] sm:$0x1] }
 0x1d4   : > { %v2684_v56 = vrot.slane %v2682_v26, 4  ;;  %v4499_v58 = vrot.slane %v4497_v49, 4  ;;  %v4502_v32 = vrot.slane %v4500_v0, 5  ;;  %v3544_v41 = vrot.slane %v12338_v23, 5  ;;  %v2057_v0 = vpop.f32.mrf.mxu2 }
 0x1d5   : > { %3804 = vmatmul.bf16.gmra.mxu1 %v3708_v29  ;;  %v4512_v29 = vrot.slane %v4510_v47, 4  ;;  %v2117_v3 = vadd.f32 %v14449_v25, %v1536_v60  ;;  %v3129_v61 = vpack.c.b16 %v3094_v20, %v3093_v43  ;;  %v2675_v8 = vor.u32 %v2674_v44, %v2671_v28  ;;  %v12251_v28 = vld [vmem:[%s14109_s11 + $0x30] sm:$0xf] }
 0x1d6   : > { %v2437_v6 = vpop.f32.mrf.mxu3  ;;  %v14656_v7 = vpop.f32.mrf.mxu0  ;;  %v2688_v42 = vshll.u32 %v12250_v14, 16  ;;  %v4516_v47 = vshll.u32 %v12580_v1, 16  ;;  %v3546_v23 = vrot.slane %v3544_v41, 4  ;;  %v4503_v60 = vor.u32 %v4502_v32, %v4499_v58 }
 0x1d7   : > { %v14654_v17 = vadd.f32 %v2437_v6, %v14472_v51  ;;  %v4922_v51 = vunpack.c.l.b16 %v4495_v62  ;;  %v14665_v6 = vrot.slane %v4506_v24, 5  ;;  %v2685_v24 = vor.u32 %v2684_v56, %v14661_v63 }
 0x1d8   : > { %v2676_v14 = vrot.slane %v2675_v8, 4  ;;  %v2690_v1 = vrot.slane %v2688_v42, 5  ;;  %v4504_v32 = vrot.slane %v4503_v60, 4  ;;  %v1443_v8 = vpop.f32.mrf.mxu1  ;;  %v13470_v60 = vld [vmem:[#allocation7 + $0x230] sm:$0xff] }
 0x1d9   : > { %17504 = vst [vmem:[#allocation53_spill] sm:$0xff] %v14654_v17  ;;  %v4957_v62 = vpack.c.b16 %v4922_v51, %v4921_v48  ;;  %v12387_v17 = vrot.slane %v12337_v45, 9  ;;  %v4513_v43 = vor.u32 %v4512_v29, %v14665_v6  ;;  %v3547_v48 = vrot.slane %v12339_v16, 5  ;;  %4229 = vmatmul.bf16.gmra.mxu2 %v13432_v15  ;;  %5620 = vmatpush.bf16.msrb.mxu0 %v13470_v60 }
 0x1da   : > { %v2686_v56 = vrot.slane %v2685_v24, 4  ;;  %v2693_v45 = vshrl.u32 %v12251_v28, 16  ;;  %v2681_v15 = vsel %vm14133_vm2, %v2676_v14, %v14661_v63 }
 0x1db   : > { %v3545_v20 = vsel %vm14226_vm5, %v12387_v17, %v3544_v41  ;;  %v3548_v58 = vsel %vm14226_vm5, %v3546_v23, %v3547_v48  ;;  %v4514_v29 = vrot.slane %v4513_v43, 4  ;;  %v4518_v17 = vrot.slane %v4516_v47, 5  ;;  %v12581_v41 = vld [vmem:[%s14109_s11 + $0x40] sm:$0xf] }
 0x1dc   : > { %v3675_v44 = vunpack.c.l.b16 %v3545_v20  ;;  %v2691_v47 = vsel %vm14133_vm2, %v2686_v56, %v2690_v1  ;;  %v4521_v23 = vshrl.u32 %v12581_v41, 16  ;;  %v4509_v43 = vsel %vm14133_vm2, %v4504_v32, %v14665_v6  ;;  %v12253_v32 = vld [vmem:[%s14109_s11 + $0x38] sm:$0x1] }
 0x1dd   : > { %v4519_v63 = vsel %vm14133_vm2, %v4514_v29, %v4518_v17  ;;  %v1538_v48 = vadd.f32 %v1443_v8, %v14496_v11  ;;  %v2695_v14 = vrot.slane %v2693_v45, 4  ;;  %v3096_v56 = vunpack.c.l.b16 %v2691_v47  ;;  %v12583_v8 = vld [vmem:[%s14109_s11 + $0x48] sm:$0x1] }
 0x1de   : > { %v2439_v30 = vpop.f32.mrf.mxu3  ;;  %v715_v49 = vpop.f32.mrf.mxu0  ;;  %v4923_v6 = vunpack.c.l.b16 %v4509_v43  ;;  %v4523_v29 = vrot.slane %v4521_v23, 4  ;;  %v12342_v47 = vld [vmem:[%s14109_s11 + $0x48] sm:$0x1] }
 0x1df   : > { %v14670_v26 = vadd.f32 %v2439_v30, %v2117_v3  ;;  %v1551_v25 = vadd.f32 %v14423_v33, %v715_v49  ;;  %v12252_v33 = vld [vmem:[%s14109_s11 + $0x34] sm:$0xf]  ;;  %v3676_v3 = vunpack.c.l.b16 %v3548_v58  ;;  %v2696_v30 = vshll.u32 %v12251_v28, 16 }
 0x1e0   : > { %v2706_v42 = vshrl.u32 %v12252_v33, 16  ;;  %v4924_v58 = vunpack.c.l.b16 %v4519_v63 }
 0x1e1   : > { %v14678_v51 = vadd.f32 %v2057_v0, %v1551_v25  ;;  %3221 = vmatmul.bf16.vlgmr.msra.gmra.mxu0 %v3129_v61  ;;  %v12582_v61 = vld [vmem:[%s14109_s11 + $0x44] sm:$0xf]  ;;  %v3709_v49 = vpack.c.b16 %v3676_v3, %v3675_v44  ;;  %v4524_v25 = vshll.u32 %v12581_v41, 16  ;;  %v2698_v28 = vrot.slane %v2696_v30, 5 }
 0x1e2   : > { %v4530_v20 = vshll.u32 %v12582_v61, 16  ;;  %v3095_v44 = vunpack.c.l.b16 %v2681_v15  ;;  %v12341_v41 = vld [vmem:[%s14109_s11 + $0x44] sm:$0xf]  ;;  %v2119_v30 = vadd.f32 %v14464_v5, %v1538_v48  ;;  %v4958_v43 = vpack.c.b16 %v4924_v58, %v4923_v6  ;;  %v12254_v6 = vld [vmem:[%s14109_s11 + $0x40] sm:$0xf] }
 0x1e3   : > { %5049 = vmatmul.bf16.vlgmr.msra.gmra.mxu3 %v4957_v62  ;;  %v2702_v62 = vshll.u32 %v12252_v33, 16  ;;  %v2708_v33 = vrot.slane %v2706_v42, 4  ;;  %v4526_v17 = vrot.slane %v4524_v25, 5  ;;  %v3551_v45 = vrot.slane %v12341_v41, 5 }
 0x1e4   : > { %v14706_v3 = vrot.slane %v4530_v20, 5  ;;  %v13433_v20 = vld [vmem:[%s14109_s11 + $0x50] sm:$0xff] }
 0x1e5   : > { %3809 = vmatmul.bf16.gmra.mxu1 %v3709_v49  ;;  %v14702_v1 = vrot.slane %v2702_v62, 5  ;;  %v3130_v62 = vpack.c.b16 %v3096_v56, %v3095_v44  ;;  %v2712_v49 = vshll.u32 %v12253_v32, 16  ;;  %v4527_v63 = vor.u32 %v4526_v17, %v4523_v29 }
 0x1e6   : > { %v2442_v16 = vpop.f32.mrf.mxu3  ;;  %v14692_v24 = vpop.f32.mrf.mxu0  ;;  %v3554_v56 = vrot.slane %v12342_v47, 5 }
 0x1e7   : > { %v14690_v0 = vadd.f32 %v2442_v16, %v14492_v37  ;;  %v4534_v37 = vshrl.u32 %v12582_v61, 16  ;;  %v2699_v61 = vor.u32 %v2698_v28, %v2695_v14  ;;  %v12340_v16 = vld [vmem:[%s14109_s11 + $0x40] sm:$0xe]  ;;  %v2709_v42 = vor.u32 %v2708_v33, %v14702_v1 }
 0x1e8   : > { %v12388_v60 = vrot.slane %v12340_v16, 9  ;;  %v4540_v14 = vshll.u32 %v12583_v8, 16  ;;  %v2714_v32 = vrot.slane %v2712_v49, 5  ;;  %v4528_v29 = vrot.slane %v4527_v63, 4 }
 0x1e9   : > { %v4536_v11 = vrot.slane %v4534_v37, 4  ;;  %v3553_v37 = vrot.slane %v3551_v45, 4  ;;  %v2700_v44 = vrot.slane %v2699_v61, 4  ;;  %v2710_v33 = vrot.slane %v2709_v42, 4  ;;  %4234 = vmatmul.bf16.gmra.mxu2 %v13433_v20 }
 0x1ea   : > { %v3552_v28 = vsel %vm14226_vm5, %v12388_v60, %v3551_v45  ;;  %v1518_v45 = vadd.f32 %v14306_v36, %v14304_v35  ;;  %v2717_v16 = vshrl.u32 %v12254_v6, 16  ;;  %v4533_v35 = vsel %vm14133_vm2, %v4528_v29, %v14706_v3  ;;  %v12256_v29 = vld [vmem:[%s14109_s11 + $0x48] sm:$0x1] }
 0x1eb   : > { %v4537_v48 = vor.u32 %v4536_v11, %v14706_v3  ;;  %v3677_v58 = vunpack.c.l.b16 %v3552_v28  ;;  %v3555_v17 = vsel %vm14226_vm5, %v3553_v37, %v3554_v56  ;;  %v4542_v11 = vrot.slane %v4540_v14, 5 }
 0x1ec   : > { %v3678_v8 = vunpack.c.l.b16 %v3555_v17  ;;  %v2705_v61 = vsel %vm14133_vm2, %v2700_v44, %v14702_v1  ;;  %v2715_v49 = vsel %vm14133_vm2, %v2710_v33, %v2714_v32  ;;  %v2719_v28 = vrot.slane %v2717_v16, 4 }
 0x1ed   : > { %v4538_v41 = vrot.slane %v4537_v48, 4  ;;  %v3097_v3 = vunpack.c.l.b16 %v2705_v61  ;;  %v3098_v56 = vunpack.c.l.b16 %v2715_v49  ;;  %v12345_v49 = vld [vmem:[%s14109_s11 + $0x58] sm:$0x1] }
 0x1ee   : > { %v2444_v15 = vpop.f32.mrf.mxu3  ;;  %v1972_v25 = vpop.f32.mrf.mxu0 }
 0x1ef   : > { %v14713_v23 = vadd.f32 %v2444_v15, %v2119_v30  ;;  %v14717_v5 = vadd.f32 %v1972_v25, %v14293_v22  ;;  %v12255_v22 = vld [vmem:[%s14109_s11 + $0x44] sm:$0xf]  ;;  %v12584_v30 = vld [vmem:[%s14109_s11 + $0x50] sm:$0xf]  ;;  %v2720_v15 = vshll.u32 %v12254_v6, 16  ;;  %v3710_v25 = vpack.c.b16 %v3678_v8, %v3677_v58 }
 0x1f0   : > { %v2726_v47 = vshll.u32 %v12255_v22, 16  ;;  %v2730_v60 = vshrl.u32 %v12255_v22, 16  ;;  %v4545_v36 = vshrl.u32 %v12584_v30, 16  ;;  %v4548_v1 = vshll.u32 %v12584_v30, 16  ;;  %v12586_v8 = vld [vmem:[%s14109_s11 + $0x58] sm:$0x1] }
 0x1f1   : > { %3226 = vmatmul.bf16.gmra.mxu0 %v3130_v62  ;;  %v12585_v62 = vld [vmem:[%s14109_s11 + $0x54] sm:$0xf]  ;;  %v4543_v37 = vsel %vm14133_vm2, %v4538_v41, %v4542_v11  ;;  %v2722_v44 = vrot.slane %v2720_v15, 5  ;;  %v4925_v6 = vunpack.c.l.b16 %v4533_v35  ;;  %v3131_v15 = vpack.c.b16 %v3098_v56, %v3097_v3  ;;  %v12257_v56 = vld [vmem:[%s14109_s11 + $0x50] sm:$0xf] }
 0x1f2   : > { %v4554_v48 = vshll.u32 %v12585_v62, 16  ;;  %v4558_v14 = vshrl.u32 %v12585_v62, 16  ;;  %v14747_v33 = vrot.slane %v2726_v47, 5  ;;  %v2732_v32 = vrot.slane %v2730_v60, 4  ;;  %v12344_v41 = vld [vmem:[%s14109_s11 + $0x54] sm:$0xf] }
 0x1f3   : > { %5054 = vmatmul.bf16.gmra.mxu3 %v4958_v43  ;;  %v4926_v58 = vunpack.c.l.b16 %v4543_v37  ;;  %v4547_v22 = vrot.slane %v4545_v36, 4  ;;  %v4550_v17 = vrot.slane %v4548_v1, 5  ;;  %v3558_v61 = vrot.slane %v12344_v41, 5  ;;  %v13434_v36 = vld [vmem:[%s14109_s11 + $0x60] sm:$0xff] }
 0x1f4   : > { %v14751_v11 = vrot.slane %v4554_v48, 5  ;;  %v4560_v30 = vrot.slane %v4558_v14, 4  ;;  %v2733_v62 = vor.u32 %v2732_v32, %v14747_v33  ;;  %v4564_v37 = vshll.u32 %v12586_v8, 16 }
 0x1f5   : > { %3814 = vmatmul.bf16.gmra.mxu1 %v3710_v25  ;;  %v4551_v35 = vor.u32 %v4550_v17, %v4547_v22  ;;  %v12587_v17 = vld [vmem:[%s14109_s11 + $0x60] sm:$0xf]  ;;  %v2744_v8 = vshll.u32 %v12257_v56, 16 }
 0x1f6   : > { %v2447_v42 = vpop.f32.mrf.mxu3  ;;  %v1974_v63 = vpop.f32.mrf.mxu0  ;;  %v4561_v1 = vor.u32 %v4560_v30, %v14751_v11  ;;  %v4566_v22 = vrot.slane %v4564_v37, 5  ;;  %v1520_v30 = vadd.f32 %v14326_v10, %v14324_v9  ;;  %v4569_v10 = vshrl.u32 %v12587_v17, 16 }
 0x1f7   : > { %v14736_v43 = vadd.f32 %v2447_v42, %v14509_v19  ;;  %v14741_v20 = vadd.f32 %v1974_v63, %v1518_v45  ;;  %v1540_v19 = vadd.f32 %v14315_v57, %v14515_v18  ;;  %v2723_v18 = vor.u32 %v2722_v44, %v2719_v28  ;;  %v12343_v45 = vld [vmem:[%s14109_s11 + $0x50] sm:$0xe] }
 0x1f8   : > { %v2736_v42 = vshll.u32 %v12256_v29, 16  ;;  %v12389_v47 = vrot.slane %v12343_v45, 9  ;;  %v4959_v63 = vpack.c.b16 %v4926_v58, %v4925_v6  ;;  %v3561_v28 = vrot.slane %v12345_v49, 5  ;;  %v12258_v6 = vld [vmem:[%s14109_s11 + $0x54] sm:$0xf] }
 0x1f9   : > { %v2121_v57 = vadd.f32 %v14490_v55, %v1540_v19  ;;  %v2724_v14 = vrot.slane %v2723_v18, 4  ;;  %v3560_v19 = vrot.slane %v3558_v61, 4  ;;  %v2734_v44 = vrot.slane %v2733_v62, 4  ;;  %4239 = vmatmul.bf16.gmra.mxu2 %v13434_v36  ;;  %v12588_v45 = vld [vmem:[%s14109_s11 + $0x64] sm:$0xf] }
 0x1fa   : > { %v3559_v48 = vsel %vm14226_vm5, %v12389_v47, %v3558_v61  ;;  %v2738_v3 = vrot.slane %v2736_v42, 5  ;;  %v4562_v29 = vrot.slane %v4561_v1, 4  ;;  %v2741_v18 = vshrl.u32 %v12257_v56, 16  ;;  %v13469_v1 = vld [vmem:[#allocation7 + $0x228] sm:$0xff]  ;;  %v12259_v56 = vld [vmem:[%s14109_s11 + $0x58] sm:$0x1] }
 0x1fb   : > { %v3679_v32 = vunpack.c.l.b16 %v3559_v48  ;;  %v3562_v58 = vsel %vm14226_vm5, %v3560_v19, %v3561_v28  ;;  %v2754_v62 = vshrl.u32 %v12258_v6, 16  ;;  %v4582_v36 = vshrl.u32 %v12588_v45, 16  ;;  %5621 = vmatpush.bf16.msrb.mxu0 %v13469_v1 }
 0x1fc   : > { %v3680_v41 = vunpack.c.l.b16 %v3562_v58  ;;  %v2743_v37 = vrot.slane %v2741_v18, 4  ;;  %v2746_v48 = vrot.slane %v2744_v8, 5  ;;  %v2760_v8 = vshll.u32 %v12259_v56, 16 }
 0x1fd   : > { %v2756_v28 = vrot.slane %v2754_v62, 4 }
 0x1fe   : > { %v2449_v16 = vpop.f32.mrf.mxu3  ;;  %v1977_v25 = vpop.f32.mrf.mxu0  ;;  %v3711_v42 = vpack.c.b16 %v3680_v41, %v3679_v32  ;;  %v4571_v32 = vrot.slane %v4569_v10, 4  ;;  %v12346_v41 = vld [vmem:[%s14109_s11 + $0x60] sm:$0xe] }
 0x1ff   : > { %v14758_v60 = vadd.f32 %v2449_v16, %v2121_v57  ;;  %v14762_v55 = vadd.f32 %v1977_v25, %v14319_v2  ;;  %v4552_v2 = vrot.slane %v4551_v35, 4  ;;  %v2729_v57 = vsel %vm14133_vm2, %v2724_v14, %v14747_v33 }
 0x200   : > { %v2739_v16 = vsel %vm14133_vm2, %v2734_v44, %v2738_v3  ;;  %v4572_v33 = vshll.u32 %v12587_v17, 16  ;;  %v4578_v35 = vshll.u32 %v12588_v45, 16  ;;  %v3099_v14 = vunpack.c.l.b16 %v2729_v57  ;;  %v12589_v17 = vld [vmem:[%s14109_s11 + $0x68] sm:$0x1] }
 0x201   : > { %3231 = vmatmul.bf16.gmra.mxu0 %v3131_v15  ;;  %v2750_v15 = vshll.u32 %v12258_v6, 16  ;;  %v4557_v9 = vsel %vm14133_vm2, %v4552_v2, %v14751_v11  ;;  %v3100_v11 = vunpack.c.l.b16 %v2739_v16  ;;  %v12347_v6 = vld [vmem:[%s14109_s11 + $0x64] sm:$0xf]  ;;  %v12348_v45 = vld [vmem:[%s14109_s11 + $0x68] sm:$0x1] }
 0x202   : > { %v4927_v44 = vunpack.c.l.b16 %v4557_v9  ;;  %v4574_v2 = vrot.slane %v4572_v33, 5  ;;  %v14796_v58 = vrot.slane %v4578_v35, 5  ;;  %v4588_v33 = vshll.u32 %v12589_v17, 16 }
 0x203   : > { %5059 = vmatmul.bf16.gmra.mxu3 %v4959_v63  ;;  %v4567_v63 = vsel %vm14133_vm2, %v4562_v29, %v4566_v22  ;;  %v14792_v19 = vrot.slane %v2750_v15, 5  ;;  %v2747_v22 = vor.u32 %v2746_v48, %v2743_v37  ;;  %v3132_v57 = vpack.c.b16 %v3100_v11, %v3099_v14  ;;  %v12260_v37 = vld [vmem:[%s14109_s11 + $0x60] sm:$0xf] }
 0x204   : > { %v4928_v3 = vunpack.c.l.b16 %v4567_v63 }
 0x205   : > { %3819 = vmatmul.bf16.gmra.mxu1 %v3711_v42  ;;  %v2757_v18 = vor.u32 %v2756_v28, %v14792_v19  ;;  %v4575_v42 = vor.u32 %v4574_v2, %v4571_v32  ;;  %v2748_v35 = vrot.slane %v2747_v22, 4  ;;  %v1522_v32 = vadd.f32 %v14349_v40, %v14347_v13 }
 0x206   : > { %v2452_v61 = vpop.f32.mrf.mxu3  ;;  %v1979_v47 = vpop.f32.mrf.mxu0  ;;  %v4960_v62 = vpack.c.b16 %v4928_v3, %v4927_v44  ;;  %v4590_v44 = vrot.slane %v4588_v33, 5  ;;  %v12590_v3 = vld [vmem:[%s14109_s11 + $0x70] sm:$0xf] }
 0x207   : > { %v14781_v49 = vadd.f32 %v2452_v61, %v14528_v31  ;;  %v14786_v25 = vadd.f32 %v1979_v47, %v1520_v30  ;;  %v1542_v31 = vadd.f32 %v14338_v27, %v14532_v4  ;;  %v4584_v27 = vrot.slane %v4582_v36, 4  ;;  %v13435_v47 = vld [vmem:[%s14109_s11 + $0x70] sm:$0xff] }
 0x208   : > { %v3565_v4 = vrot.slane %v12347_v6, 5  ;;  %v12390_v61 = vrot.slane %v12346_v41, 9  ;;  %v3568_v36 = vrot.slane %v12348_v45, 5  ;;  %v2758_v1 = vrot.slane %v2757_v18, 4 }
 0x209   : > { %v2123_v29 = vadd.f32 %v14511_v12, %v1542_v31  ;;  %v4585_v10 = vor.u32 %v4584_v27, %v14796_v58  ;;  %v2762_v31 = vrot.slane %v2760_v8, 5  ;;  %4244 = vmatmul.bf16.gmra.mxu2 %v13435_v47  ;;  %v4576_v14 = vrot.slane %v4575_v42, 4 }
 0x20a   : > { %v3567_v9 = vrot.slane %v3565_v4, 4  ;;  %v3566_v63 = vsel %vm14226_vm5, %v12390_v61, %v3565_v4  ;;  %v2753_v2 = vsel %vm14133_vm2, %v2748_v35, %v14792_v19  ;;  %v2765_v6 = vshrl.u32 %v12260_v37, 16  ;;  %v12591_v4 = vld [vmem:[%s14109_s11 + $0x74] sm:$0xf]  ;;  %v12262_v35 = vld [vmem:[%s14109_s11 + $0x68] sm:$0x1] }
 0x20b   : > { %v3681_v48 = vunpack.c.l.b16 %v3566_v63  ;;  %v4586_v28 = vrot.slane %v4585_v10, 4  ;;  %v2768_v27 = vshll.u32 %v12260_v37, 16  ;;  %v2763_v22 = vsel %vm14133_vm2, %v2758_v1, %v2762_v31  ;;  %v12350_v31 = vld [vmem:[%s14109_s11 + $0x74] sm:$0xf] }
 0x20c   : > { %v3569_v11 = vsel %vm14226_vm5, %v3567_v9, %v3568_v36  ;;  %v4581_v13 = vsel %vm14133_vm2, %v4576_v14, %v14796_v58  ;;  %v4593_v40 = vshrl.u32 %v12590_v3, 16  ;;  %v4596_v19 = vshll.u32 %v12590_v3, 16 }
 0x20d   : > { %v3682_v56 = vunpack.c.l.b16 %v3569_v11  ;;  %v4591_v45 = vsel %vm14133_vm2, %v4586_v28, %v4590_v44  ;;  %v4602_v61 = vshll.u32 %v12591_v4, 16  ;;  %v2770_v42 = vrot.slane %v2768_v27, 5  ;;  %v12349_v11 = vld [vmem:[%s14109_s11 + $0x70] sm:$0xe] }
 0x20e   : > { %v2454_v30 = vpop.f32.mrf.mxu3  ;;  %v1982_v15 = vpop.f32.mrf.mxu0  ;;  %v3101_v47 = vunpack.c.l.b16 %v2753_v2  ;;  %v3102_v58 = vunpack.c.l.b16 %v2763_v22  ;;  %v4929_v33 = vunpack.c.l.b16 %v4581_v13  ;;  %v4930_v63 = vunpack.c.l.b16 %v4591_v45  ;;  %v13436_v22 = vld [vmem:[%s14109_s11 + $0x80] sm:$0xff] }
 0x20f   : > { %v14803_v16 = vadd.f32 %v2454_v30, %v2123_v29  ;;  %v14807_v12 = vadd.f32 %v1982_v15, %v14342_v34  ;;  %v12261_v34 = vld [vmem:[%s14109_s11 + $0x64] sm:$0xf]  ;;  %v3712_v30 = vpack.c.b16 %v3682_v56, %v3681_v48  ;;  %v4606_v15 = vshrl.u32 %v12591_v4, 16 }
 0x210   : > { %v2774_v17 = vshll.u32 %v12261_v34, 16  ;;  %v2778_v41 = vshrl.u32 %v12261_v34, 16  ;;  %v4595_v36 = vrot.slane %v4593_v40, 4  ;;  %v4598_v1 = vrot.slane %v4596_v19, 5  ;;  %v12592_v34 = vld [vmem:[%s14109_s11 + $0x78] sm:$0x1] }
 0x211   : > { %3236 = vmatmul.bf16.gmra.mxu0 %v3132_v57  ;;  %v14841_v37 = vrot.slane %v4602_v61, 5  ;;  %v4608_v48 = vrot.slane %v4606_v15, 4  ;;  %v3133_v44 = vpack.c.b16 %v3102_v58, %v3101_v47  ;;  %v2784_v56 = vshll.u32 %v12262_v35, 16  ;;  %v12263_v61 = vld [vmem:[%s14109_s11 + $0x70] sm:$0xf] }
 0x212   : > { %v14837_v9 = vrot.slane %v2774_v17, 5  ;;  %v2780_v10 = vrot.slane %v2778_v41, 4  ;;  %v12391_v2 = vrot.slane %v12349_v11, 9  ;;  %v4961_v4 = vpack.c.b16 %v4930_v63, %v4929_v33  ;;  %v12593_v58 = vld [vmem:[%s14109_s11 + $0x80] sm:$0xf]  ;;  %v17507_v63 = vld [vmem:[#allocation15_spill] sm:$0xff] }
 0x213   : > { %5064 = vmatmul.bf16.gmra.mxu3 %v4960_v62  ;;  %v2767_v62 = vrot.slane %v2765_v6, 4  ;;  %v4609_v41 = vor.u32 %v4608_v48, %v14841_v37  ;;  %v2786_v45 = vrot.slane %v2784_v56, 5  ;;  %v17506_v33 = vld [vmem:[#allocation14_spill] sm:$0xff] }
 0x214   : > { %v2781_v3 = vor.u32 %v2780_v10, %v14837_v9  ;;  %v1524_v35 = vadd.f32 %v17507_v63, %v17506_v33  ;;  %v12594_v48 = vld [vmem:[%s14109_s11 + $0x84] sm:$0xf] }
 0x215   : > { %3824 = vmatmul.bf16.gmra.mxu1 %v3712_v30  ;;  %v2771_v14 = vor.u32 %v2770_v42, %v2767_v62  ;;  %v4612_v30 = vshll.u32 %v12592_v34, 16  ;;  %v4610_v42 = vrot.slane %v4609_v41, 4  ;;  %v17512_v33 = vld [vmem:[#allocation42_spill] sm:$0xff] }
 0x216   : > { %v2457_v29 = vpop.f32.mrf.mxu3  ;;  %v1984_v18 = vpop.f32.mrf.mxu0  ;;  %v2782_v19 = vrot.slane %v2781_v3, 4 }
 0x217   : > { %v14826_v57 = vadd.f32 %v2457_v29, %v14547_v21  ;;  %v14831_v8 = vadd.f32 %v1984_v18, %v1522_v32  ;;  %v1544_v21 = vadd.f32 %v14357_v53, %v14551_v52  ;;  %v3572_v53 = vrot.slane %v12350_v31, 5  ;;  %v12351_v32 = vld [vmem:[%s14109_s11 + $0x78] sm:$0x1] }
 0x218   : > { %v4599_v29 = vor.u32 %v4598_v1, %v4595_v36  ;;  %v2772_v13 = vrot.slane %v2771_v14, 4  ;;  %v3575_v40 = vrot.slane %v12351_v32, 5  ;;  %v4614_v47 = vrot.slane %v4612_v30, 5 }
 0x219   : > { %v2125_v52 = vadd.f32 %v14538_v39, %v1544_v21  ;;  %v3574_v17 = vrot.slane %v3572_v53, 4  ;;  %v3573_v18 = vsel %vm14226_vm5, %v12391_v2, %v3572_v53  ;;  %4249 = vmatmul.bf16.gmra.mxu2 %v13436_v22  ;;  %v2789_v1 = vshrl.u32 %v12263_v61, 16  ;;  %v17510_v22 = vld [vmem:[#allocation46_spill] sm:$0xff] }
 0x21a   : > { %v3683_v15 = vunpack.c.l.b16 %v3573_v18  ;;  %v4600_v21 = vrot.slane %v4599_v29, 4  ;;  %v2777_v36 = vsel %vm14133_vm2, %v2772_v13, %v14837_v9  ;;  %v2792_v31 = vshll.u32 %v12263_v61, 16 }
 0x21b   : > { %v3576_v62 = vsel %vm14226_vm5, %v3574_v17, %v3575_v40  ;;  %v4617_v9 = vshrl.u32 %v12593_v58, 16  ;;  %v4620_v32 = vshll.u32 %v12593_v58, 16  ;;  %v4630_v29 = vshrl.u32 %v12594_v48, 16  ;;  %v17511_v17 = vld [vmem:[#allocation16_spill] sm:$0xff] }
 0x21c   : > { %v3684_v10 = vunpack.c.l.b16 %v3576_v62  ;;  %v4605_v56 = vsel %vm14133_vm2, %v4600_v21, %v14841_v37  ;;  %v1546_v41 = vadd.f32 %v17511_v17, %v17510_v22  ;;  %v2791_v30 = vrot.slane %v2789_v1, 4  ;;  %v12265_v37 = vld [vmem:[%s14109_s11 + $0x78] sm:$0x1]  ;;  %v12595_v21 = vld [vmem:[%s14109_s11 + $0x88] sm:$0x1] }
 0x21d   : > { %v2794_v18 = vrot.slane %v2792_v31, 5  ;;  %v3103_v13 = vunpack.c.l.b16 %v2777_v36  ;;  %v4931_v61 = vunpack.c.l.b16 %v4605_v56  ;;  %v4622_v62 = vrot.slane %v4620_v32, 5  ;;  %v12352_v1 = vld [vmem:[%s14109_s11 + $0x80] sm:$0xe]  ;;  %v13437_v32 = vld [vmem:[%s14109_s11 + $0x90] sm:$0xff] }
 0x21e   : > { %v2459_v28 = vpop.f32.mrf.mxu3  ;;  %v1987_v27 = vpop.f32.mrf.mxu0  ;;  %v3713_v11 = vpack.c.b16 %v3684_v10, %v3683_v15  ;;  %v4632_v58 = vrot.slane %v4630_v29, 4  ;;  %v2127_v63 = vadd.f32 %v17512_v33, %v1546_v41  ;;  %v2808_v36 = vshll.u32 %v12265_v37, 16  ;;  %v12266_v17 = vld [vmem:[%s14109_s11 + $0x80] sm:$0xf] }
 0x21f   : > { %v14848_v6 = vadd.f32 %v2459_v28, %v2125_v52  ;;  %v14852_v39 = vadd.f32 %v1987_v27, %v14361_v59  ;;  %v12264_v59 = vld [vmem:[%s14109_s11 + $0x74] sm:$0xf]  ;;  %v2787_v52 = vsel %vm14133_vm2, %v2782_v19, %v2786_v45  ;;  %v4615_v27 = vsel %vm14133_vm2, %v4610_v42, %v4614_v47  ;;  %v12353_v42 = vld [vmem:[%s14109_s11 + $0x84] sm:$0xf] }
 0x220   : > { %v2798_v14 = vshll.u32 %v12264_v59, 16  ;;  %v2802_v34 = vshrl.u32 %v12264_v59, 16  ;;  %v17508_v28 = vld [vmem:[#allocation44_spill] sm:$0xff]  ;;  %v3104_v40 = vunpack.c.l.b16 %v2787_v52  ;;  %v4932_v15 = vunpack.c.l.b16 %v4615_v27  ;;  %v17515_v37 = vld [vmem:[#allocation18_spill] sm:$0xff] }
 0x221   : > { %17505 = vst [vmem:[#allocation54_spill] sm:$0xff] %v14848_v6  ;;  %3241 = vmatmul.bf16.gmra.mxu0 %v3133_v44  ;;  %v4619_v59 = vrot.slane %v4617_v9, 4  ;;  %v3579_v10 = vrot.slane %v12353_v42, 5  ;;  %v4636_v52 = vshll.u32 %v12595_v21, 16  ;;  %v13468_v9 = vld [vmem:[#allocation7 + $0x220] sm:$0xff]  ;;  %v2813_v33 = vshrl.u32 %v12266_v17, 16 }
 0x222   : > { %v14883_v19 = vrot.slane %v2798_v14, 5  ;;  %v2804_v45 = vrot.slane %v2802_v34, 4  ;;  %v12354_v14 = vld [vmem:[%s14109_s11 + $0x88] sm:$0x1]  ;;  %v12392_v34 = vrot.slane %v12352_v1, 9  ;;  %5622 = vmatpush.bf16.msrb.mxu0 %v13468_v9 }
 0x223   : > { %5069 = vmatmul.bf16.gmra.mxu3 %v4961_v4  ;;  %v4626_v4 = vshll.u32 %v12594_v48, 16  ;;  %v3134_v48 = vpack.c.b16 %v3104_v40, %v3103_v13  ;;  %v4623_v56 = vor.u32 %v4622_v62, %v4619_v59  ;;  %v3581_v27 = vrot.slane %v3579_v10, 4  ;;  %v12267_v13 = vld [vmem:[%s14109_s11 + $0x84] sm:$0xf]  ;;  %v12596_v59 = vld [vmem:[%s14109_s11 + $0x90] sm:$0xf] }
 0x224   : > { %v3580_v41 = vsel %vm14226_vm5, %v12392_v34, %v3579_v10  ;;  %v3582_v40 = vrot.slane %v12354_v14, 5  ;;  %v4638_v21 = vrot.slane %v4636_v52, 5  ;;  %v12597_v62 = vld [vmem:[%s14109_s11 + $0x94] sm:$0xf]  ;;  %v2826_v1 = vshrl.u32 %v12267_v13, 16  ;;  %v17517_v52 = vld [vmem:[#allocation51_spill] sm:$0xff] }
 0x225   : > { %3829 = vmatmul.bf16.gmra.mxu1 %v3713_v11  ;;  %v14887_v47 = vrot.slane %v4626_v4, 5  ;;  %v17514_v4 = vld [vmem:[#allocation17_spill] sm:$0xff]  ;;  %v3685_v42 = vunpack.c.l.b16 %v3580_v41  ;;  %v4641_v14 = vshrl.u32 %v12596_v59, 16  ;;  %v4644_v34 = vshll.u32 %v12596_v59, 16  ;;  %v12602_v6 = vld [vmem:[%s14109_s11 + $0xb0] sm:$0xf] }
 0x226   : > { %v2462_v53 = vpop.f32.mrf.mxu3  ;;  %v1989_v3 = vpop.f32.mrf.mxu0  ;;  %v3583_v10 = vsel %vm14226_vm5, %v3581_v27, %v3582_v40 }
 0x227   : > { %v14871_v44 = vadd.f32 %v2462_v53, %v17508_v28  ;;  %v14876_v2 = vadd.f32 %v1989_v3, %v1524_v35  ;;  %v2795_v35 = vor.u32 %v2794_v18, %v2791_v30  ;;  %v2805_v53 = vor.u32 %v2804_v45, %v14883_v19  ;;  %v17516_v45 = vld [vmem:[#allocation19_spill] sm:$0xff] }
 0x228   : > { %v4962_v3 = vpack.c.b16 %v4932_v15, %v4931_v61  ;;  %v4633_v22 = vor.u32 %v4632_v58, %v14887_v47  ;;  %v2810_v18 = vrot.slane %v2808_v36, 5  ;;  %v1526_v61 = vadd.f32 %v17516_v45, %v17515_v37  ;;  %v12268_v45 = vld [vmem:[%s14109_s11 + $0x88] sm:$0x1] }
 0x229   : > { %17509 = vst [vmem:[#allocation14_spill] sm:$0xff] %v14871_v44  ;;  %v2796_v30 = vrot.slane %v2795_v35, 4  ;;  %v2806_v15 = vrot.slane %v2805_v53, 4  ;;  %4254 = vmatmul.bf16.gmra.mxu2 %v13437_v32  ;;  %v4624_v58 = vrot.slane %v4623_v56, 4  ;;  %v2822_v36 = vshll.u32 %v12267_v13, 16 }
 0x22a   : > { %v4634_v35 = vrot.slane %v4633_v22, 4  ;;  %v4654_v53 = vshrl.u32 %v12597_v62, 16  ;;  %v2815_v13 = vrot.slane %v2813_v33, 4  ;;  %v4646_v59 = vrot.slane %v4644_v34, 5  ;;  %v12598_v33 = vld [vmem:[%s14109_s11 + $0x98] sm:$0x1]  ;;  %v14936_v34 = vpop.f32.mrf.mxu2 }
 0x22b   : > { %v2811_v56 = vsel %vm14133_vm2, %v2806_v15, %v2810_v18  ;;  %v4629_v41 = vsel %vm14133_vm2, %v4624_v58, %v14887_v47  ;;  %v2828_v18 = vrot.slane %v2826_v1, 4  ;;  %v4643_v15 = vrot.slane %v4641_v14, 4  ;;  %v17521_v1 = vld [vmem:[#allocation48_spill] sm:$0xff] }
 0x22c   : > { %v3106_v58 = vunpack.c.l.b16 %v2811_v56  ;;  %v12357_v56 = vld [vmem:[%s14109_s11 + $0x98] sm:$0x1] }
 0x22e   : > { %v2464_v31 = vpop.f32.mrf.mxu3  ;;  %v1992_v28 = vpop.f32.mrf.mxu0 }
 0x22f   : > { %v14893_v11 = vadd.f32 %v2464_v31, %v2127_v63  ;;  %v14897_v29 = vadd.f32 %v1992_v28, %v17514_v4  ;;  %v2816_v63 = vshll.u32 %v12266_v17, 16  ;;  %v3686_v31 = vunpack.c.l.b16 %v3583_v10  ;;  %v17518_v28 = vld [vmem:[#allocation20_spill] sm:$0xff]  ;;  %v17519_v4 = vld [vmem:[#allocation49_spill] sm:$0xff] }
 0x230   : > { %v1548_v9 = vadd.f32 %v17518_v28, %v17517_v52  ;;  %v4660_v52 = vshll.u32 %v12598_v33, 16  ;;  %v12355_v28 = vld [vmem:[%s14109_s11 + $0x90] sm:$0xe] }
 0x231   : > { %17513 = vst [vmem:[#allocation15_spill] sm:$0xff] %v14893_v11  ;;  %3246 = vmatmul.bf16.gmra.mxu0 %v3134_v48  ;;  %v4650_v48 = vshll.u32 %v12597_v62, 16  ;;  %v3714_v27 = vpack.c.b16 %v3686_v31, %v3685_v42  ;;  %v2818_v40 = vrot.slane %v2816_v63, 5  ;;  %v4656_v42 = vrot.slane %v4654_v53, 4  ;;  %v12356_v31 = vld [vmem:[%s14109_s11 + $0x94] sm:$0xf] }
 0x232   : > { %v2129_v14 = vadd.f32 %v17521_v1, %v1548_v9  ;;  %v4662_v33 = vrot.slane %v4660_v52, 5 }
 0x233   : > { %5074 = vmatmul.bf16.gmra.mxu3 %v4962_v3  ;;  %v2801_v3 = vsel %vm14133_vm2, %v2796_v30, %v14883_v19  ;;  %v4639_v19 = vsel %vm14133_vm2, %v4634_v35, %v4638_v21  ;;  %v14927_v30 = vrot.slane %v2822_v36, 5  ;;  %v14930_v62 = vrot.slane %v4650_v48, 5 }
 0x234   : > { %v3105_v47 = vunpack.c.l.b16 %v2801_v3  ;;  %v4934_v63 = vunpack.c.l.b16 %v4639_v19  ;;  %v2819_v10 = vor.u32 %v2818_v40, %v2815_v13  ;;  %v2832_v35 = vshll.u32 %v12268_v45, 16  ;;  %v13438_v40 = vld [vmem:[%s14109_s11 + $0xa0] sm:$0xff]  ;;  %v12269_v19 = vld [vmem:[%s14109_s11 + $0x90] sm:$0xf] }
 0x235   : > { %3834 = vmatmul.bf16.gmra.mxu1 %v3714_v27  ;;  %v2829_v21 = vor.u32 %v2828_v18, %v14927_v30  ;;  %v3586_v36 = vrot.slane %v12356_v31, 5  ;;  %v4647_v48 = vor.u32 %v4646_v59, %v4643_v15  ;;  %v4657_v53 = vor.u32 %v4656_v42, %v14930_v62  ;;  %v17523_v18 = vld [vmem:[#allocation21_spill] sm:$0xff] }
 0x236   : > { %v2467_v32 = vpop.f32.mrf.mxu3  ;;  %v1994_v17 = vpop.f32.mrf.mxu0  ;;  %v3135_v3 = vpack.c.b16 %v3106_v58, %v3105_v47  ;;  %v12393_v27 = vrot.slane %v12355_v28, 9  ;;  %v2820_v13 = vrot.slane %v2819_v10, 4  ;;  %v2834_v59 = vrot.slane %v2832_v35, 5  ;;  %v17524_v35 = vld [vmem:[#allocation22_spill] sm:$0xff]  ;;  %v17525_v28 = vld [vmem:[#allocation23_spill] sm:$0xff] }
 0x237   : > { %v14918_v22 = vadd.f32 %v2467_v32, %v17519_v4  ;;  %v14923_v37 = vadd.f32 %v1994_v17, %v1526_v61  ;;  %v4933_v61 = vunpack.c.l.b16 %v4629_v41  ;;  %v3588_v9 = vrot.slane %v3586_v36, 4 }
 0x238   : > { %v2830_v15 = vrot.slane %v2829_v21, 4  ;;  %v3587_v42 = vsel %vm14226_vm5, %v12393_v27, %v3586_v36  ;;  %v4648_v47 = vrot.slane %v4647_v48, 4  ;;  %v4658_v58 = vrot.slane %v4657_v53, 4  ;;  %v12600_v53 = vld [vmem:[%s14109_s11 + $0xa4] sm:$0xf] }
 0x239   : > { %17520 = vst [vmem:[#allocation44_spill] sm:$0xff] %v14918_v22  ;;  %v4963_v41 = vpack.c.b16 %v4934_v63, %v4933_v61  ;;  %v3589_v31 = vrot.slane %v12357_v56, 5  ;;  %4259 = vmatmul.bf16.gmra.mxu2 %v13438_v40  ;;  %v12270_v61 = vld [vmem:[%s14109_s11 + $0x94] sm:$0xf]  ;;  %v2837_v63 = vshrl.u32 %v12269_v19, 16  ;;  %v3687_v10 = vunpack.c.l.b16 %v3587_v42 }
 0x23a   : > { %v2840_v1 = vshll.u32 %v12269_v19, 16  ;;  %v2825_v36 = vsel %vm14133_vm2, %v2820_v13, %v14927_v30  ;;  %v2835_v48 = vsel %vm14133_vm2, %v2830_v15, %v2834_v59  ;;  %v4663_v56 = vsel %vm14133_vm2, %v4658_v58, %v4662_v33  ;;  %v17527_v58 = vld [vmem:[#allocation24_spill] sm:$0xff] }
 0x23b   : > { %v3590_v21 = vsel %vm14226_vm5, %v3588_v9, %v3589_v31  ;;  %v2839_v30 = vrot.slane %v2837_v63, 4  ;;  %v4674_v42 = vshll.u32 %v12600_v53, 16  ;;  %v1550_v33 = vadd.f32 %v17527_v58, %v14656_v7 }
 0x23c   : > { %v3688_v52 = vunpack.c.l.b16 %v3590_v21  ;;  %v14969_v40 = vpop.f32.mrf.mxu2  ;;  %v2842_v59 = vrot.slane %v2840_v1, 5  ;;  %v3108_v63 = vunpack.c.l.b16 %v2835_v48  ;;  %v12601_v1 = vld [vmem:[%s14109_s11 + $0xa8] sm:$0x1] }
 0x23e   : > { %v2469_v32 = vpop.f32.mrf.mxu3  ;;  %v1997_v17 = vpop.f32.mrf.mxu0 }
 0x23f   : > { %v14941_v4 = vadd.f32 %v2469_v32, %v2129_v14  ;;  %v14946_v45 = vadd.f32 %v1997_v17, %v17523_v18  ;;  %v12599_v14 = vld [vmem:[%s14109_s11 + $0xa0] sm:$0xf]  ;;  %v1528_v32 = vadd.f32 %v17525_v28, %v17524_v35  ;;  %v2846_v17 = vshll.u32 %v12270_v61, 16 }
 0x240   : > { %v4665_v13 = vshrl.u32 %v12599_v14, 16  ;;  %v4668_v9 = vshll.u32 %v12599_v14, 16  ;;  %v3715_v18 = vpack.c.b16 %v3688_v52, %v3687_v10  ;;  %v4936_v35 = vunpack.c.l.b16 %v4663_v56 }
 0x241   : > { %17522 = vst [vmem:[#allocation46_spill] sm:$0xff] %v14941_v4  ;;  %3251 = vmatmul.bf16.gmra.mxu0 %v3135_v3  ;;  %v4653_v3 = vsel %vm14133_vm2, %v4648_v47, %v14930_v62  ;;  %v4678_v47 = vshrl.u32 %v12600_v53, 16  ;;  %v14978_v14 = vrot.slane %v2846_v17, 5  ;;  %v2843_v52 = vor.u32 %v2842_v59, %v2839_v30  ;;  %v12358_v30 = vld [vmem:[%s14109_s11 + $0xa0] sm:$0xe]  ;;  %v17529_v4 = vld [vmem:[#allocation25_spill] sm:$0xff] }
 0x242   : > { %v14967_v27 = vpop.f32.mrf.mxu1  ;;  %v4935_v21 = vunpack.c.l.b16 %v4653_v3  ;;  %v4667_v28 = vrot.slane %v4665_v13, 4  ;;  %v4670_v53 = vrot.slane %v4668_v9, 5  ;;  %v4684_v3 = vshll.u32 %v12601_v1, 16  ;;  %v12272_v13 = vld [vmem:[%s14109_s11 + $0xa0] sm:$0xf]  ;;  %v13439_v1 = vld [vmem:[%s14109_s11 + $0xb0] sm:$0xff] }
 0x243   : > { %5079 = vmatmul.bf16.gmra.mxu3 %v4963_v41  ;;  %v2850_v41 = vshrl.u32 %v12270_v61, 16  ;;  %v3107_v61 = vunpack.c.l.b16 %v2825_v36  ;;  %v4680_v7 = vrot.slane %v4678_v47, 4  ;;  %v2131_v36 = vadd.f32 %v14640_v38, %v1550_v33  ;;  %v12360_v47 = vld [vmem:[%s14109_s11 + $0xa8] sm:$0x1] }
 0x244   : > { %v4964_v59 = vpack.c.b16 %v4936_v35, %v4935_v21  ;;  %v12394_v58 = vrot.slane %v12358_v30, 9  ;;  %v2861_v11 = vshrl.u32 %v12272_v13, 16  ;;  %v2864_v44 = vshll.u32 %v12272_v13, 16  ;;  %v13467_v13 = vld [vmem:[#allocation7 + $0x218] sm:$0xff] }
 0x245   : > { %3839 = vmatmul.bf16.gmra.mxu1 %v3715_v18  ;;  %v2852_v10 = vrot.slane %v2850_v41, 4  ;;  %v14989_v41 = vpop.f32.mrf.mxu2  ;;  %v4686_v35 = vrot.slane %v4684_v3, 5  ;;  %v4689_v30 = vshrl.u32 %v12602_v6, 16  ;;  %v17530_v3 = vld [vmem:[#allocation26_spill] sm:$0xff]  ;;  %5623 = vmatpush.bf16.msrb.mxu0 %v13467_v13 }
 0x246   : > { %v2472_v19 = vpop.f32.mrf.mxu3  ;;  %v1999_v62 = vpop.f32.mrf.mxu0 }
 0x247   : > { %v14972_v15 = vadd.f32 %v2472_v19, %v14633_v54  ;;  %v14976_v31 = vadd.f32 %v1999_v62, %v1528_v32  ;;  %v12271_v54 = vld [vmem:[%s14109_s11 + $0x98] sm:$0x1]  ;;  %v14982_v19 = vrot.slane %v4674_v42, 5  ;;  %v12359_v32 = vld [vmem:[%s14109_s11 + $0xa4] sm:$0xf]  ;;  %v2853_v48 = vor.u32 %v2852_v10, %v14978_v14 }
 0x248   : > { %v3593_v18 = vrot.slane %v12359_v32, 5  ;;  %v2856_v17 = vshll.u32 %v12271_v54, 16  ;;  %v3136_v62 = vpack.c.b16 %v3108_v63, %v3107_v61  ;;  %v4671_v42 = vor.u32 %v4670_v53, %v4667_v28  ;;  %v12273_v32 = vld [vmem:[%s14109_s11 + $0xa4] sm:$0xf] }
 0x249   : > { %17526 = vst [vmem:[#allocation16_spill] sm:$0xff] %v14972_v15  ;;  %v2844_v10 = vrot.slane %v2843_v52, 4  ;;  %v4681_v54 = vor.u32 %v4680_v7, %v14982_v19  ;;  %v2854_v63 = vrot.slane %v2853_v48, 4  ;;  %v3596_v28 = vrot.slane %v12360_v47, 5  ;;  %4264 = vmatmul.bf16.gmra.mxu2 %v13439_v1  ;;  %v17531_v47 = vld [vmem:[#allocation27_spill] sm:$0xff] }
 0x24a   : > { %v14987_v56 = vpop.f32.mrf.mxu1  ;;  %v3595_v15 = vrot.slane %v3593_v18, 4  ;;  %v3594_v61 = vsel %vm14226_vm5, %v12394_v58, %v3593_v18  ;;  %v2858_v21 = vrot.slane %v2856_v17, 5  ;;  %v4672_v53 = vrot.slane %v4671_v42, 4 }
 0x24b   : > { %v2870_v52 = vshll.u32 %v12273_v32, 16  ;;  %v2874_v7 = vshrl.u32 %v12273_v32, 16  ;;  %v2863_v18 = vrot.slane %v2861_v11, 4  ;;  %v2866_v48 = vrot.slane %v2864_v44, 5 }
 0x24c   : > { %v2849_v42 = vsel %vm14133_vm2, %v2844_v10, %v14978_v14  ;;  %v4677_v44 = vsel %vm14133_vm2, %v4672_v53, %v14982_v19  ;;  %v17533_v19 = vld [vmem:[#allocation28_spill] sm:$0xff] }
 0x24d   : > { %v2876_v1 = vrot.slane %v2874_v7, 4  ;;  %v1552_v53 = vadd.f32 %v17533_v19, %v14692_v24  ;;  %v12276_v19 = vld [vmem:[%s14109_s11 + $0xb4] sm:$0xf] }
 0x24e   : > { %v2474_v9 = vpop.f32.mrf.mxu3  ;;  %v2002_v33 = vpop.f32.mrf.mxu0 }
 0x24f   : > { %v14994_v38 = vadd.f32 %v2474_v9, %v2131_v36  ;;  %v15000_v22 = vadd.f32 %v2002_v33, %v17529_v4  ;;  %v3689_v36 = vunpack.c.l.b16 %v3594_v61  ;;  %v4682_v4 = vrot.slane %v4681_v54, 4  ;;  %v15017_v54 = vpop.f32.mrf.mxu2 }
 0x250   : > { %v4692_v9 = vshll.u32 %v12602_v6, 16  ;;  %v3597_v33 = vsel %vm14226_vm5, %v3595_v15, %v3596_v28  ;;  %v12603_v6 = vld [vmem:[%s14109_s11 + $0xb4] sm:$0xf]  ;;  %v2872_v15 = vrot.slane %v2870_v52, 5  ;;  %v3109_v52 = vunpack.c.l.b16 %v2849_v42 }
 0x251   : > { %17528 = vst [vmem:[#allocation42_spill] sm:$0xff] %v14994_v38  ;;  %3256 = vmatmul.bf16.gmra.mxu0 %v3136_v62  ;;  %v3690_v17 = vunpack.c.l.b16 %v3597_v33  ;;  %v1530_v62 = vadd.f32 %v17531_v47, %v17530_v3  ;;  %v4687_v10 = vsel %vm14133_vm2, %v4682_v4, %v4686_v35  ;;  %v2867_v33 = vor.u32 %v2866_v48, %v2863_v18  ;;  %v12604_v4 = vld [vmem:[%s14109_s11 + $0xb8] sm:$0x1] }
 0x252   : > { %v15014_v58 = vpop.f32.mrf.mxu1  ;;  %v4694_v28 = vrot.slane %v4692_v9, 5  ;;  %v4698_v3 = vshll.u32 %v12603_v6, 16  ;;  %v4702_v47 = vshrl.u32 %v12603_v6, 16  ;;  %v2877_v7 = vor.u32 %v2876_v1, %v2872_v15  ;;  %v17534_v48 = vld [vmem:[#allocation29_spill] sm:$0xff] }
 0x253   : > { %5084 = vmatmul.bf16.gmra.mxu3 %v4964_v59  ;;  %v2859_v59 = vsel %vm14133_vm2, %v2854_v63, %v2858_v21  ;;  %v3716_v32 = vpack.c.b16 %v3690_v17, %v3689_v36  ;;  %v12274_v63 = vld [vmem:[%s14109_s11 + $0xa8] sm:$0x1]  ;;  %v4691_v21 = vrot.slane %v4689_v30, 4  ;;  %v4937_v17 = vunpack.c.l.b16 %v4677_v44 }
 0x254   : > { %v2880_v36 = vshll.u32 %v12274_v63, 16  ;;  %v4938_v35 = vunpack.c.l.b16 %v4687_v10  ;;  %v2868_v30 = vrot.slane %v2867_v33, 4  ;;  %v4700_v9 = vrot.slane %v4698_v3, 5  ;;  %v12275_v10 = vld [vmem:[%s14109_s11 + $0xb0] sm:$0xf] }
 0x255   : > { %3844 = vmatmul.bf16.gmra.mxu1 %v3716_v32  ;;  %v2133_v18 = vadd.f32 %v14936_v34, %v1552_v53  ;;  %v2518_v6 = vadd.f32 %v17534_v48, %v14717_v5  ;;  %v2878_v44 = vrot.slane %v2877_v7, 4  ;;  %v2885_v53 = vshrl.u32 %v12275_v10, 16 }
 0x256   : > { %v2477_v11 = vpop.f32.mrf.mxu3  ;;  %v2004_v14 = vpop.f32.mrf.mxu0  ;;  %v2882_v1 = vrot.slane %v2880_v36, 5  ;;  %v4965_v34 = vpack.c.b16 %v4938_v35, %v4937_v17  ;;  %v2873_v33 = vsel %vm14133_vm2, %v2868_v30, %v2872_v15  ;;  %v17536_v36 = vld [vmem:[#allocation30_spill] sm:$0xff]  ;;  %v12362_v15 = vld [vmem:[%s14109_s11 + $0xb4] sm:$0xf] }
 0x257   : > { %v15023_v61 = vadd.f32 %v2477_v11, %v14678_v51  ;;  %v15028_v13 = vadd.f32 %v2004_v14, %v1530_v62  ;;  %v3110_v51 = vunpack.c.l.b16 %v2859_v59  ;;  %v4695_v11 = vor.u32 %v4694_v28, %v4691_v21  ;;  %v15038_v24 = vpop.f32.mrf.mxu2 }
 0x258   : > { %v4704_v62 = vrot.slane %v4702_v47, 4  ;;  %v4708_v14 = vshll.u32 %v12604_v4, 16  ;;  %v13440_v47 = vld [vmem:[%s14109_s11 + $0xc0] sm:$0xff]  ;;  %v2519_v17 = vadd.f32 %v17536_v36, %v14741_v20  ;;  %v2883_v35 = vsel %vm14133_vm2, %v2878_v44, %v2882_v1 }
 0x259   : > { %17532 = vst [vmem:[#allocation17_spill] sm:$0xff] %v15023_v61  ;;  %v3137_v59 = vpack.c.b16 %v3110_v51, %v3109_v52  ;;  %v4696_v28 = vrot.slane %v4695_v11, 4  ;;  %v2888_v52 = vshll.u32 %v12275_v10, 16  ;;  %v12605_v51 = vld [vmem:[%s14109_s11 + $0xc0] sm:$0xf]  ;;  %4269 = vmatmul.bf16.gmra.mxu2 %v13440_v47  ;;  %v15054_v11 = vunpack.c.l.b16 %v2873_v33 }
 0x25a   : > { %v15036_v32 = vpop.f32.mrf.mxu1  ;;  %v4705_v3 = vor.u32 %v4704_v62, %v4700_v9  ;;  %v4710_v4 = vrot.slane %v4708_v14, 5  ;;  %v2894_v62 = vshll.u32 %v12276_v19, 16  ;;  %v4713_v20 = vshrl.u32 %v12605_v51, 16 }
 0x25b   : > { %v4701_v30 = vsel %vm14133_vm2, %v4696_v28, %v4700_v9  ;;  %v2887_v1 = vrot.slane %v2885_v53, 4  ;;  %v2890_v14 = vrot.slane %v2888_v52, 5  ;;  %v4716_v10 = vshll.u32 %v12605_v51, 16 }
 0x25c   : > { %v3112_v28 = vunpack.c.l.b16 %v2883_v35  ;;  %v4715_v61 = vrot.slane %v4713_v20, 4 }
 0x25d   : > { %v2891_v35 = vor.u32 %v2890_v14, %v2887_v1 }
 0x25e   : > { %v2479_v42 = vpop.f32.mrf.mxu3  ;;  %v3222_v21 = vpop.f32.mrf.mxu0 }
 0x25f   : > { %v15041_v63 = vadd.f32 %v2479_v42, %v2133_v18  ;;  %v3348_v5 = vadd.f32 %v3222_v21, %v2518_v6  ;;  %v12606_v18 = vld [vmem:[%s14109_s11 + $0xc4] sm:$0xf]  ;;  %v4706_v6 = vrot.slane %v4705_v3, 4  ;;  %v12361_v42 = vld [vmem:[%s14109_s11 + $0xb0] sm:$0xe]  ;;  %v15063_v21 = vpop.f32.mrf.mxu2 }
 0x260   : > { %v4722_v33 = vshll.u32 %v12606_v18, 16  ;;  %v4726_v47 = vshrl.u32 %v12606_v18, 16  ;;  %v4718_v18 = vrot.slane %v4716_v10, 5 }
 0x261   : > { %17535 = vst [vmem:[#allocation18_spill] sm:$0xff] %v15041_v63  ;;  %v3926_v7 = vadd.f32 %v14967_v27, %v3348_v5  ;;  %3261 = vmatmul.bf16.gmra.mxu0 %v3137_v59  ;;  %v2898_v27 = vshrl.u32 %v12276_v19, 16  ;;  %v3600_v59 = vrot.slane %v12362_v15, 5  ;;  %v12395_v5 = vrot.slane %v12361_v42, 9  ;;  %v12277_v42 = vld [vmem:[%s14109_s11 + $0xb8] sm:$0x1] }
 0x262   : > { %v15061_v44 = vpop.f32.mrf.mxu1  ;;  %v4711_v51 = vsel %vm14133_vm2, %v4706_v6, %v4710_v4  ;;  %v4939_v15 = vunpack.c.l.b16 %v4701_v30  ;;  %v2892_v6 = vrot.slane %v2891_v35, 4  ;;  %v4719_v1 = vor.u32 %v4718_v18, %v4715_v61 }
 0x263   : > { %5089 = vmatmul.bf16.gmra.mxu3 %v4965_v34  ;;  %v4346_v48 = vadd.f32 %v14969_v40, %v3926_v7  ;;  %v12363_v34 = vld [vmem:[%s14109_s11 + $0xb8] sm:$0x1]  ;;  %v3602_v19 = vrot.slane %v3600_v59, 4  ;;  %v2896_v7 = vrot.slane %v2894_v62, 5  ;;  %v2900_v36 = vrot.slane %v2898_v27, 4 }
 0x264   : > { %v3601_v53 = vsel %vm14226_vm5, %v12395_v5, %v3600_v59  ;;  %v3603_v63 = vrot.slane %v12363_v34, 5  ;;  %v4728_v62 = vrot.slane %v4726_v47, 4  ;;  %v2904_v5 = vshll.u32 %v12277_v42, 16  ;;  %v17537_v34 = vld [vmem:[#allocation31_spill] sm:$0xff]  ;;  %v12278_v42 = vld [vmem:[%s14109_s11 + $0xc0] sm:$0xf] }
 0x265   : > { %v3691_v38 = vunpack.c.l.b16 %v3601_v53  ;;  %v2901_v59 = vor.u32 %v2900_v36, %v2896_v7 }
 0x266   : > { %v5050_v9 = vpop.f32.mrf.mxu3  ;;  %v3224_v3 = vpop.f32.mrf.mxu0  ;;  %v3604_v27 = vsel %vm14226_vm5, %v3602_v19, %v3603_v63  ;;  %v2520_v63 = vadd.f32 %v17537_v34, %v14762_v55  ;;  %v2906_v53 = vrot.slane %v2904_v5, 5  ;;  %v2897_v55 = vsel %vm14133_vm2, %v2892_v6, %v2896_v7 }
 0x267   : > { %v15066_v40 = vadd.f32 %v5050_v9, %v4346_v48  ;;  %v3349_v52 = vadd.f32 %v3224_v3, %v2519_v17  ;;  %v15074_v9 = vrot.slane %v4722_v33, 5  ;;  %v4940_v17 = vunpack.c.l.b16 %v4711_v51  ;;  %v12607_v3 = vld [vmem:[%s14109_s11 + $0xc8] sm:$0x1]  ;;  %v13441_v51 = vld [vmem:[%s14109_s11 + $0xd0] sm:$0xff] }
 0x268   : > { %v3692_v4 = vunpack.c.l.b16 %v3604_v27  ;;  %v3138_v33 = vpack.c.b16 %v3112_v28, %v15054_v11  ;;  %v4732_v19 = vshll.u32 %v12607_v3, 16  ;;  %v4720_v11 = vrot.slane %v4719_v1, 4  ;;  %v12279_v28 = vld [vmem:[%s14109_s11 + $0xc4] sm:$0xf]  ;;  %v17538_v27 = vld [vmem:[#allocation32_spill] sm:$0xff] }
 0x269   : > { %v3927_v48 = vadd.f32 %v14987_v56, %v3349_v52  ;;  %v15082_v56 = vpop.f32.mrf.mxu2  ;;  %v4729_v47 = vor.u32 %v4728_v62, %v15074_v9  ;;  %v4966_v36 = vpack.c.b16 %v4940_v17, %v4939_v15  ;;  %4274 = vmatmul.bf16.gmra.mxu2 %v13441_v51  ;;  %v13503_v15 = vld [vmem:[#allocation9 + $0x78] sm:$0xff]  ;;  %v12608_v62 = vld [vmem:[%s14109_s11 + $0xd0] sm:$0xf]  ;;  %v2521_v17 = vadd.f32 %v17538_v27, %v14786_v25  ;;  %v12609_v3 = vld [vmem:[%s14109_s11 + $0xd4] sm:$0xf] }
 0x26a   : > { %v3717_v20 = vpack.c.b16 %v3692_v4, %v3691_v38  ;;  %v15080_v14 = vpop.f32.mrf.mxu1  ;;  %v2902_v38 = vrot.slane %v2901_v59, 4  ;;  %v2909_v59 = vshrl.u32 %v12278_v42, 16  ;;  %v2912_v5 = vshll.u32 %v12278_v42, 16  ;;  %v12365_v4 = vld [vmem:[%s14109_s11 + $0xc4] sm:$0xf]  ;;  %7356 = vmatpush.bf16.msra.mxu2 %v13503_v15 }
 0x26b   : > { %v4347_v30 = vadd.f32 %v14989_v41, %v3927_v48  ;;  %v4730_v18 = vrot.slane %v4729_v47, 4  ;;  %v4734_v48 = vrot.slane %v4732_v19, 5  ;;  %v2918_v6 = vshll.u32 %v12279_v28, 16  ;;  %v12280_v27 = vld [vmem:[%s14109_s11 + $0xc8] sm:$0x1] }
 0x26c   : > { %3849 = vmatmul.bf16.gmra.mxu1 %v3717_v20  ;;  %v2907_v7 = vsel %vm14133_vm2, %v2902_v38, %v2906_v53  ;;  %v2922_v1 = vshrl.u32 %v12279_v28, 16  ;;  %v12364_v20 = vld [vmem:[%s14109_s11 + $0xc0] sm:$0xe]  ;;  %v4725_v25 = vsel %vm14133_vm2, %v4720_v11, %v15074_v9  ;;  %v4750_v38 = vshrl.u32 %v12609_v3, 16  ;;  %v13495_v11 = vld [vmem:[#allocation9 + $0x38] sm:$0xff]  ;;  %v13466_v28 = vld [vmem:[#allocation7 + $0x210] sm:$0xff] }
 0x26d   : > { %v12396_v19 = vrot.slane %v12364_v20, 9  ;;  %v3607_v53 = vrot.slane %v12365_v4, 5  ;;  %v2911_v42 = vrot.slane %v2909_v59, 4  ;;  %v2914_v9 = vrot.slane %v2912_v5, 5  ;;  %6674 = vmatpush.bf16.msra.mxu1 %v13495_v11  ;;  %5624 = vmatpush.bf16.msrb.mxu0 %v13466_v28  ;;  %v12610_v5 = vld [vmem:[%s14109_s11 + $0xd8] sm:$0x1] }
 0x26e   : > { %v5052_v10 = vpop.f32.mrf.mxu3  ;;  %v3227_v61 = vpop.f32.mrf.mxu0  ;;  %v15119_v15 = vrot.slane %v2918_v6, 5  ;;  %v12282_v28 = vld [vmem:[%s14109_s11 + $0xd4] sm:$0xf] }
 0x26f   : > { %v15088_v41 = vadd.f32 %v5052_v10, %v4347_v30  ;;  %v3350_v52 = vadd.f32 %v3227_v61, %v2520_v63  ;;  %v15104_v30 = vunpack.c.l.b16 %v2897_v55  ;;  %v12366_v10 = vld [vmem:[%s14109_s11 + $0xc8] sm:$0x1]  ;;  %v4737_v63 = vshrl.u32 %v12608_v62, 16 }
 0x270   : > { %v3610_v55 = vrot.slane %v12366_v10, 5  ;;  %v4941_v10 = vunpack.c.l.b16 %v4725_v25  ;;  %v4756_v25 = vshll.u32 %v12610_v5, 16 }
 0x271   : > { %v3928_v35 = vadd.f32 %v15014_v58, %v3350_v52  ;;  %3266 = vmatmul.bf16.gmra.mxu0 %v3138_v33  ;;  %v4740_v33 = vshll.u32 %v12608_v62, 16  ;;  %v15113_v47 = vpop.f32.mrf.mxu2  ;;  %v2924_v62 = vrot.slane %v2922_v1, 4 }
 0x272   : > { %v15111_v34 = vpop.f32.mrf.mxu1 }
 0x273   : > { %5094 = vmatmul.bf16.gmra.mxu3 %v4966_v36  ;;  %v4348_v58 = vadd.f32 %v15017_v54, %v3928_v35  ;;  %v4735_v54 = vsel %vm14133_vm2, %v4730_v18, %v4734_v48  ;;  %v4746_v36 = vshll.u32 %v12609_v3, 16  ;;  %v3608_v18 = vsel %vm14226_vm5, %v12396_v19, %v3607_v53 }
 0x274   : > { %v3114_v48 = vunpack.c.l.b16 %v2907_v7  ;;  %v4739_v3 = vrot.slane %v4737_v63, 4  ;;  %v4742_v4 = vrot.slane %v4740_v33, 5  ;;  %v3693_v6 = vunpack.c.l.b16 %v3608_v18 }
 0x275   : > { %v15126_v20 = vrot.slane %v4746_v36, 5  ;;  %v4942_v1 = vunpack.c.l.b16 %v4735_v54  ;;  %v2925_v33 = vor.u32 %v2924_v62, %v15119_v15  ;;  %v2928_v19 = vshll.u32 %v12280_v27, 16 }
 0x276   : > { %v5055_v61 = vpop.f32.mrf.mxu3  ;;  %v3229_v51 = vpop.f32.mrf.mxu0  ;;  %v4743_v11 = vor.u32 %v4742_v4, %v4739_v3 }
 0x277   : > { %v15117_v52 = vadd.f32 %v5055_v61, %v4348_v58  ;;  %v3351_v35 = vadd.f32 %v3229_v51, %v2521_v17  ;;  %v3609_v58 = vrot.slane %v3607_v53, 4  ;;  %v4752_v17 = vrot.slane %v4750_v38, 4  ;;  %v12281_v51 = vld [vmem:[%s14109_s11 + $0xd0] sm:$0xf] }
 0x278   : > { %v2915_v61 = vor.u32 %v2914_v9, %v2911_v42  ;;  %v3139_v38 = vpack.c.b16 %v3114_v48, %v15104_v30  ;;  %v2936_v62 = vshll.u32 %v12281_v51, 16  ;;  %v4967_v27 = vpack.c.b16 %v4942_v1, %v4941_v10 }
 0x279   : > { %v3929_v59 = vadd.f32 %v15036_v32, %v3351_v35  ;;  %v3611_v7 = vsel %vm14226_vm5, %v3609_v58, %v3610_v55  ;;  %v17539_v32 = vld [vmem:[#allocation33_spill] sm:$0xff]  ;;  %v15138_v42 = vpop.f32.mrf.mxu2  ;;  %v2933_v35 = vshrl.u32 %v12281_v51, 16  ;;  %v2926_v3 = vrot.slane %v2925_v33, 4  ;;  %v13442_v58 = vld [vmem:[%s14109_s11 + $0xe0] sm:$0xff] }
 0x27a   : > { %v3694_v53 = vunpack.c.l.b16 %v3611_v7  ;;  %v2522_v36 = vadd.f32 %v17539_v32, %v14807_v12  ;;  %v15136_v54 = vpop.f32.mrf.mxu1  ;;  %v2916_v48 = vrot.slane %v2915_v61, 4  ;;  %v2930_v4 = vrot.slane %v2928_v19, 5  ;;  %4279 = vmatmul.bf16.gmra.mxu2 %v13442_v58  ;;  %v12368_v19 = vld [vmem:[%s14109_s11 + $0xd4] sm:$0xf]  ;;  %v17540_v32 = vld [vmem:[#allocation34_spill] sm:$0xff] }
 0x27b   : > { %v4349_v63 = vadd.f32 %v15038_v24, %v3929_v59  ;;  %v4753_v24 = vor.u32 %v4752_v17, %v15126_v20  ;;  %v12611_v59 = vld [vmem:[%s14109_s11 + $0xe0] sm:$0xf]  ;;  %v4744_v5 = vrot.slane %v4743_v11, 4  ;;  %v4758_v7 = vrot.slane %v4756_v25, 5  ;;  %v12367_v11 = vld [vmem:[%s14109_s11 + $0xd0] sm:$0xe] }
 0x27c   : > { %v3718_v55 = vpack.c.b16 %v3694_v53, %v3693_v6  ;;  %v2942_v17 = vshll.u32 %v12282_v28, 16  ;;  %v2946_v6 = vshrl.u32 %v12282_v28, 16  ;;  %v2935_v10 = vrot.slane %v2933_v35, 4 }
 0x27d   : > { %v2938_v1 = vrot.slane %v2936_v62, 5  ;;  %v4761_v61 = vshrl.u32 %v12611_v59, 16  ;;  %v4764_v33 = vshll.u32 %v12611_v59, 16  ;;  %v2931_v25 = vsel %vm14133_vm2, %v2926_v3, %v2930_v4 }
 0x27e   : > { %v5057_v9 = vpop.f32.mrf.mxu3  ;;  %v3232_v12 = vpop.f32.mrf.mxu0  ;;  %3854 = vmatmul.bf16.gmra.mxu1 %v3718_v55  ;;  %v2948_v55 = vrot.slane %v2946_v6, 4  ;;  %v12397_v35 = vrot.slane %v12367_v11, 9 }
 0x27f   : > { %v15142_v18 = vadd.f32 %v5057_v9, %v4349_v63  ;;  %v3352_v30 = vadd.f32 %v3232_v12, %v2522_v36  ;;  %v4754_v63 = vrot.slane %v4753_v24, 4  ;;  %v2523_v36 = vadd.f32 %v17540_v32, %v14831_v8  ;;  %v12283_v12 = vld [vmem:[%s14109_s11 + $0xd8] sm:$0x1] }
 0x280   : > { %v15160_v24 = vrot.slane %v2942_v17, 5  ;;  %v4749_v8 = vsel %vm14133_vm2, %v4744_v5, %v15126_v20  ;;  %v4763_v4 = vrot.slane %v4761_v61, 4  ;;  %v4766_v58 = vrot.slane %v4764_v33, 5 }
 0x281   : > { %v3930_v53 = vadd.f32 %v15061_v44, %v3352_v30  ;;  %3271 = vmatmul.bf16.gmra.mxu0 %v3139_v38  ;;  %v2921_v44 = vsel %vm14133_vm2, %v2916_v48, %v15119_v15  ;;  %v12612_v38 = vld [vmem:[%s14109_s11 + $0xe4] sm:$0xf]  ;;  %v15162_v28 = vpop.f32.mrf.mxu2  ;;  %v4759_v15 = vsel %vm14133_vm2, %v4754_v63, %v4758_v7  ;;  %v3614_v30 = vrot.slane %v12368_v19, 5 }
 0x282   : > { %v15158_v9 = vpop.f32.mrf.mxu1  ;;  %v4770_v6 = vshll.u32 %v12612_v38, 16  ;;  %v3115_v20 = vunpack.c.l.b16 %v2921_v44  ;;  %v2949_v5 = vor.u32 %v2948_v55, %v15160_v24  ;;  %v2952_v7 = vshll.u32 %v12283_v12, 16  ;;  %v17541_v12 = vld [vmem:[#allocation35_spill] sm:$0xff] }
 0x283   : > { %5099 = vmatmul.bf16.gmra.mxu3 %v4967_v27  ;;  %v4350_v51 = vadd.f32 %v15063_v21, %v3930_v53  ;;  %v12369_v21 = vld [vmem:[%s14109_s11 + $0xd8] sm:$0x1]  ;;  %v2939_v27 = vor.u32 %v2938_v1, %v2935_v10  ;;  %v4774_v53 = vshrl.u32 %v12612_v38, 16  ;;  %v3615_v32 = vsel %vm14226_vm5, %v12397_v35, %v3614_v30 }
 0x284   : > { %v3617_v59 = vrot.slane %v12369_v21, 5  ;;  %v3616_v63 = vrot.slane %v3614_v30, 4  ;;  %v3116_v1 = vunpack.c.l.b16 %v2931_v25  ;;  %v4943_v19 = vunpack.c.l.b16 %v4749_v8  ;;  %v12613_v21 = vld [vmem:[%s14109_s11 + $0xe8] sm:$0x1] }
 0x285   : > { %v4944_v61 = vunpack.c.l.b16 %v4759_v15  ;;  %v2940_v33 = vrot.slane %v2939_v27, 4  ;;  %v15181_v44 = vrot.slane %v4770_v6, 5  ;;  %v4776_v55 = vrot.slane %v4774_v53, 4  ;;  %v12285_v6 = vld [vmem:[%s14109_s11 + $0xe4] sm:$0xf] }
 0x286   : > { %v5060_v62 = vpop.f32.mrf.mxu3  ;;  %v3234_v3 = vpop.f32.mrf.mxu0  ;;  %v3618_v38 = vsel %vm14226_vm5, %v3616_v63, %v3617_v59  ;;  %v2524_v27 = vadd.f32 %v17541_v12, %v14852_v39  ;;  %v3140_v30 = vpack.c.b16 %v3116_v1, %v3115_v20  ;;  %v13443_v39 = vld [vmem:[%s14109_s11 + $0xf0] sm:$0xff] }
 0x287   : > { %v15171_v48 = vadd.f32 %v5060_v62, %v4350_v51  ;;  %v3353_v17 = vadd.f32 %v3234_v3, %v2523_v36  ;;  %v3695_v51 = vunpack.c.l.b16 %v3615_v32  ;;  %v4767_v36 = vor.u32 %v4766_v58, %v4763_v4 }
 0x288   : > { %v3696_v35 = vunpack.c.l.b16 %v3618_v38  ;;  %v2950_v62 = vrot.slane %v2949_v5, 4  ;;  %v4968_v59 = vpack.c.b16 %v4944_v61, %v4943_v19  ;;  %v2945_v32 = vsel %vm14133_vm2, %v2940_v33, %v15160_v24  ;;  %v12614_v24 = vld [vmem:[%s14109_s11 + $0xf0] sm:$0xf] }
 0x289   : > { %v3931_v10 = vadd.f32 %v15080_v14, %v3353_v17  ;;  %v2954_v14 = vrot.slane %v2952_v7, 5  ;;  %v15185_v8 = vpop.f32.mrf.mxu2  ;;  %v4780_v17 = vshll.u32 %v12613_v21, 16  ;;  %v4768_v5 = vrot.slane %v4767_v36, 4  ;;  %v17542_v61 = vld [vmem:[#allocation36_spill] sm:$0xff] }
 0x28a   : > { %v15183_v25 = vpop.f32.mrf.mxu1  ;;  %v3719_v3 = vpack.c.b16 %v3696_v35, %v3695_v51  ;;  %v4777_v7 = vor.u32 %v4776_v55, %v15181_v44  ;;  %4284 = vmatmul.bf16.gmra.mxu2 %v13443_v39  ;;  %v2966_v19 = vshll.u32 %v12285_v6, 16  ;;  %v2970_v51 = vshrl.u32 %v12285_v6, 16 }
 0x28b   : > { %v4351_v11 = vadd.f32 %v15082_v56, %v3931_v10  ;;  %v12284_v56 = vld [vmem:[%s14109_s11 + $0xe0] sm:$0xf]  ;;  %v2955_v20 = vsel %vm14133_vm2, %v2950_v62, %v2954_v14  ;;  %v2525_v33 = vadd.f32 %v17542_v61, %v14876_v2  ;;  %v15204_v36 = vunpack.c.l.b16 %v2945_v32  ;;  %v12615_v62 = vld [vmem:[%s14109_s11 + $0xf4] sm:$0xf] }
 0x28c   : > { %v2957_v63 = vshrl.u32 %v12284_v56, 16  ;;  %v2960_v10 = vshll.u32 %v12284_v56, 16  ;;  %v4782_v38 = vrot.slane %v4780_v17, 5  ;;  %v15208_v55 = vunpack.c.l.b16 %v2955_v20  ;;  %v12370_v14 = vld [vmem:[%s14109_s11 + $0xe0] sm:$0xe]  ;;  %v13502_v20 = vld [vmem:[#allocation9 + $0x70] sm:$0xff] }
 0x28d   : > { %v4778_v35 = vrot.slane %v4777_v7, 4  ;;  %v12398_v56 = vrot.slane %v12370_v14, 9  ;;  %v2972_v17 = vrot.slane %v2970_v51, 4  ;;  %v4788_v6 = vshll.u32 %v12614_v24, 16  ;;  %7357 = vmatpush.bf16.msra.mxu2 %v13502_v20 }
 0x28e   : > { %v5062_v15 = vpop.f32.mrf.mxu3  ;;  %v3237_v58 = vpop.f32.mrf.mxu0  ;;  %3859 = vmatmul.bf16.gmra.mxu1 %v3719_v3  ;;  %v2959_v12 = vrot.slane %v2957_v63, 4  ;;  %v2962_v2 = vrot.slane %v2960_v10, 5  ;;  %v12372_v3 = vld [vmem:[%s14109_s11 + $0xe8] sm:$0x1]  ;;  %v4798_v7 = vshrl.u32 %v12615_v62, 16 }
 0x28f   : > { %v15190_v4 = vadd.f32 %v5062_v15, %v4351_v11  ;;  %v3354_v53 = vadd.f32 %v3237_v58, %v2524_v27  ;;  %v12371_v11 = vld [vmem:[%s14109_s11 + $0xe4] sm:$0xf]  ;;  %v4785_v27 = vshrl.u32 %v12614_v24, 16  ;;  %v3624_v39 = vrot.slane %v12372_v3, 5 }
 0x290   : > { %v4783_v10 = vsel %vm14133_vm2, %v4778_v35, %v4782_v38  ;;  %v4790_v14 = vrot.slane %v4788_v6, 5  ;;  %v4800_v35 = vrot.slane %v4798_v7, 4 }
 0x291   : > { %v3932_v1 = vadd.f32 %v15111_v34, %v3354_v53  ;;  %3276 = vmatmul.bf16.gmra.mxu0 %v3140_v30  ;;  %v4773_v34 = vsel %vm14133_vm2, %v4768_v5, %v15181_v44  ;;  %v15217_v30 = vpop.f32.mrf.mxu2  ;;  %v3621_v53 = vrot.slane %v12371_v11, 5  ;;  %v4794_v5 = vshll.u32 %v12615_v62, 16 }
 0x292   : > { %v15215_v15 = vpop.f32.mrf.mxu1  ;;  %v4787_v24 = vrot.slane %v4785_v27, 4  ;;  %v4946_v38 = vunpack.c.l.b16 %v4783_v10  ;;  %v12616_v27 = vld [vmem:[%s14109_s11 + $0xf8] sm:$0x1]  ;;  %v12288_v10 = vld [vmem:[%s14109_s11 + $0xf4] sm:$0xf] }
 0x293   : > { %5104 = vmatmul.bf16.gmra.mxu3 %v4968_v59  ;;  %v4352_v21 = vadd.f32 %v15113_v47, %v3932_v1  ;;  %v12286_v47 = vld [vmem:[%s14109_s11 + $0xe8] sm:$0x1]  ;;  %v15221_v59 = vrot.slane %v2966_v19, 5  ;;  %v4945_v1 = vunpack.c.l.b16 %v4773_v34  ;;  %v3622_v61 = vsel %vm14226_vm5, %v12398_v56, %v3621_v53 }
 0x294   : > { %v2963_v19 = vor.u32 %v2962_v2, %v2959_v12  ;;  %v2976_v51 = vshll.u32 %v12286_v47, 16  ;;  %v3623_v11 = vrot.slane %v3621_v53, 4  ;;  %v3697_v3 = vunpack.c.l.b16 %v3622_v61 }
 0x295   : > { %v2973_v62 = vor.u32 %v2972_v17, %v15221_v59  ;;  %v15231_v34 = vrot.slane %v4794_v5, 5  ;;  %v3141_v17 = vpack.c.b16 %v15208_v55, %v15204_v36  ;;  %v12287_v5 = vld [vmem:[%s14109_s11 + $0xf0] sm:$0xf]  ;;  %v4791_v20 = vor.u32 %v4790_v14, %v4787_v24 }
 0x296   : > { %v5065_v58 = vpop.f32.mrf.mxu3  ;;  %v3239_v32 = vpop.f32.mrf.mxu0  ;;  %v3625_v12 = vsel %vm14226_vm5, %v3623_v11, %v3624_v39  ;;  %v2964_v6 = vrot.slane %v2963_v19, 4  ;;  %v2978_v39 = vrot.slane %v2976_v51, 5  ;;  %v4804_v36 = vshll.u32 %v12616_v27, 16  ;;  %v13444_v19 = vld [vmem:[%s14109_s11 + $0x100] sm:$0xff]  ;;  %v12374_v27 = vld [vmem:[%s14109_s11 + $0xf4] sm:$0xf] }
 0x297   : > { %v15223_v44 = vadd.f32 %v5065_v58, %v4352_v21  ;;  %v3355_v63 = vadd.f32 %v3239_v32, %v2525_v33  ;;  %v13494_v33 = vld [vmem:[#allocation9 + $0x30] sm:$0xff]  ;;  %v13465_v58 = vld [vmem:[#allocation7 + $0x208] sm:$0xff]  ;;  %v3698_v56 = vunpack.c.l.b16 %v3625_v12  ;;  %v2990_v24 = vshll.u32 %v12288_v10, 16 }
 0x298   : > { %6675 = vmatpush.bf16.msra.mxu1 %v13494_v33  ;;  %5625 = vmatpush.bf16.msrb.mxu0 %v13465_v58  ;;  %v2981_v33 = vshrl.u32 %v12287_v5, 16  ;;  %v2984_v58 = vshll.u32 %v12287_v5, 16  ;;  %v2969_v51 = vsel %vm14133_vm2, %v2964_v6, %v15221_v59  ;;  %v12617_v59 = vld [vmem:[%s14109_s11 + $0x100] sm:$0xf]  ;;  %v12373_v6 = vld [vmem:[%s14109_s11 + $0xf0] sm:$0xe] }
 0x299   : > { %v3933_v21 = vadd.f32 %v15136_v54, %v3355_v63  ;;  %v17543_v54 = vld [vmem:[#allocation37_spill] sm:$0xff]  ;;  %v15243_v32 = vpop.f32.mrf.mxu2  ;;  %v3720_v63 = vpack.c.b16 %v3698_v56, %v3697_v3  ;;  %v4792_v3 = vrot.slane %v4791_v20, 4 }
 0x29a   : > { %v2526_v47 = vadd.f32 %v17543_v54, %v14897_v29  ;;  %v15241_v53 = vpop.f32.mrf.mxu1  ;;  %v4969_v29 = vpack.c.b16 %v4946_v38, %v4945_v1  ;;  %4289 = vmatmul.bf16.gmra.mxu2 %v13444_v19  ;;  %v17544_v38 = vld [vmem:[#allocation38_spill] sm:$0xff]  ;;  %v2983_v54 = vrot.slane %v2981_v33, 4  ;;  %v12375_v20 = vld [vmem:[%s14109_s11 + $0xf8] sm:$0x1] }
 0x29b   : > { %v4353_v2 = vadd.f32 %v15138_v42, %v3933_v21  ;;  %v2974_v42 = vrot.slane %v2973_v62, 4  ;;  %v4801_v21 = vor.u32 %v4800_v35, %v15231_v34  ;;  %v2994_v62 = vshrl.u32 %v12288_v10, 16 }
 0x29c   : > { %v2527_v35 = vadd.f32 %v17544_v38, %v14923_v37 }
 0x29d   : > { %v2979_v1 = vsel %vm14133_vm2, %v2974_v42, %v2978_v39  ;;  %v4802_v12 = vrot.slane %v4801_v21, 4  ;;  %v15268_v42 = vrot.slane %v2990_v24, 5  ;;  %v2996_v37 = vrot.slane %v2994_v62, 4 }
 0x29e   : > { %v5067_v7 = vpop.f32.mrf.mxu3  ;;  %v3242_v11 = vpop.f32.mrf.mxu0  ;;  %3864 = vmatmul.bf16.gmra.mxu1 %v3720_v63  ;;  %v3120_v5 = vunpack.c.l.b16 %v2979_v1  ;;  %v12399_v63 = vrot.slane %v12373_v6, 9  ;;  %v4812_v21 = vshll.u32 %v12617_v59, 16 }
 0x29f   : > { %v15247_v61 = vadd.f32 %v5067_v7, %v4353_v2  ;;  %v3356_v55 = vadd.f32 %v3242_v11, %v2526_v47  ;;  %v4806_v2 = vrot.slane %v4804_v36, 5  ;;  %v2986_v47 = vrot.slane %v2984_v58, 5  ;;  %v12289_v11 = vld [vmem:[%s14109_s11 + $0xf8] sm:$0x1] }
 0x2a0   : > { %v3628_v36 = vrot.slane %v12374_v27, 5  ;;  %v3000_v38 = vshll.u32 %v12289_v11, 16  ;;  %v4814_v6 = vrot.slane %v4812_v21, 5 }
 0x2a1   : > { %v3934_v14 = vadd.f32 %v15158_v9, %v3356_v55  ;;  %3281 = vmatmul.bf16.gmra.mxu0 %v3141_v17  ;;  %v15262_v9 = vunpack.c.l.b16 %v2969_v51  ;;  %v12618_v17 = vld [vmem:[%s14109_s11 + $0x104] sm:$0xf]  ;;  %v15270_v39 = vpop.f32.mrf.mxu2  ;;  %v3631_v51 = vrot.slane %v12375_v20, 5  ;;  %v4807_v62 = vsel %vm14133_vm2, %v4802_v12, %v4806_v2  ;;  %v12619_v20 = vld [vmem:[%s14109_s11 + $0x108] sm:$0x1] }
 0x2a2   : > { %v15266_v7 = vpop.f32.mrf.mxu1  ;;  %v4818_v33 = vshll.u32 %v12618_v17, 16  ;;  %v4822_v58 = vshrl.u32 %v12618_v17, 16  ;;  %v3629_v1 = vsel %vm14226_vm5, %v12399_v63, %v3628_v36  ;;  %v4948_v17 = vunpack.c.l.b16 %v4807_v62 }
 0x2a3   : > { %5109 = vmatmul.bf16.gmra.mxu3 %v4969_v29  ;;  %v4354_v56 = vadd.f32 %v15162_v28, %v3934_v14  ;;  %v4797_v28 = vsel %vm14133_vm2, %v4792_v3, %v15231_v34  ;;  %v4809_v29 = vshrl.u32 %v12617_v59, 16  ;;  %v2987_v14 = vor.u32 %v2986_v47, %v2983_v54 }
 0x2a4   : > { %v4947_v34 = vunpack.c.l.b16 %v4797_v28  ;;  %v2997_v3 = vor.u32 %v2996_v37, %v15268_v42  ;;  %v3630_v59 = vrot.slane %v3628_v36, 4  ;;  %v17545_v37 = vld [vmem:[#allocation39_spill] sm:$0xff]  ;;  %v3142_v36 = vpack.c.b16 %v3120_v5, %v15262_v9  ;;  %v12290_v9 = vld [vmem:[%s14109_s11 + $0x100] sm:$0xf] }
 0x2a5   : > { %v2988_v54 = vrot.slane %v2987_v14, 4  ;;  %v2528_v63 = vadd.f32 %v17545_v37, %v14946_v45  ;;  %v12376_v37 = vld [vmem:[%s14109_s11 + $0x100] sm:$0xe] }
 0x2a6   : > { %v5070_v10 = vpop.f32.mrf.mxu3  ;;  %v3244_v19 = vpop.f32.mrf.mxu0  ;;  %v3632_v12 = vsel %vm14226_vm5, %v3630_v59, %v3631_v51  ;;  %v2998_v28 = vrot.slane %v2997_v3, 4  ;;  %v4970_v45 = vpack.c.b16 %v4948_v17, %v4947_v34  ;;  %v13445_v3 = vld [vmem:[%s14109_s11 + $0x110] sm:$0xff] }
 0x2a7   : > { %v15277_v55 = vadd.f32 %v5070_v10, %v4354_v56  ;;  %v3357_v24 = vadd.f32 %v3244_v19, %v2527_v35  ;;  %v4811_v56 = vrot.slane %v4809_v29, 4  ;;  %v3699_v10 = vunpack.c.l.b16 %v3629_v1 }
 0x2a8   : > { %v15286_v35 = vrot.slane %v4818_v33, 5  ;;  %v4824_v19 = vrot.slane %v4822_v58, 4  ;;  %v3700_v47 = vunpack.c.l.b16 %v3632_v12  ;;  %v4828_v58 = vshll.u32 %v12619_v20, 16  ;;  %v12377_v12 = vld [vmem:[%s14109_s11 + $0x104] sm:$0xf] }
 0x2a9   : > { %v3935_v27 = vadd.f32 %v15183_v25, %v3357_v24  ;;  %v3002_v25 = vrot.slane %v3000_v38, 5  ;;  %v15295_v29 = vpop.f32.mrf.mxu2  ;;  %v4815_v33 = vor.u32 %v4814_v6, %v4811_v56  ;;  %v2993_v1 = vsel %vm14133_vm2, %v2988_v54, %v15268_v42  ;;  %v12291_v38 = vld [vmem:[%s14109_s11 + $0x104] sm:$0xf]  ;;  %v12620_v56 = vld [vmem:[%s14109_s11 + $0x110] sm:$0xf] }
 0x2aa   : > { %v15293_v11 = vpop.f32.mrf.mxu1  ;;  %v4825_v62 = vor.u32 %v4824_v19, %v15286_v35  ;;  %4294 = vmatmul.bf16.gmra.mxu2 %v13445_v3  ;;  %v17546_v42 = vld [vmem:[#allocation40_spill] sm:$0xff]  ;;  %v3005_v20 = vshrl.u32 %v12290_v9, 16  ;;  %v3008_v54 = vshll.u32 %v12290_v9, 16 }
 0x2ab   : > { %v4355_v2 = vadd.f32 %v15185_v8, %v3935_v27  ;;  %v3721_v8 = vpack.c.b16 %v3700_v47, %v3699_v10  ;;  %v3003_v5 = vsel %vm14133_vm2, %v2998_v28, %v3002_v25  ;;  %v4816_v34 = vrot.slane %v4815_v33, 4  ;;  %v12621_v19 = vld [vmem:[%s14109_s11 + $0x114] sm:$0xf] }
 0x2ac   : > { %v4830_v27 = vrot.slane %v4828_v58, 5  ;;  %v2529_v6 = vadd.f32 %v17546_v42, %v14976_v31  ;;  %v15313_v10 = vunpack.c.l.b16 %v2993_v1  ;;  %v4826_v17 = vrot.slane %v4825_v62, 4 }
 0x2ad   : > { %v3014_v47 = vshll.u32 %v12291_v38, 16  ;;  %v3018_v28 = vshrl.u32 %v12291_v38, 16  ;;  %v4833_v25 = vshrl.u32 %v12620_v56, 16  ;;  %v12400_v33 = vrot.slane %v12376_v37, 9 }
 0x2ae   : > { %v5072_v21 = vpop.f32.mrf.mxu3  ;;  %v3247_v24 = vpop.f32.mrf.mxu0  ;;  %3869 = vmatmul.bf16.gmra.mxu1 %v3721_v8  ;;  %v4821_v8 = vsel %vm14133_vm2, %v4816_v34, %v15286_v35  ;;  %v4831_v1 = vsel %vm14133_vm2, %v4826_v17, %v4830_v27  ;;  %v3007_v3 = vrot.slane %v3005_v20, 4  ;;  %v3010_v38 = vrot.slane %v3008_v54, 5  ;;  %v13501_v20 = vld [vmem:[#allocation9 + $0x68] sm:$0xff]  ;;  %v12622_v54 = vld [vmem:[%s14109_s11 + $0x118] sm:$0x1] }
 0x2af   : > { %v15298_v51 = vadd.f32 %v5072_v21, %v4355_v2  ;;  %v3358_v14 = vadd.f32 %v3247_v24, %v2528_v63  ;;  %v4836_v21 = vshll.u32 %v12620_v56, 16  ;;  %v4846_v24 = vshrl.u32 %v12621_v19, 16  ;;  %7358 = vmatpush.bf16.msra.mxu2 %v13501_v20 }
 0x2b0   : > { %v3020_v34 = vrot.slane %v3018_v28, 4  ;;  %v4835_v56 = vrot.slane %v4833_v25, 4  ;;  %v3011_v28 = vor.u32 %v3010_v38, %v3007_v3  ;;  %v4852_v3 = vshll.u32 %v12622_v54, 16  ;;  %v13464_v38 = vld [vmem:[#allocation7 + $0x200] sm:$0xff] }
 0x2b1   : > { %v3936_v59 = vadd.f32 %v15215_v15, %v3358_v14  ;;  %3286 = vmatmul.bf16.gmra.mxu0 %v3142_v36  ;;  %v15318_v15 = vunpack.c.l.b16 %v3003_v5  ;;  %v15323_v31 = vpop.f32.mrf.mxu2  ;;  %v12378_v36 = vld [vmem:[%s14109_s11 + $0x108] sm:$0x1]  ;;  %v4838_v42 = vrot.slane %v4836_v21, 5  ;;  %v4848_v27 = vrot.slane %v4846_v24, 4  ;;  %v17547_v21 = vld [vmem:[#allocation41_spill] sm:$0xff] }
 0x2b2   : > { %v15321_v63 = vpop.f32.mrf.mxu1  ;;  %v3638_v9 = vrot.slane %v12378_v36, 5  ;;  %v4950_v36 = vunpack.c.l.b16 %v4831_v1  ;;  %5626 = vmatpush.bf16.msrb.mxu0 %v13464_v38  ;;  %v12624_v54 = vld [vmem:[%s14109_s11 + $0x124] sm:$0xf] }
 0x2b3   : > { %5114 = vmatmul.bf16.gmra.mxu3 %v4970_v45  ;;  %v4356_v2 = vadd.f32 %v15217_v30, %v3936_v59  ;;  %v4842_v30 = vshll.u32 %v12621_v19, 16  ;;  %v3635_v45 = vrot.slane %v12377_v12, 5  ;;  %v15333_v59 = vrot.slane %v3014_v47, 5 }
 0x2b5   : > { %v3636_v35 = vsel %vm14226_vm5, %v12400_v33, %v3635_v45  ;;  %v3637_v19 = vrot.slane %v3635_v45, 4  ;;  %v15339_v37 = vrot.slane %v4842_v30, 5  ;;  %v3021_v30 = vor.u32 %v3020_v34, %v15333_v59 }
 0x2b6   : > { %v5075_v58 = vpop.f32.mrf.mxu3  ;;  %v3249_v14 = vpop.f32.mrf.mxu0  ;;  %v3701_v17 = vunpack.c.l.b16 %v3636_v35  ;;  %v3012_v34 = vrot.slane %v3011_v28, 4 }
 0x2b7   : > { %v15329_v62 = vadd.f32 %v5075_v58, %v4356_v2  ;;  %v3359_v5 = vadd.f32 %v3249_v14, %v2529_v6  ;;  %v12292_v2 = vld [vmem:[%s14109_s11 + $0x108] sm:$0x1]  ;;  %v4949_v6 = vunpack.c.l.b16 %v4821_v8  ;;  %v3639_v47 = vsel %vm14226_vm5, %v3637_v19, %v3638_v9  ;;  %v13446_v19 = vld [vmem:[%s14109_s11 + $0x120] sm:$0xff] }
 0x2b8   : > { %v3702_v25 = vunpack.c.l.b16 %v3639_v47  ;;  %v3143_v58 = vpack.c.b16 %v15318_v15, %v15313_v10  ;;  %v3024_v24 = vshll.u32 %v12292_v2, 16  ;;  %v4839_v14 = vor.u32 %v4838_v42, %v4835_v56  ;;  %v12294_v2 = vld [vmem:[%s14109_s11 + $0x114] sm:$0xf]  ;;  %v12623_v42 = vld [vmem:[%s14109_s11 + $0x120] sm:$0xf]  ;;  %v17550_v47 = vld [vmem:[#allocation43_spill] sm:$0xff] }
 0x2b9   : > { %v3937_v12 = vadd.f32 %v15241_v53, %v3359_v5  ;;  %v2530_v53 = vadd.f32 %v17547_v21, %v15000_v22  ;;  %v15352_v45 = vpop.f32.mrf.mxu2  ;;  %v4849_v1 = vor.u32 %v4848_v27, %v15339_v37  ;;  %v4971_v15 = vpack.c.b16 %v4950_v36, %v4949_v6  ;;  %v13493_v5 = vld [vmem:[#allocation9 + $0x28] sm:$0xff] }
 0x2ba   : > { %v15350_v8 = vpop.f32.mrf.mxu1  ;;  %17549 = vst [vmem:[#allocation51_spill] sm:$0xff] %v15352_v45  ;;  %v3722_v9 = vpack.c.b16 %v3702_v25, %v3701_v17  ;;  %v3022_v20 = vrot.slane %v3021_v30, 4  ;;  %v3026_v56 = vrot.slane %v3024_v24, 5  ;;  %6676 = vmatpush.bf16.msra.mxu1 %v13493_v5  ;;  %v4840_v17 = vrot.slane %v4839_v14, 4  ;;  %4299 = vmatmul.bf16.gmra.mxu2 %v13446_v19 }
 0x2bb   : > { %v4357_v33 = vadd.f32 %v15243_v32, %v3937_v12  ;;  %17548 = vst [vmem:[#allocation19_spill] sm:$0xff] %v15350_v8  ;;  %v12293_v12 = vld [vmem:[%s14109_s11 + $0x110] sm:$0xf]  ;;  %v4850_v6 = vrot.slane %v4849_v1, 4  ;;  %v4854_v36 = vrot.slane %v4852_v3, 5  ;;  %v3038_v21 = vshll.u32 %v12294_v2, 16 }
 0x2bc   : > { %v3029_v28 = vshrl.u32 %v12293_v12, 16  ;;  %v3032_v25 = vshll.u32 %v12293_v12, 16  ;;  %v4857_v24 = vshrl.u32 %v12623_v42, 16  ;;  %v4860_v1 = vshll.u32 %v12623_v42, 16 }
 0x2bd   : > { %v4866_v3 = vshll.u32 %v12624_v54, 16  ;;  %v4855_v5 = vsel %vm14133_vm2, %v4850_v6, %v4854_v36  ;;  %v15385_v12 = vrot.slane %v3038_v21, 5 }
 0x2be   : > { %v5077_v32 = vpop.f32.mrf.mxu3  ;;  %v3252_v10 = vpop.f32.mrf.mxu0  ;;  %3874 = vmatmul.bf16.gmra.mxu1 %v3722_v9  ;;  %v4870_v9 = vshrl.u32 %v12624_v54, 16  ;;  %v3034_v19 = vrot.slane %v3032_v25, 5  ;;  %v4859_v54 = vrot.slane %v4857_v24, 4 }
 0x2bf   : > { %v15355_v22 = vadd.f32 %v5077_v32, %v4357_v33  ;;  %v3360_v35 = vadd.f32 %v3252_v10, %v2530_v53  ;;  %v2531_v33 = vadd.f32 %v17550_v47, %v15028_v13  ;;  %v12380_v53 = vld [vmem:[%s14109_s11 + $0x114] sm:$0xf]  ;;  %v12379_v32 = vld [vmem:[%s14109_s11 + $0x110] sm:$0xe]  ;;  %v12381_v10 = vld [vmem:[%s14109_s11 + $0x118] sm:$0x1] }
 0x2c0   : > { %v3642_v38 = vrot.slane %v12380_v53, 5  ;;  %v4872_v6 = vrot.slane %v4870_v9, 4 }
 0x2c1   : > { %v3938_v27 = vadd.f32 %v15266_v7, %v3360_v35  ;;  %3291 = vmatmul.bf16.gmra.mxu0 %v3143_v58  ;;  %v3017_v7 = vsel %vm14133_vm2, %v3012_v34, %v15333_v59  ;;  %v3042_v58 = vshrl.u32 %v12294_v2, 16  ;;  %v15375_v13 = vpop.f32.mrf.mxu2  ;;  %v4845_v59 = vsel %vm14133_vm2, %v4840_v17, %v15339_v37 }
 0x2c2   : > { %v15373_v14 = vpop.f32.mrf.mxu1  ;;  %v3031_v34 = vrot.slane %v3029_v28, 4  ;;  %v3645_v2 = vrot.slane %v12381_v10, 5  ;;  %v4862_v37 = vrot.slane %v4860_v1, 5  ;;  %v15392_v17 = vrot.slane %v4866_v3, 5  ;;  %v12625_v28 = vld [vmem:[%s14109_s11 + $0x128] sm:$0x1] }
 0x2c3   : > { %5119 = vmatmul.bf16.gmra.mxu3 %v4971_v15  ;;  %v15367_v30 = vadd.f32 %v15270_v39, %v3938_v27  ;;  %v12401_v15 = vrot.slane %v12379_v32, 9  ;;  %v3027_v39 = vsel %vm14133_vm2, %v3022_v20, %v3026_v56  ;;  %v3044_v27 = vrot.slane %v3042_v58, 4  ;;  %v12295_v56 = vld [vmem:[%s14109_s11 + $0x118] sm:$0x1] }
 0x2c4   : > { %v3644_v36 = vrot.slane %v3642_v38, 4  ;;  %v3123_v47 = vunpack.c.l.b16 %v3017_v7  ;;  %v3124_v53 = vunpack.c.l.b16 %v3027_v39  ;;  %v4951_v21 = vunpack.c.l.b16 %v4845_v59 }
 0x2c5   : > { %v3643_v20 = vsel %vm14226_vm5, %v12401_v15, %v3642_v38  ;;  %v4952_v32 = vunpack.c.l.b16 %v4855_v5  ;;  %v3035_v58 = vor.u32 %v3034_v19, %v3031_v34  ;;  %v3048_v24 = vshll.u32 %v12295_v56, 16  ;;  %v17553_v34 = vld [vmem:[#allocation45_spill] sm:$0xff] }
 0x2c6   : > { %v3254_v35 = vpop.f32.mrf.mxu0  ;;  %v3703_v25 = vunpack.c.l.b16 %v3643_v20  ;;  %v3045_v15 = vor.u32 %v3044_v27, %v15385_v12  ;;  %v4863_v1 = vor.u32 %v4862_v37, %v4859_v54  ;;  %v4873_v3 = vor.u32 %v4872_v6, %v15392_v17  ;;  %v13447_v27 = vld [vmem:[%s14109_s11 + $0x130] sm:$0xff] }
 0x2c7   : > { %v15387_v42 = vadd.f32 %v3254_v35, %v2531_v33  ;;  %v3646_v33 = vsel %vm14226_vm5, %v3644_v36, %v3645_v2  ;;  %v4876_v9 = vshll.u32 %v12625_v28, 16  ;;  %v3144_v7 = vpack.c.b16 %v3124_v53, %v3123_v47  ;;  %v12296_v47 = vld [vmem:[%s14109_s11 + $0x120] sm:$0xf]  ;;  %v12297_v53 = vld [vmem:[%s14109_s11 + $0x124] sm:$0xf] }
 0x2c8   : > { %v3704_v10 = vunpack.c.l.b16 %v3646_v33  ;;  %v4972_v5 = vpack.c.b16 %v4952_v32, %v4951_v21  ;;  %v3036_v2 = vrot.slane %v3035_v58, 4  ;;  %v3050_v20 = vrot.slane %v3048_v24, 5  ;;  %v12383_v28 = vld [vmem:[%s14109_s11 + $0x124] sm:$0xf]  ;;  %v12626_v32 = vld [vmem:[%s14109_s11 + $0x130] sm:$0xf] }
 0x2c9   : > { %v15399_v38 = vpop.f32.mrf.mxu2  ;;  %v3046_v54 = vrot.slane %v3045_v15, 4  ;;  %v4864_v56 = vrot.slane %v4863_v1, 4  ;;  %v4874_v37 = vrot.slane %v4873_v3, 4  ;;  %v4878_v6 = vrot.slane %v4876_v9, 5  ;;  %v12382_v33 = vld [vmem:[%s14109_s11 + $0x120] sm:$0xe] }
 0x2ca   : > { %17551 = vst [vmem:[#allocation20_spill] sm:$0xff] %v15399_v38  ;;  %v3723_v39 = vpack.c.b16 %v3704_v10, %v3703_v25  ;;  %v15401_v35 = vpop.f32.mrf.mxu1  ;;  %4304 = vmatmul.bf16.gmra.mxu2 %v13447_v27  ;;  %v3041_v21 = vsel %vm14133_vm2, %v3036_v2, %v15385_v12  ;;  %v12627_v10 = vld [vmem:[%s14109_s11 + $0x134] sm:$0xf]  ;;  %v12402_v1 = vrot.slane %v12382_v33, 9  ;;  %v3053_v3 = vshrl.u32 %v12296_v47, 16  ;;  %v17555_v2 = vld [vmem:[#allocation47_spill] sm:$0xff] }
 0x2cb   : > { %17552 = vst [vmem:[#allocation49_spill] sm:$0xff] %v15401_v35  ;;  %v3051_v58 = vsel %vm14133_vm2, %v3046_v54, %v3050_v20  ;;  %v4879_v24 = vsel %vm14133_vm2, %v4874_v37, %v4878_v6  ;;  %v3056_v9 = vshll.u32 %v12296_v47, 16  ;;  %v3062_v12 = vshll.u32 %v12297_v53, 16  ;;  %v12298_v35 = vld [vmem:[%s14109_s11 + $0x128] sm:$0x1] }
 0x2cc   : > { %v4890_v27 = vshll.u32 %v12627_v10, 16  ;;  %v4894_v54 = vshrl.u32 %v12627_v10, 16  ;;  %v3125_v37 = vunpack.c.l.b16 %v3041_v21  ;;  %v3126_v6 = vunpack.c.l.b16 %v3051_v58  ;;  %v12628_v21 = vld [vmem:[%s14109_s11 + $0x138] sm:$0x1] }
 0x2ce   : > { %v3257_v59 = vpop.f32.mrf.mxu0  ;;  %3879 = vmatmul.bf16.gmra.mxu1 %v3723_v39  ;;  %v4896_v45 = vrot.slane %v4894_v54, 4 }
 0x2cf   : > { %v3362_v19 = vadd.f32 %v3257_v59, %v17553_v34  ;;  %v3066_v59 = vshrl.u32 %v12297_v53, 16  ;;  %v4884_v34 = vshll.u32 %v12626_v32, 16  ;;  %v4954_v53 = vunpack.c.l.b16 %v4879_v24 }
 0x2d1   : > { %v3940_v36 = vadd.f32 %v15321_v63, %v3362_v19  ;;  %3296 = vmatmul.bf16.gmra.mxu0 %v3144_v7  ;;  %v4869_v63 = vsel %vm14133_vm2, %v4864_v56, %v15392_v17  ;;  %v15425_v15 = vpop.f32.mrf.mxu2  ;;  %v3649_v7 = vrot.slane %v12383_v28, 5  ;;  %v3055_v28 = vrot.slane %v3053_v3, 4 }
 0x2d2   : > { %v15431_v17 = vpop.f32.mrf.mxu1  ;;  %v4886_v10 = vrot.slane %v4884_v34, 5 }
 0x2d3   : > { %5124 = vmatmul.bf16.gmra.mxu3 %v4972_v5  ;;  %v15410_v25 = vadd.f32 %v15323_v31, %v3940_v36  ;;  %v12384_v31 = vld [vmem:[%s14109_s11 + $0x128] sm:$0x1]  ;;  %v4881_v5 = vshrl.u32 %v12626_v32, 16  ;;  %v3650_v56 = vsel %vm14226_vm5, %v12402_v1, %v3649_v7  ;;  %v4953_v36 = vunpack.c.l.b16 %v4869_v63 }
 0x2d4   : > { %v3652_v19 = vrot.slane %v12384_v31, 5  ;;  %v3651_v47 = vrot.slane %v3649_v7, 4  ;;  %v3058_v32 = vrot.slane %v3056_v9, 5  ;;  %v3705_v33 = vunpack.c.l.b16 %v3650_v56 }
 0x2d5   : > { %17554 = vst [vmem:[#allocation48_spill] sm:$0xff] %v15410_v25  ;;  %v3064_v31 = vrot.slane %v3062_v12, 5  ;;  %v4892_v25 = vrot.slane %v4890_v27, 5  ;;  %v3145_v63 = vpack.c.b16 %v3126_v6, %v3125_v37  ;;  %v4973_v3 = vpack.c.b16 %v4954_v53, %v4953_v36  ;;  %v13492_v27 = vld [vmem:[#allocation9 + $0x20] sm:$0xff] }
 0x2d6   : > { %v3259_v39 = vpop.f32.mrf.mxu0  ;;  %v3653_v38 = vsel %vm14226_vm5, %v3651_v47, %v3652_v19  ;;  %v3059_v9 = vor.u32 %v3058_v32, %v3055_v28  ;;  %v3072_v12 = vshll.u32 %v12298_v35, 16  ;;  %v4900_v47 = vshll.u32 %v12628_v21, 16  ;;  %6677 = vmatpush.bf16.msra.mxu1 %v13492_v27 }
 0x2d7   : > { %v15429_v20 = vadd.f32 %v3259_v39, %v17555_v2  ;;  %v3068_v39 = vrot.slane %v3066_v59, 4  ;;  %v4883_v2 = vrot.slane %v4881_v5, 4  ;;  %v3706_v1 = vunpack.c.l.b16 %v3653_v38  ;;  %v13500_v59 = vld [vmem:[#allocation9 + $0x60] sm:$0xff] }
 0x2d8   : > { %v17557_v5 = vld [vmem:[#allocation50_spill] sm:$0xff]  ;;  %v4897_v19 = vor.u32 %v4896_v45, %v4892_v25  ;;  %7359 = vmatpush.bf16.msra.mxu2 %v13500_v59  ;;  %v3060_v54 = vrot.slane %v3059_v9, 4  ;;  %v3074_v6 = vrot.slane %v3072_v12, 5  ;;  %v4902_v45 = vrot.slane %v4900_v47, 5  ;;  %v17560_v12 = vld [vmem:[#allocation53_spill] sm:$0xff] }
 0x2d9   : > { %17556 = vst [vmem:[#allocation21_spill] sm:$0xff] %v15429_v20  ;;  %v15439_v58 = vpop.f32.mrf.mxu2  ;;  %v3724_v7 = vpack.c.b16 %v3706_v1, %v3705_v33  ;;  %v3069_v56 = vor.u32 %v3068_v39, %v3064_v31  ;;  %v4887_v20 = vor.u32 %v4886_v10, %v4883_v2  ;;  %v17558_v33 = vld [vmem:[#allocation52_spill] sm:$0xff] }
 0x2da   : > { %v15443_v34 = vpop.f32.mrf.mxu1  ;;  %v4898_v53 = vrot.slane %v4897_v19, 4  ;;  %v12663_v19 = vld [vmem:[%s14109_s11 + $0x28] sm:$0x1] }
 0x2db   : > { %v3070_v37 = vrot.slane %v3069_v56, 4  ;;  %v4888_v36 = vrot.slane %v4887_v20, 4  ;;  %v5361_v27 = vrot.slane %v12663_v19, 5 }
 0x2dc   : > { %v4903_v20 = vsel %vm14133_vm2, %v4898_v53, %v4902_v45 }
 0x2dd   : > { %v4956_v21 = vunpack.c.l.b16 %v4903_v20 }
 0x2de   : > { %v3262_v24 = vpop.f32.mrf.mxu0  ;;  %3884 = vmatmul.bf16.gmra.mxu1 %v3724_v7 }
 0x2df   : > { %v3364_v8 = vadd.f32 %v3262_v24, %v17557_v5  ;;  %v12661_v5 = vld [vmem:[%s14109_s11 + $0x20] sm:$0xe] }
 0x2e0   : > { %v12715_v47 = vrot.slane %v12661_v5, 9  ;;  %v13491_v5 = vld [vmem:[#allocation9 + $0x18] sm:$0xff] }
 0x2e1   : > { %v3942_v38 = vadd.f32 %v15373_v14, %v3364_v8  ;;  %3301 = vmatmul.bf16.gmra.mxu0 %v3145_v63  ;;  %v4270_v28 = vpop.f32.mrf.mxu2  ;;  %v3065_v8 = vsel %vm14133_vm2, %v3060_v54, %v3064_v31  ;;  %v3075_v14 = vsel %vm14133_vm2, %v3070_v37, %v3074_v6  ;;  %v12662_v31 = vld [vmem:[%s14109_s11 + $0x24] sm:$0xf]  ;;  %6678 = vmatpush.bf16.msra.mxu1 %v13491_v5 }
 0x2e2   : > { %v3127_v2 = vunpack.c.l.b16 %v3065_v8  ;;  %v3128_v10 = vunpack.c.l.b16 %v3075_v14  ;;  %v5358_v9 = vrot.slane %v12662_v31, 5  ;;  %v12665_v14 = vld [vmem:[%s14109_s11 + $0x34] sm:$0xf]  ;;  %v13499_v31 = vld [vmem:[#allocation9 + $0x58] sm:$0xff] }
 0x2e3   : > { %5129 = vmatmul.bf16.gmra.mxu3 %v4973_v3  ;;  %v15446_v35 = vadd.f32 %v15375_v13, %v3942_v38  ;;  %v4893_v13 = vsel %vm14133_vm2, %v4888_v36, %v4892_v25  ;;  %v5365_v20 = vrot.slane %v12665_v14, 5  ;;  %7360 = vmatpush.bf16.msra.mxu2 %v13499_v31  ;;  %v12669_v14 = vld [vmem:[%s14109_s11 + $0x48] sm:$0x1] }
 0x2e4   : > { %v4955_v1 = vunpack.c.l.b16 %v4893_v13  ;;  %v3146_v7 = vpack.c.b16 %v3128_v10, %v3127_v2  ;;  %v5360_v38 = vrot.slane %v5358_v9, 4  ;;  %v5359_v36 = vsel %vm14226_vm5, %v12715_v47, %v5358_v9  ;;  %v12664_v10 = vld [vmem:[%s14109_s11 + $0x30] sm:$0xe]  ;;  %v12668_v47 = vld [vmem:[%s14109_s11 + $0x44] sm:$0xf] }
 0x2e6   : > { %v3264_v32 = vpop.f32.mrf.mxu0  ;;  %v4974_v3 = vpack.c.b16 %v4956_v21, %v4955_v1  ;;  %v5362_v53 = vsel %vm14226_vm5, %v5360_v38, %v5361_v27  ;;  %v12666_v1 = vld [vmem:[%s14109_s11 + $0x38] sm:$0x1] }
 0x2e7   : > { %v15453_v39 = vadd.f32 %v3264_v32, %v17558_v33  ;;  %v5499_v32 = vunpack.c.l.b16 %v5359_v36  ;;  %v5500_v8 = vunpack.c.l.b16 %v5362_v53  ;;  %v5372_v53 = vrot.slane %v12668_v47, 5 }
 0x2e9   : > { %v3850_v63 = vpop.f32.mrf.mxu1  ;;  %v15460_v56 = vpop.f32.mrf.mxu2 }
 0x2ea   : > { %17559 = vst [vmem:[#allocation22_spill] sm:$0xff] %v15460_v56  ;;  %v13535_v56 = vld [vmem:[#allocation9 + $0xf8] sm:$0xff] }
 0x2ee   : > { %v3267_v24 = vpop.f32.mrf.mxu0 }
 0x2ef   : > { %v3366_v59 = vadd.f32 %v3267_v24, %v17560_v12  ;;  %v5367_v24 = vrot.slane %v5365_v20, 4 }
 0x2f1   : > { %v3944_v25 = vadd.f32 %v15431_v17, %v3366_v59  ;;  %3306 = vmatmul.bf16.gmra.mxu0 %v3146_v7  ;;  %v15469_v37 = vpop.f32.mrf.mxu1  ;;  %v4275_v45 = vpop.f32.mrf.mxu2  ;;  %v12716_v7 = vrot.slane %v12664_v10, 9 }
 0x2f3   : > { %5134 = vmatmul.bf16.gmra.mxu3 %v4974_v3  ;;  %v15467_v54 = vadd.f32 %v15425_v15, %v3944_v25  ;;  %v5535_v15 = vpack.c.b16 %v5500_v8, %v5499_v32  ;;  %v12667_v8 = vld [vmem:[%s14109_s11 + $0x40] sm:$0xe] }
 0x2f6   : > { %v3269_v6 = vpop.f32.mrf.mxu0 }
 0x2f7   : > { %v15476_v17 = vadd.f32 %v3269_v6, %v14670_v26  ;;  %v5368_v26 = vrot.slane %v12666_v1, 5 }
 0x2f9   : > { %v15482_v3 = vpop.f32.mrf.mxu2 }
 0x2fa   : > { %17561 = vst [vmem:[#allocation23_spill] sm:$0xff] %v15482_v3 }
 0x2fb   : > { %v3855_v33 = vpop.f32.mrf.mxu1 }
 0x2fe   : > { %v3272_v13 = vpop.f32.mrf.mxu0 }
 0x2ff   : > { %v3368_v2 = vadd.f32 %v3272_v13, %v14690_v0  ;;  %v5366_v0 = vsel %vm14226_vm5, %v12716_v7, %v5365_v20  ;;  %v12717_v13 = vrot.slane %v12667_v8, 9  ;;  %v5374_v20 = vrot.slane %v5372_v53, 4 }
 0x300   : > { %v5501_v25 = vunpack.c.l.b16 %v5366_v0 }
 0x301   : > { %v3946_v21 = vadd.f32 %v3850_v63, %v3368_v2  ;;  %5627 = vmatmul.bf16.vlgmr.msrb.gmra.mxu0 %v5535_v15  ;;  %v5369_v63 = vsel %vm14226_vm5, %v5367_v24, %v5368_v26  ;;  %v4280_v27 = vpop.f32.mrf.mxu2  ;;  %v12671_v26 = vld [vmem:[%s14109_s11 + $0x54] sm:$0xf] }
 0x303   : > { %v15484_v9 = vadd.f32 %v4270_v28, %v3946_v21  ;;  %v15486_v12 = vpop.f32.mrf.mxu1  ;;  %v5502_v28 = vunpack.c.l.b16 %v5369_v63  ;;  %v5373_v21 = vsel %vm14226_vm5, %v12717_v13, %v5372_v53  ;;  %v5379_v63 = vrot.slane %v12671_v26, 5 }
 0x304   : > { %17563 = vst [vmem:[#allocation25_spill] sm:$0xff] %v15486_v12  ;;  %v5503_v7 = vunpack.c.l.b16 %v5373_v21  ;;  %v12674_v21 = vld [vmem:[%s14109_s11 + $0x64] sm:$0xf] }
 0x305   : > { %17562 = vst [vmem:[#allocation24_spill] sm:$0xff] %v15484_v9  ;;  %v5536_v6 = vpack.c.b16 %v5502_v28, %v5501_v25  ;;  %v12670_v25 = vld [vmem:[%s14109_s11 + $0x50] sm:$0xe]  ;;  %v12672_v28 = vld [vmem:[%s14109_s11 + $0x58] sm:$0x1]  ;;  %v5381_v53 = vrot.slane %v5379_v63, 4 }
 0x306   : > { %v3274_v59 = vpop.f32.mrf.mxu0 }
 0x307   : > { %v15493_v19 = vadd.f32 %v3274_v59, %v14713_v23  ;;  %v5375_v23 = vrot.slane %v12669_v14, 5 }
 0x309   : > { %v15507_v31 = vpop.f32.mrf.mxu2 }
 0x30a   : > { %17566 = vst [vmem:[#allocation28_spill] sm:$0xff] %v15507_v31  ;;  %v360_v31 = vld [vmem:[#allocation2 + $0x28] sm:$0x1] }
 0x30b   : > { %v3860_v38 = vpop.f32.mrf.mxu1 }
 0x30e   : > { %v3277_v36 = vpop.f32.mrf.mxu0 }
 0x30f   : > { %v3370_v32 = vadd.f32 %v3277_v36, %v14736_v43  ;;  %v5376_v43 = vsel %vm14226_vm5, %v5374_v20, %v5375_v23  ;;  %v12718_v36 = vrot.slane %v12670_v25, 9 }
 0x310   : > { %v5504_v24 = vunpack.c.l.b16 %v5376_v43 }
 0x311   : > { %v3948_v15 = vadd.f32 %v3855_v33, %v3370_v32  ;;  %5632 = vmatmul.bf16.gmra.mxu0 %v5536_v6  ;;  %v4285_v47 = vpop.f32.mrf.mxu2  ;;  %v5382_v32 = vrot.slane %v12672_v28, 5  ;;  %v5380_v14 = vsel %vm14226_vm5, %v12718_v36, %v5379_v63 }
 0x312   : > { %v5505_v20 = vunpack.c.l.b16 %v5380_v14 }
 0x313   : > { %v15499_v2 = vadd.f32 %v4275_v45, %v3948_v15  ;;  %v15501_v10 = vpop.f32.mrf.mxu1  ;;  %v5537_v45 = vpack.c.b16 %v5504_v24, %v5503_v7  ;;  %v5383_v15 = vsel %vm14226_vm5, %v5381_v53, %v5382_v32  ;;  %v5386_v24 = vrot.slane %v12674_v21, 5 }
 0x314   : > { %17565 = vst [vmem:[#allocation27_spill] sm:$0xff] %v15501_v10  ;;  %v5506_v23 = vunpack.c.l.b16 %v5383_v15 }
 0x315   : > { %17564 = vst [vmem:[#allocation26_spill] sm:$0xff] %v15499_v2  ;;  %v5388_v25 = vrot.slane %v5386_v24, 4 }
 0x316   : > { %v3279_v1 = vpop.f32.mrf.mxu0  ;;  %v5538_v43 = vpack.c.b16 %v5506_v23, %v5505_v20 }
 0x317   : > { %v15510_v33 = vadd.f32 %v3279_v1, %v14758_v60 }
 0x319   : > { %17567 = vst [vmem:[#allocation29_spill] sm:$0xff] %v15510_v33  ;;  %v15527_v1 = vpop.f32.mrf.mxu2 }
 0x31a   : > { %17571 = vst [vmem:[#allocation33_spill] sm:$0xff] %v15527_v1  ;;  %v12685_v1 = vld [vmem:[%s14109_s11 + $0xa0] sm:$0xe] }
 0x31b   : > { %v3865_v0 = vpop.f32.mrf.mxu1 }
 0x31e   : > { %v3282_v59 = vpop.f32.mrf.mxu0 }
 0x31f   : > { %v3372_v5 = vadd.f32 %v3282_v59, %v14781_v49  ;;  %v13498_v49 = vld [vmem:[#allocation9 + $0x50] sm:$0xff]  ;;  %v12675_v59 = vld [vmem:[%s14109_s11 + $0x68] sm:$0x1] }
 0x320   : > { %7361 = vmatpush.bf16.msra.mxu2 %v13498_v49  ;;  %v5389_v28 = vrot.slane %v12675_v59, 5  ;;  %v12677_v49 = vld [vmem:[%s14109_s11 + $0x74] sm:$0xf] }
 0x321   : > { %v3950_v6 = vadd.f32 %v3860_v38, %v3372_v5  ;;  %5637 = vmatmul.bf16.gmra.mxu0 %v5537_v45  ;;  %v12673_v45 = vld [vmem:[%s14109_s11 + $0x60] sm:$0xe]  ;;  %v4290_v36 = vpop.f32.mrf.mxu2  ;;  %v5393_v21 = vrot.slane %v12677_v49, 5 }
 0x322   : > { %v12719_v5 = vrot.slane %v12673_v45, 9 }
 0x323   : > { %v15516_v60 = vadd.f32 %v4280_v27, %v3950_v6  ;;  %v15525_v38 = vpop.f32.mrf.mxu1  ;;  %v13490_v27 = vld [vmem:[#allocation9 + $0x10] sm:$0xff] }
 0x324   : > { %17570 = vst [vmem:[#allocation32_spill] sm:$0xff] %v15525_v38  ;;  %6679 = vmatpush.bf16.msra.mxu1 %v13490_v27  ;;  %v5387_v32 = vsel %vm14226_vm5, %v12719_v5, %v5386_v24  ;;  %v12678_v24 = vld [vmem:[%s14109_s11 + $0x78] sm:$0x1] }
 0x325   : > { %17568 = vst [vmem:[#allocation30_spill] sm:$0xff] %v15516_v60  ;;  %v5396_v5 = vrot.slane %v12678_v24, 5  ;;  %v13489_v24 = vld [vmem:[#allocation9 + $0x8] sm:$0xff] }
 0x326   : > { %v3284_v8 = vpop.f32.mrf.mxu0 }
 0x327   : > { %v15523_v13 = vadd.f32 %v3284_v8, %v14803_v16  ;;  %v17573_v8 = vld [vmem:[#allocation54_spill] sm:$0xff] }
 0x328   : > { %6680 = vmatpush.bf16.msra.mxu1 %v13489_v24 }
 0x329   : > { %17569 = vst [vmem:[#allocation31_spill] sm:$0xff] %v15523_v13  ;;  %v15545_v27 = vpop.f32.mrf.mxu2  ;;  %v307_v13 = vld [vmem:[#allocation2 + $0x30] sm:$0x1] }
 0x32a   : > { %17576 = vst [vmem:[#allocation37_spill] sm:$0xff] %v15545_v27  ;;  %v12679_v27 = vld [vmem:[%s14109_s11 + $0x80] sm:$0xe] }
 0x32b   : > { %v3870_v63 = vpop.f32.mrf.mxu1 }
 0x32e   : > { %v3287_v7 = vpop.f32.mrf.mxu0 }
 0x32f   : > { %v3374_v26 = vadd.f32 %v3287_v7, %v14826_v57  ;;  %v5390_v57 = vsel %vm14226_vm5, %v5388_v25, %v5389_v28  ;;  %v15552_v28 = vpop.f32.mrf.mxu3 }
 0x330   : > { %v5508_v15 = vunpack.c.l.b16 %v5390_v57 }
 0x331   : > { %v3952_v16 = vadd.f32 %v3865_v0, %v3374_v26  ;;  %5642 = vmatmul.bf16.gmra.mxu0 %v5538_v43  ;;  %v5507_v0 = vunpack.c.l.b16 %v5387_v32  ;;  %v17577_v43 = vld [vmem:[#allocation14_spill] sm:$0xff]  ;;  %v12676_v26 = vld [vmem:[%s14109_s11 + $0x70] sm:$0xe] }
 0x332   : > { %v12720_v59 = vrot.slane %v12676_v26, 9 }
 0x333   : > { %v15533_v6 = vadd.f32 %v4285_v47, %v3952_v16  ;;  %v15543_v20 = vpop.f32.mrf.mxu1  ;;  %v5539_v23 = vpack.c.b16 %v5508_v15, %v5507_v0  ;;  %v5395_v16 = vrot.slane %v5393_v21, 4  ;;  %v4295_v15 = vpop.f32.mrf.mxu2 }
 0x334   : > { %17575 = vst [vmem:[#allocation36_spill] sm:$0xff] %v15543_v20  ;;  %v5394_v57 = vsel %vm14226_vm5, %v12720_v59, %v5393_v21  ;;  %v17581_v21 = vld [vmem:[#allocation44_spill] sm:$0xff] }
 0x335   : > { %17572 = vst [vmem:[#allocation34_spill] sm:$0xff] %v15533_v6  ;;  %v5509_v49 = vunpack.c.l.b16 %v5394_v57  ;;  %v12721_v57 = vrot.slane %v12679_v27, 9  ;;  %v12687_v6 = vld [vmem:[%s14109_s11 + $0xa8] sm:$0x1] }
 0x336   : > { %v3289_v53 = vpop.f32.mrf.mxu0 }
 0x337   : > { %v15540_v14 = vadd.f32 %v3289_v53, %v17573_v8  ;;  %v5397_v8 = vsel %vm14226_vm5, %v5395_v16, %v5396_v5 }
 0x339   : > { %17574 = vst [vmem:[#allocation35_spill] sm:$0xff] %v15540_v14  ;;  %v12693_v14 = vld [vmem:[%s14109_s11 + $0xc8] sm:$0x1] }
 0x33b   : > { %v3875_v32 = vpop.f32.mrf.mxu1 }
 0x33e   : > { %v3292_v47 = vpop.f32.mrf.mxu0 }
 0x33f   : > { %v3376_v7 = vadd.f32 %v3292_v47, %v17577_v43  ;;  %v12680_v47 = vld [vmem:[%s14109_s11 + $0x84] sm:$0xf] }
 0x340   : > { %v5400_v26 = vrot.slane %v12680_v47, 5 }
 0x341   : > { %v3954_v45 = vadd.f32 %v3870_v63, %v3376_v7  ;;  %5647 = vmatmul.bf16.gmra.mxu0 %v5539_v23  ;;  %v17579_v63 = vld [vmem:[#allocation15_spill] sm:$0xff]  ;;  %v5510_v23 = vunpack.c.l.b16 %v5397_v8 }
 0x342   : > { %v5402_v8 = vrot.slane %v5400_v26, 4 }
 0x343   : > { %v15550_v25 = vadd.f32 %v4290_v36, %v3954_v45  ;;  %v13497_v36 = vld [vmem:[#allocation9 + $0x48] sm:$0xff]  ;;  %v5540_v43 = vpack.c.b16 %v5510_v23, %v5509_v49  ;;  %v15562_v45 = vpop.f32.mrf.mxu3  ;;  %v15567_v16 = vpop.f32.mrf.mxu1 }
 0x344   : > { %7362 = vmatpush.bf16.msra.mxu2 %v13497_v36  ;;  %17582 = vst [vmem:[#allocation40_spill] sm:$0xff] %v15567_v16  ;;  %v5401_v36 = vsel %vm14226_vm5, %v12721_v57, %v5400_v26  ;;  %v298_v26 = vld [vmem:[#allocation2] sm:$0x1]  ;;  %v17587_v57 = vld [vmem:[#allocation16_spill] sm:$0xff] }
 0x345   : > { %17578 = vst [vmem:[#allocation38_spill] sm:$0xff] %v15550_v25  ;;  %v12681_v25 = vld [vmem:[%s14109_s11 + $0x88] sm:$0x1] }
 0x346   : > { %v3294_v53 = vpop.f32.mrf.mxu0 }
 0x347   : > { %v15559_v0 = vadd.f32 %v3294_v53, %v17579_v63  ;;  %v15569_v53 = vpop.f32.mrf.mxu2  ;;  %v5403_v63 = vrot.slane %v12681_v25, 5  ;;  %v12683_v25 = vld [vmem:[%s14109_s11 + $0x94] sm:$0xf] }
 0x348   : > { %17583 = vst [vmem:[#allocation41_spill] sm:$0xff] %v15569_v53  ;;  %v5407_v53 = vrot.slane %v12683_v25, 5 }
 0x349   : > { %17580 = vst [vmem:[#allocation39_spill] sm:$0xff] %v15559_v0  ;;  %v5404_v47 = vsel %vm14226_vm5, %v5402_v8, %v5403_v63  ;;  %v12682_v8 = vld [vmem:[%s14109_s11 + $0x90] sm:$0xe]  ;;  %v12684_v63 = vld [vmem:[%s14109_s11 + $0x98] sm:$0x1] }
 0x34a   : > { %v5512_v27 = vunpack.c.l.b16 %v5404_v47  ;;  %v17595_v0 = vld [vmem:[#allocation17_spill] sm:$0xff] }
 0x34e   : > { %v3297_v7 = vpop.f32.mrf.mxu0 }
 0x34f   : > { %v3378_v59 = vadd.f32 %v3297_v7, %v17581_v21  ;;  %v17585_v7 = vld [vmem:[#allocation46_spill] sm:$0xff]  ;;  %v3880_v21 = vpop.f32.mrf.mxu1 }
 0x351   : > { %v3956_v5 = vadd.f32 %v3875_v32, %v3378_v59  ;;  %5652 = vmatmul.bf16.gmra.mxu0 %v5540_v43  ;;  %v15580_v32 = vpop.f32.mrf.mxu3  ;;  %v5511_v43 = vunpack.c.l.b16 %v5401_v36  ;;  %v299_v36 = vsel %vm15588_vm8, 0, %v298_v26 }
 0x352   : > { %300 = vst [vmem:[#allocation2] sm:$0x1] %v299_v36 }
 0x353   : > { %v15571_v49 = vadd.f32 %v4295_v15, %v3956_v5  ;;  %v4300_v15 = vpop.f32.mrf.mxu2  ;;  %v5541_v59 = vpack.c.b16 %v5512_v27, %v5511_v43  ;;  %v5409_v43 = vrot.slane %v5407_v53, 4  ;;  %v5410_v27 = vrot.slane %v12684_v63, 5 }
 0x355   : > { %17584 = vst [vmem:[#allocation43_spill] sm:$0xff] %v15571_v49 }
 0x356   : > { %v3299_v23 = vpop.f32.mrf.mxu0 }
 0x357   : > { %v15578_v24 = vadd.f32 %v3299_v23, %v17585_v7  ;;  %v12722_v7 = vrot.slane %v12682_v8, 9 }
 0x359   : > { %17586 = vst [vmem:[#allocation45_spill] sm:$0xff] %v15578_v24  ;;  %v15594_v25 = vpop.f32.mrf.mxu3 }
 0x35b   : > { %v15600_v24 = vpop.f32.mrf.mxu2 }
 0x35c   : > { %17592 = vst [vmem:[#allocation52_spill] sm:$0xff] %v15600_v24 }
 0x35e   : > { %v3302_v5 = vpop.f32.mrf.mxu0 }
 0x35f   : > { %v3380_v49 = vadd.f32 %v3302_v5, %v17587_v57  ;;  %v15598_v57 = vpop.f32.mrf.mxu1 }
 0x360   : > { %17591 = vst [vmem:[#allocation50_spill] sm:$0xff] %v15598_v57 }
 0x361   : > { %v3958_v47 = vadd.f32 %v3880_v21, %v3380_v49  ;;  %5657 = vmatmul.bf16.gmra.mxu0 %v5541_v59  ;;  %v5408_v49 = vsel %vm14226_vm5, %v12722_v7, %v5407_v53  ;;  %v5411_v21 = vsel %vm14226_vm5, %v5409_v43, %v5410_v27  ;;  %v17593_v59 = vld [vmem:[#allocation42_spill] sm:$0xff]  ;;  %v15610_v36 = vpop.f32.mrf.mxu3  ;;  %v12723_v43 = vrot.slane %v12685_v1, 9 }
 0x362   : > { %v5513_v8 = vunpack.c.l.b16 %v5408_v49  ;;  %v5514_v63 = vunpack.c.l.b16 %v5411_v21  ;;  %v5417_v27 = vrot.slane %v12687_v6, 5 }
 0x363   : > { %v15596_v5 = vadd.f32 %v4300_v15, %v3958_v47  ;;  %v12686_v15 = vld [vmem:[%s14109_s11 + $0xa4] sm:$0xf]  ;;  %v4305_v53 = vpop.f32.mrf.mxu2 }
 0x364   : > { %v5542_v47 = vpack.c.b16 %v5514_v63, %v5513_v8  ;;  %v5414_v20 = vrot.slane %v12686_v15, 5  ;;  %v17599_v8 = vld [vmem:[#allocation18_spill] sm:$0xff] }
 0x365   : > { %17590 = vst [vmem:[#allocation47_spill] sm:$0xff] %v15596_v5 }
 0x366   : > { %v3304_v16 = vpop.f32.mrf.mxu0  ;;  %v5415_v1 = vsel %vm14226_vm5, %v12723_v43, %v5414_v20  ;;  %v15640_v43 = vld [vmem:[%s17442_s2] ss:$0 sm:$0xff] }
 0x367   : > { %v15607_v26 = vadd.f32 %v3304_v16, %v17593_v59  ;;  %v3885_v57 = vpop.f32.mrf.mxu1  ;;  %v5416_v16 = vrot.slane %v5414_v20, 4  ;;  %v354_v59 = vld [vmem:[#allocation2 + $0x8] sm:$0x1]  ;;  %v5515_v15 = vunpack.c.l.b16 %v5415_v1 }
 0x369   : > { %17594 = vst [vmem:[#allocation53_spill] sm:$0xff] %v15607_v26  ;;  %v5418_v6 = vsel %vm14226_vm5, %v5416_v16, %v5417_v27  ;;  %v13509_v27 = vld [vmem:[#allocation9 + $0xa8] sm:$0xff]  ;;  %v357_v26 = vld [vmem:[#allocation2 + $0x18] sm:$0x1] }
 0x36e   : > { %v3307_v5 = vpop.f32.mrf.mxu0 }
 0x36f   : > { %v3382_v24 = vadd.f32 %v3307_v5, %v17595_v0  ;;  %v355_v0 = vsel %vm15619_vm10, 0, %v354_v59  ;;  %v13511_v5 = vld [vmem:[#allocation9 + $0xb8] sm:$0xff]  ;;  %v12689_v59 = vld [vmem:[%s14109_s11 + $0xb4] sm:$0xf] }
 0x370   : > { %356 = vst [vmem:[#allocation2 + $0x8] sm:$0x1] %v355_v0  ;;  %7878 = vmatpush.bf16.msrb.mxu3 %v13511_v5  ;;  %v12688_v5 = vld [vmem:[%s14109_s11 + $0xb0] sm:$0xe] }
 0x371   : > { %v3960_v7 = vadd.f32 %v3885_v57, %v3382_v24  ;;  %5662 = vmatmul.bf16.gmra.mxu0 %v5542_v47  ;;  %v15629_v57 = vpop.f32.mrf.mxu3  ;;  %v5516_v47 = vunpack.c.l.b16 %v5418_v6  ;;  %v12690_v6 = vld [vmem:[%s14109_s11 + $0xb8] sm:$0x1] }
 0x373   : > { %v15615_v49 = vadd.f32 %v4305_v53, %v3960_v7  ;;  %v13510_v53 = vld [vmem:[#allocation9 + $0xb0] sm:$0xff]  ;;  %v5543_v16 = vpack.c.b16 %v5516_v47, %v5515_v15  ;;  %v5424_v15 = vrot.slane %v12690_v6, 5  ;;  %v358_v47 = vsel %vm15619_vm10, 0, %v357_v26  ;;  %v304_v6 = vld [vmem:[#allocation2 + $0x20] sm:$0x1] }
 0x374   : > { %v301_v7 = vld [vmem:[#allocation2 + $0x10] sm:$0x1]  ;;  %7879 = vmatpush.bf16.msrb.mxu3 %v13510_v53  ;;  %359 = vst [vmem:[#allocation2 + $0x18] sm:$0x1] %v358_v47 }
 0x375   : > { %17596 = vst [vmem:[#allocation54_spill] sm:$0xff] %v15615_v49  ;;  %v302_v20 = vsel %vm15588_vm8, 0, %v301_v7  ;;  %v13496_v7 = vld [vmem:[#allocation9 + $0x40] sm:$0xff] }
 0x376   : > { %v3309_v24 = vpop.f32.mrf.mxu0  ;;  %303 = vst [vmem:[#allocation2 + $0x10] sm:$0x1] %v302_v20  ;;  %v13488_v49 = vld [vmem:[#allocation9] sm:$0xff]  ;;  %7363 = vmatpush.bf16.msra.mxu2 %v13496_v7 }
 0x377   : > { %v15632_v63 = vadd.f32 %v3309_v24, %v17599_v8  ;;  %v5421_v24 = vrot.slane %v12689_v59, 5  ;;  %v13508_v20 = vld [vmem:[#allocation9 + $0xa0] sm:$0xff]  ;;  %6681 = vmatpush.bf16.msra.mxu1 %v13488_v49  ;;  %v305_v49 = vsel %vm15588_vm8, 0, %v304_v6  ;;  %v13505_v6 = vld [vmem:[#allocation9 + $0x88] sm:$0xff] }
 0x378   : > { %7880 = vmatpush.bf16.msrb.mxu3 %v13509_v27  ;;  %v13507_v27 = vld [vmem:[#allocation9 + $0x98] sm:$0xff]  ;;  %v12692_v7 = vld [vmem:[%s14109_s11 + $0xc4] sm:$0xf]  ;;  %306 = vst [vmem:[#allocation2 + $0x20] sm:$0x1] %v305_v49 }
 0x379   : > { %17600 = vst [vmem:[#allocation14_spill] sm:$0xff] %v15632_v63  ;;  %v15645_v8 = vpop.f32.mrf.mxu3  ;;  %v12724_v63 = vrot.slane %v12688_v5, 9  ;;  %v5423_v38 = vrot.slane %v5421_v24, 4 }
 0x37b   : > { %v5425_v5 = vsel %vm14226_vm5, %v5423_v38, %v5424_v15  ;;  %v13506_v38 = vld [vmem:[#allocation9 + $0x90] sm:$0xff]  ;;  %8257 = vmatpush.bf16.msrb.mxu1 %v13535_v56 }
 0x37c   : > { %7881 = vmatpush.bf16.msrb.mxu3 %v13508_v20 }
 0x37e   : > { %v5628_v0 = vpop.f32.mrf.mxu0 }
 0x37f   : > { %v5754_v1 = vadd.f32 %v5628_v0, %v15066_v40 }
 0x380   : > { %7882 = vmatpush.bf16.msrb.mxu3 %v13507_v27 }
 0x381   : > { %v5865_v53 = vadd.f32 %v15640_v43, %v5754_v1  ;;  %5667 = vmatmul.bf16.gmra.mxu0 %v5543_v16  ;;  %v5422_v16 = vsel %vm14226_vm5, %v12724_v63, %v5421_v24  ;;  %v5518_v24 = vunpack.c.l.b16 %v5425_v5 }
 0x383   : > { %v5901_v59 = vmax.f32 %v5865_v53, 0.0  ;;  %v5517_v53 = vunpack.c.l.b16 %v5422_v16 }
 0x384   : > { %7883 = vmatpush.bf16.msrb.mxu3 %v13506_v38 }
 0x385   : > { %v5937_v40 = vpack.c.bf16 %v5901_v59, %v5901_v59  ;;  %v15664_v59 = vpop.f32.mrf.mxu3  ;;  %v5544_v5 = vpack.c.b16 %v5518_v24, %v5517_v53 }
 0x386   : > { %v5630_v0 = vpop.f32.mrf.mxu0 }
 0x387   : > { %v5976_v1 = vshrl.u32 %v5937_v40, 16  ;;  %v5755_v26 = vadd.f32 %v5630_v0, %v15088_v41  ;;  %v5979_v20 = vshll.u32 %v5937_v40, 16  ;;  %v6337_v41 = vld [vmem:[#allocation2] sm:$0xf]  ;;  %v5428_v0 = vrot.slane %v12692_v7, 5 }
 0x388   : > { %7884 = vmatpush.bf16.msrb.mxu3 %v13505_v6 }
 0x389   : > { %v5978_v47 = vrot.slane %v5976_v1, 7  ;;  %v5866_v63 = vadd.f32 %v15640_v43, %v5755_v26  ;;  %v12691_v26 = vld [vmem:[%s14109_s11 + $0xc0] sm:$0xe] }
 0x38a   : > { %v12725_v7 = vrot.slane %v12691_v26, 9 }
 0x38b   : > { %v5981_v16 = vor.u32 %v5979_v20, %v5978_v47  ;;  %v5902_v27 = vmax.f32 %v5866_v63, 0.0  ;;  %v361_v20 = vsel %vm15619_vm10, 0, %v360_v31  ;;  %v5430_v63 = vrot.slane %v5428_v0, 4 }
 0x38c   : > { %362 = vst [vmem:[#allocation2 + $0x28] sm:$0x1] %v361_v20 }
 0x38d   : > { %v6338_v40 = vsel %vm15660_vm12, %v5981_v16, %v6337_v41  ;;  %v5938_v1 = vpack.c.bf16 %v5902_v27, %v5902_v27  ;;  %v5431_v41 = vrot.slane %v12693_v14, 5  ;;  %v13504_v16 = vld [vmem:[#allocation9 + $0x80] sm:$0xff] }
 0x38e   : > { %6339 = vst [vmem:[#allocation2] sm:$0xf] %v6338_v40  ;;  %v5633_v49 = vpop.f32.mrf.mxu0  ;;  %v5982_v40 = vrot.slane %v5978_v47, 4  ;;  %7885 = vmatpush.bf16.msrb.mxu3 %v13504_v16 }
 0x38f   : > { %v5984_v60 = vshrl.u32 %v5938_v1, 16  ;;  %v5756_v10 = vadd.f32 %v5633_v49, %v15117_v52  ;;  %v5987_v53 = vshll.u32 %v5938_v1, 16  ;;  %v6341_v52 = vld [vmem:[#allocation2 + $0x8] sm:$0x1]  ;;  %v12695_v1 = vld [vmem:[%s14109_s11 + $0xd4] sm:$0xf]  ;;  %v5432_v20 = vsel %vm14226_vm5, %v5430_v63, %v5431_v41 }
 0x390   : > { %v5435_v16 = vrot.slane %v12695_v1, 5 }
 0x391   : > { %v5986_v38 = vrot.slane %v5984_v60, 7  ;;  %v5867_v24 = vadd.f32 %v15640_v43, %v5756_v10  ;;  %5672 = vmatmul.bf16.gmra.mxu0 %v5544_v5  ;;  %v5429_v60 = vsel %vm14226_vm5, %v12725_v7, %v5428_v0  ;;  %v15682_v10 = vpop.f32.mrf.mxu3 }
 0x392   : > { %17605 = vst [vmem:[#allocation15_spill] sm:$0xff] %v15682_v10 }
 0x393   : > { %v5989_v31 = vor.u32 %v5987_v53, %v5986_v38  ;;  %v5991_v26 = vrot.slane %v5986_v38, 4  ;;  %v5903_v49 = vmax.f32 %v5867_v24, 0.0  ;;  %v12694_v24 = vld [vmem:[%s14109_s11 + $0xd0] sm:$0xe] }
 0x394   : > { %v12726_v1 = vrot.slane %v12694_v24, 9 }
 0x395   : > { %v6467_v14 = vld [vmem:[#allocation2] sm:$0xf]  ;;  %v5990_v5 = vsel %vm15675_vm14, %v5982_v40, %v5989_v31  ;;  %v6342_v6 = vsel %vm15588_vm8, %v5991_v26, %v6341_v52  ;;  %v5939_v47 = vpack.c.bf16 %v5903_v49, %v5903_v49  ;;  %v5519_v40 = vunpack.c.l.b16 %v5429_v60  ;;  %v12696_v52 = vld [vmem:[%s14109_s11 + $0xd8] sm:$0x1] }
 0x396   : > { %v6468_v38 = vsel %vm15660_vm12, 0, %v6467_v14  ;;  %6340 = vst [vmem:[#allocation2 + $0x4] sm:$0xf] %v5990_v5  ;;  %v5635_v0 = vpop.f32.mrf.mxu0  ;;  %v5520_v31 = vunpack.c.l.b16 %v5432_v20  ;;  %v17448_v26 = vmov 0   ;;  %v308_v14 = vsel %vm15588_vm8, 0, %v307_v13 }
 0x397   : > { %6469 = vst [vmem:[#allocation2] sm:$0xf] %v6468_v38  ;;  %v5993_v7 = vshrl.u32 %v5939_v47, 16  ;;  %v5757_v53 = vadd.f32 %v5635_v0, %v15142_v18  ;;  %v5996_v41 = vshll.u32 %v5939_v47, 16  ;;  %v6344_v5 = vld [vmem:[#allocation2 + $0x10] sm:$0xf] }
 0x398   : > { %6343 = vst [vmem:[#allocation2 + $0x8] sm:$0x1] %v6342_v6  ;;  %v5437_v6 = vrot.slane %v5435_v16, 4  ;;  %v5438_v60 = vrot.slane %v12696_v52, 5  ;;  %v5545_v3 = vpack.c.b16 %v5520_v31, %v5519_v40  ;;  %v6348_v52 = vld [vmem:[#allocation2 + $0x18] sm:$0x1]  ;;  %v15708_v40 = vsel %vm14226_vm5, %v12726_v1, %v5435_v16 }
 0x399   : > { %6470 = vst [vmem:[#allocation2 + $0x4] sm:$0xf] %v17448_v26  ;;  %v5995_v63 = vrot.slane %v5993_v7, 7  ;;  %v5868_v49 = vadd.f32 %v15640_v43, %v5757_v53  ;;  %v15701_v47 = vpop.f32.mrf.mxu3 }
 0x39a   : > { %309 = vst [vmem:[#allocation2 + $0x30] sm:$0x1] %v308_v14  ;;  %v15712_v31 = vsel %vm14226_vm5, %v5437_v6, %v5438_v60  ;;  %v363_v6 = vld [vmem:[#allocation2 + $0x38] sm:$0x1] }
 0x39b   : > { %v5998_v18 = vor.u32 %v5996_v41, %v5995_v63  ;;  %v5904_v38 = vmax.f32 %v5868_v49, 0.0  ;;  %17606 = vst [vmem:[#allocation44_spill] sm:$0xff] %v15701_v47  ;;  %v13543_v41 = vld [vmem:[#allocation9 + $0x138] sm:$0xff]  ;;  %v5999_v16 = vrot.slane %v5995_v63, 4 }
 0x39c   : > { %9003 = vmatpush.bf16.msrb.mxu2 %v13543_v41 }
 0x39d   : > { %v6345_v20 = vsel %vm15660_vm12, %v5998_v18, %v6344_v5  ;;  %v5940_v0 = vpack.c.bf16 %v5904_v38, %v5904_v38 }
 0x39e   : > { %6346 = vst [vmem:[#allocation2 + $0x10] sm:$0xf] %v6345_v20  ;;  %v5638_v7 = vpop.f32.mrf.mxu0  ;;  %v7541_v2 = vld [vmem:[#allocation2] sm:$0xe] }
 0x39f   : > { %v6471_v53 = vld [vmem:[#allocation2 + $0x8] sm:$0x1]  ;;  %v6001_v26 = vshrl.u32 %v5940_v0, 16  ;;  %v5758_v13 = vadd.f32 %v5638_v7, %v15171_v48  ;;  %v6795_v14 = vld [vmem:[#allocation2] sm:$0xf]  ;;  %v6004_v18 = vshll.u32 %v5940_v0, 16 }
 0x3a0   : > { %v6472_v24 = vsel %vm15588_vm8, 0, %v6471_v53  ;;  %v13472_v49 = vld [vmem:[#allocation2] sm:$0xff]  ;;  %v6844_v7 = vshrl.u32 %v6795_v14, 16  ;;  %v6847_v53 = vshll.u32 %v6795_v14, 16  ;;  %v12893_v60 = vrot.slane %v7541_v2, 9 }
 0x3a1   : > { %v7542_v12 = vld [vmem:[#allocation2 + $0x4] sm:$0xf]  ;;  %6473 = vst [vmem:[#allocation2 + $0x8] sm:$0x1] %v6472_v24  ;;  %v6003_v48 = vrot.slane %v6001_v26, 7  ;;  %v5869_v38 = vadd.f32 %v15640_v43, %v5758_v13  ;;  %5677 = vmatmul.bf16.gmra.mxu0 %v5545_v3  ;;  %6682 = vmatmul.bf16.vlgmr.msra.gmra.mxu1 %v13472_v49  ;;  %v364_v2 = vsel %vm15619_vm10, 0, %v363_v6 }
 0x3a2   : > { %v6796_v5 = vld [vmem:[#allocation2 + $0x4] sm:$0xf]  ;;  %v7639_v20 = vrot.slane %v7542_v12, 5  ;;  %v6846_v26 = vrot.slane %v6844_v7, 4  ;;  %v6849_v0 = vrot.slane %v6847_v53, 5  ;;  %v5522_v7 = vunpack.c.l.b16 %v15712_v31 }
 0x3a3   : > { %v6853_v33 = vshll.u32 %v6796_v5, 16  ;;  %v6857_v47 = vshrl.u32 %v6796_v5, 16  ;;  %v6006_v1 = vor.u32 %v6004_v18, %v6003_v48  ;;  %v6008_v10 = vrot.slane %v6003_v48, 4  ;;  %365 = vst [vmem:[#allocation2 + $0x38] sm:$0x1] %v364_v2 }
 0x3a4   : > { %v5905_v9 = vmax.f32 %v5869_v38, 0.0  ;;  %v7641_v24 = vrot.slane %v7639_v20, 4  ;;  %v6850_v63 = vor.u32 %v6849_v0, %v6846_v26  ;;  %v5521_v5 = vunpack.c.l.b16 %v15708_v40 }
 0x3a5   : > { %v6007_v3 = vsel %vm15675_vm14, %v5999_v16, %v6006_v1  ;;  %v6349_v12 = vsel %vm15588_vm8, %v6008_v10, %v6348_v52  ;;  %v6855_v14 = vrot.slane %v6853_v33, 5  ;;  %v6859_v49 = vrot.slane %v6857_v47, 4  ;;  %v6798_v48 = vld [vmem:[#allocation2 + $0x10] sm:$0xf]  ;;  %v310_v10 = vld [vmem:[#allocation2 + $0x40] sm:$0x1]  ;;  %v15728_v1 = vpop.f32.mrf.mxu3 }
 0x3a6   : > { %v5941_v13 = vpack.c.bf16 %v5905_v9, %v5905_v9  ;;  %6347 = vst [vmem:[#allocation2 + $0x14] sm:$0xf] %v6007_v3  ;;  %v5640_v41 = vpop.f32.mrf.mxu0  ;;  %v6351_v9 = vld [vmem:[#allocation2 + $0x20] sm:$0xf]  ;;  %v7640_v52 = vsel %vm14226_vm5, %v12893_v60, %v7639_v20  ;;  %v6851_v53 = vrot.slane %v6850_v63, 4  ;;  %v311_v16 = vsel %vm15588_vm8, 0, %v310_v10 }
 0x3a7   : > { %6350 = vst [vmem:[#allocation2 + $0x18] sm:$0x1] %v6349_v12  ;;  %v5759_v38 = vadd.f32 %v5640_v41, %v15190_v4  ;;  %v6860_v40 = vor.u32 %v6859_v49, %v6855_v14  ;;  %v6868_v3 = vshrl.u32 %v6798_v48, 16  ;;  %v6871_v12 = vshll.u32 %v6798_v48, 16 }
 0x3a8   : > { %v6010_v56 = vshrl.u32 %v5941_v13, 16  ;;  %v6013_v18 = vshll.u32 %v5941_v13, 16  ;;  %v7543_v33 = vld [vmem:[#allocation2 + $0x8] sm:$0x1]  ;;  %17607 = vst [vmem:[#allocation46_spill] sm:$0xff] %v15728_v1  ;;  %v7766_v41 = vunpack.c.l.b16 %v7640_v52  ;;  %v6856_v49 = vsel %vm14133_vm2, %v6851_v53, %v6855_v14 }
 0x3a9   : > { %v6797_v47 = vld [vmem:[#allocation2 + $0x8] sm:$0x1]  ;;  %v5870_v4 = vadd.f32 %v15640_v43, %v5759_v38  ;;  %v7642_v26 = vrot.slane %v7543_v33, 5  ;;  %v6861_v0 = vrot.slane %v6860_v40, 4  ;;  %312 = vst [vmem:[#allocation2 + $0x40] sm:$0x1] %v311_v16 }
 0x3aa   : > { %v15730_v6 = vrot.slane %v6010_v56, 7  ;;  %v6863_v31 = vshll.u32 %v6797_v47, 16  ;;  %v7544_v38 = vld [vmem:[#allocation2 + $0x10] sm:$0xe]  ;;  %v6870_v10 = vrot.slane %v6868_v3, 4  ;;  %v5546_v47 = vpack.c.b16 %v5522_v7, %v5521_v5 }
 0x3ab   : > { %v5906_v60 = vmax.f32 %v5870_v4, 0.0  ;;  %v7643_v13 = vsel %vm14226_vm5, %v7641_v24, %v7642_v26  ;;  %v6873_v16 = vrot.slane %v6871_v12, 5  ;;  %v12894_v7 = vrot.slane %v7544_v38, 9 }
 0x3ac   : > { %v6015_v20 = vor.u32 %v6013_v18, %v15730_v6  ;;  %v7767_v63 = vunpack.c.l.b16 %v7643_v13  ;;  %v6865_v56 = vrot.slane %v6863_v31, 5 }
 0x3ad   : > { %v5942_v33 = vpack.c.bf16 %v5906_v60, %v5906_v60  ;;  %v13473_v48 = vld [vmem:[#allocation2 + $0x10] sm:$0xff]  ;;  %v15748_v38 = vpop.f32.mrf.mxu3 }
 0x3ae   : > { %v6352_v2 = vsel %vm15660_vm12, %v6015_v20, %v6351_v9  ;;  %v7545_v40 = vld [vmem:[#allocation2 + $0x14] sm:$0xf]  ;;  %v5643_v4 = vpop.f32.mrf.mxu0  ;;  %v7798_v24 = vpack.c.b16 %v7767_v63, %v7766_v41  ;;  %v6866_v52 = vsel %vm14133_vm2, %v6861_v0, %v6865_v56  ;;  %v7546_v26 = vld [vmem:[#allocation2 + $0x18] sm:$0x1]  ;;  %v7244_v9 = vunpack.c.l.b16 %v6856_v49  ;;  %v12697_v56 = vld [vmem:[%s14109_s11 + $0xe0] sm:$0xe] }
 0x3af   : > { %v6799_v18 = vld [vmem:[#allocation2 + $0x14] sm:$0xf]  ;;  %6353 = vst [vmem:[#allocation2 + $0x20] sm:$0xf] %v6352_v2  ;;  %v7646_v14 = vrot.slane %v7545_v40, 5  ;;  %v6018_v31 = vshrl.u32 %v5942_v33, 16  ;;  %v5760_v3 = vadd.f32 %v5643_v4, %v15223_v44  ;;  %v7245_v20 = vunpack.c.l.b16 %v6866_v52 }
 0x3b0   : > { %v6877_v53 = vshll.u32 %v6799_v18, 16  ;;  %v6021_v5 = vshll.u32 %v5942_v33, 16  ;;  %7886 = vmatmul.bf16.vlgmr.msrb.gmra.mxu3 %v7798_v24  ;;  %v7649_v0 = vrot.slane %v7546_v26, 5  ;;  %v6800_v63 = vld [vmem:[#allocation2 + $0x18] sm:$0x1]  ;;  %v6016_v2 = vrot.slane %v15730_v6, 4 }
 0x3b1   : > { %v7648_v60 = vrot.slane %v7646_v14, 4  ;;  %v6020_v12 = vrot.slane %v6018_v31, 7  ;;  %v5871_v13 = vadd.f32 %v15640_v43, %v5760_v3  ;;  %v7276_v41 = vpack.c.b16 %v7245_v20, %v7244_v9  ;;  %5682 = vmatmul.bf16.gmra.mxu0 %v5546_v47  ;;  %v6355_v40 = vld [vmem:[#allocation2 + $0x28] sm:$0x1]  ;;  %6687 = vmatmul.bf16.gmra.mxu1 %v13473_v48  ;;  %17608 = vst [vmem:[#allocation16_spill] sm:$0xff] %v15748_v38 }
 0x3b2   : > { %v6874_v44 = vor.u32 %v6873_v16, %v6870_v10  ;;  %v15746_v49 = vrot.slane %v6877_v53, 5  ;;  %v6881_v33 = vshrl.u32 %v6799_v18, 16  ;;  %v12698_v26 = vld [vmem:[%s14109_s11 + $0xe4] sm:$0xf]  ;;  %v6887_v3 = vshll.u32 %v6800_v63, 16 }
 0x3b3   : > { %v6023_v4 = vor.u32 %v6021_v5, %v6020_v12  ;;  %v6025_v24 = vrot.slane %v6020_v12, 4  ;;  %v5907_v52 = vmax.f32 %v5871_v13, 0.0  ;;  %7364 = vmatmul.bf16.vlgmr.msra.gmra.mxu2 %v7276_v41  ;;  %v7650_v47 = vsel %vm14226_vm5, %v7648_v60, %v7649_v0  ;;  %v12699_v9 = vld [vmem:[%s14109_s11 + $0xe8] sm:$0x1] }
 0x3b4   : > { %v6883_v31 = vrot.slane %v6881_v33, 4  ;;  %v12727_v6 = vrot.slane %v12697_v56, 9  ;;  %v7647_v16 = vsel %vm14226_vm5, %v12894_v7, %v7646_v14  ;;  %v366_v53 = vld [vmem:[#allocation2 + $0x48] sm:$0x1]  ;;  %v7769_v5 = vunpack.c.l.b16 %v7650_v47 }
 0x3b5   : > { %v6024_v10 = vsel %vm15675_vm14, %v6016_v2, %v6023_v4  ;;  %v6356_v48 = vsel %vm15588_vm8, %v6025_v24, %v6355_v40  ;;  %v5943_v18 = vpack.c.bf16 %v5907_v52, %v5907_v52  ;;  %v6875_v60 = vrot.slane %v6874_v44, 4  ;;  %v313_v4 = vld [vmem:[#allocation2 + $0x50] sm:$0x1] }
 0x3b6   : > { %6354 = vst [vmem:[#allocation2 + $0x24] sm:$0xf] %v6024_v10  ;;  %v5645_v20 = vpop.f32.mrf.mxu0  ;;  %v6884_v12 = vor.u32 %v6883_v31, %v15746_v49  ;;  %v5442_v13 = vrot.slane %v12698_v26, 5  ;;  %v6801_v41 = vld [vmem:[#allocation2 + $0x20] sm:$0xf]  ;;  %v6889_v56 = vrot.slane %v6887_v3, 5 }
 0x3b7   : > { %6357 = vst [vmem:[#allocation2 + $0x28] sm:$0x1] %v6356_v48  ;;  %v6027_v0 = vshrl.u32 %v5943_v18, 16  ;;  %v5761_v63 = vadd.f32 %v5645_v20, %v15247_v61  ;;  %v5445_v2 = vrot.slane %v12699_v9, 5  ;;  %v15762_v40 = vld [vmem:[#allocation2 + $0x20] sm:$0xe] }
 0x3b8   : > { %v6885_v33 = vrot.slane %v6884_v12, 4  ;;  %v5443_v14 = vsel %vm14226_vm5, %v12727_v6, %v5442_v13  ;;  %v5444_v7 = vrot.slane %v5442_v13, 4  ;;  %v367_v44 = vsel %vm15619_vm10, 0, %v366_v53  ;;  %v6358_v26 = vld [vmem:[#allocation2 + $0x30] sm:$0xf] }
 0x3b9   : > { %v15768_v24 = vrot.slane %v6027_v0, 7  ;;  %v6030_v52 = vshll.u32 %v5943_v18, 16  ;;  %v5872_v47 = vadd.f32 %v15640_v43, %v5761_v63  ;;  %368 = vst [vmem:[#allocation2 + $0x48] sm:$0x1] %v367_v44  ;;  %v314_v61 = vsel %vm15588_vm8, 0, %v313_v4 }
 0x3ba   : > { %v6890_v31 = vsel %vm14133_vm2, %v6885_v33, %v6889_v56  ;;  %v5446_v3 = vsel %vm14226_vm5, %v5444_v7, %v5445_v2  ;;  %v5523_v9 = vunpack.c.l.b16 %v5443_v14  ;;  %315 = vst [vmem:[#allocation2 + $0x50] sm:$0x1] %v314_v61  ;;  %v6892_v6 = vshrl.u32 %v6801_v41, 16  ;;  %v12700_v63 = vld [vmem:[%s14109_s11 + $0xf0] sm:$0xe]  ;;  %v15783_v56 = vpop.f32.mrf.mxu3 }
 0x3bb   : > { %v6032_v10 = vor.u32 %v6030_v52, %v15768_v24  ;;  %v5908_v48 = vmax.f32 %v5872_v47, 0.0  ;;  %v7768_v18 = vunpack.c.l.b16 %v7647_v16  ;;  %v6880_v53 = vsel %vm14133_vm2, %v6875_v60, %v15746_v49  ;;  %17609 = vst [vmem:[#allocation42_spill] sm:$0xff] %v15783_v56  ;;  %v13542_v56 = vld [vmem:[#allocation9 + $0x130] sm:$0xff] }
 0x3bc   : > { %v7247_v20 = vunpack.c.l.b16 %v6890_v31  ;;  %v5524_v12 = vunpack.c.l.b16 %v5446_v3  ;;  %v12895_v13 = vrot.slane %v15762_v40, 9  ;;  %v6895_v0 = vshll.u32 %v6801_v41, 16  ;;  %9004 = vmatpush.bf16.msrb.mxu2 %v13542_v56 }
 0x3bd   : > { %v6359_v2 = vsel %vm15660_vm12, %v6032_v10, %v6358_v26  ;;  %v5944_v33 = vpack.c.bf16 %v5908_v48, %v5908_v48  ;;  %v7799_v14 = vpack.c.b16 %v7769_v5, %v7768_v18  ;;  %v13474_v7 = vld [vmem:[#allocation2 + $0x20] sm:$0xff]  ;;  %v6894_v4 = vrot.slane %v6892_v6, 4  ;;  %v12701_v26 = vld [vmem:[%s14109_s11 + $0xf4] sm:$0xf] }
 0x3be   : > { %v7548_v16 = vld [vmem:[#allocation2 + $0x24] sm:$0xf]  ;;  %6360 = vst [vmem:[#allocation2 + $0x30] sm:$0xf] %v6359_v2  ;;  %v5648_v49 = vpop.f32.mrf.mxu0  ;;  %v7246_v60 = vunpack.c.l.b16 %v6880_v53  ;;  %v5547_v52 = vpack.c.b16 %v5524_v12, %v5523_v9  ;;  %v7549_v47 = vld [vmem:[#allocation2 + $0x28] sm:$0x1] }
 0x3bf   : > { %v6802_v44 = vld [vmem:[#allocation2 + $0x24] sm:$0xf]  ;;  %v7653_v40 = vrot.slane %v7548_v16, 5  ;;  %v6897_v41 = vrot.slane %v6895_v0, 5  ;;  %v6035_v61 = vshrl.u32 %v5944_v33, 16  ;;  %v6038_v31 = vshll.u32 %v5944_v33, 16 }
 0x3c0   : > { %v5762_v3 = vadd.f32 %v5648_v49, %v15277_v55  ;;  %v12728_v10 = vrot.slane %v12700_v63, 9  ;;  %7891 = vmatmul.bf16.gmra.mxu3 %v7799_v14  ;;  %v7277_v5 = vpack.c.b16 %v7247_v20, %v7246_v60  ;;  %v7656_v18 = vrot.slane %v7549_v47, 5  ;;  %v6803_v38 = vld [vmem:[#allocation2 + $0x28] sm:$0x1]  ;;  %v13534_v2 = vld [vmem:[#allocation9 + $0xf0] sm:$0xff] }
 0x3c1   : > { %v7655_v48 = vrot.slane %v7653_v40, 4  ;;  %v6901_v6 = vshll.u32 %v6802_v44, 16  ;;  %v6037_v1 = vrot.slane %v6035_v61, 7  ;;  %5687 = vmatmul.bf16.gmra.mxu0 %v5547_v52  ;;  %v6898_v53 = vor.u32 %v6897_v41, %v6894_v4  ;;  %v6362_v0 = vld [vmem:[#allocation2 + $0x38] sm:$0x1]  ;;  %6692 = vmatmul.bf16.gmra.mxu1 %v13474_v7 }
 0x3c2   : > { %v5873_v9 = vadd.f32 %v15640_v43, %v5762_v3  ;;  %v6905_v12 = vshrl.u32 %v6802_v44, 16  ;;  %v6033_v55 = vrot.slane %v15768_v24, 4  ;;  %v5449_v33 = vrot.slane %v12701_v26, 5  ;;  %v12702_v47 = vld [vmem:[%s14109_s11 + $0xf8] sm:$0x1]  ;;  %8258 = vmatpush.bf16.msrb.mxu1 %v13534_v2  ;;  %v15805_v26 = vpop.f32.mrf.mxu3 }
 0x3c3   : > { %v7657_v20 = vsel %vm14226_vm5, %v7655_v48, %v7656_v18  ;;  %v15793_v63 = vrot.slane %v6901_v6, 5  ;;  %v6040_v14 = vor.u32 %v6038_v31, %v6037_v1  ;;  %v6042_v16 = vrot.slane %v6037_v1, 4  ;;  %7369 = vmatmul.bf16.gmra.mxu2 %v7277_v5  ;;  %v369_v41 = vld [vmem:[#allocation2 + $0x58] sm:$0x1]  ;;  %v316_v6 = vld [vmem:[#allocation2 + $0x60] sm:$0x1] }
 0x3c4   : > { %v5909_v49 = vmax.f32 %v5873_v9, 0.0  ;;  %v6911_v60 = vshll.u32 %v6803_v38, 16  ;;  %v7654_v56 = vsel %vm14226_vm5, %v12895_v13, %v7653_v40  ;;  %v6907_v44 = vrot.slane %v6905_v12, 4 }
 0x3c5   : > { %v5450_v24 = vsel %vm14226_vm5, %v12728_v10, %v5449_v33  ;;  %v6041_v7 = vsel %vm15675_vm14, %v6033_v55, %v6040_v14  ;;  %v6363_v4 = vsel %vm15588_vm8, %v6042_v16, %v6362_v0  ;;  %v6899_v1 = vrot.slane %v6898_v53, 4  ;;  %v6804_v40 = vld [vmem:[#allocation2 + $0x30] sm:$0xf] }
 0x3c6   : > { %v5945_v52 = vpack.c.bf16 %v5909_v49, %v5909_v49  ;;  %6361 = vst [vmem:[#allocation2 + $0x34] sm:$0xf] %v6041_v7  ;;  %v5650_v38 = vpop.f32.mrf.mxu0  ;;  %v7771_v61 = vunpack.c.l.b16 %v7657_v20  ;;  %v6908_v31 = vor.u32 %v6907_v44, %v15793_v63  ;;  %v5451_v3 = vrot.slane %v5449_v33, 4  ;;  %v6365_v33 = vld [vmem:[#allocation2 + $0x40] sm:$0xf] }
 0x3c7   : > { %v5452_v13 = vrot.slane %v12702_v47, 5  ;;  %6364 = vst [vmem:[#allocation2 + $0x38] sm:$0x1] %v6363_v4  ;;  %v5763_v5 = vadd.f32 %v5650_v38, %v15298_v51  ;;  %v6913_v48 = vrot.slane %v6911_v60, 5  ;;  %v5525_v18 = vunpack.c.l.b16 %v5450_v24  ;;  %v12704_v4 = vld [vmem:[%s14109_s11 + $0x104] sm:$0xf] }
 0x3c8   : > { %v6044_v10 = vshrl.u32 %v5945_v52, 16  ;;  %v6909_v2 = vrot.slane %v6908_v31, 4  ;;  %v370_v53 = vsel %vm15619_vm10, 0, %v369_v41  ;;  %v317_v12 = vsel %vm15588_vm8, 0, %v316_v6  ;;  %v12703_v38 = vld [vmem:[%s14109_s11 + $0x100] sm:$0xe] }
 0x3c9   : > { %v5453_v9 = vsel %vm14226_vm5, %v5451_v3, %v5452_v13  ;;  %v6047_v0 = vshll.u32 %v5945_v52, 16  ;;  %v5874_v20 = vadd.f32 %v15640_v43, %v5763_v5  ;;  %371 = vst [vmem:[#allocation2 + $0x58] sm:$0x1] %v370_v53  ;;  %v7770_v14 = vunpack.c.l.b16 %v7654_v56  ;;  %v12705_v31 = vld [vmem:[%s14109_s11 + $0x108] sm:$0x1] }
 0x3ca   : > { %v15814_v55 = vrot.slane %v6044_v10, 7  ;;  %v5526_v51 = vunpack.c.l.b16 %v5453_v9  ;;  %v6914_v16 = vsel %vm14133_vm2, %v6909_v2, %v6913_v48  ;;  %318 = vst [vmem:[#allocation2 + $0x60] sm:$0x1] %v317_v12  ;;  %v6916_v49 = vshrl.u32 %v6804_v40, 16  ;;  %v7550_v53 = vld [vmem:[#allocation2 + $0x30] sm:$0xe] }
 0x3cb   : > { %v6919_v60 = vshll.u32 %v6804_v40, 16  ;;  %v3939_v47 = vadd.f32 %v15293_v11, %v15387_v42  ;;  %v5910_v24 = vmax.f32 %v5874_v20, 0.0  ;;  %v6904_v7 = vsel %vm14133_vm2, %v6899_v1, %v15793_v63 }
 0x3cc   : > { %v6049_v44 = vor.u32 %v6047_v0, %v15814_v55  ;;  %v7800_v52 = vpack.c.b16 %v7771_v61, %v7770_v14  ;;  %v7249_v41 = vunpack.c.l.b16 %v6914_v16  ;;  %v5548_v56 = vpack.c.b16 %v5526_v51, %v5525_v18  ;;  %v15835_v14 = vpop.f32.mrf.mxu3 }
 0x3cd   : > { %v5946_v13 = vpack.c.bf16 %v5910_v24, %v5910_v24  ;;  %v7551_v40 = vld [vmem:[#allocation2 + $0x34] sm:$0xf]  ;;  %v6918_v11 = vrot.slane %v6916_v49, 4  ;;  %v6921_v42 = vrot.slane %v6919_v60, 5  ;;  %v7248_v48 = vunpack.c.l.b16 %v6904_v7 }
 0x3ce   : > { %v6366_v3 = vsel %vm15660_vm12, %v6049_v44, %v6365_v33  ;;  %v6805_v10 = vld [vmem:[#allocation2 + $0x34] sm:$0xf]  ;;  %v5653_v5 = vpop.f32.mrf.mxu0  ;;  %v7660_v2 = vrot.slane %v7551_v40, 5  ;;  %v5456_v1 = vrot.slane %v12704_v4, 5  ;;  %v15831_v61 = vadd.f32 %v15295_v29, %v3939_v47  ;;  %v6806_v20 = vld [vmem:[#allocation2 + $0x38] sm:$0x1] }
 0x3cf   : > { %6367 = vst [vmem:[#allocation2 + $0x40] sm:$0xf] %v6366_v3  ;;  %v13475_v6 = vld [vmem:[#allocation2 + $0x30] sm:$0xff]  ;;  %v6925_v63 = vshll.u32 %v6805_v10, 16  ;;  %v6052_v18 = vshrl.u32 %v5946_v13, 16  ;;  %v5764_v9 = vadd.f32 %v5653_v5, %v15329_v62  ;;  %v6050_v12 = vrot.slane %v15814_v55, 4 }
 0x3d0   : > { %7896 = vmatmul.bf16.gmra.mxu3 %v7800_v52  ;;  %v7278_v0 = vpack.c.b16 %v7249_v41, %v7248_v48  ;;  %v12729_v51 = vrot.slane %v12703_v38, 9  ;;  %v5459_v33 = vrot.slane %v12705_v31, 5  ;;  %v6055_v49 = vshll.u32 %v5946_v13, 16  ;;  %v7552_v29 = vld [vmem:[#allocation2 + $0x38] sm:$0x1] }
 0x3d1   : > { %v6054_v16 = vrot.slane %v6052_v18, 7  ;;  %v5875_v60 = vadd.f32 %v15640_v43, %v5764_v9  ;;  %5692 = vmatmul.bf16.gmra.mxu0 %v5548_v56  ;;  %v6929_v47 = vshrl.u32 %v6805_v10, 16  ;;  %v6369_v44 = vld [vmem:[#allocation2 + $0x48] sm:$0x1]  ;;  %6697 = vmatmul.bf16.gmra.mxu1 %v13475_v6  ;;  %v7662_v62 = vrot.slane %v7660_v2, 4 }
 0x3d2   : > { %v6922_v24 = vor.u32 %v6921_v42, %v6918_v11  ;;  %v6927_v7 = vrot.slane %v6925_v63, 5  ;;  %v5458_v55 = vrot.slane %v5456_v1, 4  ;;  %v6935_v38 = vshll.u32 %v6806_v20, 16  ;;  %v372_v31 = vld [vmem:[#allocation2 + $0x68] sm:$0x1] }
 0x3d3   : > { %v6057_v4 = vor.u32 %v6055_v49, %v6054_v16  ;;  %v6059_v52 = vrot.slane %v6054_v16, 4  ;;  %v5911_v41 = vmax.f32 %v5875_v60, 0.0  ;;  %7374 = vmatmul.bf16.gmra.mxu2 %v7278_v0  ;;  %v12896_v3 = vrot.slane %v7550_v53, 9  ;;  %v319_v20 = vld [vmem:[#allocation2 + $0x70] sm:$0x1] }
 0x3d4   : > { %v7663_v40 = vrot.slane %v7552_v29, 5  ;;  %v6931_v13 = vrot.slane %v6929_v47, 4  ;;  %v5457_v56 = vsel %vm14226_vm5, %v12729_v51, %v5456_v1  ;;  %v5460_v5 = vsel %vm14226_vm5, %v5458_v55, %v5459_v33 }
 0x3d5   : > { %v6058_v10 = vsel %vm15675_vm14, %v6050_v12, %v6057_v4  ;;  %v6370_v11 = vsel %vm15588_vm8, %v6059_v52, %v6369_v44  ;;  %v5947_v42 = vpack.c.bf16 %v5911_v41, %v5911_v41  ;;  %v7661_v6 = vsel %vm14226_vm5, %v12896_v3, %v7660_v2  ;;  %v15870_v41 = vpop.f32.mrf.mxu3  ;;  %v12706_v3 = vld [vmem:[%s14109_s11 + $0x110] sm:$0xe] }
 0x3d6   : > { %6368 = vst [vmem:[#allocation2 + $0x44] sm:$0xf] %v6058_v10  ;;  %v5655_v48 = vpop.f32.mrf.mxu0  ;;  %v6923_v63 = vrot.slane %v6922_v24, 4  ;;  %v6932_v18 = vor.u32 %v6931_v13, %v6927_v7  ;;  %v373_v1 = vsel %vm15619_vm10, 0, %v372_v31  ;;  %v7664_v12 = vsel %vm14226_vm5, %v7662_v62, %v7663_v40  ;;  %v6807_v47 = vld [vmem:[#allocation2 + $0x40] sm:$0xf] }
 0x3d7   : > { %6371 = vst [vmem:[#allocation2 + $0x48] sm:$0x1] %v6370_v11  ;;  %v6061_v9 = vshrl.u32 %v5947_v42, 16  ;;  %v5765_v53 = vadd.f32 %v5655_v48, %v15355_v22  ;;  %v6937_v0 = vrot.slane %v6935_v38, 5  ;;  %v5527_v33 = vunpack.c.l.b16 %v5457_v56  ;;  %v6372_v62 = vld [vmem:[#allocation2 + $0x50] sm:$0xf] }
 0x3d8   : > { %v6933_v51 = vrot.slane %v6932_v18, 4  ;;  %v5528_v16 = vunpack.c.l.b16 %v5460_v5  ;;  %374 = vst [vmem:[#allocation2 + $0x68] sm:$0x1] %v373_v1  ;;  %v320_v2 = vsel %vm15588_vm8, 0, %v319_v20  ;;  %v6064_v60 = vshll.u32 %v5947_v42, 16 }
 0x3d9   : > { %v15855_v49 = vrot.slane %v6061_v9, 7  ;;  %v5876_v29 = vadd.f32 %v15640_v43, %v5765_v53  ;;  %v6928_v22 = vsel %vm14133_vm2, %v6923_v63, %v6927_v7  ;;  %321 = vst [vmem:[#allocation2 + $0x70] sm:$0x1] %v320_v2  ;;  %v5188_v44 = vadd.f32 %v15552_v28, %v15367_v30  ;;  %v15864_v4 = vld [vmem:[#allocation2 + $0x40] sm:$0xe] }
 0x3da   : > { %v7773_v24 = vunpack.c.l.b16 %v7664_v12  ;;  %v6938_v55 = vsel %vm14133_vm2, %v6933_v51, %v6937_v0  ;;  %v15868_v52 = vadd.f32 %v15562_v45, %v15831_v61  ;;  %v7772_v31 = vunpack.c.l.b16 %v7661_v6  ;;  %v12707_v30 = vld [vmem:[%s14109_s11 + $0x114] sm:$0xf]  ;;  %v12708_v10 = vld [vmem:[%s14109_s11 + $0x118] sm:$0x1]  ;;  %v13541_v51 = vld [vmem:[#allocation9 + $0x128] sm:$0xff] }
 0x3db   : > { %v6066_v7 = vor.u32 %v6064_v60, %v15855_v49  ;;  %v5912_v38 = vmax.f32 %v5876_v29, 0.0  ;;  %v7250_v28 = vunpack.c.l.b16 %v6928_v22  ;;  %v5549_v40 = vpack.c.b16 %v5528_v16, %v5527_v33  ;;  %v6376_v60 = vld [vmem:[#allocation2 + $0x58] sm:$0x1]  ;;  %9005 = vmatpush.bf16.msrb.mxu2 %v13541_v51 }
 0x3dc   : > { %v6940_v13 = vshrl.u32 %v6807_v47, 16  ;;  %v6943_v56 = vshll.u32 %v6807_v47, 16  ;;  %v7251_v5 = vunpack.c.l.b16 %v6938_v55  ;;  %v12897_v61 = vrot.slane %v15864_v4, 9  ;;  %v17610_v47 = vld [vmem:[#allocation21_spill] sm:$0xff] }
 0x3dd   : > { %v6373_v11 = vsel %vm15660_vm12, %v6066_v7, %v6372_v62  ;;  %v5948_v42 = vpack.c.bf16 %v5912_v38, %v5912_v38  ;;  %v15878_v45 = vld [vmem:[#allocation2 + $0x44] sm:$0xf]  ;;  %v7801_v6 = vpack.c.b16 %v7773_v24, %v7772_v31  ;;  %v12730_v9 = vrot.slane %v12706_v3, 9  ;;  %v17611_v62 = vld [vmem:[#allocation19_spill] sm:$0xff]  ;;  %v375_v31 = vld [vmem:[#allocation2 + $0x78] sm:$0x1] }
 0x3de   : > { %v6808_v48 = vld [vmem:[#allocation2 + $0x44] sm:$0xf]  ;;  %6374 = vst [vmem:[#allocation2 + $0x50] sm:$0xf] %v6373_v11  ;;  %v5658_v63 = vpop.f32.mrf.mxu0  ;;  %v5463_v53 = vrot.slane %v12707_v30, 5  ;;  %v7667_v20 = vrot.slane %v15878_v45, 5  ;;  %v3941_v24 = vadd.f32 %v17611_v62, %v17610_v47  ;;  %v7279_v7 = vpack.c.b16 %v7251_v5, %v7250_v28 }
 0x3df   : > { %v13476_v18 = vld [vmem:[#allocation2 + $0x40] sm:$0xff]  ;;  %v6949_v1 = vshll.u32 %v6808_v48, 16  ;;  %v6069_v12 = vshrl.u32 %v5948_v42, 16  ;;  %v5766_v0 = vadd.f32 %v5658_v63, %v5188_v44  ;;  %v5466_v33 = vrot.slane %v12708_v10, 5  ;;  %v6809_v44 = vld [vmem:[#allocation2 + $0x48] sm:$0x1]  ;;  %v15892_v63 = vpop.f32.mrf.mxu3 }
 0x3e0   : > { %v6067_v16 = vrot.slane %v15855_v49, 4  ;;  %v6072_v2 = vshll.u32 %v5948_v42, 16  ;;  %7901 = vmatmul.bf16.gmra.mxu3 %v7801_v6  ;;  %v6942_v29 = vrot.slane %v6940_v13, 4  ;;  %v6945_v22 = vrot.slane %v6943_v56, 5  ;;  %v13533_v38 = vld [vmem:[#allocation9 + $0xe8] sm:$0xff] }
 0x3e1   : > { %v6071_v55 = vrot.slane %v6069_v12, 7  ;;  %v5877_v4 = vadd.f32 %v15640_v43, %v5766_v0  ;;  %5697 = vmatmul.bf16.gmra.mxu0 %v5549_v40  ;;  %6702 = vmatmul.bf16.gmra.mxu1 %v13476_v18  ;;  %v7555_v3 = vld [vmem:[#allocation2 + $0x48] sm:$0x1]  ;;  %v15886_v49 = vrot.slane %v6949_v1, 5  ;;  %v6953_v30 = vshrl.u32 %v6808_v48, 16 }
 0x3e2   : > { %v5464_v13 = vsel %vm14226_vm5, %v12730_v9, %v5463_v53  ;;  %v5465_v56 = vrot.slane %v5463_v53, 4  ;;  %v7669_v43 = vrot.slane %v7667_v20, 4  ;;  %8259 = vmatpush.bf16.msrb.mxu1 %v13533_v38  ;;  %v6946_v28 = vor.u32 %v6945_v22, %v6942_v29  ;;  %v17612_v9 = vld [vmem:[#allocation51_spill] sm:$0xff]  ;;  %v322_v62 = vld [vmem:[#allocation2 + $0x80] sm:$0x1] }
 0x3e3   : > { %v6074_v10 = vor.u32 %v6072_v2, %v6071_v55  ;;  %v6076_v11 = vrot.slane %v6071_v55, 4  ;;  %v5913_v42 = vmax.f32 %v5877_v4, 0.0  ;;  %7379 = vmatmul.bf16.gmra.mxu2 %v7279_v7  ;;  %v6955_v40 = vrot.slane %v6953_v30, 4 }
 0x3e4   : > { %v6959_v5 = vshll.u32 %v6809_v44, 16  ;;  %v376_v45 = vsel %vm15619_vm10, 0, %v375_v31  ;;  %v7670_v1 = vrot.slane %v7555_v3, 5  ;;  %v4361_v53 = vadd.f32 %v17612_v9, %v3941_v24  ;;  %v6379_v31 = vld [vmem:[#allocation2 + $0x60] sm:$0xf] }
 0x3e5   : > { %v6075_v48 = vsel %vm15675_vm14, %v6067_v16, %v6074_v10  ;;  %v6377_v6 = vsel %vm15588_vm8, %v6076_v11, %v6376_v60  ;;  %v5949_v18 = vpack.c.bf16 %v5913_v42, %v5913_v42  ;;  %377 = vst [vmem:[#allocation2 + $0x78] sm:$0x1] %v376_v45  ;;  %v6956_v0 = vor.u32 %v6955_v40, %v15886_v49  ;;  %v6810_v29 = vld [vmem:[#allocation2 + $0x50] sm:$0xf] }
 0x3e6   : > { %6375 = vst [vmem:[#allocation2 + $0x54] sm:$0xf] %v6075_v48  ;;  %v5660_v12 = vpop.f32.mrf.mxu0  ;;  %v5467_v51 = vsel %vm14226_vm5, %v5465_v56, %v5466_v33  ;;  %v5529_v2 = vunpack.c.l.b16 %v5464_v13  ;;  %v7668_v60 = vsel %vm14226_vm5, %v12897_v61, %v7667_v20  ;;  %v7671_v47 = vsel %vm14226_vm5, %v7669_v43, %v7670_v1  ;;  %v13575_v33 = vld [vmem:[#allocation9 + $0x1b8] sm:$0xff]  ;;  %v17613_v56 = vld [vmem:[#allocation48_spill] sm:$0xff] }
 0x3e7   : > { %6378 = vst [vmem:[#allocation2 + $0x58] sm:$0x1] %v6377_v6  ;;  %v6078_v22 = vshrl.u32 %v5949_v18, 16  ;;  %v5767_v16 = vadd.f32 %v5660_v12, %v15868_v52  ;;  %v6947_v24 = vrot.slane %v6946_v28, 4  ;;  %v6957_v55 = vrot.slane %v6956_v0, 4  ;;  %9904 = vmatpush.bf16.msra.mxu0 %v13575_v33 }
 0x3e8   : > { %v6961_v4 = vrot.slane %v6959_v5, 5  ;;  %v323_v7 = vsel %vm15588_vm8, 0, %v322_v62  ;;  %v6081_v38 = vshll.u32 %v5949_v18, 16  ;;  %v15914_v52 = vld [vmem:[%s17442_s2] ss:$0 sm:$0xff]  ;;  %v5530_v20 = vunpack.c.l.b16 %v5467_v51  ;;  %v17614_v5 = vld [vmem:[#allocation49_spill] sm:$0xff] }
 0x3e9   : > { %v15909_v44 = vrot.slane %v6078_v22, 7  ;;  %v5878_v61 = vadd.f32 %v15914_v52, %v5767_v16  ;;  %324 = vst [vmem:[#allocation2 + $0x80] sm:$0x1] %v323_v7  ;;  %v7775_v3 = vunpack.c.l.b16 %v7671_v47  ;;  %v6964_v13 = vshrl.u32 %v6810_v29, 16  ;;  %v12710_v28 = vld [vmem:[%s14109_s11 + $0x124] sm:$0xf] }
 0x3ea   : > { %v6962_v30 = vsel %vm14133_vm2, %v6957_v55, %v6961_v4  ;;  %v5190_v10 = vadd.f32 %v15580_v32, %v17613_v56  ;;  %v6952_v43 = vsel %vm14133_vm2, %v6947_v24, %v15886_v49  ;;  %v15927_v40 = vadd.f32 %v15594_v25, %v4361_v53  ;;  %v12709_v18 = vld [vmem:[%s14109_s11 + $0x120] sm:$0xe]  ;;  %v13574_v32 = vld [vmem:[#allocation9 + $0x1b0] sm:$0xff]  ;;  %v12711_v22 = vld [vmem:[%s14109_s11 + $0x128] sm:$0x1] }
 0x3eb   : > { %v6083_v11 = vor.u32 %v6081_v38, %v15909_v44  ;;  %v5914_v42 = vmax.f32 %v5878_v61, 0.0  ;;  %v15931_v45 = vadd.f32 %v17614_v5, %v15453_v39  ;;  %v7774_v48 = vunpack.c.l.b16 %v7668_v60  ;;  %9905 = vmatpush.bf16.msra.mxu0 %v13574_v32  ;;  %v7556_v56 = vld [vmem:[#allocation2 + $0x50] sm:$0xe] }
 0x3ec   : > { %v6967_v6 = vshll.u32 %v6810_v29, 16  ;;  %v7253_v12 = vunpack.c.l.b16 %v6962_v30  ;;  %v5550_v0 = vpack.c.b16 %v5530_v20, %v5529_v2  ;;  %v7252_v16 = vunpack.c.l.b16 %v6952_v43  ;;  %v15939_v29 = vpop.f32.mrf.mxu3  ;;  %v6383_v2 = vld [vmem:[#allocation2 + $0x68] sm:$0x1] }
 0x3ed   : > { %v6380_v1 = vsel %vm15660_vm12, %v6083_v11, %v6379_v31  ;;  %v5950_v9 = vpack.c.bf16 %v5914_v42, %v5914_v42  ;;  %v15936_v51 = vld [vmem:[#allocation2 + $0x54] sm:$0xf]  ;;  %v7802_v53 = vpack.c.b16 %v7775_v3, %v7774_v48  ;;  %v6966_v47 = vrot.slane %v6964_v13, 4  ;;  %v13573_v20 = vld [vmem:[#allocation9 + $0x1a8] sm:$0xff] }
 0x3ee   : > { %v6811_v49 = vld [vmem:[#allocation2 + $0x54] sm:$0xf]  ;;  %6381 = vst [vmem:[#allocation2 + $0x60] sm:$0xf] %v6380_v1  ;;  %v5663_v25 = vpop.f32.mrf.mxu0  ;;  %v5470_v60 = vrot.slane %v12710_v28, 5  ;;  %v7674_v55 = vrot.slane %v15936_v51, 5  ;;  %v7280_v13 = vpack.c.b16 %v7253_v12, %v7252_v16 }
 0x3ef   : > { %v13477_v39 = vld [vmem:[#allocation2 + $0x50] sm:$0xff]  ;;  %v6086_v62 = vshrl.u32 %v5950_v9, 16  ;;  %v5768_v24 = vadd.f32 %v5663_v25, %v5190_v10  ;;  %v12731_v4 = vrot.slane %v12709_v18, 9  ;;  %v6969_v7 = vrot.slane %v6967_v6, 5  ;;  %v6812_v11 = vld [vmem:[#allocation2 + $0x58] sm:$0x1]  ;;  %9906 = vmatpush.bf16.msra.mxu0 %v13573_v20 }
 0x3f0   : > { %7906 = vmatmul.bf16.gmra.mxu3 %v7802_v53  ;;  %v6973_v33 = vshll.u32 %v6811_v49, 16  ;;  %v6977_v38 = vshrl.u32 %v6811_v49, 16  ;;  %v5473_v61 = vrot.slane %v12711_v22, 5  ;;  %v6089_v3 = vshll.u32 %v5950_v9, 16  ;;  %v7558_v42 = vld [vmem:[#allocation2 + $0x58] sm:$0x1] }
 0x3f1   : > { %v6088_v31 = vrot.slane %v6086_v62, 7  ;;  %v5879_v30 = vadd.f32 %v15914_v52, %v5768_v24  ;;  %5702 = vmatmul.bf16.gmra.mxu0 %v5550_v0  ;;  %v6084_v10 = vrot.slane %v15909_v44, 4  ;;  %6707 = vmatmul.bf16.gmra.mxu1 %v13477_v39  ;;  %v5472_v5 = vrot.slane %v5470_v60, 4  ;;  %v378_v1 = vld [vmem:[#allocation2 + $0x88] sm:$0x1]  ;;  %v13572_v51 = vld [vmem:[#allocation9 + $0x1a0] sm:$0xff] }
 0x3f2   : > { %v15944_v43 = vrot.slane %v6973_v33, 5  ;;  %v6979_v28 = vrot.slane %v6977_v38, 4  ;;  %v7676_v32 = vrot.slane %v7674_v55, 4  ;;  %v6970_v9 = vor.u32 %v6969_v7, %v6966_v47  ;;  %v325_v33 = vld [vmem:[#allocation2 + $0x90] sm:$0x1] }
 0x3f3   : > { %v6091_v48 = vor.u32 %v6089_v3, %v6088_v31  ;;  %v6093_v6 = vrot.slane %v6088_v31, 4  ;;  %v5915_v18 = vmax.f32 %v5879_v30, 0.0  ;;  %7384 = vmatmul.bf16.gmra.mxu2 %v7280_v13  ;;  %v6983_v0 = vshll.u32 %v6812_v11, 16  ;;  %9907 = vmatpush.bf16.msra.mxu0 %v13572_v51  ;;  %v13571_v3 = vld [vmem:[#allocation9 + $0x198] sm:$0xff]  ;;  %v13570_v51 = vld [vmem:[#allocation9 + $0x190] sm:$0xff] }
 0x3f4   : > { %v6980_v12 = vor.u32 %v6979_v28, %v15944_v43  ;;  %v5471_v44 = vsel %vm14226_vm5, %v12731_v4, %v5470_v60  ;;  %v7677_v53 = vrot.slane %v7558_v42, 5  ;;  %v12898_v39 = vrot.slane %v7556_v56, 9  ;;  %v15964_v30 = vpop.f32.mrf.mxu3  ;;  %v6386_v28 = vld [vmem:[#allocation2 + $0x70] sm:$0xf] }
 0x3f5   : > { %v6092_v49 = vsel %vm15675_vm14, %v6084_v10, %v6091_v48  ;;  %v6384_v22 = vsel %vm15588_vm8, %v6093_v6, %v6383_v2  ;;  %v5951_v25 = vpack.c.bf16 %v5915_v18, %v5915_v18  ;;  %v5474_v47 = vsel %vm14226_vm5, %v5472_v5, %v5473_v61  ;;  %v6813_v10 = vld [vmem:[#allocation2 + $0x60] sm:$0xf] }
 0x3f6   : > { %6382 = vst [vmem:[#allocation2 + $0x64] sm:$0xf] %v6092_v49  ;;  %v5665_v16 = vpop.f32.mrf.mxu0  ;;  %v6981_v62 = vrot.slane %v6980_v12, 4  ;;  %v379_v24 = vsel %vm15619_vm10, 0, %v378_v1  ;;  %v7678_v2 = vsel %vm14226_vm5, %v7676_v32, %v7677_v53  ;;  %v5531_v7 = vunpack.c.l.b16 %v5471_v44  ;;  %v12713_v1 = vld [vmem:[%s14109_s11 + $0x134] sm:$0xf] }
 0x3f7   : > { %6385 = vst [vmem:[#allocation2 + $0x68] sm:$0x1] %v6384_v22  ;;  %v6095_v60 = vshrl.u32 %v5951_v25, 16  ;;  %v5769_v4 = vadd.f32 %v5665_v16, %v15927_v40  ;;  %v7675_v38 = vsel %vm14226_vm5, %v12898_v39, %v7674_v55  ;;  %v6971_v20 = vrot.slane %v6970_v9, 4  ;;  %v17615_v55 = vld [vmem:[#allocation20_spill] sm:$0xff]  ;;  %9908 = vmatpush.bf16.msra.mxu0 %v13571_v3 }
 0x3f8   : > { %v6985_v31 = vrot.slane %v6983_v0, 5  ;;  %380 = vst [vmem:[#allocation2 + $0x88] sm:$0x1] %v379_v24  ;;  %v326_v61 = vsel %vm15588_vm8, 0, %v325_v33  ;;  %v6098_v40 = vshll.u32 %v5951_v25, 16  ;;  %v5532_v11 = vunpack.c.l.b16 %v5474_v47  ;;  %v13540_v33 = vld [vmem:[#allocation9 + $0x120] sm:$0xff] }
 0x3f9   : > { %v15966_v13 = vrot.slane %v6095_v60, 7  ;;  %v5880_v56 = vadd.f32 %v15914_v52, %v5769_v4  ;;  %327 = vst [vmem:[#allocation2 + $0x90] sm:$0x1] %v326_v61  ;;  %v4363_v42 = vadd.f32 %v17615_v55, %v15931_v45  ;;  %v7777_v5 = vunpack.c.l.b16 %v7678_v2  ;;  %v12712_v44 = vld [vmem:[%s14109_s11 + $0x130] sm:$0xe]  ;;  %9006 = vmatpush.bf16.msrb.mxu2 %v13540_v33 }
 0x3fa   : > { %v6986_v48 = vsel %vm14133_vm2, %v6981_v62, %v6985_v31  ;;  %v6976_v32 = vsel %vm14133_vm2, %v6971_v20, %v15944_v43  ;;  %v5192_v9 = vadd.f32 %v15610_v36, %v15446_v35  ;;  %v7776_v12 = vunpack.c.l.b16 %v7675_v38  ;;  %v12714_v38 = vld [vmem:[%s14109_s11 + $0x138] sm:$0x1] }
 0x3fb   : > { %v6100_v6 = vor.u32 %v6098_v40, %v15966_v13  ;;  %v5916_v18 = vmax.f32 %v5880_v56, 0.0  ;;  %v6988_v0 = vshrl.u32 %v6813_v10, 16  ;;  %v6991_v45 = vshll.u32 %v6813_v10, 16  ;;  %9909 = vmatpush.bf16.msra.mxu0 %v13570_v51  ;;  %v6390_v31 = vld [vmem:[#allocation2 + $0x78] sm:$0x1] }
 0x3fc   : > { %v7255_v25 = vunpack.c.l.b16 %v6986_v48  ;;  %v5551_v53 = vpack.c.b16 %v5532_v11, %v5531_v7  ;;  %v15986_v43 = vadd.f32 %v15629_v57, %v4363_v42  ;;  %v7803_v36 = vpack.c.b16 %v7777_v5, %v7776_v12  ;;  %v13532_v42 = vld [vmem:[#allocation9 + $0xe0] sm:$0xff]  ;;  %v13569_v5 = vld [vmem:[#allocation9 + $0x188] sm:$0xff] }
 0x3fd   : > { %v6387_v49 = vsel %vm15660_vm12, %v6100_v6, %v6386_v28  ;;  %v5952_v22 = vpack.c.bf16 %v5916_v18, %v5916_v18  ;;  %v15983_v16 = vld [vmem:[#allocation2 + $0x64] sm:$0xf]  ;;  %v7254_v62 = vunpack.c.l.b16 %v6976_v32  ;;  %v5477_v24 = vrot.slane %v12713_v1, 5  ;;  %v381_v28 = vld [vmem:[#allocation2 + $0x98] sm:$0x1]  ;;  %8260 = vmatpush.bf16.msrb.mxu1 %v13532_v42 }
 0x3fe   : > { %v6814_v39 = vld [vmem:[#allocation2 + $0x64] sm:$0xf]  ;;  %6388 = vst [vmem:[#allocation2 + $0x70] sm:$0xf] %v6387_v49  ;;  %v5668_v35 = vpop.f32.mrf.mxu0  ;;  %v7681_v2 = vrot.slane %v15983_v16, 5  ;;  %v12732_v7 = vrot.slane %v12712_v44, 9  ;;  %v3945_v42 = vadd.f32 %v15443_v34, %v15476_v17 }
 0x3ff   : > { %v13478_v47 = vld [vmem:[#allocation2 + $0x60] sm:$0xff]  ;;  %v6103_v60 = vshrl.u32 %v5952_v22, 16  ;;  %v5770_v4 = vadd.f32 %v5668_v35, %v5192_v9  ;;  %v6106_v20 = vshll.u32 %v5952_v22, 16  ;;  %v6815_v61 = vld [vmem:[#allocation2 + $0x68] sm:$0x1]  ;;  %v15990_v57 = vrot.slane %v6988_v0, 4  ;;  %v15996_v9 = vpop.f32.mrf.mxu3  ;;  %9910 = vmatpush.bf16.msra.mxu0 %v13569_v5 }
 0x400   : > { %7911 = vmatmul.bf16.gmra.mxu3 %v7803_v36  ;;  %v6993_v3 = vrot.slane %v6991_v45, 5  ;;  %v6997_v40 = vshll.u32 %v6814_v39, 16  ;;  %v7281_v10 = vpack.c.b16 %v7255_v25, %v7254_v62  ;;  %v7001_v55 = vshrl.u32 %v6814_v39, 16  ;;  %v7561_v6 = vld [vmem:[#allocation2 + $0x68] sm:$0x1] }
 0x401   : > { %v6105_v56 = vrot.slane %v6103_v60, 7  ;;  %v5881_v11 = vadd.f32 %v15914_v52, %v5770_v4  ;;  %5707 = vmatmul.bf16.gmra.mxu0 %v5551_v53  ;;  %v6101_v48 = vrot.slane %v15966_v13, 4  ;;  %6712 = vmatmul.bf16.gmra.mxu1 %v13478_v47  ;;  %v5479_v32 = vrot.slane %v5477_v24, 4  ;;  %v7559_v44 = vld [vmem:[#allocation2 + $0x60] sm:$0xe] }
 0x402   : > { %v15994_v18 = vrot.slane %v6997_v40, 5  ;;  %v5480_v1 = vrot.slane %v12714_v38, 5  ;;  %v7683_v51 = vrot.slane %v7681_v2, 4  ;;  %v7003_v49 = vrot.slane %v7001_v55, 4  ;;  %v13568_v53 = vld [vmem:[#allocation9 + $0x180] sm:$0xff] }
 0x403   : > { %v6108_v12 = vor.u32 %v6106_v20, %v6105_v56  ;;  %v6110_v0 = vrot.slane %v6105_v56, 4  ;;  %v5917_v45 = vmax.f32 %v5881_v11, 0.0  ;;  %7389 = vmatmul.bf16.gmra.mxu2 %v7281_v10  ;;  %v7007_v22 = vshll.u32 %v6815_v61, 16  ;;  %9911 = vmatpush.bf16.msra.mxu0 %v13568_v53 }
 0x404   : > { %v5478_v13 = vsel %vm14226_vm5, %v12732_v7, %v5477_v24  ;;  %v382_v25 = vsel %vm15619_vm10, 0, %v381_v28  ;;  %v7684_v36 = vrot.slane %v7561_v6, 5  ;;  %v12899_v47 = vrot.slane %v7559_v44, 9  ;;  %v6393_v28 = vld [vmem:[#allocation2 + $0x80] sm:$0xf] }
 0x405   : > { %v6109_v16 = vsel %vm15675_vm14, %v6101_v48, %v6108_v12  ;;  %v6391_v39 = vsel %vm15588_vm8, %v6110_v0, %v6390_v31  ;;  %v5953_v35 = vpack.c.bf16 %v5917_v45, %v5917_v45  ;;  %383 = vst [vmem:[#allocation2 + $0x98] sm:$0x1] %v382_v25  ;;  %v6994_v60 = vor.u32 %v6993_v3, %v15990_v57  ;;  %v328_v31 = vld [vmem:[#allocation2 + $0xa0] sm:$0x1]  ;;  %v6816_v55 = vld [vmem:[#allocation2 + $0x70] sm:$0xf] }
 0x406   : > { %6389 = vst [vmem:[#allocation2 + $0x74] sm:$0xf] %v6109_v16  ;;  %v5670_v62 = vpop.f32.mrf.mxu0  ;;  %v7004_v24 = vor.u32 %v7003_v49, %v15994_v18  ;;  %v5481_v4 = vsel %vm14226_vm5, %v5479_v32, %v5480_v1  ;;  %v7685_v7 = vsel %vm14226_vm5, %v7683_v51, %v7684_v36  ;;  %v5533_v20 = vunpack.c.l.b16 %v5478_v13 }
 0x407   : > { %6392 = vst [vmem:[#allocation2 + $0x78] sm:$0x1] %v6391_v39  ;;  %v6112_v33 = vshrl.u32 %v5953_v35, 16  ;;  %v5771_v38 = vadd.f32 %v5670_v62, %v15986_v43  ;;  %v7682_v61 = vsel %vm14226_vm5, %v12899_v47, %v7681_v2  ;;  %v7009_v56 = vrot.slane %v7007_v22, 5  ;;  %v16030_v34 = vpop.f32.mrf.mxu3  ;;  %v6397_v62 = vld [vmem:[#allocation2 + $0x88] sm:$0x1] }
 0x408   : > { %v7005_v40 = vrot.slane %v7004_v24, 4  ;;  %v329_v57 = vsel %vm15588_vm8, 0, %v328_v31  ;;  %v6115_v11 = vshll.u32 %v5953_v35, 16  ;;  %v5534_v43 = vunpack.c.l.b16 %v5481_v4  ;;  %v384_v31 = vld [vmem:[#allocation2 + $0xa8] sm:$0x1] }
 0x409   : > { %v16017_v3 = vrot.slane %v6112_v33, 7  ;;  %v5882_v10 = vadd.f32 %v15914_v52, %v5771_v38  ;;  %330 = vst [vmem:[#allocation2 + $0xa0] sm:$0x1] %v329_v57  ;;  %v7779_v5 = vunpack.c.l.b16 %v7685_v7  ;;  %v6995_v2 = vrot.slane %v6994_v60, 4 }
 0x40a   : > { %v7010_v48 = vsel %vm14133_vm2, %v7005_v40, %v7009_v56  ;;  %v5194_v6 = vadd.f32 %v15645_v8, %v15467_v54  ;;  %v7778_v12 = vunpack.c.l.b16 %v7682_v61  ;;  %v7012_v45 = vshrl.u32 %v6816_v55, 16 }
 0x40b   : > { %v6117_v32 = vor.u32 %v6115_v11, %v16017_v3  ;;  %v5918_v1 = vmax.f32 %v5882_v10, 0.0  ;;  %v7000_v0 = vsel %vm14133_vm2, %v6995_v2, %v15994_v18  ;;  %v7015_v44 = vshll.u32 %v6816_v55, 16 }
 0x40c   : > { %v7257_v49 = vunpack.c.l.b16 %v7010_v48  ;;  %v5552_v22 = vpack.c.b16 %v5534_v43, %v5533_v20  ;;  %v4365_v8 = vadd.f32 %v15439_v58, %v3945_v42  ;;  %v7804_v53 = vpack.c.b16 %v7779_v5, %v7778_v12  ;;  %v7562_v5 = vld [vmem:[#allocation2 + $0x70] sm:$0xe] }
 0x40d   : > { %v6394_v17 = vsel %vm15660_vm12, %v6117_v32, %v6393_v28  ;;  %v5954_v51 = vpack.c.bf16 %v5918_v1, %v5918_v1  ;;  %v16034_v13 = vld [vmem:[#allocation2 + $0x74] sm:$0xf]  ;;  %v7256_v35 = vunpack.c.l.b16 %v7000_v0  ;;  %v7014_v47 = vrot.slane %v7012_v45, 4 }
 0x40e   : > { %v6817_v54 = vld [vmem:[#allocation2 + $0x74] sm:$0xf]  ;;  %6395 = vst [vmem:[#allocation2 + $0x80] sm:$0xf] %v6394_v17  ;;  %v5673_v25 = vpop.f32.mrf.mxu0  ;;  %v7688_v36 = vrot.slane %v16034_v13, 5  ;;  %v7017_v60 = vrot.slane %v7015_v44, 5  ;;  %v5195_v28 = vadd.f32 %v15664_v59, %v4365_v8  ;;  %v16049_v17 = vpop.f32.mrf.mxu1 }
 0x40f   : > { %v13479_v16 = vld [vmem:[#allocation2 + $0x70] sm:$0xff]  ;;  %v6120_v18 = vshrl.u32 %v5954_v51, 16  ;;  %v5772_v39 = vadd.f32 %v5673_v25, %v5194_v6  ;;  %v7021_v24 = vshll.u32 %v6817_v54, 16  ;;  %v7025_v4 = vshrl.u32 %v6817_v54, 16  ;;  %v6818_v20 = vld [vmem:[#allocation2 + $0x78] sm:$0x1]  ;;  %v16047_v44 = vpop.f32.mrf.mxu3 }
 0x410   : > { %7916 = vmatmul.bf16.gmra.mxu3 %v7804_v53  ;;  %v6123_v38 = vshll.u32 %v5954_v51, 16  ;;  %v7282_v58 = vpack.c.b16 %v7257_v49, %v7256_v35  ;;  %v6118_v61 = vrot.slane %v16017_v3, 4  ;;  %v7564_v40 = vld [vmem:[#allocation2 + $0x78] sm:$0x1]  ;;  %v385_v11 = vsel %vm15619_vm10, 0, %v384_v31  ;;  %v17617_v31 = vld [vmem:[#allocation15_spill] sm:$0xff] }
 0x411   : > { %v6122_v33 = vrot.slane %v6120_v18, 7  ;;  %v5883_v7 = vadd.f32 %v15914_v52, %v5772_v39  ;;  %5712 = vmatmul.bf16.gmra.mxu0 %v5552_v22  ;;  %6717 = vmatmul.bf16.gmra.mxu1 %v13479_v16  ;;  %v7023_v56 = vrot.slane %v7021_v24, 5  ;;  %v7027_v57 = vrot.slane %v7025_v4, 4  ;;  %386 = vst [vmem:[#allocation2 + $0xa8] sm:$0x1] %v385_v11 }
 0x412   : > { %v7690_v42 = vrot.slane %v7688_v36, 4  ;;  %v7031_v48 = vshll.u32 %v6818_v20, 16  ;;  %v7691_v1 = vrot.slane %v7564_v40, 5  ;;  %v7018_v0 = vor.u32 %v7017_v60, %v7014_v47  ;;  %v331_v13 = vld [vmem:[#allocation2 + $0xb0] sm:$0x1] }
 0x413   : > { %v6125_v10 = vor.u32 %v6123_v38, %v6122_v33  ;;  %v6127_v43 = vrot.slane %v6122_v33, 4  ;;  %v5919_v55 = vmax.f32 %v5883_v7, 0.0  ;;  %7394 = vmatmul.bf16.gmra.mxu2 %v7282_v58  ;;  %v7028_v2 = vor.u32 %v7027_v57, %v7023_v56  ;;  %v17616_v20 = vld [vmem:[#allocation24_spill] sm:$0xff] }
 0x414   : > { %v12900_v49 = vrot.slane %v7562_v5, 9  ;;  %v7692_v22 = vsel %vm14226_vm5, %v7690_v42, %v7691_v1  ;;  %v7033_v54 = vrot.slane %v7031_v48, 5  ;;  %v332_v8 = vsel %vm15588_vm8, 0, %v331_v13  ;;  %v6404_v1 = vld [vmem:[#allocation2 + $0x98] sm:$0x1] }
 0x415   : > { %v6126_v3 = vsel %vm15675_vm14, %v6118_v61, %v6125_v10  ;;  %v6398_v6 = vsel %vm15588_vm8, %v6127_v43, %v6397_v62  ;;  %v5955_v32 = vpack.c.bf16 %v5919_v55, %v5919_v55  ;;  %v7029_v45 = vrot.slane %v7028_v2, 4  ;;  %333 = vst [vmem:[#allocation2 + $0xb0] sm:$0x1] %v332_v8  ;;  %v6819_v39 = vld [vmem:[#allocation2 + $0x80] sm:$0xf] }
 0x416   : > { %6396 = vst [vmem:[#allocation2 + $0x84] sm:$0xf] %v6126_v3  ;;  %v5675_v12 = vpop.f32.mrf.mxu0  ;;  %v7689_v18 = vsel %vm14226_vm5, %v12900_v49, %v7688_v36  ;;  %v3947_v35 = vadd.f32 %v15469_v37, %v15493_v19  ;;  %v6400_v62 = vld [vmem:[#allocation2 + $0x90] sm:$0xf]  ;;  %v7781_v47 = vunpack.c.l.b16 %v7692_v22  ;;  %v7019_v60 = vrot.slane %v7018_v0, 4  ;;  %v17618_v10 = vld [vmem:[#allocation22_spill] sm:$0xff] }
 0x417   : > { %6399 = vst [vmem:[#allocation2 + $0x88] sm:$0x1] %v6398_v6  ;;  %v6129_v59 = vshrl.u32 %v5955_v32, 16  ;;  %v5773_v51 = vadd.f32 %v5675_v12, %v5195_v28  ;;  %v6132_v53 = vshll.u32 %v5955_v32, 16  ;;  %v7034_v24 = vsel %vm14133_vm2, %v7029_v45, %v7033_v54  ;;  %v13552_v3 = vld [vmem:[#allocation2 + $0x20] sm:$0xff]  ;;  %v13539_v32 = vld [vmem:[#allocation9 + $0x118] sm:$0xff]  ;;  %v16077_v49 = vpop.f32.mrf.mxu3 }
 0x418   : > { %v7780_v38 = vunpack.c.l.b16 %v7689_v18  ;;  %v7024_v7 = vsel %vm14133_vm2, %v7019_v60, %v7023_v56  ;;  %v7036_v58 = vshrl.u32 %v6819_v39, 16  ;;  %v7039_v36 = vshll.u32 %v6819_v39, 16  ;;  %9007 = vmatpush.bf16.msrb.mxu2 %v13539_v32 }
 0x419   : > { %v16055_v25 = vrot.slane %v6129_v59, 7  ;;  %v5884_v16 = vadd.f32 %v15914_v52, %v5773_v51  ;;  %v5196_v61 = vadd.f32 %v17617_v31, %v17616_v20  ;;  %v7259_v40 = vunpack.c.l.b16 %v7034_v24  ;;  %v13531_v51 = vld [vmem:[#allocation9 + $0xd8] sm:$0xff] }
 0x41a   : > { %v4367_v43 = vadd.f32 %v17618_v10, %v3947_v35  ;;  %v7805_v42 = vpack.c.b16 %v7781_v47, %v7780_v38  ;;  %v7258_v48 = vunpack.c.l.b16 %v7024_v7  ;;  %v7038_v12 = vrot.slane %v7036_v58, 4  ;;  %8261 = vmatpush.bf16.msrb.mxu1 %v13531_v51  ;;  %v17619_v38 = vld [vmem:[#allocation44_spill] sm:$0xff]  ;;  %v7565_v58 = vld [vmem:[#allocation2 + $0x80] sm:$0xe] }
 0x41b   : > { %v6134_v4 = vor.u32 %v6132_v53, %v16055_v25  ;;  %v5920_v33 = vmax.f32 %v5884_v16, 0.0  ;;  %v7041_v0 = vrot.slane %v7039_v36, 5  ;;  %v387_v16 = vld [vmem:[#allocation2 + $0xb8] sm:$0x1]  ;;  %v6135_v18 = vrot.slane %v16055_v25, 4 }
 0x41c   : > { %v7283_v8 = vpack.c.b16 %v7259_v40, %v7258_v48  ;;  %v388_v47 = vsel %vm15619_vm10, 0, %v387_v16  ;;  %v5197_v7 = vadd.f32 %v17619_v38, %v4367_v43  ;;  %v6407_v51 = vld [vmem:[#allocation2 + $0xa0] sm:$0xf] }
 0x41d   : > { %v6401_v37 = vsel %vm15660_vm12, %v6134_v4, %v6400_v62  ;;  %v5956_v19 = vpack.c.bf16 %v5920_v33, %v5920_v33  ;;  %v16071_v57 = vld [vmem:[#allocation2 + $0x84] sm:$0xf]  ;;  %389 = vst [vmem:[#allocation2 + $0xb8] sm:$0x1] %v388_v47  ;;  %v7042_v40 = vor.u32 %v7041_v0, %v7038_v12  ;;  %v17620_v0 = vld [vmem:[#allocation29_spill] sm:$0xff] }
 0x41e   : > { %v6820_v11 = vld [vmem:[#allocation2 + $0x84] sm:$0xf]  ;;  %6402 = vst [vmem:[#allocation2 + $0x90] sm:$0xf] %v6401_v37  ;;  %v5678_v55 = vpop.f32.mrf.mxu0  ;;  %v16074_v2 = vpop.f32.mrf.mxu1  ;;  %v7695_v6 = vrot.slane %v16071_v57, 5 }
 0x41f   : > { %v13480_v28 = vld [vmem:[#allocation2 + $0x80] sm:$0xff]  ;;  %v6137_v56 = vshrl.u32 %v5956_v19, 16  ;;  %v5774_v5 = vadd.f32 %v5678_v55, %v5196_v61  ;;  %v7045_v45 = vshll.u32 %v6820_v11, 16  ;;  %v7049_v59 = vshrl.u32 %v6820_v11, 16  ;;  %v6821_v53 = vld [vmem:[#allocation2 + $0x88] sm:$0x1] }
 0x420   : > { %7921 = vmatmul.bf16.gmra.mxu3 %v7805_v42  ;;  %v6140_v13 = vshll.u32 %v5956_v19, 16  ;;  %v7567_v39 = vld [vmem:[#allocation2 + $0x88] sm:$0x1]  ;;  %v7697_v33 = vrot.slane %v7695_v6, 4  ;;  %v7055_v36 = vshll.u32 %v6821_v53, 16  ;;  %v12901_v55 = vrot.slane %v7565_v58, 9 }
 0x421   : > { %v6139_v22 = vrot.slane %v6137_v56, 7  ;;  %v5885_v54 = vadd.f32 %v15914_v52, %v5774_v5  ;;  %9912 = vmatmul.bf16.vlgmr.msra.gmra.mxu0 %v13552_v3  ;;  %6722 = vmatmul.bf16.gmra.mxu1 %v13480_v28  ;;  %v16081_v35 = vrot.slane %v7045_v45, 5  ;;  %v7051_v62 = vrot.slane %v7049_v59, 4  ;;  %v334_v28 = vld [vmem:[#allocation2 + $0xc0] sm:$0x1]  ;;  %v17621_v45 = vld [vmem:[#allocation25_spill] sm:$0xff] }
 0x422   : > { %v7698_v37 = vrot.slane %v7567_v39, 5  ;;  %v7057_v56 = vrot.slane %v7055_v36, 5  ;;  %v335_v5 = vsel %vm15588_vm8, 0, %v334_v28  ;;  %v3949_v59 = vadd.f32 %v17621_v45, %v17620_v0  ;;  %v17622_v47 = vld [vmem:[#allocation26_spill] sm:$0xff] }
 0x423   : > { %v6142_v60 = vor.u32 %v6140_v13, %v6139_v22  ;;  %v6144_v24 = vrot.slane %v6139_v22, 4  ;;  %v5921_v4 = vmax.f32 %v5885_v54, 0.0  ;;  %7399 = vmatmul.bf16.gmra.mxu2 %v7283_v8  ;;  %v7052_v25 = vor.u32 %v7051_v62, %v16081_v35  ;;  %336 = vst [vmem:[#allocation2 + $0xc0] sm:$0x1] %v335_v5  ;;  %v16106_v8 = vpop.f32.mrf.mxu3 }
 0x424   : > { %v7699_v42 = vsel %vm14226_vm5, %v7697_v33, %v7698_v37  ;;  %v7043_v13 = vrot.slane %v7042_v40, 4 }
 0x425   : > { %v6143_v20 = vsel %vm15675_vm14, %v6135_v18, %v6142_v60  ;;  %v6405_v31 = vsel %vm15588_vm8, %v6144_v24, %v6404_v1  ;;  %v5957_v61 = vpack.c.bf16 %v5921_v4, %v5921_v4  ;;  %v7053_v57 = vrot.slane %v7052_v25, 4  ;;  %v6822_v12 = vld [vmem:[#allocation2 + $0x90] sm:$0xf]  ;;  %v17623_v60 = vld [vmem:[#allocation46_spill] sm:$0xff]  ;;  %v17624_v25 = vld [vmem:[#allocation23_spill] sm:$0xff] }
 0x426   : > { %6403 = vst [vmem:[#allocation2 + $0x94] sm:$0xf] %v6143_v20  ;;  %v5680_v19 = vpop.f32.mrf.mxu0  ;;  %v16091_v43 = vpop.f32.mrf.mxu1  ;;  %v7696_v1 = vsel %vm14226_vm5, %v12901_v55, %v7695_v6  ;;  %v7783_v22 = vunpack.c.l.b16 %v7699_v42  ;;  %v7048_v6 = vsel %vm14133_vm2, %v7043_v13, %v16081_v35  ;;  %v7060_v39 = vshrl.u32 %v6822_v12, 16  ;;  %v6411_v55 = vld [vmem:[#allocation2 + $0xa8] sm:$0x1] }
 0x427   : > { %6406 = vst [vmem:[#allocation2 + $0x98] sm:$0x1] %v6405_v31  ;;  %v6146_v11 = vshrl.u32 %v5957_v61, 16  ;;  %v5775_v10 = vadd.f32 %v5680_v19, %v5197_v7  ;;  %v6149_v3 = vshll.u32 %v5957_v61, 16  ;;  %v7058_v54 = vsel %vm14133_vm2, %v7053_v57, %v7057_v56  ;;  %v16119_v20 = vpop.f32.mrf.mxu2  ;;  %v7568_v0 = vld [vmem:[#allocation2 + $0x90] sm:$0xe] }
 0x428   : > { %v7782_v18 = vunpack.c.l.b16 %v7696_v1  ;;  %v7063_v62 = vshll.u32 %v6822_v12, 16  ;;  %v5198_v24 = vadd.f32 %v17623_v60, %v17622_v47  ;;  %v7261_v38 = vunpack.c.l.b16 %v7058_v54  ;;  %v17625_v47 = vld [vmem:[#allocation16_spill] sm:$0xff] }
 0x429   : > { %v16097_v48 = vrot.slane %v6146_v11, 7  ;;  %v5886_v32 = vadd.f32 %v15914_v52, %v5775_v10  ;;  %v4369_v36 = vadd.f32 %v17624_v25, %v3949_v59  ;;  %v7260_v57 = vunpack.c.l.b16 %v7048_v6  ;;  %v13553_v11 = vld [vmem:[#allocation2 + $0x30] sm:$0xff]  ;;  %v390_v59 = vld [vmem:[#allocation2 + $0xc8] sm:$0x1] }
 0x42a   : > { %v7806_v35 = vpack.c.b16 %v7783_v22, %v7782_v18  ;;  %v7062_v42 = vrot.slane %v7060_v39, 4  ;;  %v7065_v28 = vrot.slane %v7063_v62, 5 }
 0x42b   : > { %v6151_v53 = vor.u32 %v6149_v3, %v16097_v48  ;;  %v5922_v16 = vmax.f32 %v5886_v32, 0.0  ;;  %v7284_v12 = vpack.c.b16 %v7261_v38, %v7260_v57  ;;  %v5199_v60 = vadd.f32 %v17625_v47, %v4369_v36  ;;  %v17628_v47 = vld [vmem:[#allocation30_spill] sm:$0xff] }
 0x42d   : > { %v6408_v4 = vsel %vm15660_vm12, %v6151_v53, %v6407_v51  ;;  %v5958_v33 = vpack.c.bf16 %v5922_v16, %v5922_v16  ;;  %v16116_v7 = vld [vmem:[#allocation2 + $0x94] sm:$0xf]  ;;  %v6152_v51 = vrot.slane %v16097_v48, 4  ;;  %v391_v53 = vsel %vm15619_vm10, 0, %v390_v59  ;;  %v6414_v59 = vld [vmem:[#allocation2 + $0xb0] sm:$0xf] }
 0x42e   : > { %v6823_v58 = vld [vmem:[#allocation2 + $0x94] sm:$0xf]  ;;  %6409 = vst [vmem:[#allocation2 + $0xa0] sm:$0xf] %v6408_v4  ;;  %v5683_v31 = vpop.f32.mrf.mxu0  ;;  %v16121_v40 = vpop.f32.mrf.mxu1  ;;  %v7702_v10 = vrot.slane %v16116_v7, 5 }
 0x42f   : > { %v13481_v61 = vld [vmem:[#allocation2 + $0x90] sm:$0xff]  ;;  %v6154_v37 = vshrl.u32 %v5958_v33, 16  ;;  %v5776_v19 = vadd.f32 %v5683_v31, %v5198_v24  ;;  %v7069_v56 = vshll.u32 %v6823_v58, 16  ;;  %v7073_v5 = vshrl.u32 %v6823_v58, 16  ;;  %v6824_v45 = vld [vmem:[#allocation2 + $0x98] sm:$0x1] }
 0x430   : > { %7926 = vmatmul.bf16.gmra.mxu3 %v7806_v35  ;;  %v6157_v32 = vshll.u32 %v5958_v33, 16  ;;  %v7570_v22 = vld [vmem:[#allocation2 + $0x98] sm:$0x1]  ;;  %v7704_v62 = vrot.slane %v7702_v10, 4  ;;  %392 = vst [vmem:[#allocation2 + $0xc8] sm:$0x1] %v391_v53  ;;  %v7066_v24 = vor.u32 %v7065_v28, %v7062_v42 }
 0x431   : > { %v6156_v3 = vrot.slane %v6154_v37, 7  ;;  %v5887_v1 = vadd.f32 %v15914_v52, %v5776_v19  ;;  %9917 = vmatmul.bf16.gmra.mxu0 %v13553_v11  ;;  %6727 = vmatmul.bf16.gmra.mxu1 %v13481_v61  ;;  %v7071_v13 = vrot.slane %v7069_v56, 5  ;;  %v7075_v54 = vrot.slane %v7073_v5, 4  ;;  %v337_v42 = vld [vmem:[#allocation2 + $0xd0] sm:$0x1] }
 0x432   : > { %v7079_v48 = vshll.u32 %v6824_v45, 16  ;;  %v7705_v58 = vrot.slane %v7570_v22, 5  ;;  %v12902_v35 = vrot.slane %v7568_v0, 9  ;;  %v338_v56 = vsel %vm15588_vm8, 0, %v337_v42  ;;  %v17627_v0 = vld [vmem:[#allocation27_spill] sm:$0xff] }
 0x433   : > { %v6159_v16 = vor.u32 %v6157_v32, %v6156_v3  ;;  %v6161_v18 = vrot.slane %v6156_v3, 4  ;;  %v5923_v6 = vmax.f32 %v5887_v1, 0.0  ;;  %7404 = vmatmul.bf16.gmra.mxu2 %v7284_v12  ;;  %v16128_v39 = vpop.f32.mrf.mxu3  ;;  %v7076_v4 = vor.u32 %v7075_v54, %v7071_v13  ;;  %339 = vst [vmem:[#allocation2 + $0xd0] sm:$0x1] %v338_v56  ;;  %v17626_v12 = vld [vmem:[#allocation31_spill] sm:$0xff] }
 0x434   : > { %v7706_v11 = vsel %vm14226_vm5, %v7704_v62, %v7705_v58  ;;  %v7081_v28 = vrot.slane %v7079_v48, 5  ;;  %v3951_v45 = vadd.f32 %v17627_v0, %v17626_v12  ;;  %v17630_v58 = vld [vmem:[#allocation28_spill] sm:$0xff] }
 0x435   : > { %v6160_v33 = vsel %vm15675_vm14, %v6152_v51, %v6159_v16  ;;  %v6412_v38 = vsel %vm15588_vm8, %v6161_v18, %v6411_v55  ;;  %v5959_v7 = vpack.c.bf16 %v5923_v6, %v5923_v6  ;;  %v7077_v61 = vrot.slane %v7076_v4, 4  ;;  %v6825_v1 = vld [vmem:[#allocation2 + $0xa0] sm:$0xf] }
 0x436   : > { %6410 = vst [vmem:[#allocation2 + $0xa4] sm:$0xf] %v6160_v33  ;;  %v7365_v25 = vpop.f32.mrf.mxu2  ;;  %v5685_v31 = vpop.f32.mrf.mxu0  ;;  %v7067_v55 = vrot.slane %v7066_v24, 4  ;;  %v7785_v51 = vunpack.c.l.b16 %v7706_v11  ;;  %v7087_v62 = vshll.u32 %v6825_v1, 16 }
 0x437   : > { %6413 = vst [vmem:[#allocation2 + $0xa8] sm:$0x1] %v6412_v38  ;;  %v6163_v37 = vshrl.u32 %v5959_v7, 16  ;;  %v16136_v36 = vadd.f32 %v7365_v25, %v16074_v2  ;;  %v5777_v19 = vadd.f32 %v5685_v31, %v5199_v60  ;;  %v16138_v57 = vpop.f32.mrf.mxu1  ;;  %v6166_v3 = vshll.u32 %v5959_v7, 16  ;;  %v17629_v60 = vld [vmem:[#allocation42_spill] sm:$0xff] }
 0x438   : > { %v7703_v2 = vsel %vm14226_vm5, %v12902_v35, %v7702_v10  ;;  %v7082_v22 = vsel %vm14133_vm2, %v7077_v61, %v7081_v28  ;;  %v7072_v18 = vsel %vm14133_vm2, %v7067_v55, %v7071_v13  ;;  %v7084_v10 = vshrl.u32 %v6825_v1, 16  ;;  %v13554_v28 = vld [vmem:[#allocation2 + $0x40] sm:$0xff]  ;;  %v6418_v1 = vld [vmem:[#allocation2 + $0xb8] sm:$0x1] }
 0x439   : > { %v16144_v5 = vrot.slane %v6163_v37, 7  ;;  %v5888_v32 = vadd.f32 %v15914_v52, %v5777_v19  ;;  %v7784_v6 = vunpack.c.l.b16 %v7703_v2  ;;  %v5200_v24 = vadd.f32 %v17629_v60, %v17628_v47 }
 0x43a   : > { %v7263_v33 = vunpack.c.l.b16 %v7082_v22  ;;  %v4371_v25 = vadd.f32 %v17630_v58, %v3951_v45  ;;  %v7262_v61 = vunpack.c.l.b16 %v7072_v18  ;;  %v7086_v12 = vrot.slane %v7084_v10, 4  ;;  %v393_v18 = vld [vmem:[#allocation2 + $0xd8] sm:$0x1] }
 0x43b   : > { %v6168_v54 = vor.u32 %v6166_v3, %v16144_v5  ;;  %v5924_v53 = vmax.f32 %v5888_v32, 0.0  ;;  %v16154_v16 = vpop.f32.mrf.mxu3  ;;  %v7807_v13 = vpack.c.b16 %v7785_v51, %v7784_v6  ;;  %v13538_v3 = vld [vmem:[#allocation9 + $0x110] sm:$0xff]  ;;  %v7089_v0 = vrot.slane %v7087_v62, 5 }
 0x43c   : > { %v13530_v32 = vld [vmem:[#allocation9 + $0xd0] sm:$0xff]  ;;  %v7285_v22 = vpack.c.b16 %v7263_v33, %v7262_v61  ;;  %9008 = vmatpush.bf16.msrb.mxu2 %v13538_v3  ;;  %v6169_v6 = vrot.slane %v16144_v5, 4  ;;  %v394_v10 = vsel %vm15619_vm10, 0, %v393_v18  ;;  %v5201_v33 = vadd.f32 %v15805_v26, %v4371_v25 }
 0x43d   : > { %v6415_v4 = vsel %vm15660_vm12, %v6168_v54, %v6414_v59  ;;  %v5960_v48 = vpack.c.bf16 %v5924_v53, %v5924_v53  ;;  %v16162_v38 = vld [vmem:[#allocation2 + $0xa4] sm:$0xf]  ;;  %8262 = vmatpush.bf16.msrb.mxu1 %v13530_v32  ;;  %395 = vst [vmem:[#allocation2 + $0xd8] sm:$0x1] %v394_v10  ;;  %v17632_v18 = vld [vmem:[#allocation32_spill] sm:$0xff] }
 0x43e   : > { %v6826_v7 = vld [vmem:[#allocation2 + $0xa4] sm:$0xf]  ;;  %6416 = vst [vmem:[#allocation2 + $0xb0] sm:$0xf] %v6415_v4  ;;  %v7367_v31 = vpop.f32.mrf.mxu2  ;;  %v5688_v35 = vpop.f32.mrf.mxu0  ;;  %v7709_v56 = vrot.slane %v16162_v38, 5  ;;  %v7090_v38 = vor.u32 %v7089_v0, %v7086_v12 }
 0x43f   : > { %v13482_v37 = vld [vmem:[#allocation2 + $0xa0] sm:$0xff]  ;;  %v6171_v19 = vshrl.u32 %v5960_v48, 16  ;;  %v16166_v11 = vadd.f32 %v7367_v31, %v16091_v43  ;;  %v5778_v42 = vadd.f32 %v5688_v35, %v5200_v24  ;;  %v16168_v55 = vpop.f32.mrf.mxu1  ;;  %v6174_v2 = vshll.u32 %v5960_v48, 16  ;;  %v6827_v54 = vld [vmem:[#allocation2 + $0xa8] sm:$0x1] }
 0x440   : > { %7931 = vmatmul.bf16.gmra.mxu3 %v7807_v13  ;;  %v7093_v45 = vshll.u32 %v6826_v7, 16  ;;  %v7571_v43 = vld [vmem:[#allocation2 + $0xa0] sm:$0xe]  ;;  %v7097_v53 = vshrl.u32 %v6826_v7, 16  ;;  %v7573_v47 = vld [vmem:[#allocation2 + $0xa8] sm:$0x1] }
 0x441   : > { %v6173_v59 = vrot.slane %v6171_v19, 7  ;;  %v5889_v51 = vadd.f32 %v15914_v52, %v5778_v42  ;;  %9922 = vmatmul.bf16.gmra.mxu0 %v13554_v28  ;;  %6732 = vmatmul.bf16.gmra.mxu1 %v13482_v37  ;;  %v7711_v48 = vrot.slane %v7709_v56, 4  ;;  %v7103_v7 = vshll.u32 %v6827_v54, 16 }
 0x442   : > { %v16173_v60 = vrot.slane %v7093_v45, 5  ;;  %v7099_v5 = vrot.slane %v7097_v53, 4  ;;  %v7712_v13 = vrot.slane %v7573_v47, 5  ;;  %v12903_v19 = vrot.slane %v7571_v43, 9  ;;  %v17631_v53 = vld [vmem:[#allocation35_spill] sm:$0xff] }
 0x443   : > { %v6176_v62 = vor.u32 %v6174_v2, %v6173_v59  ;;  %v6178_v24 = vrot.slane %v6173_v59, 4  ;;  %v5925_v4 = vmax.f32 %v5889_v51, 0.0  ;;  %7409 = vmatmul.bf16.gmra.mxu2 %v7285_v22  ;;  %v16177_v52 = vpop.f32.mrf.mxu3  ;;  %v340_v2 = vld [vmem:[#allocation2 + $0xe0] sm:$0x1]  ;;  %v7105_v0 = vrot.slane %v7103_v7, 5 }
 0x444   : > { %v7100_v42 = vor.u32 %v7099_v5, %v16173_v60  ;;  %v7713_v32 = vsel %vm14226_vm5, %v7711_v48, %v7712_v13  ;;  %v341_v45 = vsel %vm15588_vm8, 0, %v340_v2  ;;  %v7710_v43 = vsel %vm14226_vm5, %v12903_v19, %v7709_v56  ;;  %v6421_v47 = vld [vmem:[#allocation2 + $0xc0] sm:$0xf]  ;;  %v17634_v19 = vld [vmem:[#allocation33_spill] sm:$0xff] }
 0x445   : > { %v6177_v58 = vsel %vm15675_vm14, %v6169_v6, %v6176_v62  ;;  %v6419_v31 = vsel %vm15588_vm8, %v6178_v24, %v6418_v1  ;;  %v5961_v35 = vpack.c.bf16 %v5925_v4, %v5925_v4  ;;  %v7091_v1 = vrot.slane %v7090_v38, 4  ;;  %342 = vst [vmem:[#allocation2 + $0xe0] sm:$0x1] %v341_v45  ;;  %v6828_v54 = vld [vmem:[#allocation2 + $0xb0] sm:$0xf] }
 0x446   : > { %6417 = vst [vmem:[#allocation2 + $0xb4] sm:$0xf] %v6177_v58  ;;  %v7370_v61 = vpop.f32.mrf.mxu2  ;;  %v5690_v37 = vpop.f32.mrf.mxu0  ;;  %v7101_v12 = vrot.slane %v7100_v42, 4  ;;  %v3953_v6 = vadd.f32 %v17632_v18, %v17631_v53  ;;  %v7787_v10 = vunpack.c.l.b16 %v7713_v32  ;;  %v7786_v56 = vunpack.c.l.b16 %v7710_v43  ;;  %v17633_v58 = vld [vmem:[#allocation34_spill] sm:$0xff]  ;;  %v13555_v45 = vld [vmem:[#allocation2 + $0x50] sm:$0xff] }
 0x447   : > { %6420 = vst [vmem:[#allocation2 + $0xb8] sm:$0x1] %v6419_v31  ;;  %v6180_v28 = vshrl.u32 %v5961_v35, 16  ;;  %v16186_v26 = vadd.f32 %v7370_v61, %v16121_v40  ;;  %v5779_v25 = vadd.f32 %v5690_v37, %v5201_v33  ;;  %v16188_v3 = vpop.f32.mrf.mxu1  ;;  %v6183_v51 = vshll.u32 %v5961_v35, 16  ;;  %v16199_v40 = vld [vmem:[%s17442_s2] ss:$0 sm:$0xff] }
 0x448   : > { %v7106_v62 = vsel %vm14133_vm2, %v7101_v12, %v7105_v0  ;;  %v7096_v33 = vsel %vm14133_vm2, %v7091_v1, %v16173_v60  ;;  %v7108_v5 = vshrl.u32 %v6828_v54, 16  ;;  %v7111_v7 = vshll.u32 %v6828_v54, 16  ;;  %v6425_v43 = vld [vmem:[#allocation2 + $0xc8] sm:$0x1] }
 0x449   : > { %v16194_v59 = vrot.slane %v6180_v28, 7  ;;  %v5890_v22 = vadd.f32 %v16199_v40, %v5779_v25  ;;  %v7265_v38 = vunpack.c.l.b16 %v7106_v62  ;;  %v5202_v31 = vadd.f32 %v15835_v14, %v17633_v58 }
 0x44a   : > { %v4373_v42 = vadd.f32 %v17634_v19, %v3953_v6  ;;  %v7808_v60 = vpack.c.b16 %v7787_v10, %v7786_v56  ;;  %v7264_v32 = vunpack.c.l.b16 %v7096_v33  ;;  %v7110_v53 = vrot.slane %v7108_v5, 4 }
 0x44b   : > { %v6185_v24 = vor.u32 %v6183_v51, %v16194_v59  ;;  %v5926_v4 = vmax.f32 %v5890_v22, 0.0  ;;  %v16209_v48 = vpop.f32.mrf.mxu3  ;;  %v396_v22 = vld [vmem:[#allocation2 + $0xe8] sm:$0x1]  ;;  %v7113_v18 = vrot.slane %v7111_v7, 5  ;;  %v6186_v33 = vrot.slane %v16194_v59, 4 }
 0x44c   : > { %v7286_v54 = vpack.c.b16 %v7265_v38, %v7264_v32 }
 0x44d   : > { %v6422_v35 = vsel %vm15660_vm12, %v6185_v24, %v6421_v47  ;;  %v5962_v13 = vpack.c.bf16 %v5926_v4, %v5926_v4  ;;  %v16218_v61 = vld [vmem:[#allocation2 + $0xb4] sm:$0xf]  ;;  %v7114_v19 = vor.u32 %v7113_v18, %v7110_v53  ;;  %v343_v18 = vld [vmem:[#allocation2 + $0xf0] sm:$0x1] }
 0x44e   : > { %v6829_v37 = vld [vmem:[#allocation2 + $0xb4] sm:$0xf]  ;;  %6423 = vst [vmem:[#allocation2 + $0xc0] sm:$0xf] %v6422_v35  ;;  %v7372_v28 = vpop.f32.mrf.mxu2  ;;  %v5693_v25 = vpop.f32.mrf.mxu0  ;;  %v7716_v51 = vrot.slane %v16218_v61, 5  ;;  %v5203_v61 = vadd.f32 %v15870_v41, %v4373_v42 }
 0x44f   : > { %v13483_v2 = vld [vmem:[#allocation2 + $0xb0] sm:$0xff]  ;;  %v6188_v1 = vshrl.u32 %v5962_v13, 16  ;;  %v16222_v12 = vadd.f32 %v7372_v28, %v16138_v57  ;;  %v5780_v14 = vadd.f32 %v5693_v25, %v5202_v31  ;;  %v16224_v0 = vpop.f32.mrf.mxu1  ;;  %v7117_v6 = vshll.u32 %v6829_v37, 16  ;;  %v6830_v24 = vld [vmem:[#allocation2 + $0xb8] sm:$0x1] }
 0x450   : > { %7936 = vmatmul.bf16.gmra.mxu3 %v7808_v60  ;;  %v6191_v10 = vshll.u32 %v5962_v13, 16  ;;  %v7574_v57 = vld [vmem:[#allocation2 + $0xb0] sm:$0xe]  ;;  %v7121_v4 = vshrl.u32 %v6829_v37, 16  ;;  %v7576_v56 = vld [vmem:[#allocation2 + $0xb8] sm:$0x1] }
 0x451   : > { %v6190_v47 = vrot.slane %v6188_v1, 7  ;;  %v5891_v62 = vadd.f32 %v16199_v40, %v5780_v14  ;;  %9927 = vmatmul.bf16.gmra.mxu0 %v13555_v45  ;;  %6737 = vmatmul.bf16.gmra.mxu1 %v13483_v2  ;;  %v7119_v58 = vrot.slane %v7117_v6, 5  ;;  %v397_v31 = vsel %vm15619_vm10, 0, %v396_v22 }
 0x452   : > { %v7718_v13 = vrot.slane %v7716_v51, 4  ;;  %398 = vst [vmem:[#allocation2 + $0xe8] sm:$0x1] %v397_v31  ;;  %v7123_v37 = vrot.slane %v7121_v4, 4  ;;  %v7127_v28 = vshll.u32 %v6830_v24, 16  ;;  %v7719_v32 = vrot.slane %v7576_v56, 5 }
 0x453   : > { %v6193_v38 = vor.u32 %v6191_v10, %v6190_v47  ;;  %v6195_v5 = vrot.slane %v6190_v47, 4  ;;  %v5927_v7 = vmax.f32 %v5891_v62, 0.0  ;;  %7414 = vmatmul.bf16.gmra.mxu2 %v7286_v54  ;;  %v16231_v35 = vpop.f32.mrf.mxu3  ;;  %v12904_v14 = vrot.slane %v7574_v57, 9  ;;  %v17636_v56 = vld [vmem:[#allocation36_spill] sm:$0xff] }
 0x454   : > { %v7124_v45 = vor.u32 %v7123_v37, %v7119_v58  ;;  %v7720_v53 = vsel %vm14226_vm5, %v7718_v13, %v7719_v32  ;;  %v7129_v47 = vrot.slane %v7127_v28, 5  ;;  %v344_v10 = vsel %vm15588_vm8, 0, %v343_v18 }
 0x455   : > { %v6194_v59 = vsel %vm15675_vm14, %v6186_v33, %v6193_v38  ;;  %v6426_v25 = vsel %vm15588_vm8, %v6195_v5, %v6425_v43  ;;  %v5963_v60 = vpack.c.bf16 %v5927_v7, %v5927_v7  ;;  %v7115_v43 = vrot.slane %v7114_v19, 4  ;;  %345 = vst [vmem:[#allocation2 + $0xf0] sm:$0x1] %v344_v10  ;;  %v6831_v4 = vld [vmem:[#allocation2 + $0xc0] sm:$0xf]  ;;  %v17635_v33 = vld [vmem:[#allocation39_spill] sm:$0xff] }
 0x456   : > { %6424 = vst [vmem:[#allocation2 + $0xc4] sm:$0xf] %v6194_v59  ;;  %v7375_v2 = vpop.f32.mrf.mxu2  ;;  %v5695_v1 = vpop.f32.mrf.mxu0  ;;  %v7125_v6 = vrot.slane %v7124_v45, 4  ;;  %v3955_v31 = vadd.f32 %v17636_v56, %v17635_v33  ;;  %v6428_v38 = vld [vmem:[#allocation2 + $0xd0] sm:$0xf]  ;;  %v7789_v5 = vunpack.c.l.b16 %v7720_v53  ;;  %v7135_v59 = vshll.u32 %v6831_v4, 16 }
 0x457   : > { %6427 = vst [vmem:[#allocation2 + $0xc8] sm:$0x1] %v6426_v25  ;;  %v6197_v22 = vshrl.u32 %v5963_v60, 16  ;;  %v16239_v41 = vadd.f32 %v7375_v2, %v16168_v55  ;;  %v5781_v42 = vadd.f32 %v5695_v1, %v5203_v61  ;;  %v16241_v54 = vpop.f32.mrf.mxu1  ;;  %v6200_v57 = vshll.u32 %v5963_v60, 16  ;;  %v17637_v25 = vld [vmem:[#allocation38_spill] sm:$0xff]  ;;  %v13529_v33 = vld [vmem:[#allocation9 + $0xc8] sm:$0xff] }
 0x458   : > { %v7717_v55 = vsel %vm14226_vm5, %v12904_v14, %v7716_v51  ;;  %v7130_v7 = vsel %vm14133_vm2, %v7125_v6, %v7129_v47  ;;  %v7120_v37 = vsel %vm14133_vm2, %v7115_v43, %v7119_v58  ;;  %v7132_v51 = vshrl.u32 %v6831_v4, 16  ;;  %v13537_v4 = vld [vmem:[#allocation9 + $0x108] sm:$0xff]  ;;  %8263 = vmatpush.bf16.msrb.mxu1 %v13529_v33 }
 0x459   : > { %v16247_v62 = vrot.slane %v6197_v22, 7  ;;  %v5892_v24 = vadd.f32 %v16199_v40, %v5781_v42  ;;  %v7788_v28 = vunpack.c.l.b16 %v7717_v55  ;;  %v5204_v60 = vadd.f32 %v15892_v63, %v17637_v25  ;;  %v17638_v22 = vld [vmem:[#allocation37_spill] sm:$0xff]  ;;  %9009 = vmatpush.bf16.msrb.mxu2 %v13537_v4 }
 0x45a   : > { %v7267_v1 = vunpack.c.l.b16 %v7130_v7  ;;  %v4375_v42 = vadd.f32 %v17638_v22, %v3955_v31  ;;  %v7266_v43 = vunpack.c.l.b16 %v7120_v37  ;;  %v6432_v31 = vld [vmem:[#allocation2 + $0xd8] sm:$0x1]  ;;  %v7137_v7 = vrot.slane %v7135_v59, 5 }
 0x45b   : > { %v6202_v13 = vor.u32 %v6200_v57, %v16247_v62  ;;  %v5928_v61 = vmax.f32 %v5892_v24, 0.0  ;;  %v16257_v19 = vpop.f32.mrf.mxu3  ;;  %v7809_v58 = vpack.c.b16 %v7789_v5, %v7788_v28  ;;  %v13556_v24 = vld [vmem:[#allocation2 + $0x60] sm:$0xff] }
 0x45c   : > { %v7287_v37 = vpack.c.b16 %v7267_v1, %v7266_v43 }
 0x45d   : > { %v6429_v32 = vsel %vm15660_vm12, %v6202_v13, %v6428_v38  ;;  %v5964_v2 = vpack.c.bf16 %v5928_v61, %v5928_v61  ;;  %v16265_v14 = vld [vmem:[#allocation2 + $0xc4] sm:$0xf]  ;;  %v7134_v38 = vrot.slane %v7132_v51, 4 }
 0x45e   : > { %v6832_v45 = vld [vmem:[#allocation2 + $0xc4] sm:$0xf]  ;;  %6430 = vst [vmem:[#allocation2 + $0xd0] sm:$0xf] %v6429_v32  ;;  %v7377_v53 = vpop.f32.mrf.mxu2  ;;  %v5698_v18 = vpop.f32.mrf.mxu0  ;;  %v7723_v55 = vrot.slane %v16265_v14, 5  ;;  %v6203_v32 = vrot.slane %v16247_v62, 4 }
 0x45f   : > { %v13484_v6 = vld [vmem:[#allocation2 + $0xc0] sm:$0xff]  ;;  %v6205_v47 = vshrl.u32 %v5964_v2, 16  ;;  %v16269_v10 = vadd.f32 %v7377_v53, %v16188_v3  ;;  %v5782_v63 = vadd.f32 %v5698_v18, %v5204_v60  ;;  %v16271_v57 = vpop.f32.mrf.mxu1  ;;  %v6208_v56 = vshll.u32 %v5964_v2, 16  ;;  %v6833_v28 = vld [vmem:[#allocation2 + $0xc8] sm:$0x1] }
 0x460   : > { %7941 = vmatmul.bf16.gmra.mxu3 %v7809_v58  ;;  %v7141_v5 = vshll.u32 %v6832_v45, 16  ;;  %v7577_v3 = vld [vmem:[#allocation2 + $0xc0] sm:$0xe]  ;;  %v7145_v25 = vshrl.u32 %v6832_v45, 16  ;;  %v399_v60 = vld [vmem:[#allocation2 + $0xf8] sm:$0x1]  ;;  %v5205_v45 = vadd.f32 %v15939_v29, %v4375_v42  ;;  %v7138_v58 = vor.u32 %v7137_v7, %v7134_v38 }
 0x461   : > { %v6207_v13 = vrot.slane %v6205_v47, 7  ;;  %v5893_v61 = vadd.f32 %v16199_v40, %v5782_v63  ;;  %9932 = vmatmul.bf16.gmra.mxu0 %v13556_v24  ;;  %6742 = vmatmul.bf16.gmra.mxu1 %v13484_v6  ;;  %v7579_v14 = vld [vmem:[#allocation2 + $0xc8] sm:$0x1]  ;;  %v400_v51 = vsel %vm15619_vm10, 0, %v399_v60  ;;  %v7725_v1 = vrot.slane %v7723_v55, 4 }
 0x462   : > { %v7143_v2 = vrot.slane %v7141_v5, 5  ;;  %401 = vst [vmem:[#allocation2 + $0xf8] sm:$0x1] %v400_v51  ;;  %v7147_v43 = vrot.slane %v7145_v25, 4  ;;  %v7151_v62 = vshll.u32 %v6833_v28, 16  ;;  %v7726_v24 = vrot.slane %v7579_v14, 5 }
 0x463   : > { %v6210_v59 = vor.u32 %v6208_v56, %v6207_v13  ;;  %v6212_v22 = vrot.slane %v6207_v13, 4  ;;  %v5929_v53 = vmax.f32 %v5893_v61, 0.0  ;;  %7419 = vmatmul.bf16.gmra.mxu2 %v7287_v37  ;;  %v16278_v18 = vpop.f32.mrf.mxu3  ;;  %v12905_v5 = vrot.slane %v7577_v3, 9  ;;  %v346_v61 = vld [vmem:[#allocation2 + $0x100] sm:$0x1]  ;;  %v17639_v51 = vld [vmem:[#allocation45_spill] sm:$0xff] }
 0x464   : > { %v7148_v13 = vor.u32 %v7147_v43, %v7143_v2  ;;  %v7727_v7 = vsel %vm14226_vm5, %v7725_v1, %v7726_v24  ;;  %v7153_v28 = vrot.slane %v7151_v62, 5  ;;  %v347_v25 = vsel %vm15588_vm8, 0, %v346_v61 }
 0x465   : > { %v6211_v6 = vsel %vm15675_vm14, %v6203_v32, %v6210_v59  ;;  %v6433_v47 = vsel %vm15588_vm8, %v6212_v22, %v6432_v31  ;;  %v5965_v63 = vpack.c.bf16 %v5929_v53, %v5929_v53  ;;  %v7139_v31 = vrot.slane %v7138_v58, 4  ;;  %348 = vst [vmem:[#allocation2 + $0x100] sm:$0x1] %v347_v25  ;;  %v6834_v14 = vld [vmem:[#allocation2 + $0xd0] sm:$0xf] }
 0x466   : > { %6431 = vst [vmem:[#allocation2 + $0xd4] sm:$0xf] %v6211_v6  ;;  %v7380_v4 = vpop.f32.mrf.mxu2  ;;  %v5700_v56 = vpop.f32.mrf.mxu0  ;;  %v7149_v37 = vrot.slane %v7148_v13, 4  ;;  %v17640_v59 = vld [vmem:[#allocation40_spill] sm:$0xff]  ;;  %v6435_v53 = vld [vmem:[#allocation2 + $0xe0] sm:$0xf]  ;;  %v7791_v1 = vunpack.c.l.b16 %v7727_v7 }
 0x467   : > { %6434 = vst [vmem:[#allocation2 + $0xd8] sm:$0x1] %v6433_v47  ;;  %v6214_v33 = vshrl.u32 %v5965_v63, 16  ;;  %v16286_v29 = vadd.f32 %v7380_v4, %v16224_v0  ;;  %v5783_v42 = vadd.f32 %v5700_v56, %v5205_v45  ;;  %v16288_v38 = vpop.f32.mrf.mxu1  ;;  %v6217_v60 = vshll.u32 %v5965_v63, 16  ;;  %v17641_v4 = vld [vmem:[#allocation43_spill] sm:$0xff]  ;;  %v17642_v7 = vld [vmem:[#allocation41_spill] sm:$0xff] }
 0x468   : > { %v7724_v0 = vsel %vm14226_vm5, %v12905_v5, %v7723_v55  ;;  %v3957_v22 = vadd.f32 %v17640_v59, %v17639_v51  ;;  %v7154_v45 = vsel %vm14133_vm2, %v7149_v37, %v7153_v28  ;;  %v7144_v6 = vsel %vm14133_vm2, %v7139_v31, %v7143_v2  ;;  %v402_v59 = vld [vmem:[#allocation2 + $0x108] sm:$0x1] }
 0x469   : > { %v16294_v3 = vrot.slane %v6214_v33, 7  ;;  %v5894_v32 = vadd.f32 %v16199_v40, %v5783_v42  ;;  %v7790_v47 = vunpack.c.l.b16 %v7724_v0  ;;  %v7269_v55 = vunpack.c.l.b16 %v7154_v45 }
 0x46a   : > { %v7156_v63 = vshrl.u32 %v6834_v14, 16  ;;  %v7159_v24 = vshll.u32 %v6834_v14, 16  ;;  %v5206_v56 = vadd.f32 %v15964_v30, %v17641_v4  ;;  %v4377_v61 = vadd.f32 %v17642_v7, %v3957_v22  ;;  %v13557_v14 = vld [vmem:[#allocation2 + $0x70] sm:$0xff] }
 0x46b   : > { %v6219_v58 = vor.u32 %v6217_v60, %v16294_v3  ;;  %v5930_v43 = vmax.f32 %v5894_v32, 0.0  ;;  %v16304_v62 = vpop.f32.mrf.mxu3  ;;  %v7810_v2 = vpack.c.b16 %v7791_v1, %v7790_v47  ;;  %v7268_v31 = vunpack.c.l.b16 %v7144_v6 }
 0x46c   : > { %v7158_v45 = vrot.slane %v7156_v63, 4 }
 0x46d   : > { %v6436_v5 = vsel %vm15660_vm12, %v6219_v58, %v6435_v53  ;;  %v5966_v13 = vpack.c.bf16 %v5930_v43, %v5930_v43  ;;  %v16312_v33 = vld [vmem:[#allocation2 + $0xd4] sm:$0xf]  ;;  %v6439_v53 = vld [vmem:[#allocation2 + $0xe8] sm:$0x1]  ;;  %v7288_v22 = vpack.c.b16 %v7269_v55, %v7268_v31  ;;  %v7161_v58 = vrot.slane %v7159_v24, 5 }
 0x46e   : > { %v6835_v42 = vld [vmem:[#allocation2 + $0xd4] sm:$0xf]  ;;  %6437 = vst [vmem:[#allocation2 + $0xe0] sm:$0xf] %v6436_v5  ;;  %v7382_v37 = vpop.f32.mrf.mxu2  ;;  %v5703_v28 = vpop.f32.mrf.mxu0  ;;  %v7730_v51 = vrot.slane %v16312_v33, 5  ;;  %v6220_v5 = vrot.slane %v16294_v3, 4 }
 0x46f   : > { %v13485_v25 = vld [vmem:[#allocation2 + $0xd0] sm:$0xff]  ;;  %v6222_v60 = vshrl.u32 %v5966_v13, 16  ;;  %v16316_v32 = vadd.f32 %v7382_v37, %v16241_v54  ;;  %v5784_v30 = vadd.f32 %v5703_v28, %v5206_v56  ;;  %v16318_v0 = vpop.f32.mrf.mxu1  ;;  %v7165_v43 = vshll.u32 %v6835_v42, 16  ;;  %v6836_v4 = vld [vmem:[#allocation2 + $0xd8] sm:$0x1] }
 0x470   : > { %7946 = vmatmul.bf16.gmra.mxu3 %v7810_v2  ;;  %v6225_v6 = vshll.u32 %v5966_v13, 16  ;;  %v7580_v54 = vld [vmem:[#allocation2 + $0xd0] sm:$0xe]  ;;  %v7169_v56 = vshrl.u32 %v6835_v42, 16  ;;  %v7582_v7 = vld [vmem:[#allocation2 + $0xd8] sm:$0x1]  ;;  %v5207_v2 = vadd.f32 %v15996_v9, %v4377_v61  ;;  %v7162_v42 = vor.u32 %v7161_v58, %v7158_v45 }
 0x471   : > { %v6224_v1 = vrot.slane %v6222_v60, 7  ;;  %v5895_v47 = vadd.f32 %v16199_v40, %v5784_v30  ;;  %9937 = vmatmul.bf16.gmra.mxu0 %v13557_v14  ;;  %6747 = vmatmul.bf16.gmra.mxu1 %v13485_v25  ;;  %v16323_v33 = vrot.slane %v7165_v43, 5  ;;  %v403_v55 = vsel %vm15619_vm10, 0, %v402_v59  ;;  %v13551_v59 = vld [vmem:[#allocation9 + $0x178] sm:$0xff] }
 0x472   : > { %v7732_v28 = vrot.slane %v7730_v51, 4  ;;  %404 = vst [vmem:[#allocation2 + $0x108] sm:$0x1] %v403_v55  ;;  %v7171_v31 = vrot.slane %v7169_v56, 4  ;;  %v7175_v3 = vshll.u32 %v6836_v4, 16  ;;  %v7733_v14 = vrot.slane %v7582_v7, 5  ;;  %9525 = vmatpush.bf16.msra.mxu3 %v13551_v59 }
 0x473   : > { %v6227_v63 = vor.u32 %v6225_v6, %v6224_v1  ;;  %v6229_v24 = vrot.slane %v6224_v1, 4  ;;  %v5931_v37 = vmax.f32 %v5895_v47, 0.0  ;;  %7424 = vmatmul.bf16.gmra.mxu2 %v7288_v22  ;;  %v16327_v13 = vpop.f32.mrf.mxu3  ;;  %v12906_v1 = vrot.slane %v7580_v54, 9  ;;  %v349_v47 = vld [vmem:[#allocation2 + $0x110] sm:$0x1] }
 0x474   : > { %v7172_v6 = vor.u32 %v7171_v31, %v16323_v33  ;;  %v7163_v4 = vrot.slane %v7162_v42, 4  ;;  %v350_v54 = vsel %vm15588_vm8, 0, %v349_v47  ;;  %v6442_v42 = vld [vmem:[#allocation2 + $0xf0] sm:$0xf] }
 0x475   : > { %v6228_v25 = vsel %vm15675_vm14, %v6220_v5, %v6227_v63  ;;  %v6440_v60 = vsel %vm15588_vm8, %v6229_v24, %v6439_v53  ;;  %v5967_v30 = vpack.c.bf16 %v5931_v37, %v5931_v37  ;;  %v7734_v53 = vsel %vm14226_vm5, %v7732_v28, %v7733_v14  ;;  %v6837_v7 = vld [vmem:[#allocation2 + $0xe0] sm:$0xf]  ;;  %351 = vst [vmem:[#allocation2 + $0x110] sm:$0x1] %v350_v54  ;;  %v13550_v37 = vld [vmem:[#allocation9 + $0x170] sm:$0xff]  ;;  %v17643_v28 = vld [vmem:[#allocation53_spill] sm:$0xff] }
 0x476   : > { %6438 = vst [vmem:[#allocation2 + $0xe4] sm:$0xf] %v6228_v25  ;;  %v7385_v22 = vpop.f32.mrf.mxu2  ;;  %v5705_v43 = vpop.f32.mrf.mxu0  ;;  %v7173_v56 = vrot.slane %v7172_v6, 4  ;;  %v7177_v5 = vrot.slane %v7175_v3, 5  ;;  %v7731_v24 = vsel %vm14226_vm5, %v12906_v1, %v7730_v51  ;;  %v7793_v25 = vunpack.c.l.b16 %v7734_v53  ;;  %9526 = vmatpush.bf16.msra.mxu3 %v13550_v37  ;;  %v17646_v6 = vld [vmem:[#allocation47_spill] sm:$0xff] }
 0x477   : > { %6441 = vst [vmem:[#allocation2 + $0xe8] sm:$0x1] %v6440_v60  ;;  %v6231_v9 = vshrl.u32 %v5967_v30, 16  ;;  %v16336_v61 = vadd.f32 %v7385_v22, %v16271_v57  ;;  %v5785_v45 = vadd.f32 %v5705_v43, %v5207_v2  ;;  %v16338_v58 = vpop.f32.mrf.mxu1  ;;  %v6234_v63 = vshll.u32 %v5967_v30, 16  ;;  %v17644_v2 = vld [vmem:[#allocation50_spill] sm:$0xff] }
 0x478   : > { %v3959_v31 = vadd.f32 %v17644_v2, %v17643_v28  ;;  %v7178_v3 = vsel %vm14133_vm2, %v7173_v56, %v7177_v5  ;;  %v7168_v30 = vsel %vm14133_vm2, %v7163_v4, %v16323_v33  ;;  %v7792_v51 = vunpack.c.l.b16 %v7731_v24  ;;  %v17647_v5 = vld [vmem:[#allocation52_spill] sm:$0xff]  ;;  %v13558_v2 = vld [vmem:[#allocation2 + $0x80] sm:$0xff] }
 0x479   : > { %v16344_v55 = vrot.slane %v6231_v9, 7  ;;  %v5896_v57 = vadd.f32 %v16199_v40, %v5785_v45  ;;  %v7271_v22 = vunpack.c.l.b16 %v7178_v3  ;;  %v7180_v43 = vshrl.u32 %v6837_v7, 16  ;;  %v13549_v3 = vld [vmem:[#allocation9 + $0x168] sm:$0xff] }
 0x47a   : > { %v7183_v1 = vshll.u32 %v6837_v7, 16  ;;  %v5208_v9 = vadd.f32 %v16030_v34, %v17646_v6  ;;  %v4379_v54 = vadd.f32 %v17647_v5, %v3959_v31  ;;  %v7811_v4 = vpack.c.b16 %v7793_v25, %v7792_v51  ;;  %9527 = vmatpush.bf16.msra.mxu3 %v13549_v3 }
 0x47b   : > { %v6236_v60 = vor.u32 %v6234_v63, %v16344_v55  ;;  %v5932_v14 = vmax.f32 %v5896_v57, 0.0  ;;  %v16354_v59 = vpop.f32.mrf.mxu3  ;;  %v7270_v57 = vunpack.c.l.b16 %v7168_v30  ;;  %v7182_v6 = vrot.slane %v7180_v43, 4 }
 0x47c   : > { %17645 = vst [vmem:[#allocation17_spill] sm:$0xff] %v16354_v59 }
 0x47d   : > { %v6443_v45 = vsel %vm15660_vm12, %v6236_v60, %v6442_v42  ;;  %v5968_v53 = vpack.c.bf16 %v5932_v14, %v5932_v14  ;;  %v16363_v47 = vld [vmem:[#allocation2 + $0xe4] sm:$0xf]  ;;  %v6446_v60 = vld [vmem:[#allocation2 + $0xf8] sm:$0x1]  ;;  %v7289_v31 = vpack.c.b16 %v7271_v22, %v7270_v57 }
 0x47e   : > { %v6838_v56 = vld [vmem:[#allocation2 + $0xe4] sm:$0xf]  ;;  %6444 = vst [vmem:[#allocation2 + $0xf0] sm:$0xf] %v6443_v45  ;;  %v7387_v63 = vpop.f32.mrf.mxu2  ;;  %v5708_v33 = vpop.f32.mrf.mxu0  ;;  %v7737_v42 = vrot.slane %v16363_v47, 5  ;;  %v7185_v45 = vrot.slane %v7183_v1, 5 }
 0x47f   : > { %v13486_v24 = vld [vmem:[#allocation2 + $0xe0] sm:$0xff]  ;;  %v6239_v37 = vshrl.u32 %v5968_v53, 16  ;;  %v16367_v7 = vadd.f32 %v7387_v63, %v16288_v38  ;;  %v5786_v34 = vadd.f32 %v5708_v33, %v5208_v9  ;;  %v16369_v28 = vpop.f32.mrf.mxu1  ;;  %v7585_v14 = vld [vmem:[#allocation2 + $0xe8] sm:$0x1]  ;;  %v7189_v25 = vshll.u32 %v6838_v56, 16 }
 0x480   : > { %7951 = vmatmul.bf16.gmra.mxu3 %v7811_v4  ;;  %v6242_v51 = vshll.u32 %v5968_v53, 16  ;;  %v6839_v38 = vld [vmem:[#allocation2 + $0xe8] sm:$0x1]  ;;  %v7193_v9 = vshrl.u32 %v6838_v56, 16  ;;  %v5209_v63 = vadd.f32 %v16047_v44, %v4379_v54  ;;  %v6237_v47 = vrot.slane %v16344_v55, 4  ;;  %v13548_v22 = vld [vmem:[#allocation9 + $0x160] sm:$0xff] }
 0x481   : > { %v6241_v30 = vrot.slane %v6239_v37, 7  ;;  %v5897_v5 = vadd.f32 %v16199_v40, %v5786_v34  ;;  %9942 = vmatmul.bf16.gmra.mxu0 %v13558_v2  ;;  %6752 = vmatmul.bf16.gmra.mxu1 %v13486_v24  ;;  %v7583_v33 = vld [vmem:[#allocation2 + $0xe0] sm:$0xe]  ;;  %v16375_v4 = vrot.slane %v7189_v25, 5  ;;  %v7739_v37 = vrot.slane %v7737_v42, 4 }
 0x482   : > { %v13528_v34 = vld [vmem:[#allocation9 + $0xc0] sm:$0xff]  ;;  %v405_v2 = vld [vmem:[#allocation2 + $0x118] sm:$0x1]  ;;  %v7740_v56 = vrot.slane %v7585_v14, 5  ;;  %v7186_v3 = vor.u32 %v7185_v45, %v7182_v6  ;;  %v7195_v59 = vrot.slane %v7193_v9, 4  ;;  %v7199_v44 = vshll.u32 %v6839_v38, 16  ;;  %9528 = vmatpush.bf16.msra.mxu3 %v13548_v22 }
 0x483   : > { %v6244_v43 = vor.u32 %v6242_v51, %v6241_v30  ;;  %v6246_v1 = vrot.slane %v6241_v30, 4  ;;  %v5933_v57 = vmax.f32 %v5897_v5, 0.0  ;;  %7429 = vmatmul.bf16.gmra.mxu2 %v7289_v31  ;;  %v16377_v53 = vpop.f32.mrf.mxu3  ;;  %8264 = vmatpush.bf16.msrb.mxu1 %v13528_v34  ;;  %v406_v31 = vsel %vm15619_vm10, 0, %v405_v2  ;;  %v13547_v6 = vld [vmem:[#allocation9 + $0x158] sm:$0xff]  ;;  %v13536_v9 = vld [vmem:[#allocation9 + $0x100] sm:$0xff]  ;;  %v13546_v2 = vld [vmem:[#allocation9 + $0x150] sm:$0xff] }
 0x484   : > { %v12907_v51 = vrot.slane %v7583_v33, 9  ;;  %v7196_v14 = vor.u32 %v7195_v59, %v16375_v4  ;;  %v7741_v21 = vsel %vm14226_vm5, %v7739_v37, %v7740_v56  ;;  %407 = vst [vmem:[#allocation2 + $0x118] sm:$0x1] %v406_v31  ;;  %9010 = vmatpush.bf16.msrb.mxu2 %v13536_v9 }
 0x485   : > { %v6245_v55 = vsel %vm15675_vm14, %v6237_v47, %v6244_v43  ;;  %v6447_v54 = vsel %vm15588_vm8, %v6246_v1, %v6446_v60  ;;  %v5969_v24 = vpack.c.bf16 %v5933_v57, %v5933_v57  ;;  %v7187_v47 = vrot.slane %v7186_v3, 4  ;;  %v6449_v57 = vld [vmem:[#allocation2 + $0x100] sm:$0xf] }
 0x486   : > { %6445 = vst [vmem:[#allocation2 + $0xf4] sm:$0xf] %v6245_v55  ;;  %v7390_v25 = vpop.f32.mrf.mxu2  ;;  %v5710_v30 = vpop.f32.mrf.mxu0  ;;  %v7197_v43 = vrot.slane %v7196_v14, 4  ;;  %v7201_v1 = vrot.slane %v7199_v44, 5  ;;  %v7795_v34 = vunpack.c.l.b16 %v7741_v21  ;;  %9529 = vmatpush.bf16.msra.mxu3 %v13547_v6 }
 0x487   : > { %6448 = vst [vmem:[#allocation2 + $0xf8] sm:$0x1] %v6447_v54  ;;  %v6248_v45 = vshrl.u32 %v5969_v24, 16  ;;  %v16387_v5 = vadd.f32 %v7390_v25, %v16318_v0  ;;  %v5787_v38 = vadd.f32 %v5710_v30, %v5209_v63  ;;  %v16389_v60 = vpop.f32.mrf.mxu1  ;;  %v6251_v59 = vshll.u32 %v5969_v24, 16  ;;  %v6840_v63 = vld [vmem:[#allocation2 + $0xf0] sm:$0xf] }
 0x488   : > { %v7738_v0 = vsel %vm14226_vm5, %v12907_v51, %v7737_v42  ;;  %v7202_v37 = vsel %vm14133_vm2, %v7197_v43, %v7201_v1  ;;  %v7192_v55 = vsel %vm14133_vm2, %v7187_v47, %v16375_v4  ;;  %v17648_v54 = vld [vmem:[#allocation14_spill] sm:$0xff]  ;;  %v7204_v25 = vshrl.u32 %v6840_v63, 16 }
 0x489   : > { %v16393_v33 = vrot.slane %v6248_v45, 7  ;;  %v5898_v22 = vadd.f32 %v16199_v40, %v5787_v38  ;;  %v3961_v42 = vadd.f32 %v16049_v17, %v17648_v54  ;;  %v7794_v24 = vunpack.c.l.b16 %v7738_v0  ;;  %v17649_v30 = vld [vmem:[#allocation54_spill] sm:$0xff]  ;;  %v13559_v0 = vld [vmem:[#allocation2 + $0x90] sm:$0xff]  ;;  %v13545_v54 = vld [vmem:[#allocation9 + $0x148] sm:$0xff] }
 0x48a   : > { %v7273_v31 = vunpack.c.l.b16 %v7202_v37  ;;  %v5210_v51 = vadd.f32 %v16077_v49, %v17649_v30  ;;  %v7272_v47 = vunpack.c.l.b16 %v7192_v55  ;;  %v7207_v17 = vshll.u32 %v6840_v63, 16  ;;  %9530 = vmatpush.bf16.msra.mxu3 %v13546_v2 }
 0x48b   : > { %v6253_v56 = vor.u32 %v6251_v59, %v16393_v33  ;;  %v5934_v3 = vmax.f32 %v5898_v22, 0.0  ;;  %v16401_v44 = vpop.f32.mrf.mxu3  ;;  %v7812_v4 = vpack.c.b16 %v7795_v34, %v7794_v24  ;;  %v4381_v37 = vadd.f32 %v16119_v20, %v3961_v42  ;;  %v13544_v20 = vld [vmem:[#allocation9 + $0x140] sm:$0xff] }
 0x48c   : > { %v7206_v34 = vrot.slane %v7204_v25, 4 }
 0x48d   : > { %v6450_v14 = vsel %vm15660_vm12, %v6253_v56, %v6449_v57  ;;  %v5970_v6 = vpack.c.bf16 %v5934_v3, %v5934_v3  ;;  %v16412_v45 = vld [vmem:[#allocation2 + $0xf4] sm:$0xf]  ;;  %v6453_v56 = vld [vmem:[#allocation2 + $0x108] sm:$0x1]  ;;  %v7290_v3 = vpack.c.b16 %v7273_v31, %v7272_v47  ;;  %v13591_v47 = vld [vmem:[#allocation9 + $0x238] sm:$0xff] }
 0x48e   : > { %v6841_v38 = vld [vmem:[#allocation2 + $0xf4] sm:$0xf]  ;;  %6451 = vst [vmem:[#allocation2 + $0x100] sm:$0xf] %v6450_v14  ;;  %v7392_v21 = vpop.f32.mrf.mxu2  ;;  %v5713_v9 = vpop.f32.mrf.mxu0  ;;  %v7744_v57 = vrot.slane %v16412_v45, 5  ;;  %v7209_v45 = vrot.slane %v7207_v17, 5  ;;  %9531 = vmatpush.bf16.msra.mxu3 %v13545_v54  ;;  %11172 = vmatpush.bf16.msra.mxu2 %v13591_v47 }
 0x48f   : > { %v13487_v43 = vld [vmem:[#allocation2 + $0xf0] sm:$0xff]  ;;  %v6256_v1 = vshrl.u32 %v5970_v6, 16  ;;  %v16415_v59 = vadd.f32 %v7392_v21, %v16338_v58  ;;  %v5788_v49 = vadd.f32 %v5713_v9, %v5210_v51  ;;  %v16417_v22 = vpop.f32.mrf.mxu1  ;;  %v7213_v55 = vshll.u32 %v6841_v38, 16  ;;  %v6842_v58 = vld [vmem:[#allocation2 + $0xf8] sm:$0x1] }
 0x490   : > { %7956 = vmatmul.bf16.gmra.mxu3 %v7812_v4  ;;  %v6259_v2 = vshll.u32 %v5970_v6, 16  ;;  %v7217_v30 = vshrl.u32 %v6841_v38, 16  ;;  %v6254_v51 = vrot.slane %v16393_v33, 4  ;;  %v7588_v14 = vld [vmem:[#allocation2 + $0xf8] sm:$0x1]  ;;  %v7746_v4 = vrot.slane %v7744_v57, 4 }
 0x491   : > { %v6258_v63 = vrot.slane %v6256_v1, 7  ;;  %v5899_v24 = vadd.f32 %v16199_v40, %v5788_v49  ;;  %9947 = vmatmul.bf16.gmra.mxu0 %v13559_v0  ;;  %6757 = vmatmul.bf16.gmra.mxu1 %v13487_v43  ;;  %v16423_v21 = vrot.slane %v7213_v55, 5  ;;  %v7586_v6 = vld [vmem:[#allocation2 + $0xf0] sm:$0xe]  ;;  %v5211_v38 = vadd.f32 %v16106_v8, %v4381_v37  ;;  %v8443_v55 = vld [vmem:[#allocation2 + $0x14] sm:$0xf] }
 0x492   : > { %v7219_v1 = vrot.slane %v7217_v30, 4  ;;  %v7223_v33 = vshll.u32 %v6842_v58, 16  ;;  %v7747_v0 = vrot.slane %v7588_v14, 5  ;;  %9532 = vmatpush.bf16.msra.mxu3 %v13544_v20 }
 0x493   : > { %v6261_v42 = vor.u32 %v6259_v2, %v6258_v63  ;;  %v6263_v31 = vrot.slane %v6258_v63, 4  ;;  %v5935_v25 = vmax.f32 %v5899_v24, 0.0  ;;  %7434 = vmatmul.bf16.gmra.mxu2 %v7290_v3  ;;  %v16425_v9 = vpop.f32.mrf.mxu3  ;;  %v12908_v63 = vrot.slane %v7586_v6, 9  ;;  %v16443_v6 = vld [vmem:[#allocation2 + $0x14] sm:$0xf] }
 0x494   : > { %v7210_v2 = vor.u32 %v7209_v45, %v7206_v34  ;;  %v7220_v24 = vor.u32 %v7219_v1, %v16423_v21  ;;  %v8442_v1 = vld [vmem:[#allocation2 + $0x10] sm:$0xf] }
 0x495   : > { %v6262_v43 = vsel %vm15675_vm14, %v6254_v51, %v6261_v42  ;;  %v6454_v17 = vsel %vm15588_vm8, %v6263_v31, %v6453_v56  ;;  %v5971_v49 = vpack.c.bf16 %v5935_v25, %v5935_v25  ;;  %v7748_v56 = vsel %vm14226_vm5, %v7746_v4, %v7747_v0  ;;  %v13583_v51 = vld [vmem:[#allocation9 + $0x1f8] sm:$0xff] }
 0x496   : > { %6452 = vst [vmem:[#allocation2 + $0x104] sm:$0xf] %v6262_v43  ;;  %v7395_v3 = vpop.f32.mrf.mxu2  ;;  %v5715_v54 = vpop.f32.mrf.mxu0  ;;  %v7221_v14 = vrot.slane %v7220_v24, 4  ;;  %v7225_v42 = vrot.slane %v7223_v33, 5  ;;  %v8500_v31 = vshll.u32 %v8443_v55, 16  ;;  %v7745_v20 = vsel %vm14226_vm5, %v12908_v63, %v7744_v57  ;;  %10650 = vmatpush.bf16.msra.mxu1 %v13583_v51 }
 0x497   : > { %6455 = vst [vmem:[#allocation2 + $0x108] sm:$0x1] %v6454_v17  ;;  %v6265_v8 = vshrl.u32 %v5971_v49, 16  ;;  %v16434_v37 = vadd.f32 %v7395_v3, %v16369_v28  ;;  %v5789_v58 = vadd.f32 %v5715_v54, %v5211_v38  ;;  %v16436_v30 = vpop.f32.mrf.mxu1  ;;  %v6268_v34 = vshll.u32 %v5971_v49, 16  ;;  %v6456_v28 = vld [vmem:[#allocation2 + $0x110] sm:$0xf] }
 0x498   : > { %v7797_v47 = vunpack.c.l.b16 %v7748_v56  ;;  %v7211_v38 = vrot.slane %v7210_v2, 4  ;;  %v7226_v4 = vsel %vm14133_vm2, %v7221_v14, %v7225_v42  ;;  %v8504_v43 = vshrl.u32 %v8443_v55, 16 }
 0x499   : > { %v6267_v25 = vrot.slane %v6265_v8, 7  ;;  %v5900_v45 = vadd.f32 %v16199_v40, %v5789_v58  ;;  %v7796_v49 = vunpack.c.l.b16 %v7745_v20  ;;  %v9286_v57 = vrot.slane %v16443_v6, 5  ;;  %v9188_v20 = vld [vmem:[#allocation2 + $0x10] sm:$0xe] }
 0x49a   : > { %v7216_v40 = vsel %vm14133_vm2, %v7211_v38, %v16423_v21  ;;  %v7275_v63 = vunpack.c.l.b16 %v7226_v4  ;;  %v8491_v2 = vshrl.u32 %v8442_v1, 16  ;;  %v8494_v8 = vshll.u32 %v8442_v1, 16  ;;  %v8444_v4 = vld [vmem:[#allocation2 + $0x18] sm:$0x1] }
 0x49b   : > { %v6270_v33 = vor.u32 %v6268_v34, %v6267_v25  ;;  %v5936_v17 = vmax.f32 %v5900_v45, 0.0  ;;  %v16447_v0 = vpop.f32.mrf.mxu3  ;;  %v7813_v55 = vpack.c.b16 %v7797_v47, %v7796_v49  ;;  %v16455_v58 = vrot.slane %v8500_v31, 5  ;;  %v13560_v34 = vld [vmem:[#allocation2 + $0xa0] sm:$0xff]  ;;  %v13512_v45 = vld [vmem:[#allocation2 + $0x10] sm:$0xff]  ;;  %v9190_v47 = vld [vmem:[#allocation2 + $0x18] sm:$0x1] }
 0x49c   : > { %v8506_v56 = vrot.slane %v8504_v43, 4  ;;  %v7274_v42 = vunpack.c.l.b16 %v7216_v40  ;;  %v6460_v31 = vld [vmem:[#allocation2 + $0x118] sm:$0x1]  ;;  %v9288_v1 = vrot.slane %v9286_v57, 4  ;;  %v8493_v43 = vrot.slane %v8491_v2, 4 }
 0x49d   : > { %v6457_v3 = vsel %vm15660_vm12, %v6270_v33, %v6456_v28  ;;  %v5972_v54 = vpack.c.bf16 %v5936_v17, %v5936_v17  ;;  %v8496_v33 = vrot.slane %v8494_v8, 5  ;;  %v6271_v17 = vrot.slane %v6267_v25, 4 }
 0x49e   : > { %6458 = vst [vmem:[#allocation2 + $0x110] sm:$0xf] %v6457_v3  ;;  %v7397_v24 = vpop.f32.mrf.mxu2  ;;  %v7291_v38 = vpack.c.b16 %v7275_v63, %v7274_v42  ;;  %v13069_v42 = vrot.slane %v9188_v20, 9 }
 0x49f   : > { %v6273_v51 = vshrl.u32 %v5972_v54, 16  ;;  %v16458_v14 = vadd.f32 %v7397_v24, %v16389_v60  ;;  %v16460_v21 = vpop.f32.mrf.mxu1  ;;  %v6276_v28 = vshll.u32 %v5972_v54, 16  ;;  %v8507_v60 = vor.u32 %v8506_v56, %v16455_v58 }
 0x4a0   : > { %7961 = vmatmul.bf16.gmra.mxu3 %v7813_v55  ;;  %v9289_v24 = vrot.slane %v9190_v47, 5  ;;  %v8510_v55 = vshll.u32 %v8444_v4, 16  ;;  %v8497_v56 = vor.u32 %v8496_v33, %v8493_v43  ;;  %v9287_v20 = vsel %vm14226_vm5, %v13069_v42, %v9286_v57 }
 0x4a1   : > { %v6275_v6 = vrot.slane %v6273_v51, 7  ;;  %9952 = vmatmul.bf16.gmra.mxu0 %v13560_v34  ;;  %8265 = vmatmul.bf16.vlgmr.msrb.gmra.mxu1 %v13512_v45  ;;  %v8508_v34 = vrot.slane %v8507_v60, 4  ;;  %v9413_v33 = vunpack.c.l.b16 %v9287_v20  ;;  %v8445_v60 = vld [vmem:[#allocation2 + $0x20] sm:$0xf]  ;;  %v9193_v20 = vld [vmem:[#allocation2 + $0x28] sm:$0x1] }
 0x4a2   : > { %v9290_v8 = vsel %vm14226_vm5, %v9288_v1, %v9289_v24  ;;  %v8512_v15 = vrot.slane %v8510_v55, 5  ;;  %v8498_v47 = vrot.slane %v8497_v56, 4  ;;  %v8515_v55 = vshrl.u32 %v8445_v60, 16  ;;  %v13561_v56 = vld [vmem:[#allocation2 + $0xb0] sm:$0xff] }
 0x4a3   : > { %v6278_v49 = vor.u32 %v6276_v28, %v6275_v6  ;;  %v6280_v40 = vrot.slane %v6275_v6, 4  ;;  %7439 = vmatmul.bf16.gmra.mxu2 %v7291_v38  ;;  %v16463_v3 = vpop.f32.mrf.mxu3  ;;  %v8446_v6 = vld [vmem:[#allocation2 + $0x24] sm:$0xf]  ;;  %v17650_v28 = vmov 0   ;;  %v9414_v38 = vunpack.c.l.b16 %v9290_v8 }
 0x4a4   : > { %v8513_v4 = vsel %vm14133_vm2, %v8508_v34, %v8512_v15  ;;  %v8524_v1 = vshll.u32 %v8446_v6, 16  ;;  %v8528_v43 = vshrl.u32 %v8446_v6, 16  ;;  %v8447_v15 = vld [vmem:[#allocation2 + $0x28] sm:$0x1] }
 0x4a5   : > { %v6475_v54 = vld [vmem:[#allocation2 + $0x110] sm:$0xf]  ;;  %v6279_v63 = vsel %vm15675_vm14, %v6271_v17, %v6278_v49  ;;  %v6461_v51 = vsel %vm15588_vm8, %v6280_v40, %v6460_v31  ;;  %v9192_v31 = vld [vmem:[#allocation2 + $0x24] sm:$0xf]  ;;  %v8503_v17 = vsel %vm14133_vm2, %v8498_v47, %v16455_v58  ;;  %v9445_v57 = vpack.c.b16 %v9414_v38, %v9413_v33 }
 0x4a6   : > { %v6476_v2 = vsel %vm15660_vm12, 0, %v6475_v54  ;;  %6459 = vst [vmem:[#allocation2 + $0x114] sm:$0xf] %v6279_v63  ;;  %v7400_v25 = vpop.f32.mrf.mxu2  ;;  %v8892_v49 = vunpack.c.l.b16 %v8513_v4  ;;  %v9293_v40 = vrot.slane %v9192_v31, 5  ;;  %v8518_v54 = vshll.u32 %v8445_v60, 16  ;;  %v13513_v58 = vld [vmem:[#allocation2 + $0x20] sm:$0xff] }
 0x4a7   : > { %6477 = vst [vmem:[#allocation2 + $0x110] sm:$0xf] %v6476_v2  ;;  %v16474_v45 = vadd.f32 %v7400_v25, %v16417_v22  ;;  %v16476_v27 = vpop.f32.mrf.mxu1  ;;  %v8526_v63 = vrot.slane %v8524_v1, 5  ;;  %v8891_v8 = vunpack.c.l.b16 %v8503_v17  ;;  %v8517_v38 = vrot.slane %v8515_v55, 4  ;;  %v9191_v31 = vld [vmem:[#allocation2 + $0x20] sm:$0xe] }
 0x4a8   : > { %6462 = vst [vmem:[#allocation2 + $0x118] sm:$0x1] %v6461_v51  ;;  %v8530_v51 = vrot.slane %v8528_v43, 4  ;;  %v8520_v47 = vrot.slane %v8518_v54, 5  ;;  %v13590_v1 = vld [vmem:[#allocation9 + $0x230] sm:$0xff]  ;;  %v9296_v43 = vrot.slane %v9193_v20, 5 }
 0x4a9   : > { %6478 = vst [vmem:[#allocation2 + $0x114] sm:$0xf] %v17650_v28  ;;  %v8923_v6 = vpack.c.b16 %v8892_v49, %v8891_v8  ;;  %v9295_v28 = vrot.slane %v9293_v40, 4  ;;  %v8534_v23 = vshll.u32 %v8447_v15, 16  ;;  %11173 = vmatpush.bf16.msra.mxu2 %v13590_v1  ;;  %v13070_v60 = vrot.slane %v9191_v31, 9 }
 0x4aa   : > { %v8449_v54 = vld [vmem:[#allocation2 + $0x34] sm:$0xf] }
 0x4ab   : > { %v16483_v22 = vpop.f32.mrf.mxu3  ;;  %v9297_v17 = vsel %vm14226_vm5, %v9295_v28, %v9296_v43  ;;  %v8536_v8 = vrot.slane %v8534_v23, 5  ;;  %v8548_v20 = vshll.u32 %v8449_v54, 16  ;;  %v8552_v15 = vshrl.u32 %v8449_v54, 16  ;;  %v13562_v54 = vld [vmem:[#allocation2 + $0xc0] sm:$0xff] }
 0x4ae   : > { %v7402_v24 = vpop.f32.mrf.mxu2 }
 0x4af   : > { %v6479_v42 = vld [vmem:[#allocation2 + $0x118] sm:$0x1]  ;;  %v16489_v2 = vadd.f32 %v7402_v24, %v16436_v30  ;;  %v16491_v25 = vpop.f32.mrf.mxu1  ;;  %v8531_v30 = vor.u32 %v8530_v51, %v8526_v63  ;;  %v13582_v51 = vld [vmem:[#allocation9 + $0x1f0] sm:$0xff] }
 0x4b0   : > { %v6480_v34 = vsel %vm15588_vm8, 0, %v6479_v42  ;;  %9533 = vmatmul.bf16.vlgmr.msra.gmra.mxu3 %v9445_v57  ;;  %v8521_v57 = vor.u32 %v8520_v47, %v8517_v38  ;;  %v9294_v42 = vsel %vm14226_vm5, %v13070_v60, %v9293_v40  ;;  %10651 = vmatpush.bf16.msra.mxu1 %v13582_v51  ;;  %v8448_v38 = vld [vmem:[#allocation2 + $0x30] sm:$0xf]  ;;  %v8554_v60 = vrot.slane %v8552_v15, 4 }
 0x4b1   : > { %6481 = vst [vmem:[#allocation2 + $0x118] sm:$0x1] %v6480_v34  ;;  %9957 = vmatmul.bf16.gmra.mxu0 %v13561_v56  ;;  %8270 = vmatmul.bf16.gmra.mxu1 %v13513_v58  ;;  %v8532_v49 = vrot.slane %v8531_v30, 4  ;;  %v9416_v56 = vunpack.c.l.b16 %v9297_v17  ;;  %v8539_v43 = vshrl.u32 %v8448_v38, 16  ;;  %v8542_v23 = vshll.u32 %v8448_v38, 16  ;;  %v13514_v51 = vld [vmem:[#allocation2 + $0x30] sm:$0xff] }
 0x4b2   : > { %v8522_v34 = vrot.slane %v8521_v57, 4 }
 0x4b3   : > { %9011 = vmatmul.bf16.vlgmr.msrb.gmra.mxu2 %v8923_v6  ;;  %v16495_v4 = vpop.f32.mrf.mxu3  ;;  %v8537_v58 = vsel %vm14133_vm2, %v8532_v49, %v8536_v8  ;;  %v9195_v6 = vld [vmem:[#allocation2 + $0x34] sm:$0xf]  ;;  %v8450_v8 = vld [vmem:[#allocation2 + $0x38] sm:$0x1] }
 0x4b4   : > { %v8527_v47 = vsel %vm14133_vm2, %v8522_v34, %v8526_v63  ;;  %v8894_v31 = vunpack.c.l.b16 %v8537_v58  ;;  %v9300_v40 = vrot.slane %v9195_v6, 5  ;;  %v9196_v63 = vld [vmem:[#allocation2 + $0x38] sm:$0x1]  ;;  %v8541_v34 = vrot.slane %v8539_v43, 4  ;;  %v8452_v43 = vld [vmem:[#allocation2 + $0x44] sm:$0xf] }
 0x4b5   : > { %v8893_v49 = vunpack.c.l.b16 %v8527_v47  ;;  %v8544_v58 = vrot.slane %v8542_v23, 5  ;;  %v9303_v15 = vrot.slane %v9196_v63, 5 }
 0x4b6   : > { %v7405_v33 = vpop.f32.mrf.mxu2 }
 0x4b7   : > { %v16500_v24 = vadd.f32 %v7405_v33, %v16460_v21  ;;  %v16502_v55 = vpop.f32.mrf.mxu1  ;;  %v9415_v21 = vunpack.c.l.b16 %v9294_v42  ;;  %v8550_v33 = vrot.slane %v8548_v20, 5  ;;  %v8924_v42 = vpack.c.b16 %v8894_v31, %v8893_v49 }
 0x4b8   : > { %v8545_v31 = vor.u32 %v8544_v58, %v8541_v34  ;;  %v16530_v34 = vpop.f32.mrf.mxu0 }
 0x4b9   : > { %v9446_v30 = vpack.c.b16 %v9416_v56, %v9415_v21  ;;  %v9302_v56 = vrot.slane %v9300_v40, 4  ;;  %v8555_v6 = vor.u32 %v8554_v60, %v8550_v33  ;;  %v8558_v21 = vshll.u32 %v8450_v8, 16  ;;  %v9198_v8 = vld [vmem:[#allocation2 + $0x44] sm:$0xf]  ;;  %17653 = vst [vmem:[#allocation19_spill] sm:$0xff] %v16530_v34 }
 0x4bb   : > { %v16508_v28 = vpop.f32.mrf.mxu3  ;;  %v8560_v60 = vrot.slane %v8558_v21, 5  ;;  %v9307_v21 = vrot.slane %v9198_v8, 5 }
 0x4be   : > { %v7407_v1 = vpop.f32.mrf.mxu2 }
 0x4bf   : > { %v16513_v17 = vadd.f32 %v7407_v1, %v16476_v27  ;;  %v16515_v57 = vpop.f32.mrf.mxu1  ;;  %v9194_v27 = vld [vmem:[#allocation2 + $0x30] sm:$0xe]  ;;  %v8556_v1 = vrot.slane %v8555_v6, 4  ;;  %v8451_v6 = vld [vmem:[#allocation2 + $0x40] sm:$0xf] }
 0x4c0   : > { %9538 = vmatmul.bf16.gmra.mxu3 %v9446_v30  ;;  %v13071_v47 = vrot.slane %v9194_v27, 9  ;;  %v9304_v30 = vsel %vm14226_vm5, %v9302_v56, %v9303_v15  ;;  %v8572_v27 = vshll.u32 %v8452_v43, 16  ;;  %v8576_v56 = vshrl.u32 %v8452_v43, 16 }
 0x4c1   : > { %9962 = vmatmul.bf16.gmra.mxu0 %v13562_v54  ;;  %8275 = vmatmul.bf16.gmra.mxu1 %v13514_v51  ;;  %v9418_v51 = vunpack.c.l.b16 %v9304_v30  ;;  %v8561_v63 = vsel %vm14133_vm2, %v8556_v1, %v8560_v60  ;;  %v8563_v30 = vshrl.u32 %v8451_v6, 16 }
 0x4c2   : > { %v9301_v23 = vsel %vm14226_vm5, %v13071_v47, %v9300_v40  ;;  %v8896_v40 = vunpack.c.l.b16 %v8561_v63  ;;  %v8578_v1 = vrot.slane %v8576_v56, 4  ;;  %v13589_v56 = vld [vmem:[#allocation9 + $0x228] sm:$0xff] }
 0x4c3   : > { %9016 = vmatmul.bf16.gmra.mxu2 %v8924_v42  ;;  %v16517_v20 = vpop.f32.mrf.mxu3  ;;  %v8546_v42 = vrot.slane %v8545_v31, 4  ;;  %v8566_v31 = vshll.u32 %v8451_v6, 16  ;;  %v8565_v63 = vrot.slane %v8563_v30, 4 }
 0x4c4   : > { %17651 = vst [vmem:[#allocation18_spill] sm:$0xff] %v16517_v20  ;;  %v8574_v20 = vrot.slane %v8572_v27, 5  ;;  %11174 = vmatpush.bf16.msra.mxu2 %v13589_v56 }
 0x4c5   : > { %v8551_v15 = vsel %vm14133_vm2, %v8546_v42, %v8550_v33  ;;  %v9199_v33 = vld [vmem:[#allocation2 + $0x48] sm:$0x1]  ;;  %v9309_v42 = vrot.slane %v9307_v21, 4  ;;  %v8568_v8 = vrot.slane %v8566_v31, 5  ;;  %v8455_v31 = vld [vmem:[#allocation2 + $0x54] sm:$0xf] }
 0x4c6   : > { %v7410_v38 = vpop.f32.mrf.mxu2  ;;  %v8895_v34 = vunpack.c.l.b16 %v8551_v15  ;;  %v9310_v6 = vrot.slane %v9199_v33, 5  ;;  %v16543_v15 = vpop.f32.mrf.mxu0 }
 0x4c7   : > { %v16522_v49 = vadd.f32 %v7410_v38, %v16491_v25  ;;  %v16524_v54 = vpop.f32.mrf.mxu1  ;;  %v9417_v25 = vunpack.c.l.b16 %v9301_v23  ;;  %v13515_v23 = vld [vmem:[#allocation2 + $0x40] sm:$0xff]  ;;  %17657 = vst [vmem:[#allocation20_spill] sm:$0xff] %v16543_v15 }
 0x4c9   : > { %17652 = vst [vmem:[#allocation21_spill] sm:$0xff] %v16522_v49  ;;  %v9447_v38 = vpack.c.b16 %v9418_v51, %v9417_v25  ;;  %v8925_v49 = vpack.c.b16 %v8896_v40, %v8895_v34  ;;  %v8453_v51 = vld [vmem:[#allocation2 + $0x48] sm:$0x1]  ;;  %v8579_v25 = vor.u32 %v8578_v1, %v8574_v20  ;;  %v8569_v40 = vor.u32 %v8568_v8, %v8565_v63 }
 0x4ca   : > { %v13581_v1 = vld [vmem:[#allocation9 + $0x1e8] sm:$0xff]  ;;  %v8596_v63 = vshll.u32 %v8455_v31, 16  ;;  %v8600_v8 = vshrl.u32 %v8455_v31, 16 }
 0x4cb   : > { %v16532_v58 = vpop.f32.mrf.mxu3  ;;  %10652 = vmatpush.bf16.msra.mxu1 %v13581_v1  ;;  %v8570_v56 = vrot.slane %v8569_v40, 4 }
 0x4cc   : > { %17654 = vst [vmem:[#allocation51_spill] sm:$0xff] %v16532_v58  ;;  %v13563_v58 = vld [vmem:[#allocation2 + $0xd0] sm:$0xff]  ;;  %v8598_v40 = vrot.slane %v8596_v63, 5  ;;  %v8602_v1 = vrot.slane %v8600_v8, 4 }
 0x4ce   : > { %v7412_v47 = vpop.f32.mrf.mxu2  ;;  %v8603_v8 = vor.u32 %v8602_v1, %v8598_v40 }
 0x4cf   : > { %v16537_v60 = vadd.f32 %v7412_v47, %v16502_v55  ;;  %v16539_v43 = vpop.f32.mrf.mxu1  ;;  %v9197_v55 = vld [vmem:[#allocation2 + $0x40] sm:$0xe]  ;;  %v8582_v47 = vshll.u32 %v8453_v51, 16 }
 0x4d0   : > { %9543 = vmatmul.bf16.gmra.mxu3 %v9447_v38  ;;  %v13072_v34 = vrot.slane %v9197_v55, 9 }
 0x4d1   : > { %17655 = vst [vmem:[#allocation48_spill] sm:$0xff] %v16537_v60  ;;  %9967 = vmatmul.bf16.gmra.mxu0 %v13563_v58  ;;  %8280 = vmatmul.bf16.gmra.mxu1 %v13515_v23  ;;  %v9311_v58 = vsel %vm14226_vm5, %v9309_v42, %v9310_v6  ;;  %v8580_v23 = vrot.slane %v8579_v25, 4  ;;  %v8584_v51 = vrot.slane %v8582_v47, 5  ;;  %v9201_v42 = vld [vmem:[#allocation2 + $0x54] sm:$0xf]  ;;  %v16560_v60 = vpop.f32.mrf.mxu0 }
 0x4d2   : > { %v9308_v33 = vsel %vm14226_vm5, %v13072_v34, %v9307_v21  ;;  %v9420_v15 = vunpack.c.l.b16 %v9311_v58  ;;  %v8454_v6 = vld [vmem:[#allocation2 + $0x50] sm:$0xf]  ;;  %v9314_v21 = vrot.slane %v9201_v42, 5  ;;  %17660 = vst [vmem:[#allocation22_spill] sm:$0xff] %v16560_v60 }
 0x4d3   : > { %9021 = vmatmul.bf16.gmra.mxu2 %v8925_v49  ;;  %v16541_v27 = vpop.f32.mrf.mxu3  ;;  %v8585_v55 = vsel %vm14133_vm2, %v8580_v23, %v8584_v51  ;;  %v8587_v34 = vshrl.u32 %v8454_v6, 16  ;;  %v8590_v58 = vshll.u32 %v8454_v6, 16  ;;  %v13564_v51 = vld [vmem:[#allocation2 + $0xe0] sm:$0xff] }
 0x4d4   : > { %17656 = vst [vmem:[#allocation49_spill] sm:$0xff] %v16541_v27 }
 0x4d5   : > { %v8589_v42 = vrot.slane %v8587_v34, 4  ;;  %v8592_v63 = vrot.slane %v8590_v58, 5  ;;  %v8458_v34 = vld [vmem:[#allocation2 + $0x64] sm:$0xf] }
 0x4d6   : > { %v7415_v38 = vpop.f32.mrf.mxu2 }
 0x4d7   : > { %v16548_v30 = vadd.f32 %v7415_v38, %v16515_v57  ;;  %v16550_v49 = vpop.f32.mrf.mxu1  ;;  %v9419_v57 = vunpack.c.l.b16 %v9308_v33  ;;  %v8575_v38 = vsel %vm14133_vm2, %v8570_v56, %v8574_v20  ;;  %v8456_v56 = vld [vmem:[#allocation2 + $0x58] sm:$0x1] }
 0x4d8   : > { %v8897_v33 = vunpack.c.l.b16 %v8575_v38 }
 0x4d9   : > { %17658 = vst [vmem:[#allocation24_spill] sm:$0xff] %v16548_v30  ;;  %v9448_v27 = vpack.c.b16 %v9420_v15, %v9419_v57  ;;  %v8898_v30 = vunpack.c.l.b16 %v8585_v55  ;;  %v9202_v15 = vld [vmem:[#allocation2 + $0x58] sm:$0x1]  ;;  %v9316_v55 = vrot.slane %v9314_v21, 4 }
 0x4da   : > { %v9317_v6 = vrot.slane %v9202_v15, 5 }
 0x4db   : > { %v16556_v25 = vpop.f32.mrf.mxu3  ;;  %v8926_v20 = vpack.c.b16 %v8898_v30, %v8897_v33  ;;  %v8593_v30 = vor.u32 %v8592_v63, %v8589_v42  ;;  %v8604_v33 = vrot.slane %v8603_v8, 4  ;;  %v8620_v42 = vshll.u32 %v8458_v34, 16 }
 0x4dc   : > { %17659 = vst [vmem:[#allocation15_spill] sm:$0xff] %v16556_v25  ;;  %v13516_v25 = vld [vmem:[#allocation2 + $0x50] sm:$0xff]  ;;  %v8624_v63 = vshrl.u32 %v8458_v34, 16 }
 0x4de   : > { %v7417_v47 = vpop.f32.mrf.mxu2 }
 0x4df   : > { %v16563_v23 = vadd.f32 %v7417_v47, %v16524_v54  ;;  %v16565_v31 = vpop.f32.mrf.mxu1  ;;  %v9200_v54 = vld [vmem:[#allocation2 + $0x50] sm:$0xe]  ;;  %v8606_v47 = vshll.u32 %v8456_v56, 16  ;;  %v8594_v56 = vrot.slane %v8593_v30, 4  ;;  %v8622_v30 = vrot.slane %v8620_v42, 5 }
 0x4e0   : > { %9548 = vmatmul.bf16.gmra.mxu3 %v9448_v27  ;;  %v13073_v38 = vrot.slane %v9200_v54, 9  ;;  %v9318_v27 = vsel %vm14226_vm5, %v9316_v55, %v9317_v6  ;;  %v9204_v55 = vld [vmem:[#allocation2 + $0x64] sm:$0xf] }
 0x4e1   : > { %17661 = vst [vmem:[#allocation44_spill] sm:$0xff] %v16563_v23  ;;  %9972 = vmatmul.bf16.gmra.mxu0 %v13564_v51  ;;  %8285 = vmatmul.bf16.gmra.mxu1 %v13516_v25  ;;  %v8608_v1 = vrot.slane %v8606_v47, 5  ;;  %v9422_v15 = vunpack.c.l.b16 %v9318_v27  ;;  %v8599_v6 = vsel %vm14133_vm2, %v8594_v56, %v8598_v40  ;;  %v9321_v47 = vrot.slane %v9204_v55, 5  ;;  %v9205_v40 = vld [vmem:[#allocation2 + $0x68] sm:$0x1] }
 0x4e2   : > { %v9315_v58 = vsel %vm14226_vm5, %v13073_v38, %v9314_v21  ;;  %v8899_v34 = vunpack.c.l.b16 %v8599_v6  ;;  %v9324_v6 = vrot.slane %v9205_v40, 5 }
 0x4e3   : > { %9026 = vmatmul.bf16.gmra.mxu2 %v8926_v20  ;;  %v16567_v57 = vpop.f32.mrf.mxu3  ;;  %v16578_v20 = vpop.f32.mrf.mxu0  ;;  %v8609_v54 = vsel %vm14133_vm2, %v8604_v33, %v8608_v1  ;;  %v9323_v56 = vrot.slane %v9321_v47, 4 }
 0x4e4   : > { %17662 = vst [vmem:[#allocation29_spill] sm:$0xff] %v16567_v57  ;;  %v8900_v21 = vunpack.c.l.b16 %v8609_v54 }
 0x4e5   : > { %17664 = vst [vmem:[#allocation26_spill] sm:$0xff] %v16578_v20 }
 0x4e6   : > { %v7420_v60 = vpop.f32.mrf.mxu2  ;;  %v8927_v23 = vpack.c.b16 %v8900_v21, %v8899_v34 }
 0x4e7   : > { %v16572_v51 = vadd.f32 %v7420_v60, %v16539_v43  ;;  %v16574_v25 = vpop.f32.mrf.mxu1  ;;  %v9421_v60 = vunpack.c.l.b16 %v9315_v58  ;;  %v8457_v43 = vld [vmem:[#allocation2 + $0x60] sm:$0xf] }
 0x4e8   : > { %v8611_v20 = vshrl.u32 %v8457_v43, 16  ;;  %v8614_v27 = vshll.u32 %v8457_v43, 16  ;;  %v13517_v58 = vld [vmem:[#allocation2 + $0x60] sm:$0xff] }
 0x4e9   : > { %17663 = vst [vmem:[#allocation25_spill] sm:$0xff] %v16572_v51  ;;  %v9449_v57 = vpack.c.b16 %v9422_v15, %v9421_v60  ;;  %v8626_v51 = vrot.slane %v8624_v63, 4  ;;  %v8459_v15 = vld [vmem:[#allocation2 + $0x68] sm:$0x1]  ;;  %v9203_v63 = vld [vmem:[#allocation2 + $0x60] sm:$0xe] }
 0x4ea   : > { %v8613_v54 = vrot.slane %v8611_v20, 4  ;;  %v8616_v55 = vrot.slane %v8614_v27, 5  ;;  %v13588_v43 = vld [vmem:[#allocation9 + $0x220] sm:$0xff]  ;;  %v13074_v21 = vrot.slane %v9203_v63, 9 }
 0x4eb   : > { %v16582_v8 = vpop.f32.mrf.mxu3  ;;  %v8627_v60 = vor.u32 %v8626_v51, %v8622_v30  ;;  %v16591_v42 = vpop.f32.mrf.mxu0  ;;  %11175 = vmatpush.bf16.msra.mxu2 %v13588_v43  ;;  %v13580_v27 = vld [vmem:[#allocation9 + $0x1e0] sm:$0xff] }
 0x4ec   : > { %17665 = vst [vmem:[#allocation46_spill] sm:$0xff] %v16582_v8  ;;  %v13565_v8 = vld [vmem:[#allocation2 + $0xf0] sm:$0xff]  ;;  %v8617_v34 = vor.u32 %v8616_v55, %v8613_v54  ;;  %10653 = vmatpush.bf16.msra.mxu1 %v13580_v27 }
 0x4ed   : > { %17667 = vst [vmem:[#allocation16_spill] sm:$0xff] %v16591_v42  ;;  %v9322_v42 = vsel %vm14226_vm5, %v13074_v21, %v9321_v47 }
 0x4ee   : > { %v7422_v38 = vpop.f32.mrf.mxu2  ;;  %v8618_v43 = vrot.slane %v8617_v34, 4 }
 0x4ef   : > { %v16587_v33 = vadd.f32 %v7422_v38, %v16550_v49  ;;  %v16589_v1 = vpop.f32.mrf.mxu1  ;;  %v8630_v38 = vshll.u32 %v8459_v15, 16 }
 0x4f0   : > { %9553 = vmatmul.bf16.gmra.mxu3 %v9449_v57 }
 0x4f1   : > { %17666 = vst [vmem:[#allocation23_spill] sm:$0xff] %v16587_v33  ;;  %9977 = vmatmul.bf16.gmra.mxu0 %v13565_v8  ;;  %8290 = vmatmul.bf16.gmra.mxu1 %v13517_v58  ;;  %v9325_v8 = vsel %vm14226_vm5, %v9323_v56, %v9324_v6  ;;  %v8628_v58 = vrot.slane %v8627_v60, 4  ;;  %v8632_v40 = vrot.slane %v8630_v38, 5  ;;  %v9207_v56 = vld [vmem:[#allocation2 + $0x74] sm:$0xf] }
 0x4f2   : > { %v9424_v15 = vunpack.c.l.b16 %v9325_v8  ;;  %v8460_v6 = vld [vmem:[#allocation2 + $0x70] sm:$0xf]  ;;  %v9328_v21 = vrot.slane %v9207_v56, 5 }
 0x4f3   : > { %9031 = vmatmul.bf16.gmra.mxu2 %v8927_v23  ;;  %v16593_v49 = vpop.f32.mrf.mxu3  ;;  %v8461_v23 = vld [vmem:[#allocation2 + $0x74] sm:$0xf]  ;;  %v8633_v63 = vsel %vm14133_vm2, %v8628_v58, %v8632_v40  ;;  %v8635_v34 = vshrl.u32 %v8460_v6, 16  ;;  %v8638_v27 = vshll.u32 %v8460_v6, 16 }
 0x4f4   : > { %17668 = vst [vmem:[#allocation31_spill] sm:$0xff] %v16593_v49  ;;  %v8644_v54 = vshll.u32 %v8461_v23, 16  ;;  %v8648_v55 = vshrl.u32 %v8461_v23, 16  ;;  %v16610_v49 = vpop.f32.mrf.mxu0  ;;  %v8902_v38 = vunpack.c.l.b16 %v8633_v63  ;;  %v13518_v33 = vld [vmem:[#allocation2 + $0x70] sm:$0xff]  ;;  %v9330_v63 = vrot.slane %v9328_v21, 4 }
 0x4f5   : > { %17671 = vst [vmem:[#allocation42_spill] sm:$0xff] %v16610_v49  ;;  %v8637_v56 = vrot.slane %v8635_v34, 4 }
 0x4f6   : > { %v7425_v57 = vpop.f32.mrf.mxu2  ;;  %v8650_v58 = vrot.slane %v8648_v55, 4 }
 0x4f7   : > { %v16598_v20 = vadd.f32 %v7425_v57, %v16565_v31  ;;  %v16600_v51 = vpop.f32.mrf.mxu1  ;;  %v9423_v31 = vunpack.c.l.b16 %v9322_v42  ;;  %v8623_v57 = vsel %vm14133_vm2, %v8618_v43, %v8622_v30  ;;  %v9208_v43 = vld [vmem:[#allocation2 + $0x78] sm:$0x1] }
 0x4f8   : > { %v8901_v42 = vunpack.c.l.b16 %v8623_v57  ;;  %v9331_v55 = vrot.slane %v9208_v43, 5 }
 0x4f9   : > { %17669 = vst [vmem:[#allocation27_spill] sm:$0xff] %v16598_v20  ;;  %v9450_v47 = vpack.c.b16 %v9424_v15, %v9423_v31  ;;  %v8646_v20 = vrot.slane %v8644_v54, 5  ;;  %v8462_v15 = vld [vmem:[#allocation2 + $0x78] sm:$0x1]  ;;  %v8640_v31 = vrot.slane %v8638_v27, 5 }
 0x4fa   : > { %v8928_v30 = vpack.c.b16 %v8902_v38, %v8901_v42  ;;  %v8464_v27 = vld [vmem:[#allocation2 + $0x84] sm:$0xf] }
 0x4fb   : > { %v16606_v60 = vpop.f32.mrf.mxu3  ;;  %v8651_v6 = vor.u32 %v8650_v58, %v8646_v20  ;;  %v8641_v38 = vor.u32 %v8640_v31, %v8637_v56  ;;  %v8668_v56 = vshll.u32 %v8464_v27, 16  ;;  %v8672_v31 = vshrl.u32 %v8464_v27, 16 }
 0x4fc   : > { %17670 = vst [vmem:[#allocation30_spill] sm:$0xff] %v16606_v60  ;;  %v13566_v60 = vld [vmem:[#allocation2 + $0x100] sm:$0xff]  ;;  %v16621_v42 = vpop.f32.mrf.mxu0 }
 0x4fd   : > { %17674 = vst [vmem:[#allocation32_spill] sm:$0xff] %v16621_v42 }
 0x4fe   : > { %v7427_v8 = vpop.f32.mrf.mxu2 }
 0x4ff   : > { %v16613_v40 = vadd.f32 %v7427_v8, %v16574_v25  ;;  %v16615_v23 = vpop.f32.mrf.mxu1  ;;  %v9206_v25 = vld [vmem:[#allocation2 + $0x70] sm:$0xe]  ;;  %v8654_v8 = vshll.u32 %v8462_v15, 16  ;;  %v8642_v15 = vrot.slane %v8641_v38, 4  ;;  %v8674_v38 = vrot.slane %v8672_v31, 4 }
 0x500   : > { %9558 = vmatmul.bf16.gmra.mxu3 %v9450_v47  ;;  %v13075_v57 = vrot.slane %v9206_v25, 9  ;;  %v9332_v47 = vsel %vm14226_vm5, %v9330_v63, %v9331_v55  ;;  %v8463_v63 = vld [vmem:[#allocation2 + $0x80] sm:$0xf] }
 0x501   : > { %17672 = vst [vmem:[#allocation28_spill] sm:$0xff] %v16613_v40  ;;  %9982 = vmatmul.bf16.gmra.mxu0 %v13566_v60  ;;  %8295 = vmatmul.bf16.gmra.mxu1 %v13518_v33  ;;  %v8652_v60 = vrot.slane %v8651_v6, 4  ;;  %v9426_v43 = vunpack.c.l.b16 %v9332_v47  ;;  %v8670_v47 = vrot.slane %v8668_v56, 5 }
 0x502   : > { %v9329_v58 = vsel %vm14226_vm5, %v13075_v57, %v9328_v21  ;;  %v8662_v57 = vshll.u32 %v8463_v63, 16 }
 0x503   : > { %9036 = vmatmul.bf16.gmra.mxu2 %v8928_v30  ;;  %v16617_v54 = vpop.f32.mrf.mxu3  ;;  %v8656_v30 = vrot.slane %v8654_v8, 5  ;;  %v9425_v55 = vunpack.c.l.b16 %v9329_v58  ;;  %v13519_v58 = vld [vmem:[#allocation2 + $0x80] sm:$0xff]  ;;  %v8675_v31 = vor.u32 %v8674_v38, %v8670_v47 }
 0x504   : > { %17673 = vst [vmem:[#allocation35_spill] sm:$0xff] %v16617_v54  ;;  %v16641_v40 = vpop.f32.mrf.mxu0  ;;  %v8664_v56 = vrot.slane %v8662_v57, 5  ;;  %v8467_v57 = vld [vmem:[#allocation2 + $0x94] sm:$0xf] }
 0x505   : > { %v8657_v25 = vsel %vm14133_vm2, %v8652_v60, %v8656_v30  ;;  %v9451_v42 = vpack.c.b16 %v9426_v43, %v9425_v55  ;;  %17678 = vst [vmem:[#allocation36_spill] sm:$0xff] %v16641_v40  ;;  %v9211_v43 = vld [vmem:[#allocation2 + $0x88] sm:$0x1]  ;;  %v9209_v55 = vld [vmem:[#allocation2 + $0x80] sm:$0xe] }
 0x506   : > { %v7430_v49 = vpop.f32.mrf.mxu2  ;;  %v8904_v54 = vunpack.c.l.b16 %v8657_v25  ;;  %v8466_v40 = vld [vmem:[#allocation2 + $0x90] sm:$0xf] }
 0x507   : > { %v16624_v33 = vadd.f32 %v7430_v49, %v16589_v1  ;;  %v16626_v34 = vpop.f32.mrf.mxu1  ;;  %v9210_v1 = vld [vmem:[#allocation2 + $0x84] sm:$0xf]  ;;  %v8647_v49 = vsel %vm14133_vm2, %v8642_v15, %v8646_v20  ;;  %v8465_v15 = vld [vmem:[#allocation2 + $0x88] sm:$0x1] }
 0x508   : > { %v9335_v8 = vrot.slane %v9210_v1, 5  ;;  %v8903_v27 = vunpack.c.l.b16 %v8647_v49  ;;  %v13587_v1 = vld [vmem:[#allocation9 + $0x218] sm:$0xff]  ;;  %v9338_v49 = vrot.slane %v9211_v43, 5 }
 0x509   : > { %17675 = vst [vmem:[#allocation34_spill] sm:$0xff] %v16624_v33  ;;  %v8659_v33 = vshrl.u32 %v8463_v63, 16  ;;  %11176 = vmatpush.bf16.msra.mxu2 %v13587_v1 }
 0x50a   : > { %v8929_v20 = vpack.c.b16 %v8904_v54, %v8903_v27  ;;  %v9337_v25 = vrot.slane %v9335_v8, 4  ;;  %v8676_v27 = vrot.slane %v8675_v31, 4  ;;  %v9213_v31 = vld [vmem:[#allocation2 + $0x94] sm:$0xf] }
 0x50b   : > { %v16632_v6 = vpop.f32.mrf.mxu3  ;;  %v8661_v63 = vrot.slane %v8659_v33, 4 }
 0x50c   : > { %17676 = vst [vmem:[#allocation33_spill] sm:$0xff] %v16632_v6  ;;  %v13567_v6 = vld [vmem:[#allocation2 + $0x110] sm:$0xff]  ;;  %v9339_v54 = vsel %vm14226_vm5, %v9337_v25, %v9338_v49  ;;  %v8692_v25 = vshll.u32 %v8467_v57, 16 }
 0x50d   : > { %v9428_v43 = vunpack.c.l.b16 %v9339_v54 }
 0x50e   : > { %v7432_v21 = vpop.f32.mrf.mxu2 }
 0x50f   : > { %v16637_v60 = vadd.f32 %v7432_v21, %v16600_v51  ;;  %v16639_v30 = vpop.f32.mrf.mxu1  ;;  %v8678_v21 = vshll.u32 %v8465_v15, 16  ;;  %v13579_v15 = vld [vmem:[#allocation9 + $0x1d8] sm:$0xff] }
 0x510   : > { %9563 = vmatmul.bf16.gmra.mxu3 %v9451_v42  ;;  %10654 = vmatpush.bf16.msra.mxu1 %v13579_v15 }
 0x511   : > { %17677 = vst [vmem:[#allocation39_spill] sm:$0xff] %v16637_v60  ;;  %9987 = vmatmul.bf16.gmra.mxu0 %v13567_v6  ;;  %8300 = vmatmul.bf16.gmra.mxu1 %v13519_v58  ;;  %v13076_v60 = vrot.slane %v9209_v55, 9  ;;  %v8665_v6 = vor.u32 %v8664_v56, %v8661_v63  ;;  %v8696_v63 = vshrl.u32 %v8467_v57, 16 }
 0x513   : > { %9041 = vmatmul.bf16.gmra.mxu2 %v8929_v20  ;;  %v16643_v51 = vpop.f32.mrf.mxu3  ;;  %v9336_v38 = vsel %vm14226_vm5, %v13076_v60, %v9335_v8  ;;  %v8680_v20 = vrot.slane %v8678_v21, 5  ;;  %v8666_v1 = vrot.slane %v8665_v6, 4  ;;  %v8683_v60 = vshrl.u32 %v8466_v40, 16 }
 0x514   : > { %17679 = vst [vmem:[#allocation38_spill] sm:$0xff] %v16643_v51  ;;  %v8686_v21 = vshll.u32 %v8466_v40, 16  ;;  %v7999_v6 = vadd.f32 %v16128_v39, %v16136_v36  ;;  %v8698_v51 = vrot.slane %v8696_v63, 4  ;;  %v9212_v40 = vld [vmem:[#allocation2 + $0x90] sm:$0xe] }
 0x515   : > { %v8681_v55 = vsel %vm14133_vm2, %v8676_v27, %v8680_v20  ;;  %v8671_v49 = vsel %vm14133_vm2, %v8666_v1, %v8670_v47  ;;  %v9342_v27 = vrot.slane %v9213_v31, 5  ;;  %v8694_v20 = vrot.slane %v8692_v25, 5  ;;  %v13520_v47 = vld [vmem:[#allocation2 + $0x90] sm:$0xff]  ;;  %v9214_v1 = vld [vmem:[#allocation2 + $0x98] sm:$0x1] }
 0x516   : > { %v7435_v42 = vpop.f32.mrf.mxu2  ;;  %v8906_v8 = vunpack.c.l.b16 %v8681_v55  ;;  %v8468_v55 = vld [vmem:[#allocation2 + $0x98] sm:$0x1]  ;;  %v8688_v39 = vrot.slane %v8686_v21, 5  ;;  %v13077_v31 = vrot.slane %v9212_v40, 9 }
 0x517   : > { %v16648_v58 = vadd.f32 %v7435_v42, %v16615_v23  ;;  %v16650_v33 = vpop.f32.mrf.mxu1  ;;  %v9427_v23 = vunpack.c.l.b16 %v9336_v38  ;;  %v8699_v36 = vor.u32 %v8698_v51, %v8694_v20  ;;  %v8702_v63 = vshll.u32 %v8468_v55, 16  ;;  %v8470_v51 = vld [vmem:[#allocation2 + $0xa4] sm:$0xf] }
 0x518   : > { %v8716_v55 = vshll.u32 %v8470_v51, 16 }
 0x519   : > { %17680 = vst [vmem:[#allocation37_spill] sm:$0xff] %v16648_v58  ;;  %v9452_v42 = vpack.c.b16 %v9428_v43, %v9427_v23  ;;  %v9344_v23 = vrot.slane %v9342_v27, 4  ;;  %v8685_v58 = vrot.slane %v8683_v60, 4 }
 0x51b   : > { %v16656_v56 = vpop.f32.mrf.mxu3 }
 0x51c   : > { %17681 = vst [vmem:[#allocation45_spill] sm:$0xff] %v16656_v56  ;;  %v8905_v56 = vunpack.c.l.b16 %v8671_v49 }
 0x51e   : > { %v7437_v54 = vpop.f32.mrf.mxu2  ;;  %v8930_v43 = vpack.c.b16 %v8906_v8, %v8905_v56  ;;  %v8689_v8 = vor.u32 %v8688_v39, %v8685_v58  ;;  %v8720_v58 = vshrl.u32 %v8470_v51, 16 }
 0x51f   : > { %v16663_v57 = vadd.f32 %v7437_v54, %v16626_v34  ;;  %v8266_v38 = vpop.f32.mrf.mxu1  ;;  %v9345_v34 = vrot.slane %v9214_v1, 5  ;;  %v8700_v54 = vrot.slane %v8699_v36, 4 }
 0x520   : > { %v16665_v15 = vadd.f32 %v8266_v38, %v7999_v6  ;;  %9568 = vmatmul.bf16.gmra.mxu3 %v9452_v42  ;;  %v8000_v42 = vadd.f32 %v16154_v16, %v16166_v11  ;;  %v9343_v38 = vsel %vm14226_vm5, %v13077_v31, %v9342_v27  ;;  %v8690_v1 = vrot.slane %v8689_v8, 4  ;;  %v8469_v11 = vld [vmem:[#allocation2 + $0xa0] sm:$0xf] }
 0x521   : > { %8305 = vmatmul.bf16.gmra.mxu1 %v13520_v47  ;;  %v9346_v56 = vsel %vm14226_vm5, %v9344_v23, %v9345_v34  ;;  %v8704_v47 = vrot.slane %v8702_v63, 5  ;;  %v9216_v23 = vld [vmem:[#allocation2 + $0xa4] sm:$0xf]  ;;  %v8710_v27 = vshll.u32 %v8469_v11, 16  ;;  %v8001_v31 = vadd.f32 %v16177_v52, %v16186_v26 }
 0x522   : > { %v8695_v39 = vsel %vm14133_vm2, %v8690_v1, %v8694_v20  ;;  %v8722_v8 = vrot.slane %v8720_v58, 4  ;;  %v13521_v20 = vld [vmem:[#allocation2 + $0xa0] sm:$0xff]  ;;  %v8471_v1 = vld [vmem:[#allocation2 + $0xa8] sm:$0x1]  ;;  %v13586_v58 = vld [vmem:[#allocation9 + $0x210] sm:$0xff] }
 0x523   : > { %9046 = vmatmul.bf16.gmra.mxu2 %v8930_v43  ;;  %v16667_v25 = vpop.f32.mrf.mxu3  ;;  %v9430_v43 = vunpack.c.l.b16 %v9346_v56  ;;  %v8705_v16 = vsel %vm14133_vm2, %v8700_v54, %v8704_v47  ;;  %v8718_v56 = vrot.slane %v8716_v55, 5  ;;  %v8907_v51 = vunpack.c.l.b16 %v8695_v39 }
 0x524   : > { %v8908_v34 = vunpack.c.l.b16 %v8705_v16  ;;  %v9215_v16 = vld [vmem:[#allocation2 + $0xa0] sm:$0xe]  ;;  %v8712_v52 = vrot.slane %v8710_v27, 5  ;;  %11177 = vmatpush.bf16.msra.mxu2 %v13586_v58  ;;  %v9219_v58 = vld [vmem:[#allocation2 + $0xb4] sm:$0xf] }
 0x525   : > { %v8723_v26 = vor.u32 %v8722_v8, %v8718_v56  ;;  %v8473_v8 = vld [vmem:[#allocation2 + $0xb4] sm:$0xf] }
 0x526   : > { %v7440_v49 = vpop.f32.mrf.mxu2  ;;  %v8931_v47 = vpack.c.b16 %v8908_v34, %v8907_v51 }
 0x527   : > { %v16674_v6 = vadd.f32 %v7440_v49, %v16639_v30  ;;  %v8268_v60 = vpop.f32.mrf.mxu1  ;;  %v9429_v30 = vunpack.c.l.b16 %v9343_v38  ;;  %v8707_v49 = vshrl.u32 %v8469_v11, 16 }
 0x528   : > { %v16676_v21 = vadd.f32 %v8268_v60, %v8000_v42  ;;  %v9349_v42 = vrot.slane %v9216_v23, 5  ;;  %v8726_v23 = vshll.u32 %v8471_v1, 16 }
 0x529   : > { %v9453_v36 = vpack.c.b16 %v9430_v43, %v9429_v30  ;;  %v9217_v43 = vld [vmem:[#allocation2 + $0xa8] sm:$0x1]  ;;  %v8709_v30 = vrot.slane %v8707_v49, 4 }
 0x52a   : > { %v9351_v11 = vrot.slane %v9349_v42, 4 }
 0x52b   : > { %v16682_v40 = vpop.f32.mrf.mxu3 }
 0x52e   : > { %v7442_v63 = vpop.f32.mrf.mxu2 }
 0x52f   : > { %v16689_v54 = vadd.f32 %v7442_v63, %v16650_v33  ;;  %v8271_v60 = vpop.f32.mrf.mxu1  ;;  %v9352_v33 = vrot.slane %v9217_v43, 5  ;;  %v13078_v63 = vrot.slane %v9215_v16, 9  ;;  %v13578_v16 = vld [vmem:[#allocation9 + $0x1d0] sm:$0xff] }
 0x530   : > { %v16691_v38 = vadd.f32 %v8271_v60, %v8001_v31  ;;  %9573 = vmatmul.bf16.gmra.mxu3 %v9453_v36  ;;  %v8002_v36 = vadd.f32 %v16209_v48, %v16222_v12  ;;  %v8713_v31 = vor.u32 %v8712_v52, %v8709_v30  ;;  %v8724_v60 = vrot.slane %v8723_v26, 4  ;;  %10655 = vmatpush.bf16.msra.mxu1 %v13578_v16  ;;  %v9220_v16 = vld [vmem:[#allocation2 + $0xb8] sm:$0x1] }
 0x531   : > { %8310 = vmatmul.bf16.gmra.mxu1 %v13521_v20  ;;  %v9353_v34 = vsel %vm14226_vm5, %v9351_v11, %v9352_v33  ;;  %v9350_v20 = vsel %vm14226_vm5, %v13078_v63, %v9349_v42  ;;  %v8472_v11 = vld [vmem:[#allocation2 + $0xb0] sm:$0xf]  ;;  %v8740_v30 = vshll.u32 %v8473_v8, 16  ;;  %v8744_v52 = vshrl.u32 %v8473_v8, 16 }
 0x532   : > { %v9432_v1 = vunpack.c.l.b16 %v9353_v34  ;;  %v8714_v48 = vrot.slane %v8713_v31, 4  ;;  %v9431_v26 = vunpack.c.l.b16 %v9350_v20  ;;  %v8734_v63 = vshll.u32 %v8472_v11, 16 }
 0x533   : > { %9051 = vmatmul.bf16.gmra.mxu2 %v8931_v47  ;;  %v9534_v55 = vpop.f32.mrf.mxu3  ;;  %v8728_v47 = vrot.slane %v8726_v23, 5  ;;  %v9356_v34 = vrot.slane %v9219_v58, 5  ;;  %v8742_v31 = vrot.slane %v8740_v30, 5 }
 0x534   : > { %v8719_v33 = vsel %vm14133_vm2, %v8714_v48, %v8718_v56  ;;  %v9454_v42 = vpack.c.b16 %v9432_v1, %v9431_v26  ;;  %v8474_v48 = vld [vmem:[#allocation2 + $0xb8] sm:$0x1] }
 0x535   : > { %v8729_v12 = vsel %vm14133_vm2, %v8724_v60, %v8728_v47  ;;  %v8746_v60 = vrot.slane %v8744_v52, 4  ;;  %v8909_v8 = vunpack.c.l.b16 %v8719_v33  ;;  %v13522_v47 = vld [vmem:[#allocation2 + $0xb0] sm:$0xff]  ;;  %v8750_v26 = vshll.u32 %v8474_v48, 16 }
 0x536   : > { %v9012_v39 = vpop.f32.mrf.mxu2  ;;  %v8910_v23 = vunpack.c.l.b16 %v8729_v12  ;;  %v9218_v12 = vld [vmem:[#allocation2 + $0xb0] sm:$0xe] }
 0x537   : > { %v9124_v49 = vadd.f32 %v9012_v39, %v16665_v15  ;;  %v8273_v27 = vpop.f32.mrf.mxu1  ;;  %v8747_v30 = vor.u32 %v8746_v60, %v8742_v31  ;;  %v13079_v58 = vrot.slane %v9218_v12, 9 }
 0x538   : > { %v16698_v51 = vadd.f32 %v8273_v27, %v8002_v36  ;;  %v8003_v36 = vadd.f32 %v16231_v35, %v16239_v41  ;;  %v8932_v1 = vpack.c.b16 %v8910_v23, %v8909_v8  ;;  %v8736_v41 = vrot.slane %v8734_v63, 5 }
 0x539   : > { %v16702_v43 = vadd.f32 %v9534_v55, %v9124_v49  ;;  %v8731_v55 = vshrl.u32 %v8472_v11, 16  ;;  %v9358_v11 = vrot.slane %v9356_v34, 4  ;;  %v9357_v60 = vsel %vm14226_vm5, %v13079_v58, %v9356_v34 }
 0x53b   : > { %v9536_v15 = vpop.f32.mrf.mxu3  ;;  %v8733_v35 = vrot.slane %v8731_v55, 4  ;;  %v8476_v55 = vld [vmem:[#allocation2 + $0xc4] sm:$0xf] }
 0x53c   : > { %v8768_v48 = vshrl.u32 %v8476_v55, 16 }
 0x53d   : > { %v8737_v23 = vor.u32 %v8736_v41, %v8733_v35 }
 0x53e   : > { %v9014_v39 = vpop.f32.mrf.mxu2 }
 0x53f   : > { %v9125_v49 = vadd.f32 %v9014_v39, %v16676_v21  ;;  %v8276_v27 = vpop.f32.mrf.mxu1  ;;  %v9359_v21 = vrot.slane %v9220_v16, 5  ;;  %v8748_v39 = vrot.slane %v8747_v30, 4  ;;  %v8764_v16 = vshll.u32 %v8476_v55, 16 }
 0x540   : > { %v16711_v20 = vadd.f32 %v8276_v27, %v8003_v36  ;;  %9578 = vmatmul.bf16.gmra.mxu3 %v9454_v42  ;;  %v8004_v42 = vadd.f32 %v16257_v19, %v16269_v10  ;;  %v8752_v27 = vrot.slane %v8750_v26, 5  ;;  %v8475_v10 = vld [vmem:[#allocation2 + $0xc0] sm:$0xf]  ;;  %v8005_v26 = vadd.f32 %v16278_v18, %v16286_v29 }
 0x541   : > { %v16713_v56 = vadd.f32 %v9536_v15, %v9125_v49  ;;  %8315 = vmatmul.bf16.gmra.mxu1 %v13522_v47  ;;  %v9360_v15 = vsel %vm14226_vm5, %v9358_v11, %v9359_v21  ;;  %v9222_v11 = vld [vmem:[#allocation2 + $0xc4] sm:$0xf]  ;;  %v8755_v34 = vshrl.u32 %v8475_v10, 16  ;;  %v8758_v21 = vshll.u32 %v8475_v10, 16 }
 0x542   : > { %v9434_v47 = vunpack.c.l.b16 %v9360_v15  ;;  %v8753_v19 = vsel %vm14133_vm2, %v8748_v39, %v8752_v27  ;;  %v9363_v58 = vrot.slane %v9222_v11, 5  ;;  %v8477_v27 = vld [vmem:[#allocation2 + $0xc8] sm:$0x1] }
 0x543   : > { %9056 = vmatmul.bf16.gmra.mxu2 %v8932_v1  ;;  %v9539_v52 = vpop.f32.mrf.mxu3  ;;  %v8738_v1 = vrot.slane %v8737_v23, 4  ;;  %v8912_v30 = vunpack.c.l.b16 %v8753_v19  ;;  %v8757_v18 = vrot.slane %v8755_v34, 4  ;;  %v8760_v29 = vrot.slane %v8758_v21, 5 }
 0x545   : > { %v8743_v35 = vsel %vm14133_vm2, %v8738_v1, %v8742_v31  ;;  %v9365_v1 = vrot.slane %v9363_v58, 4 }
 0x546   : > { %v9017_v33 = vpop.f32.mrf.mxu2  ;;  %v8911_v39 = vunpack.c.l.b16 %v8743_v35 }
 0x547   : > { %v9126_v36 = vadd.f32 %v9017_v33, %v16691_v38  ;;  %v8278_v49 = vpop.f32.mrf.mxu1  ;;  %v9433_v38 = vunpack.c.l.b16 %v9357_v60  ;;  %v8766_v33 = vrot.slane %v8764_v16, 5  ;;  %v9223_v60 = vld [vmem:[#allocation2 + $0xc8] sm:$0x1] }
 0x548   : > { %v16720_v63 = vadd.f32 %v8278_v49, %v8004_v42  ;;  %v8770_v42 = vrot.slane %v8768_v48, 4  ;;  %v13523_v49 = vld [vmem:[#allocation2 + $0xc0] sm:$0xff]  ;;  %v8933_v55 = vpack.c.b16 %v8912_v30, %v8911_v39  ;;  %v9366_v16 = vrot.slane %v9223_v60, 5 }
 0x549   : > { %v16724_v8 = vadd.f32 %v9539_v52, %v9126_v36  ;;  %v9455_v41 = vpack.c.b16 %v9434_v47, %v9433_v38  ;;  %v9221_v47 = vld [vmem:[#allocation2 + $0xc0] sm:$0xe]  ;;  %v8774_v48 = vshll.u32 %v8477_v27, 16 }
 0x54a   : > { %v8771_v19 = vor.u32 %v8770_v42, %v8766_v33  ;;  %v13080_v38 = vrot.slane %v9221_v47, 9  ;;  %v9367_v35 = vsel %vm14226_vm5, %v9365_v1, %v9366_v16  ;;  %v9225_v47 = vld [vmem:[#allocation2 + $0xd4] sm:$0xf]  ;;  %v8007_v16 = vadd.f32 %v16327_v13, %v16336_v61 }
 0x54b   : > { %v9541_v12 = vpop.f32.mrf.mxu3  ;;  %v9436_v39 = vunpack.c.l.b16 %v9367_v35 }
 0x54c   : > { %v8772_v30 = vrot.slane %v8771_v19, 4  ;;  %v9364_v42 = vsel %vm14226_vm5, %v13080_v38, %v9363_v58 }
 0x54e   : > { %v9019_v52 = vpop.f32.mrf.mxu2 }
 0x54f   : > { %v9127_v15 = vadd.f32 %v9019_v52, %v16698_v51  ;;  %v8281_v23 = vpop.f32.mrf.mxu1  ;;  %v13585_v51 = vld [vmem:[#allocation9 + $0x208] sm:$0xff]  ;;  %v8479_v52 = vld [vmem:[#allocation2 + $0xd4] sm:$0xf] }
 0x550   : > { %v16733_v36 = vadd.f32 %v8281_v23, %v8005_v26  ;;  %9583 = vmatmul.bf16.gmra.mxu3 %v9455_v41  ;;  %11178 = vmatpush.bf16.msra.mxu2 %v13585_v51  ;;  %v8761_v41 = vor.u32 %v8760_v29, %v8757_v18  ;;  %v8788_v60 = vshll.u32 %v8479_v52, 16  ;;  %v8792_v27 = vshrl.u32 %v8479_v52, 16  ;;  %v9226_v52 = vld [vmem:[#allocation2 + $0xd8] sm:$0x1] }
 0x551   : > { %v16735_v31 = vadd.f32 %v9541_v12, %v9127_v15  ;;  %8320 = vmatmul.bf16.gmra.mxu1 %v13523_v49  ;;  %v8006_v12 = vadd.f32 %v16304_v62, %v16316_v32  ;;  %v8776_v15 = vrot.slane %v8774_v48, 5  ;;  %v13577_v49 = vld [vmem:[#allocation9 + $0x1c8] sm:$0xff]  ;;  %v9370_v48 = vrot.slane %v9225_v47, 5 }
 0x552   : > { %v8762_v62 = vrot.slane %v8761_v41, 4  ;;  %10656 = vmatpush.bf16.msra.mxu1 %v13577_v49  ;;  %v8790_v38 = vrot.slane %v8788_v60, 5 }
 0x553   : > { %9061 = vmatmul.bf16.gmra.mxu2 %v8933_v55  ;;  %v9544_v10 = vpop.f32.mrf.mxu3  ;;  %v8777_v32 = vsel %vm14133_vm2, %v8772_v30, %v8776_v15  ;;  %v8478_v55 = vld [vmem:[#allocation2 + $0xd0] sm:$0xf] }
 0x554   : > { %v8767_v18 = vsel %vm14133_vm2, %v8762_v62, %v8766_v33  ;;  %v8914_v29 = vunpack.c.l.b16 %v8777_v32  ;;  %v8779_v19 = vshrl.u32 %v8478_v55, 16  ;;  %v9224_v15 = vld [vmem:[#allocation2 + $0xd0] sm:$0xe]  ;;  %v9373_v62 = vrot.slane %v9226_v52, 5 }
 0x555   : > { %v8913_v41 = vunpack.c.l.b16 %v8767_v18  ;;  %v13081_v32 = vrot.slane %v9224_v15, 9 }
 0x556   : > { %v9022_v11 = vpop.f32.mrf.mxu2  ;;  %v8781_v13 = vrot.slane %v8779_v19, 4  ;;  %v8482_v19 = vld [vmem:[#allocation2 + $0xe4] sm:$0xf] }
 0x557   : > { %v9128_v34 = vadd.f32 %v9022_v11, %v16711_v20  ;;  %v8283_v21 = vpop.f32.mrf.mxu1  ;;  %v9435_v20 = vunpack.c.l.b16 %v9364_v42  ;;  %v8794_v11 = vrot.slane %v8792_v27, 4  ;;  %v8480_v42 = vld [vmem:[#allocation2 + $0xd8] sm:$0x1] }
 0x558   : > { %v16742_v26 = vadd.f32 %v8283_v21, %v8006_v12  ;;  %v8934_v21 = vpack.c.b16 %v8914_v29, %v8913_v41  ;;  %v17682_v27 = vld [vmem:[#allocation17_spill] sm:$0xff]  ;;  %v8481_v41 = vld [vmem:[#allocation2 + $0xe0] sm:$0xf] }
 0x559   : > { %v16746_v23 = vadd.f32 %v9544_v10, %v9128_v34  ;;  %v9456_v58 = vpack.c.b16 %v9436_v39, %v9435_v20  ;;  %v8782_v10 = vshll.u32 %v8478_v55, 16  ;;  %v13524_v34 = vld [vmem:[#allocation2 + $0xd0] sm:$0xff]  ;;  %v9372_v39 = vrot.slane %v9370_v48, 4 }
 0x55a   : > { %v8795_v49 = vor.u32 %v8794_v11, %v8790_v38  ;;  %v8008_v20 = vadd.f32 %v17682_v27, %v16367_v7 }
 0x55b   : > { %v9546_v1 = vpop.f32.mrf.mxu3  ;;  %v8784_v61 = vrot.slane %v8782_v10, 5  ;;  %v9374_v47 = vsel %vm14226_vm5, %v9372_v39, %v9373_v62 }
 0x55c   : > { %v8796_v18 = vrot.slane %v8795_v49, 4  ;;  %v8009_v49 = vadd.f32 %v16377_v53, %v16387_v5 }
 0x55e   : > { %v9024_v51 = vpop.f32.mrf.mxu2 }
 0x55f   : > { %v9129_v12 = vadd.f32 %v9024_v51, %v16720_v63  ;;  %v8286_v35 = vpop.f32.mrf.mxu1  ;;  %v8798_v63 = vshll.u32 %v8480_v42, 16  ;;  %v9371_v51 = vsel %vm14226_vm5, %v13081_v32, %v9370_v48  ;;  %v8806_v48 = vshll.u32 %v8481_v41, 16 }
 0x560   : > { %v16755_v30 = vadd.f32 %v8286_v35, %v8007_v16  ;;  %9588 = vmatmul.bf16.gmra.mxu3 %v9456_v58  ;;  %v9437_v52 = vunpack.c.l.b16 %v9371_v51 }
 0x561   : > { %v16757_v33 = vadd.f32 %v9546_v1, %v9129_v12  ;;  %8325 = vmatmul.bf16.gmra.mxu1 %v13524_v34  ;;  %v8785_v1 = vor.u32 %v8784_v61, %v8781_v13  ;;  %v8800_v16 = vrot.slane %v8798_v63, 5  ;;  %v9438_v12 = vunpack.c.l.b16 %v9374_v47 }
 0x562   : > { %v8812_v34 = vshll.u32 %v8482_v19, 16  ;;  %v8803_v13 = vshrl.u32 %v8481_v41, 16  ;;  %v8808_v51 = vrot.slane %v8806_v48, 5 }
 0x563   : > { %9066 = vmatmul.bf16.gmra.mxu2 %v8934_v21  ;;  %v9549_v55 = vpop.f32.mrf.mxu3  ;;  %v8786_v35 = vrot.slane %v8785_v1, 4  ;;  %v8801_v7 = vsel %vm14133_vm2, %v8796_v18, %v8800_v16  ;;  %v8816_v21 = vshrl.u32 %v8482_v19, 16  ;;  %v9457_v15 = vpack.c.b16 %v9438_v12, %v9437_v52  ;;  %v9227_v19 = vld [vmem:[#allocation2 + $0xe0] sm:$0xe] }
 0x564   : > { %v8916_v39 = vunpack.c.l.b16 %v8801_v7  ;;  %v8814_v63 = vrot.slane %v8812_v34, 5  ;;  %v8805_v5 = vrot.slane %v8803_v13, 4  ;;  %v13082_v7 = vrot.slane %v9227_v19, 9 }
 0x565   : > { %v8791_v42 = vsel %vm14133_vm2, %v8786_v35, %v8790_v38  ;;  %v8818_v32 = vrot.slane %v8816_v21, 4  ;;  %v13525_v38 = vld [vmem:[#allocation2 + $0xe0] sm:$0xff]  ;;  %v8010_v34 = vadd.f32 %v16401_v44, %v16415_v59  ;;  %v8484_v59 = vld [vmem:[#allocation2 + $0xf0] sm:$0xf] }
 0x566   : > { %v9027_v60 = vpop.f32.mrf.mxu2  ;;  %v8915_v27 = vunpack.c.l.b16 %v8791_v42  ;;  %v8809_v52 = vor.u32 %v8808_v51, %v8805_v5 }
 0x567   : > { %v9130_v58 = vadd.f32 %v9027_v60, %v16733_v36  ;;  %v8288_v29 = vpop.f32.mrf.mxu1  ;;  %v9228_v36 = vld [vmem:[#allocation2 + $0xe4] sm:$0xf]  ;;  %v8819_v16 = vor.u32 %v8818_v32, %v8814_v63 }
 0x568   : > { %v16764_v10 = vadd.f32 %v8288_v29, %v8008_v20  ;;  %v9377_v62 = vrot.slane %v9228_v36, 5  ;;  %v8935_v18 = vpack.c.b16 %v8916_v39, %v8915_v27  ;;  %v8483_v29 = vld [vmem:[#allocation2 + $0xe8] sm:$0x1]  ;;  %v8485_v39 = vld [vmem:[#allocation2 + $0xf4] sm:$0xf]  ;;  %v13576_v32 = vld [vmem:[#allocation9 + $0x1c0] sm:$0xff] }
 0x569   : > { %v16768_v11 = vadd.f32 %v9549_v55, %v9130_v58  ;;  %v9229_v58 = vld [vmem:[#allocation2 + $0xe8] sm:$0x1]  ;;  %v8822_v35 = vshll.u32 %v8483_v29, 16  ;;  %v8820_v36 = vrot.slane %v8819_v16, 4  ;;  %v8840_v27 = vshrl.u32 %v8485_v39, 16  ;;  %10657 = vmatpush.bf16.msra.mxu1 %v13576_v32 }
 0x56a   : > { %v9379_v53 = vrot.slane %v9377_v62, 4  ;;  %v9380_v12 = vrot.slane %v9229_v58, 5  ;;  %v9378_v48 = vsel %vm14226_vm5, %v13082_v7, %v9377_v62  ;;  %v8827_v29 = vshrl.u32 %v8484_v59, 16 }
 0x56b   : > { %v9551_v20 = vpop.f32.mrf.mxu3  ;;  %v8830_v62 = vshll.u32 %v8484_v59, 16  ;;  %v8842_v16 = vrot.slane %v8840_v27, 4  ;;  %v8012_v32 = vadd.f32 %v16447_v0, %v16458_v14 }
 0x56c   : > { %v9381_v21 = vsel %vm14226_vm5, %v9379_v53, %v9380_v12  ;;  %v8011_v53 = vadd.f32 %v16425_v9, %v16434_v37 }
 0x56d   : > { %v8832_v9 = vrot.slane %v8830_v62, 5  ;;  %v10089_v62 = vld [vmem:[#allocation2 + $0x20] sm:$0xf] }
 0x56e   : > { %v9029_v61 = vpop.f32.mrf.mxu2 }
 0x56f   : > { %v9131_v55 = vadd.f32 %v9029_v61, %v16742_v26  ;;  %v8291_v60 = vpop.f32.mrf.mxu1  ;;  %v13584_v26 = vld [vmem:[#allocation9 + $0x200] sm:$0xff]  ;;  %v8824_v61 = vrot.slane %v8822_v35, 5 }
 0x570   : > { %v16777_v47 = vadd.f32 %v8291_v60, %v8009_v49  ;;  %9593 = vmatmul.bf16.gmra.mxu3 %v9457_v15  ;;  %11179 = vmatpush.bf16.msra.mxu2 %v13584_v26  ;;  %v9440_v49 = vunpack.c.l.b16 %v9381_v21  ;;  %v8836_v60 = vshll.u32 %v8485_v39, 16  ;;  %v8486_v21 = vld [vmem:[#allocation2 + $0xf8] sm:$0x1] }
 0x571   : > { %v16779_v1 = vadd.f32 %v9551_v20, %v9131_v55  ;;  %8330 = vmatmul.bf16.gmra.mxu1 %v13525_v38  ;;  %v8810_v55 = vrot.slane %v8809_v52, 4  ;;  %v8825_v44 = vsel %vm14133_vm2, %v8820_v36, %v8824_v61  ;;  %v9439_v20 = vunpack.c.l.b16 %v9378_v48  ;;  %v9230_v52 = vld [vmem:[#allocation2 + $0xf0] sm:$0xe]  ;;  %v10090_v61 = vld [vmem:[#allocation2 + $0x24] sm:$0xf] }
 0x572   : > { %v8918_v58 = vunpack.c.l.b16 %v8825_v44  ;;  %v8838_v51 = vrot.slane %v8836_v60, 5  ;;  %v8846_v48 = vshll.u32 %v8486_v21, 16  ;;  %v10151_v0 = vshrl.u32 %v10090_v61, 16 }
 0x573   : > { %9071 = vmatmul.bf16.gmra.mxu2 %v8935_v18  ;;  %v8815_v38 = vsel %vm14133_vm2, %v8810_v55, %v8814_v63  ;;  %v9458_v18 = vpack.c.b16 %v9440_v49, %v9439_v20  ;;  %v13526_v63 = vld [vmem:[#allocation2 + $0xf0] sm:$0xff]  ;;  %v8488_v20 = vld [vmem:[#allocation2 + $0x104] sm:$0xf] }
 0x574   : > { %v8917_v35 = vunpack.c.l.b16 %v8815_v38  ;;  %v8843_v37 = vor.u32 %v8842_v16, %v8838_v51  ;;  %v8860_v16 = vshll.u32 %v8488_v20, 16 }
 0x576   : > { %v9032_v41 = vpop.f32.mrf.mxu2  ;;  %v8844_v59 = vrot.slane %v8843_v37, 4  ;;  %v8013_v37 = vadd.f32 %v16463_v3, %v16474_v45  ;;  %v9235_v45 = vld [vmem:[#allocation2 + $0x108] sm:$0x1] }
 0x577   : > { %v16786_v42 = vadd.f32 %v9032_v41, %v16755_v30  ;;  %v8293_v15 = vpop.f32.mrf.mxu1  ;;  %v9231_v30 = vld [vmem:[#allocation2 + $0xf4] sm:$0xf]  ;;  %v8936_v41 = vpack.c.b16 %v8918_v58, %v8917_v35  ;;  %v10147_v58 = vshll.u32 %v10090_v61, 16 }
 0x578   : > { %v16788_v13 = vadd.f32 %v8293_v15, %v8010_v34  ;;  %v9384_v5 = vrot.slane %v9231_v30, 5  ;;  %v9232_v34 = vld [vmem:[#allocation2 + $0xf8] sm:$0x1]  ;;  %v8829_v15 = vrot.slane %v8827_v29, 4 }
 0x579   : > { %v9387_v39 = vrot.slane %v9232_v34, 5  ;;  %v10141_v34 = vshll.u32 %v10089_v62, 16 }
 0x57a   : > { %v9386_v36 = vrot.slane %v9384_v5, 4  ;;  %v8833_v44 = vor.u32 %v8832_v9, %v8829_v15  ;;  %v10153_v15 = vrot.slane %v10151_v0, 4 }
 0x57c   : > { %v9388_v55 = vsel %vm14226_vm5, %v9386_v36, %v9387_v39  ;;  %v8834_v14 = vrot.slane %v8833_v44, 4  ;;  %v13527_v44 = vld [vmem:[#allocation2 + $0x100] sm:$0xff] }
 0x57d   : > { %v9442_v29 = vunpack.c.l.b16 %v9388_v55 }
 0x57e   : > { %v9034_v19 = vpop.f32.mrf.mxu2  ;;  %v8839_v35 = vsel %vm14133_vm2, %v8834_v14, %v8838_v51  ;;  %v9233_v14 = vld [vmem:[#allocation2 + $0x100] sm:$0xe] }
 0x57f   : > { %v16799_v26 = vadd.f32 %v9034_v19, %v16764_v10  ;;  %v8296_v12 = vpop.f32.mrf.mxu1  ;;  %v13083_v10 = vrot.slane %v9230_v52, 9 }
 0x580   : > { %v16801_v7 = vadd.f32 %v8296_v12, %v8011_v53  ;;  %9598 = vmatmul.bf16.gmra.mxu3 %v9458_v18  ;;  %v8848_v18 = vrot.slane %v8846_v48, 5  ;;  %v8487_v53 = vld [vmem:[#allocation2 + $0x100] sm:$0xf]  ;;  %v16822_v48 = vrot.slane %v8860_v16, 5  ;;  %v9394_v16 = vrot.slane %v9235_v45, 5 }
 0x581   : > { %8335 = vmatmul.bf16.gmra.mxu1 %v13526_v63  ;;  %v9385_v38 = vsel %vm14226_vm5, %v13083_v10, %v9384_v5  ;;  %v9234_v63 = vld [vmem:[#allocation2 + $0x104] sm:$0xf]  ;;  %v16818_v5 = vrot.slane %v10147_v58, 5  ;;  %v8851_v36 = vshrl.u32 %v8487_v53, 16  ;;  %v8854_v39 = vshll.u32 %v8487_v53, 16 }
 0x582   : > { %v8849_v19 = vsel %vm14133_vm2, %v8844_v59, %v8848_v18  ;;  %v9441_v12 = vunpack.c.l.b16 %v9385_v38  ;;  %v10091_v59 = vld [vmem:[#allocation2 + $0x28] sm:$0x1] }
 0x583   : > { %9076 = vmatmul.bf16.gmra.mxu2 %v8936_v41  ;;  %v10138_v41 = vshrl.u32 %v10089_v62, 16  ;;  %v8920_v52 = vunpack.c.l.b16 %v8849_v19  ;;  %v8489_v18 = vld [vmem:[#allocation2 + $0x108] sm:$0x1]  ;;  %v10154_v3 = vor.u32 %v10153_v15, %v16818_v5  ;;  %v8853_v58 = vrot.slane %v8851_v36, 4 }
 0x584   : > { %v9459_v21 = vpack.c.b16 %v9442_v29, %v9441_v12  ;;  %v8856_v29 = vrot.slane %v8854_v39, 5  ;;  %v10157_v0 = vshll.u32 %v10091_v59, 16  ;;  %v8870_v19 = vshll.u32 %v8489_v18, 16 }
 0x585   : > { %v13084_v36 = vrot.slane %v9233_v14, 9  ;;  %v8015_v14 = vadd.f32 %v16495_v4, %v16500_v24  ;;  %v10837_v4 = vld [vmem:[#allocation2 + $0x28] sm:$0x1] }
 0x586   : > { %v9037_v49 = vpop.f32.mrf.mxu2  ;;  %v8872_v39 = vrot.slane %v8870_v19, 5 }
 0x587   : > { %v16808_v60 = vadd.f32 %v9037_v49, %v16777_v47  ;;  %v8298_v27 = vpop.f32.mrf.mxu1  ;;  %v8864_v47 = vshrl.u32 %v8488_v20, 16  ;;  %v8919_v49 = vunpack.c.l.b16 %v8839_v35  ;;  %v10143_v20 = vrot.slane %v10141_v34, 5  ;;  %v10093_v34 = vld [vmem:[#allocation2 + $0x34] sm:$0xf] }
 0x588   : > { %v16810_v30 = vadd.f32 %v8298_v27, %v8012_v32  ;;  %v9391_v32 = vrot.slane %v9234_v63, 5  ;;  %v10140_v27 = vrot.slane %v10138_v41, 4  ;;  %v8014_v35 = vadd.f32 %v16483_v22, %v16489_v2  ;;  %v10092_v2 = vld [vmem:[#allocation2 + $0x30] sm:$0xf] }
 0x589   : > { %v8866_v10 = vrot.slane %v8864_v47, 4  ;;  %v8937_v38 = vpack.c.b16 %v8920_v52, %v8919_v49  ;;  %v10155_v47 = vrot.slane %v10154_v3, 4  ;;  %v8857_v63 = vor.u32 %v8856_v29, %v8853_v58  ;;  %v10836_v58 = vld [vmem:[#allocation2 + $0x24] sm:$0xf] }
 0x58a   : > { %v9393_v62 = vrot.slane %v9391_v32, 4  ;;  %v10144_v53 = vor.u32 %v10143_v20, %v10140_v27  ;;  %v10171_v49 = vshll.u32 %v10093_v34, 16  ;;  %v10162_v3 = vshrl.u32 %v10092_v2, 16 }
 0x58b   : > { %v8858_v59 = vrot.slane %v8857_v63, 4  ;;  %v10165_v29 = vshll.u32 %v10092_v2, 16  ;;  %v10094_v63 = vld [vmem:[#allocation2 + $0x38] sm:$0x1] }
 0x58c   : > { %v9395_v15 = vsel %vm14226_vm5, %v9393_v62, %v9394_v16  ;;  %v10181_v24 = vshll.u32 %v10094_v63, 16 }
 0x58e   : > { %v9039_v9 = vpop.f32.mrf.mxu2 }
 0x58f   : > { %v16825_v61 = vadd.f32 %v9039_v9, %v16788_v13  ;;  %v8301_v51 = vpop.f32.mrf.mxu1  ;;  %v8867_v13 = vor.u32 %v8866_v10, %v16822_v48  ;;  %v10159_v9 = vrot.slane %v10157_v0, 5  ;;  %v10145_v10 = vrot.slane %v10144_v53, 4 }
 0x590   : > { %v16827_v55 = vadd.f32 %v8301_v51, %v8013_v37  ;;  %9603 = vmatmul.bf16.gmra.mxu3 %v9459_v21  ;;  %v9392_v51 = vsel %vm14226_vm5, %v13084_v36, %v9391_v32  ;;  %v8863_v32 = vsel %vm14133_vm2, %v8858_v59, %v16822_v48 }
 0x591   : > { %8340 = vmatmul.bf16.gmra.mxu1 %v13527_v44  ;;  %v8868_v41 = vrot.slane %v8867_v13, 4  ;;  %v10160_v22 = vsel %vm14133_vm2, %v10155_v47, %v10159_v9  ;;  %v9444_v44 = vunpack.c.l.b16 %v9395_v15  ;;  %v10150_v20 = vsel %vm14133_vm2, %v10145_v10, %v16818_v5 }
 0x592   : > { %v10539_v18 = vunpack.c.l.b16 %v10160_v22  ;;  %v10173_v13 = vrot.slane %v10171_v49, 5  ;;  %v10538_v53 = vunpack.c.l.b16 %v10150_v20  ;;  %v8921_v47 = vunpack.c.l.b16 %v8863_v32  ;;  %v10096_v22 = vld [vmem:[#allocation2 + $0x44] sm:$0xf] }
 0x593   : > { %9081 = vmatmul.bf16.gmra.mxu2 %v8937_v38  ;;  %v8873_v27 = vsel %vm14133_vm2, %v8868_v41, %v8872_v39  ;;  %v9443_v38 = vunpack.c.l.b16 %v9392_v51  ;;  %v8016_v10 = vadd.f32 %v16508_v28, %v16513_v17  ;;  %v10936_v51 = vrot.slane %v10837_v4, 5  ;;  %v10095_v17 = vld [vmem:[#allocation2 + $0x40] sm:$0xf]  ;;  %v10097_v4 = vld [vmem:[#allocation2 + $0x48] sm:$0x1] }
 0x594   : > { %v8922_v45 = vunpack.c.l.b16 %v8873_v27  ;;  %v10570_v48 = vpack.c.b16 %v10539_v18, %v10538_v53  ;;  %v10195_v32 = vshll.u32 %v10096_v22, 16  ;;  %v10199_v18 = vshrl.u32 %v10096_v22, 16 }
 0x595   : > { %v9460_v19 = vpack.c.b16 %v9444_v44, %v9443_v38  ;;  %v10183_v44 = vrot.slane %v10181_v24, 5 }
 0x596   : > { %v9042_v12 = vpop.f32.mrf.mxu2  ;;  %v8938_v41 = vpack.c.b16 %v8922_v45, %v8921_v47  ;;  %v17684_v47 = vld [vmem:[#allocation18_spill] sm:$0xff] }
 0x597   : > { %v16834_v21 = vadd.f32 %v9042_v12, %v16801_v7  ;;  %v8303_v52 = vpop.f32.mrf.mxu1  ;;  %v10175_v7 = vshrl.u32 %v10093_v34, 16  ;;  %v10164_v34 = vrot.slane %v10162_v3, 4 }
 0x598   : > { %v16838_v37 = vadd.f32 %v8303_v52, %v8014_v35  ;;  %v10933_v35 = vrot.slane %v10836_v58, 5  ;;  %v10167_v52 = vrot.slane %v10165_v29, 5  ;;  %v10839_v29 = vld [vmem:[#allocation2 + $0x34] sm:$0xf] }
 0x599   : > { %v10177_v62 = vrot.slane %v10175_v7, 4  ;;  %v10835_v7 = vld [vmem:[#allocation2 + $0x20] sm:$0xe] }
 0x59a   : > { %v10935_v15 = vrot.slane %v10933_v35, 4  ;;  %v10168_v9 = vor.u32 %v10167_v52, %v10164_v34  ;;  %v13245_v28 = vrot.slane %v10835_v7, 9  ;;  %v17685_v7 = vld [vmem:[#allocation48_spill] sm:$0xff] }
 0x59b   : > { %v10178_v36 = vor.u32 %v10177_v62, %v10173_v13  ;;  %v10186_v62 = vshrl.u32 %v10095_v17, 16 }
 0x59c   : > { %v10937_v27 = vsel %vm14226_vm5, %v10935_v15, %v10936_v51  ;;  %v10169_v20 = vrot.slane %v10168_v9, 4  ;;  %v10934_v3 = vsel %vm14226_vm5, %v13245_v28, %v10933_v35  ;;  %v10838_v28 = vld [vmem:[#allocation2 + $0x30] sm:$0xe] }
 0x59d   : > { %v11061_v45 = vunpack.c.l.b16 %v10937_v27  ;;  %v10188_v15 = vrot.slane %v10186_v62, 4 }
 0x59e   : > { %v9044_v0 = vpop.f32.mrf.mxu2 }
 0x59f   : > { %v16855_v5 = vadd.f32 %v9044_v0, %v16810_v30  ;;  %v8306_v16 = vpop.f32.mrf.mxu1  ;;  %v10179_v30 = vrot.slane %v10178_v36, 4  ;;  %v10189_v0 = vshll.u32 %v10095_v17, 16  ;;  %v10940_v36 = vrot.slane %v10839_v29, 5 }
 0x5a0   : > { %v16857_v12 = vadd.f32 %v8306_v16, %v8015_v14  ;;  %9608 = vmatmul.bf16.gmra.mxu3 %v9460_v19  ;;  %v10197_v14 = vrot.slane %v10195_v32, 5  ;;  %v10201_v19 = vrot.slane %v10199_v18, 4  ;;  %v17683_v16 = vld [vmem:[#allocation21_spill] sm:$0xff] }
 0x5a1   : > { %10658 = vmatmul.bf16.vlgmr.msra.gmra.mxu1 %v10570_v48  ;;  %v10184_v38 = vsel %vm14133_vm2, %v10179_v30, %v10183_v44  ;;  %v8017_v48 = vadd.f32 %v17684_v47, %v17683_v16  ;;  %v10191_v9 = vrot.slane %v10189_v0, 5  ;;  %v10942_v51 = vrot.slane %v10940_v36, 4  ;;  %v17686_v44 = vld [vmem:[#allocation51_spill] sm:$0xff] }
 0x5a2   : > { %v10541_v58 = vunpack.c.l.b16 %v10184_v38  ;;  %v10202_v30 = vor.u32 %v10201_v19, %v10197_v14  ;;  %v8018_v27 = vadd.f32 %v17686_v44, %v17685_v7  ;;  %v10099_v38 = vld [vmem:[#allocation2 + $0x54] sm:$0xf]  ;;  %v13246_v0 = vrot.slane %v10838_v28, 9  ;;  %v10098_v19 = vld [vmem:[#allocation2 + $0x50] sm:$0xf] }
 0x5a3   : > { %9086 = vmatmul.bf16.gmra.mxu2 %v8938_v41  ;;  %v10192_v22 = vor.u32 %v10191_v9, %v10188_v15  ;;  %v10219_v29 = vshll.u32 %v10099_v38, 16  ;;  %v10223_v62 = vshrl.u32 %v10099_v38, 16  ;;  %v17688_v15 = vld [vmem:[#allocation49_spill] sm:$0xff] }
 0x5a6   : > { %v9047_v39 = vpop.f32.mrf.mxu2 }
 0x5a7   : > { %v16862_v2 = vadd.f32 %v9047_v39, %v16827_v55  ;;  %v8308_v49 = vpop.f32.mrf.mxu1  ;;  %v10174_v55 = vsel %vm14133_vm2, %v10169_v20, %v10173_v13  ;;  %v11060_v13 = vunpack.c.l.b16 %v10934_v3  ;;  %v10840_v39 = vld [vmem:[#allocation2 + $0x38] sm:$0x1] }
 0x5a8   : > { %v16864_v59 = vadd.f32 %v8308_v49, %v8016_v10  ;;  %v10540_v63 = vunpack.c.l.b16 %v10174_v55  ;;  %v10205_v10 = vshll.u32 %v10097_v4, 16  ;;  %v10203_v49 = vrot.slane %v10202_v30, 4 }
 0x5a9   : > { %v11092_v24 = vpack.c.b16 %v11061_v45, %v11060_v13  ;;  %v10943_v20 = vrot.slane %v10840_v39, 5  ;;  %v10193_v45 = vrot.slane %v10192_v22, 4  ;;  %v10221_v13 = vrot.slane %v10219_v29, 5 }
 0x5aa   : > { %v10571_v35 = vpack.c.b16 %v10541_v58, %v10540_v63  ;;  %v10207_v17 = vrot.slane %v10205_v10, 5  ;;  %v10210_v63 = vshrl.u32 %v10098_v19, 16 }
 0x5ab   : > { %v10944_v3 = vsel %vm14226_vm5, %v10942_v51, %v10943_v20  ;;  %v10843_v20 = vld [vmem:[#allocation2 + $0x48] sm:$0x1] }
 0x5ac   : > { %v10208_v58 = vsel %vm14133_vm2, %v10203_v49, %v10207_v17  ;;  %v11063_v16 = vunpack.c.l.b16 %v10944_v3  ;;  %v10100_v49 = vld [vmem:[#allocation2 + $0x58] sm:$0x1]  ;;  %v10212_v7 = vrot.slane %v10210_v63, 4  ;;  %v17689_v3 = vld [vmem:[#allocation44_spill] sm:$0xff]  ;;  %v10950_v29 = vrot.slane %v10843_v20, 5 }
 0x5ad   : > { %v10543_v47 = vunpack.c.l.b16 %v10208_v58  ;;  %v10229_v38 = vshll.u32 %v10100_v49, 16 }
 0x5ae   : > { %v9049_v53 = vpop.f32.mrf.mxu2 }
 0x5af   : > { %v16877_v41 = vadd.f32 %v9049_v53, %v16838_v37  ;;  %v8311_v34 = vpop.f32.mrf.mxu1  ;;  %v10941_v53 = vsel %vm14226_vm5, %v13246_v0, %v10940_v36 }
 0x5b0   : > { %v16879_v52 = vadd.f32 %v8311_v34, %v8017_v48  ;;  %v10842_v48 = vld [vmem:[#allocation2 + $0x44] sm:$0xf]  ;;  %v10213_v34 = vshll.u32 %v10098_v19, 16 }
 0x5b1   : > { %10663 = vmatmul.bf16.gmra.mxu1 %v10571_v35  ;;  %v10225_v35 = vrot.slane %v10223_v62, 4  ;;  %v10947_v22 = vrot.slane %v10842_v48, 5  ;;  %v10102_v62 = vld [vmem:[#allocation2 + $0x64] sm:$0xf] }
 0x5b2   : > { %v10215_v44 = vrot.slane %v10213_v34, 5  ;;  %v10243_v34 = vshll.u32 %v10102_v62, 16 }
 0x5b3   : > { %11180 = vmatmul.bf16.vlgmr.msra.gmra.mxu2 %v11092_v24  ;;  %v17687_v24 = vld [vmem:[#allocation24_spill] sm:$0xff] }
 0x5b4   : > { %v8019_v9 = vadd.f32 %v17688_v15, %v17687_v24  ;;  %v10216_v28 = vor.u32 %v10215_v44, %v10212_v7  ;;  %v10101_v24 = vld [vmem:[#allocation2 + $0x60] sm:$0xf]  ;;  %v10245_v49 = vrot.slane %v10243_v34, 5  ;;  %v17691_v44 = vld [vmem:[#allocation25_spill] sm:$0xff] }
 0x5b5   : > { %v17694_v34 = vld [vmem:[#allocation46_spill] sm:$0xff] }
 0x5b6   : > { %v9052_v37 = vpop.f32.mrf.mxu2  ;;  %v10217_v48 = vrot.slane %v10216_v28, 4 }
 0x5b7   : > { %v16884_v32 = vadd.f32 %v9052_v37, %v16857_v12  ;;  %v8313_v18 = vpop.f32.mrf.mxu1  ;;  %v10198_v12 = vsel %vm14133_vm2, %v10193_v45, %v10197_v14  ;;  %v11062_v14 = vunpack.c.l.b16 %v10941_v53  ;;  %v17690_v45 = vld [vmem:[#allocation15_spill] sm:$0xff]  ;;  %v10231_v53 = vrot.slane %v10229_v38, 5 }
 0x5b8   : > { %v16886_v55 = vadd.f32 %v8313_v18, %v8018_v27  ;;  %v10542_v30 = vunpack.c.l.b16 %v10198_v12  ;;  %v10226_v27 = vor.u32 %v10225_v35, %v10221_v13  ;;  %v10949_v18 = vrot.slane %v10947_v22, 4  ;;  %v10841_v12 = vld [vmem:[#allocation2 + $0x40] sm:$0xe] }
 0x5b9   : > { %v11093_v37 = vpack.c.b16 %v11063_v16, %v11062_v14  ;;  %v8020_v58 = vadd.f32 %v17690_v45, %v17689_v3  ;;  %v10247_v35 = vshrl.u32 %v10102_v62, 16  ;;  %v10234_v14 = vshrl.u32 %v10101_v24, 16  ;;  %v10103_v3 = vld [vmem:[#allocation2 + $0x68] sm:$0x1] }
 0x5ba   : > { %v10572_v36 = vpack.c.b16 %v10543_v47, %v10542_v30  ;;  %v10227_v17 = vrot.slane %v10226_v27, 4  ;;  %v10951_v47 = vsel %vm14226_vm5, %v10949_v18, %v10950_v29  ;;  %v17692_v27 = vld [vmem:[#allocation29_spill] sm:$0xff] }
 0x5bb   : > { %v8021_v20 = vadd.f32 %v17692_v27, %v17691_v44 }
 0x5bc   : > { %v10232_v63 = vsel %vm14133_vm2, %v10227_v17, %v10231_v53 }
 0x5bd   : > { %v10545_v30 = vunpack.c.l.b16 %v10232_v63  ;;  %v17693_v63 = vld [vmem:[#allocation23_spill] sm:$0xff] }
 0x5be   : > { %v9054_v4 = vpop.f32.mrf.mxu2 }
 0x5bf   : > { %v16899_v39 = vadd.f32 %v9054_v4, %v16864_v59  ;;  %v8316_v10 = vpop.f32.mrf.mxu1  ;;  %v13247_v4 = vrot.slane %v10841_v12, 9  ;;  %v10253_v12 = vshll.u32 %v10103_v3, 16 }
 0x5c0   : > { %v16901_v51 = vadd.f32 %v8316_v10, %v8019_v9  ;;  %v11065_v9 = vunpack.c.l.b16 %v10951_v47  ;;  %v10845_v10 = vld [vmem:[#allocation2 + $0x54] sm:$0xf] }
 0x5c1   : > { %10668 = vmatmul.bf16.gmra.mxu1 %v10572_v36  ;;  %v10948_v15 = vsel %vm14226_vm5, %v13247_v4, %v10947_v22  ;;  %v10237_v36 = vshll.u32 %v10101_v24, 16  ;;  %v10105_v24 = vld [vmem:[#allocation2 + $0x74] sm:$0xf] }
 0x5c2   : > { %v10271_v44 = vshrl.u32 %v10105_v24, 16 }
 0x5c3   : > { %11185 = vmatmul.bf16.gmra.mxu2 %v11093_v37  ;;  %v10249_v37 = vrot.slane %v10247_v35, 4  ;;  %v10239_v29 = vrot.slane %v10237_v36, 5  ;;  %v8022_v35 = vadd.f32 %v17694_v34, %v17693_v63 }
 0x5c5   : > { %v10250_v62 = vor.u32 %v10249_v37, %v10245_v49 }
 0x5c6   : > { %v9057_v59 = vpop.f32.mrf.mxu2 }
 0x5c7   : > { %v16906_v0 = vadd.f32 %v9057_v59, %v16879_v52  ;;  %v8318_v19 = vpop.f32.mrf.mxu1  ;;  %v10222_v52 = vsel %vm14133_vm2, %v10217_v48, %v10221_v13  ;;  %v11064_v13 = vunpack.c.l.b16 %v10948_v15  ;;  %v10954_v59 = vrot.slane %v10845_v10, 5 }
 0x5c8   : > { %v16908_v16 = vadd.f32 %v8318_v19, %v8020_v58  ;;  %v10544_v38 = vunpack.c.l.b16 %v10222_v52  ;;  %v10236_v58 = vrot.slane %v10234_v14, 4  ;;  %v10846_v19 = vld [vmem:[#allocation2 + $0x58] sm:$0x1]  ;;  %v10251_v48 = vrot.slane %v10250_v62, 4 }
 0x5c9   : > { %v11094_v45 = vpack.c.b16 %v11065_v9, %v11064_v13  ;;  %v10956_v53 = vrot.slane %v10954_v59, 4  ;;  %v10957_v4 = vrot.slane %v10846_v19, 5  ;;  %v10844_v9 = vld [vmem:[#allocation2 + $0x50] sm:$0xe]  ;;  %v17695_v19 = vld [vmem:[#allocation27_spill] sm:$0xff] }
 0x5ca   : > { %v10573_v22 = vpack.c.b16 %v10545_v30, %v10544_v38  ;;  %v10240_v47 = vor.u32 %v10239_v29, %v10236_v58  ;;  %v10255_v30 = vrot.slane %v10253_v12, 5  ;;  %v13248_v27 = vrot.slane %v10844_v9, 9  ;;  %v17696_v12 = vld [vmem:[#allocation31_spill] sm:$0xff] }
 0x5cb   : > { %v10958_v14 = vsel %vm14226_vm5, %v10956_v53, %v10957_v4  ;;  %v10273_v29 = vrot.slane %v10271_v44, 4  ;;  %v8023_v53 = vadd.f32 %v17696_v12, %v17695_v19  ;;  %v17697_v44 = vld [vmem:[#allocation28_spill] sm:$0xff] }
 0x5cc   : > { %v10241_v36 = vrot.slane %v10240_v47, 4  ;;  %v10256_v37 = vsel %vm14133_vm2, %v10251_v48, %v10255_v30  ;;  %v10955_v38 = vsel %vm14226_vm5, %v13248_v27, %v10954_v59  ;;  %v10849_v30 = vld [vmem:[#allocation2 + $0x68] sm:$0x1]  ;;  %v17698_v27 = vld [vmem:[#allocation30_spill] sm:$0xff] }
 0x5cd   : > { %v10547_v13 = vunpack.c.l.b16 %v10256_v37 }
 0x5ce   : > { %v9059_v7 = vpop.f32.mrf.mxu2 }
 0x5cf   : > { %v16921_v18 = vadd.f32 %v9059_v7, %v16886_v55  ;;  %v8321_v28 = vpop.f32.mrf.mxu1  ;;  %v10267_v7 = vshll.u32 %v10105_v24, 16 }
 0x5d0   : > { %v16923_v17 = vadd.f32 %v8321_v28, %v8021_v20  ;;  %v10104_v20 = vld [vmem:[#allocation2 + $0x70] sm:$0xf]  ;;  %v11067_v28 = vunpack.c.l.b16 %v10958_v14 }
 0x5d1   : > { %10673 = vmatmul.bf16.gmra.mxu1 %v10573_v22  ;;  %v10848_v22 = vld [vmem:[#allocation2 + $0x64] sm:$0xf]  ;;  %v10258_v3 = vshrl.u32 %v10104_v20, 16  ;;  %v10269_v58 = vrot.slane %v10267_v7, 5 }
 0x5d2   : > { %v10961_v34 = vrot.slane %v10848_v22, 5  ;;  %v10847_v22 = vld [vmem:[#allocation2 + $0x60] sm:$0xe] }
 0x5d3   : > { %11190 = vmatmul.bf16.gmra.mxu2 %v11094_v45  ;;  %v10261_v45 = vshll.u32 %v10104_v20, 16  ;;  %v10260_v24 = vrot.slane %v10258_v3, 4  ;;  %v10274_v9 = vor.u32 %v10273_v29, %v10269_v58  ;;  %v8024_v20 = vadd.f32 %v17698_v27, %v17697_v44 }
 0x5d5   : > { %v10275_v7 = vrot.slane %v10274_v9, 4 }
 0x5d6   : > { %v9062_v55 = vpop.f32.mrf.mxu2 }
 0x5d7   : > { %v16928_v52 = vadd.f32 %v9062_v55, %v16901_v51  ;;  %v8323_v15 = vpop.f32.mrf.mxu1  ;;  %v10246_v51 = vsel %vm14133_vm2, %v10241_v36, %v10245_v49  ;;  %v11066_v49 = vunpack.c.l.b16 %v10955_v38  ;;  %v10963_v36 = vrot.slane %v10961_v34, 4  ;;  %v10108_v38 = vld [vmem:[#allocation2 + $0x84] sm:$0xf] }
 0x5d8   : > { %v16930_v10 = vadd.f32 %v8323_v15, %v8022_v35  ;;  %v10546_v47 = vunpack.c.l.b16 %v10246_v51  ;;  %v10106_v35 = vld [vmem:[#allocation2 + $0x78] sm:$0x1]  ;;  %v10263_v15 = vrot.slane %v10261_v45, 5  ;;  %v10964_v51 = vrot.slane %v10849_v30, 5 }
 0x5d9   : > { %v11095_v4 = vpack.c.b16 %v11067_v28, %v11066_v49  ;;  %v10277_v14 = vshll.u32 %v10106_v35, 16  ;;  %v10291_v12 = vshll.u32 %v10108_v38, 16 }
 0x5da   : > { %v10574_v59 = vpack.c.b16 %v10547_v13, %v10546_v47  ;;  %v10264_v37 = vor.u32 %v10263_v15, %v10260_v24  ;;  %v10965_v29 = vsel %vm14226_vm5, %v10963_v36, %v10964_v51  ;;  %v13249_v47 = vrot.slane %v10847_v22, 9  ;;  %v17699_v36 = vld [vmem:[#allocation34_spill] sm:$0xff] }
 0x5db   : > { %v10279_v3 = vrot.slane %v10277_v14, 5  ;;  %v10293_v9 = vrot.slane %v10291_v12, 5 }
 0x5dc   : > { %v10962_v49 = vsel %vm14226_vm5, %v13249_v47, %v10961_v34 }
 0x5dd   : > { %v10280_v19 = vsel %vm14133_vm2, %v10275_v7, %v10279_v3 }
 0x5de   : > { %v9064_v62 = vpop.f32.mrf.mxu2  ;;  %v10549_v35 = vunpack.c.l.b16 %v10280_v19 }
 0x5df   : > { %v16943_v48 = vadd.f32 %v9064_v62, %v16908_v16  ;;  %v8326_v55 = vpop.f32.mrf.mxu1  ;;  %v10265_v62 = vrot.slane %v10264_v37, 4  ;;  %v17700_v37 = vld [vmem:[#allocation35_spill] sm:$0xff] }
 0x5e0   : > { %v16945_v63 = vadd.f32 %v8326_v55, %v8023_v53  ;;  %v10295_v53 = vshrl.u32 %v10108_v38, 16  ;;  %v10107_v55 = vld [vmem:[#allocation2 + $0x80] sm:$0xf]  ;;  %v8025_v7 = vadd.f32 %v17700_v37, %v17699_v36  ;;  %v10109_v38 = vld [vmem:[#allocation2 + $0x88] sm:$0x1] }
 0x5e1   : > { %10678 = vmatmul.bf16.gmra.mxu1 %v10574_v59  ;;  %v11069_v59 = vunpack.c.l.b16 %v10965_v29  ;;  %v10282_v24 = vshrl.u32 %v10107_v55, 16  ;;  %v10285_v15 = vshll.u32 %v10107_v55, 16  ;;  %v10301_v19 = vshll.u32 %v10109_v38, 16  ;;  %v17701_v55 = vld [vmem:[#allocation39_spill] sm:$0xff]  ;;  %v10111_v36 = vld [vmem:[#allocation2 + $0x94] sm:$0xf] }
 0x5e2   : > { %v10297_v30 = vrot.slane %v10295_v53, 4 }
 0x5e3   : > { %11195 = vmatmul.bf16.gmra.mxu2 %v11095_v4  ;;  %v10851_v4 = vld [vmem:[#allocation2 + $0x74] sm:$0xf]  ;;  %v10284_v22 = vrot.slane %v10282_v24, 4  ;;  %v10287_v3 = vrot.slane %v10285_v15, 5  ;;  %v10303_v24 = vrot.slane %v10301_v19, 5 }
 0x5e4   : > { %v10968_v51 = vrot.slane %v10851_v4, 5  ;;  %v10298_v29 = vor.u32 %v10297_v30, %v10293_v9  ;;  %v10850_v4 = vld [vmem:[#allocation2 + $0x70] sm:$0xe] }
 0x5e5   : > { %v10288_v53 = vor.u32 %v10287_v3, %v10284_v22  ;;  %v10854_v3 = vld [vmem:[#allocation2 + $0x84] sm:$0xf] }
 0x5e6   : > { %v9067_v16 = vpop.f32.mrf.mxu2  ;;  %v10970_v12 = vrot.slane %v10968_v51, 4  ;;  %v10299_v47 = vrot.slane %v10298_v29, 4 }
 0x5e7   : > { %v16950_v13 = vadd.f32 %v9067_v16, %v16923_v17  ;;  %v8328_v28 = vpop.f32.mrf.mxu1  ;;  %v10270_v17 = vsel %vm14133_vm2, %v10265_v62, %v10269_v58  ;;  %v11068_v58 = vunpack.c.l.b16 %v10962_v49  ;;  %v10852_v62 = vld [vmem:[#allocation2 + $0x78] sm:$0x1]  ;;  %v10289_v37 = vrot.slane %v10288_v53, 4 }
 0x5e8   : > { %v16952_v45 = vadd.f32 %v8328_v28, %v8024_v20  ;;  %v10548_v16 = vunpack.c.l.b16 %v10270_v17  ;;  %v17702_v17 = vld [vmem:[#allocation33_spill] sm:$0xff] }
 0x5e9   : > { %v11096_v28 = vpack.c.b16 %v11069_v59, %v11068_v58  ;;  %v8026_v49 = vadd.f32 %v17702_v17, %v17701_v55  ;;  %v13250_v58 = vrot.slane %v10850_v4, 9  ;;  %v10112_v4 = vld [vmem:[#allocation2 + $0x98] sm:$0x1] }
 0x5ea   : > { %v10575_v34 = vpack.c.b16 %v10549_v35, %v10548_v16  ;;  %v10315_v16 = vshll.u32 %v10111_v36, 16 }
 0x5eb   : > { %v10969_v38 = vsel %vm14226_vm5, %v13250_v58, %v10968_v51 }
 0x5ec   : > { %v10317_v19 = vrot.slane %v10315_v16, 5  ;;  %v10855_v16 = vld [vmem:[#allocation2 + $0x88] sm:$0x1] }
 0x5ee   : > { %v9069_v14 = vpop.f32.mrf.mxu2 }
 0x5ef   : > { %v16965_v44 = vadd.f32 %v9069_v14, %v16930_v10  ;;  %v8331_v27 = vpop.f32.mrf.mxu1  ;;  %v10971_v14 = vrot.slane %v10852_v62, 5 }
 0x5f0   : > { %v16967_v20 = vadd.f32 %v8331_v27, %v8025_v7  ;;  %v10304_v7 = vsel %vm14133_vm2, %v10299_v47, %v10303_v24  ;;  %v10319_v27 = vshrl.u32 %v10111_v36, 16  ;;  %v17704_v47 = vld [vmem:[#allocation38_spill] sm:$0xff] }
 0x5f1   : > { %10683 = vmatmul.bf16.gmra.mxu1 %v10575_v34  ;;  %v10972_v30 = vsel %vm14226_vm5, %v10970_v12, %v10971_v14  ;;  %v10110_v34 = vld [vmem:[#allocation2 + $0x90] sm:$0xf]  ;;  %v10551_v22 = vunpack.c.l.b16 %v10304_v7 }
 0x5f2   : > { %v10306_v29 = vshrl.u32 %v10110_v34, 16  ;;  %v10309_v62 = vshll.u32 %v10110_v34, 16  ;;  %v10321_v12 = vrot.slane %v10319_v27, 4  ;;  %v10325_v27 = vshll.u32 %v10112_v4, 16 }
 0x5f3   : > { %11200 = vmatmul.bf16.gmra.mxu2 %v11096_v28  ;;  %v11071_v28 = vunpack.c.l.b16 %v10972_v30 }
 0x5f4   : > { %v10308_v30 = vrot.slane %v10306_v29, 4  ;;  %v10322_v7 = vor.u32 %v10321_v12, %v10317_v19  ;;  %v10327_v29 = vrot.slane %v10325_v27, 5 }
 0x5f6   : > { %v9072_v10 = vpop.f32.mrf.mxu2 }
 0x5f7   : > { %v16972_v35 = vadd.f32 %v9072_v10, %v16945_v63  ;;  %v8333_v59 = vpop.f32.mrf.mxu1  ;;  %v10294_v63 = vsel %vm14133_vm2, %v10289_v37, %v10293_v9  ;;  %v17703_v10 = vld [vmem:[#allocation37_spill] sm:$0xff]  ;;  %v11070_v9 = vunpack.c.l.b16 %v10969_v38  ;;  %v10311_v37 = vrot.slane %v10309_v62, 5 }
 0x5f8   : > { %v16974_v15 = vadd.f32 %v8333_v59, %v8026_v49  ;;  %v8027_v55 = vadd.f32 %v17704_v47, %v17703_v10  ;;  %v10550_v17 = vunpack.c.l.b16 %v10294_v63  ;;  %v10975_v59 = vrot.slane %v10854_v3, 5  ;;  %v10114_v47 = vld [vmem:[#allocation2 + $0xa4] sm:$0xf]  ;;  %v10853_v3 = vld [vmem:[#allocation2 + $0x80] sm:$0xe] }
 0x5f9   : > { %v11097_v24 = vpack.c.b16 %v11071_v28, %v11070_v9  ;;  %v10312_v34 = vor.u32 %v10311_v37, %v10308_v30  ;;  %v10323_v63 = vrot.slane %v10322_v7, 4  ;;  %v10978_v10 = vrot.slane %v10855_v16, 5  ;;  %v10857_v37 = vld [vmem:[#allocation2 + $0x94] sm:$0xf] }
 0x5fa   : > { %v10576_v51 = vpack.c.b16 %v10551_v22, %v10550_v17  ;;  %v10977_v58 = vrot.slane %v10975_v59, 4  ;;  %v10343_v9 = vshrl.u32 %v10114_v47, 16 }
 0x5fb   : > { %v10328_v17 = vsel %vm14133_vm2, %v10323_v63, %v10327_v29  ;;  %v8029_v63 = vadd.f32 %v16667_v25, %v16674_v6 }
 0x5fc   : > { %v10979_v12 = vsel %vm14226_vm5, %v10977_v58, %v10978_v10  ;;  %v10553_v30 = vunpack.c.l.b16 %v10328_v17  ;;  %v10345_v58 = vrot.slane %v10343_v9, 4  ;;  %v10858_v17 = vld [vmem:[#allocation2 + $0x98] sm:$0x1] }
 0x5fe   : > { %v9074_v53 = vpop.f32.mrf.mxu2 }
 0x5ff   : > { %v16987_v49 = vadd.f32 %v9074_v53, %v16952_v45  ;;  %v8336_v14 = vpop.f32.mrf.mxu1  ;;  %v17705_v53 = vld [vmem:[#allocation45_spill] sm:$0xff] }
 0x600   : > { %v16989_v36 = vadd.f32 %v8336_v14, %v8027_v55  ;;  %v8028_v38 = vadd.f32 %v17705_v53, %v16663_v57  ;;  %v10313_v55 = vrot.slane %v10312_v34, 4  ;;  %v10339_v14 = vshll.u32 %v10114_v47, 16 }
 0x601   : > { %10688 = vmatmul.bf16.gmra.mxu1 %v10576_v51  ;;  %v13251_v57 = vrot.slane %v10853_v3, 9  ;;  %v10113_v51 = vld [vmem:[#allocation2 + $0xa0] sm:$0xf] }
 0x602   : > { %v10330_v7 = vshrl.u32 %v10113_v51, 16  ;;  %v10333_v16 = vshll.u32 %v10113_v51, 16  ;;  %v10341_v27 = vrot.slane %v10339_v14, 5  ;;  %v10985_v51 = vrot.slane %v10858_v17, 5 }
 0x603   : > { %11205 = vmatmul.bf16.gmra.mxu2 %v11097_v24  ;;  %v10976_v4 = vsel %vm14226_vm5, %v13251_v57, %v10975_v59  ;;  %v11073_v24 = vunpack.c.l.b16 %v10979_v12  ;;  %v10982_v59 = vrot.slane %v10857_v37, 5 }
 0x604   : > { %v10332_v29 = vrot.slane %v10330_v7, 4  ;;  %v10335_v12 = vrot.slane %v10333_v16, 5 }
 0x605   : > { %v10984_v9 = vrot.slane %v10982_v59, 4 }
 0x606   : > { %v9077_v45 = vpop.f32.mrf.mxu2  ;;  %v10336_v25 = vor.u32 %v10335_v12, %v10332_v29 }
 0x607   : > { %v16994_v22 = vadd.f32 %v9077_v45, %v16967_v20  ;;  %v8338_v28 = vpop.f32.mrf.mxu1  ;;  %v10318_v20 = vsel %vm14133_vm2, %v10313_v55, %v10317_v19  ;;  %v11072_v19 = vunpack.c.l.b16 %v10976_v4  ;;  %v10346_v55 = vor.u32 %v10345_v58, %v10341_v27 }
 0x608   : > { %v16996_v62 = vadd.f32 %v8338_v28, %v8028_v38  ;;  %v10552_v45 = vunpack.c.l.b16 %v10318_v20  ;;  %v10115_v28 = vld [vmem:[#allocation2 + $0xa8] sm:$0x1]  ;;  %v10117_v20 = vld [vmem:[#allocation2 + $0xb4] sm:$0xf]  ;;  %v10986_v16 = vsel %vm14226_vm5, %v10984_v9, %v10985_v51  ;;  %v10337_v58 = vrot.slane %v10336_v25, 4 }
 0x609   : > { %v11098_v3 = vpack.c.b16 %v11073_v24, %v11072_v19  ;;  %v10349_v14 = vshll.u32 %v10115_v28, 16  ;;  %v10347_v6 = vrot.slane %v10346_v55, 4  ;;  %v11075_v19 = vunpack.c.l.b16 %v10986_v16 }
 0x60a   : > { %v10577_v47 = vpack.c.b16 %v10553_v30, %v10552_v45  ;;  %v10856_v30 = vld [vmem:[#allocation2 + $0x90] sm:$0xe]  ;;  %v10367_v45 = vshrl.u32 %v10117_v20, 16 }
 0x60b   : > { %v10351_v37 = vrot.slane %v10349_v14, 5 }
 0x60c   : > { %v10369_v12 = vrot.slane %v10367_v45, 4 }
 0x60e   : > { %v9079_v34 = vpop.f32.mrf.mxu2 }
 0x60f   : > { %v17009_v53 = vadd.f32 %v9079_v34, %v16974_v15  ;;  %v8341_v38 = vpop.f32.mrf.mxu1  ;;  %v8030_v15 = vadd.f32 %v16682_v40, %v16689_v54  ;;  %v10352_v34 = vsel %vm14133_vm2, %v10347_v6, %v10351_v37  ;;  %v10116_v40 = vld [vmem:[#allocation2 + $0xb0] sm:$0xf]  ;;  %v10342_v54 = vsel %vm14133_vm2, %v10337_v58, %v10341_v27  ;;  %v10860_v6 = vld [vmem:[#allocation2 + $0xa4] sm:$0xf]  ;;  %v10118_v27 = vld [vmem:[#allocation2 + $0xb8] sm:$0x1] }
 0x610   : > { %v8408_v10 = vadd.f32 %v8341_v38, %v8029_v63  ;;  %v10363_v63 = vshll.u32 %v10117_v20, 16  ;;  %v13252_v38 = vrot.slane %v10856_v30, 9  ;;  %v10354_v28 = vshrl.u32 %v10116_v40, 16  ;;  %v10861_v37 = vld [vmem:[#allocation2 + $0xa8] sm:$0x1] }
 0x611   : > { %10693 = vmatmul.bf16.gmra.mxu1 %v10577_v47  ;;  %v10555_v47 = vunpack.c.l.b16 %v10352_v34  ;;  %v10554_v17 = vunpack.c.l.b16 %v10342_v54  ;;  %v10373_v30 = vshll.u32 %v10118_v27, 16  ;;  %v10863_v27 = vld [vmem:[#allocation2 + $0xb4] sm:$0xf] }
 0x612   : > { %v10365_v29 = vrot.slane %v10363_v63, 5  ;;  %v10356_v51 = vrot.slane %v10354_v28, 4  ;;  %v10120_v63 = vld [vmem:[#allocation2 + $0xc4] sm:$0xf] }
 0x613   : > { %11210 = vmatmul.bf16.gmra.mxu2 %v11098_v3  ;;  %v10357_v3 = vshll.u32 %v10116_v40, 16  ;;  %v10859_v40 = vld [vmem:[#allocation2 + $0xa0] sm:$0xe]  ;;  %v10375_v54 = vrot.slane %v10373_v30, 5 }
 0x614   : > { %v10370_v20 = vor.u32 %v10369_v12, %v10365_v29  ;;  %v10391_v12 = vshrl.u32 %v10120_v63, 16 }
 0x616   : > { %v9082_v57 = vpop.f32.mrf.mxu2  ;;  %v10371_v58 = vrot.slane %v10370_v20, 4  ;;  %v10393_v30 = vrot.slane %v10391_v12, 4 }
 0x617   : > { %v17014_v4 = vadd.f32 %v9082_v57, %v16989_v36  ;;  %v8343_v24 = vpop.f32.mrf.mxu1  ;;  %v10983_v36 = vsel %vm14226_vm5, %v13252_v38, %v10982_v59  ;;  %v10578_v57 = vpack.c.b16 %v10555_v47, %v10554_v17  ;;  %v10359_v59 = vrot.slane %v10357_v3, 5 }
 0x618   : > { %v8409_v7 = vadd.f32 %v8343_v24, %v8030_v15  ;;  %v11074_v25 = vunpack.c.l.b16 %v10983_v36  ;;  %v10989_v24 = vrot.slane %v10860_v6, 5  ;;  %v10992_v36 = vrot.slane %v10861_v37, 5 }
 0x619   : > { %17706 = vst [vmem:[#allocation40_spill] sm:$0xff] %v17014_v4  ;;  %v10360_v16 = vor.u32 %v10359_v59, %v10356_v51  ;;  %v10376_v28 = vsel %vm14133_vm2, %v10371_v58, %v10375_v54  ;;  %v10387_v3 = vshll.u32 %v10120_v63, 16  ;;  %v13657_v59 = vld [vmem:[%s14109_s11 + $0x20] sm:$0xff]   ;;  %v13304_v4 = vld [vmem:[%s14109_s11 + $0x58] sm:$0x1] }
 0x61a   : > { %v11099_v15 = vpack.c.b16 %v11075_v19, %v11074_v25  ;;  %v10119_v19 = vld [vmem:[#allocation2 + $0xc0] sm:$0xf]  ;;  %v13595_v54 = vunpack.c.l.bf16 %v13657_v59 }
 0x61b   : > { %v10361_v47 = vrot.slane %v10360_v16, 4  ;;  %v10378_v25 = vshrl.u32 %v10119_v19, 16  ;;  %v17042_v20 = vrot.slane %v10387_v3, 5  ;;  %v17710_v3 = vld [vmem:[#allocation19_spill] sm:$0xff] }
 0x61c   : > { %v10025_v12 = vadd.f32 %v17710_v3, %v16702_v43 }
 0x61d   : > { %v10380_v63 = vrot.slane %v10378_v25, 4 }
 0x61e   : > { %v9084_v55 = vpop.f32.mrf.mxu2 }
 0x61f   : > { %v17025_v14 = vadd.f32 %v9084_v55, %v16996_v62  ;;  %v17027_v9 = vpop.f32.mrf.mxu1  ;;  %v10991_v62 = vrot.slane %v10989_v24, 4  ;;  %v13253_v55 = vrot.slane %v10859_v40, 9 }
 0x621   : > { %17707 = vst [vmem:[#allocation43_spill] sm:$0xff] %v17025_v14  ;;  %10698 = vmatmul.bf16.gmra.mxu1 %v10578_v57  ;;  %v10993_v17 = vsel %vm14226_vm5, %v10991_v62, %v10992_v36  ;;  %v10990_v6 = vsel %vm14226_vm5, %v13253_v55, %v10989_v24  ;;  %v10557_v57 = vunpack.c.l.b16 %v10376_v28  ;;  %v13596_v24 = vunpack.c.h.bf16 %v13657_v59  ;;  %v10121_v36 = vld [vmem:[#allocation2 + $0xc8] sm:$0x1] }
 0x622   : > { %v11077_v51 = vunpack.c.l.b16 %v10993_v17  ;;  %v11076_v62 = vunpack.c.l.b16 %v10990_v6  ;;  %v10394_v28 = vor.u32 %v10393_v30, %v17042_v20  ;;  %v10397_v55 = vshll.u32 %v10121_v36, 16  ;;  %v10123_v30 = vld [vmem:[#allocation2 + $0xd4] sm:$0xf]  ;;  %v10122_v36 = vld [vmem:[#allocation2 + $0xd0] sm:$0xf] }
 0x623   : > { %11215 = vmatmul.bf16.gmra.mxu2 %v11099_v15  ;;  %v10381_v15 = vshll.u32 %v10119_v19, 16  ;;  %v11569_v17 = vrot.slane %v13595_v54, 1  ;;  %v10415_v3 = vshrl.u32 %v10123_v30, 16 }
 0x625   : > { %v10383_v19 = vrot.slane %v10381_v15, 5  ;;  %v13295_v15 = vld [vmem:[%s14109_s11 + $0x28] sm:$0x1] }
 0x626   : > { %v9087_v34 = vpop.f32.mrf.mxu2 }
 0x627   : > { %v17029_v45 = vadd.f32 %v9087_v34, %v8408_v10  ;;  %v17031_v38 = vpop.f32.mrf.mxu1  ;;  %v10366_v10 = vsel %vm14133_vm2, %v10361_v47, %v10365_v29  ;;  %v10996_v29 = vrot.slane %v10863_v27, 5  ;;  %v11100_v47 = vpack.c.b16 %v11077_v51, %v11076_v62  ;;  %v17055_v27 = vld [vmem:[%s17444_s4] ss:$0 sm:$0xff]  ;;  %v10862_v62 = vld [vmem:[#allocation2 + $0xb0] sm:$0xe] }
 0x628   : > { %v10556_v16 = vunpack.c.l.b16 %v10366_v10  ;;  %v11570_v10 = vrot.slane %v13596_v24, 1  ;;  %v10384_v25 = vor.u32 %v10383_v19, %v10380_v63  ;;  %v10395_v51 = vrot.slane %v10394_v28, 4 }
 0x629   : > { %17708 = vst [vmem:[#allocation41_spill] sm:$0xff] %v17029_v45  ;;  %v10998_v6 = vrot.slane %v10996_v29, 4  ;;  %v10411_v28 = vshll.u32 %v10123_v30, 16 }
 0x62a   : > { %v10579_v40 = vpack.c.b16 %v10557_v57, %v10556_v16  ;;  %v10771_v57 = vadd.f32 %v17027_v9, %v10025_v12  ;;  %v11571_v63 = vsel %vm11568_vm15, %v11569_v17, %v11570_v10  ;;  %v11407_v9 = vunpack.c.l.bf16 %v13295_v15 }
 0x62b   : > { %v10385_v24 = vrot.slane %v10384_v25, 4  ;;  %v13254_v12 = vrot.slane %v10862_v62, 9  ;;  %v10402_v25 = vshrl.u32 %v10122_v36, 16  ;;  %v13658_v62 = vld [vmem:[%s14109_s11 + $0x30] sm:$0xff]  }
 0x62c   : > { %v11572_v15 = vrot.slane %v11407_v9, 1 }
 0x62e   : > { %v9089_v37 = vpop.f32.mrf.mxu2 }
 0x62f   : > { %v17044_v58 = vadd.f32 %v9089_v37, %v8409_v7  ;;  %v17046_v34 = vpop.f32.mrf.mxu1  ;;  %v10864_v7 = vld [vmem:[#allocation2 + $0xb8] sm:$0x1] }
 0x630   : > { %v10999_v43 = vrot.slane %v10864_v7, 5  ;;  %v10390_v7 = vsel %vm14133_vm2, %v10385_v24, %v17042_v20 }
 0x631   : > { %17709 = vst [vmem:[#allocation53_spill] sm:$0xff] %v17044_v58  ;;  %10703 = vmatmul.bf16.gmra.mxu1 %v10579_v40  ;;  %v10399_v40 = vrot.slane %v10397_v55, 5  ;;  %v17711_v55 = vld [vmem:[#allocation20_spill] sm:$0xff]  ;;  %v10417_v58 = vrot.slane %v10415_v3, 4  ;;  %v10558_v24 = vunpack.c.l.b16 %v10390_v7  ;;  %v13600_v3 = vunpack.c.h.bf16 %v13658_v62 }
 0x632   : > { %v11000_v54 = vsel %vm14226_vm5, %v10998_v6, %v10999_v43  ;;  %v10026_v17 = vadd.f32 %v17711_v55, %v16713_v56 }
 0x633   : > { %11220 = vmatmul.bf16.gmra.mxu2 %v11100_v47  ;;  %v10400_v47 = vsel %vm14133_vm2, %v10395_v51, %v10399_v40  ;;  %v11079_v43 = vunpack.c.l.b16 %v11000_v54  ;;  %v17076_v40 = vrot.slane %v10411_v28, 5  ;;  %v10404_v54 = vrot.slane %v10402_v25, 4  ;;  %v17712_v25 = vld [vmem:[#allocation22_spill] sm:$0xff] }
 0x634   : > { %v10772_v51 = vadd.f32 %v17031_v38, %v10026_v17  ;;  %v11573_v38 = vsel %vm11568_vm15, %v11570_v10, %v11572_v15  ;;  %v13599_v28 = vunpack.c.l.bf16 %v13658_v62  ;;  %v10865_v10 = vld [vmem:[#allocation2 + $0xc0] sm:$0xe] }
 0x635   : > { %v10418_v17 = vor.u32 %v10417_v58, %v17076_v40  ;;  %v13298_v58 = vld [vmem:[%s14109_s11 + $0x38] sm:$0x1] }
 0x636   : > { %v11181_v59 = vpop.f32.mrf.mxu2 }
 0x637   : > { %v11293_v37 = vadd.f32 %v11181_v59, %v10771_v57  ;;  %v17058_v16 = vpop.f32.mrf.mxu1  ;;  %v10405_v57 = vshll.u32 %v10122_v36, 16  ;;  %v10997_v59 = vsel %vm14226_vm5, %v13254_v12, %v10996_v29  ;;  %v10866_v29 = vld [vmem:[#allocation2 + $0xc4] sm:$0xf]  ;;  %v10124_v12 = vld [vmem:[#allocation2 + $0xd8] sm:$0x1] }
 0x638   : > { %v11078_v9 = vunpack.c.l.b16 %v10997_v59  ;;  %v17088_v59 = vpop.f32.mrf.mxu0  ;;  %v10421_v15 = vshll.u32 %v10124_v12, 16 }
 0x639   : > { %v11488_v19 = vadd.f32 %v17055_v27, %v11293_v37  ;;  %v10559_v37 = vunpack.c.l.b16 %v10400_v47  ;;  %v10407_v36 = vrot.slane %v10405_v57, 5  ;;  %v10027_v57 = vadd.f32 %v17712_v25, %v16724_v8 }
 0x63a   : > { %v11101_v55 = vpack.c.b16 %v11079_v43, %v11078_v9  ;;  %v10419_v9 = vrot.slane %v10418_v17, 4 }
 0x63b   : > { %v11681_v6 = vadd.f32 %v11571_v63, %v11488_v19  ;;  %v17083_v19 = vpop.f32.mrf.mxu3  ;;  %v10580_v47 = vpack.c.b16 %v10559_v37, %v10558_v24  ;;  %v11574_v37 = vrot.slane %v13599_v28, 1  ;;  %v10408_v62 = vor.u32 %v10407_v36, %v10404_v54 }
 0x63c   : > { %v10773_v43 = vadd.f32 %v17046_v34, %v10027_v57  ;;  %v11410_v36 = vunpack.c.l.bf16 %v13298_v58 }
 0x63d   : > { %v11713_v30 = vmax.f32 %v11681_v6, 0.0  ;;  %v11003_v6 = vrot.slane %v10866_v29, 5  ;;  %v10409_v34 = vrot.slane %v10408_v62, 4 }
 0x63e   : > { %v11183_v20 = vpop.f32.mrf.mxu2 }
 0x63f   : > { %11745 = vst [vmem:[%s17078_s13] sm:$0xff] %v11713_v30  ;;  %v11294_v56 = vadd.f32 %v11183_v20, %v10772_v51  ;;  %v17081_v63 = vpop.f32.mrf.mxu1  ;;  %v11575_v30 = vrot.slane %v13600_v3, 1  ;;  %v10126_v20 = vld [vmem:[#allocation2 + $0xe4] sm:$0xf]  ;;  %v11005_v45 = vrot.slane %v11003_v6, 4 }
 0x640   : > { %v10435_v12 = vshll.u32 %v10126_v20, 16  ;;  %v10439_v28 = vshrl.u32 %v10126_v20, 16  ;;  %v17713_v20 = vld [vmem:[#allocation26_spill] sm:$0xff] }
 0x641   : > { %v11489_v7 = vadd.f32 %v17055_v27, %v11294_v56  ;;  %10708 = vmatmul.bf16.gmra.mxu1 %v10580_v47  ;;  %v10867_v56 = vld [vmem:[#allocation2 + $0xc8] sm:$0x1]  ;;  %v13255_v47 = vrot.slane %v10865_v10, 9  ;;  %v11576_v54 = vsel %vm11568_vm15, %v11574_v37, %v11575_v30 }
 0x642   : > { %v11006_v3 = vrot.slane %v10867_v56, 5  ;;  %v10441_v58 = vrot.slane %v10439_v28, 4  ;;  %v11577_v56 = vrot.slane %v11410_v36, 1 }
 0x643   : > { %v11682_v51 = vadd.f32 %v11573_v38, %v11489_v7  ;;  %11225 = vmatmul.bf16.gmra.mxu2 %v11101_v55  ;;  %v10423_v7 = vrot.slane %v10421_v15, 5  ;;  %v10125_v55 = vld [vmem:[#allocation2 + $0xe0] sm:$0xf]  ;;  %v11004_v17 = vsel %vm14226_vm5, %v13255_v47, %v11003_v6  ;;  %v10414_v15 = vsel %vm14133_vm2, %v10409_v34, %v17076_v40  ;;  %v10127_v34 = vld [vmem:[#allocation2 + $0xe8] sm:$0x1] }
 0x644   : > { %v11007_v10 = vsel %vm14226_vm5, %v11005_v45, %v11006_v3  ;;  %v10426_v37 = vshrl.u32 %v10125_v55, 16  ;;  %v10429_v62 = vshll.u32 %v10125_v55, 16  ;;  %v11080_v3 = vunpack.c.l.b16 %v11004_v17 }
 0x645   : > { %v11714_v24 = vmax.f32 %v11682_v51, 0.0  ;;  %v10424_v57 = vsel %vm14133_vm2, %v10419_v9, %v10423_v7  ;;  %v17103_v51 = vpop.f32.mrf.mxu3  ;;  %v13659_v7 = vld [vmem:[%s14109_s11 + $0x40] sm:$0xff]   ;;  %v10560_v55 = vunpack.c.l.b16 %v10414_v15  ;;  %v10445_v17 = vshll.u32 %v10127_v34, 16 }
 0x646   : > { %v11186_v29 = vpop.f32.mrf.mxu2  ;;  %v10561_v9 = vunpack.c.l.b16 %v10424_v57  ;;  %v10431_v28 = vrot.slane %v10429_v62, 5 }
 0x647   : > { %11746 = vst [vmem:[%s17078_s13 + $0x8] sm:$0xff] %v11714_v24  ;;  %v11295_v8 = vadd.f32 %v11186_v29, %v10773_v43  ;;  %v17095_v38 = vpop.f32.mrf.mxu1  ;;  %v10028_v43 = vadd.f32 %v17713_v20, %v16735_v31  ;;  %v17112_v24 = vrot.slane %v10435_v12, 5  ;;  %v17114_v29 = vpop.f32.mrf.mxu0  ;;  %v10869_v12 = vld [vmem:[#allocation2 + $0xd4] sm:$0xf]  ;;  %v13604_v20 = vunpack.c.h.bf16 %v13659_v7 }
 0x648   : > { %v10581_v57 = vpack.c.b16 %v10561_v9, %v10560_v55  ;;  %v11010_v15 = vrot.slane %v10869_v12, 5  ;;  %v10129_v55 = vld [vmem:[#allocation2 + $0xf4] sm:$0xf] }
 0x649   : > { %v11490_v25 = vadd.f32 %v17055_v27, %v11295_v8  ;;  %v10774_v45 = vadd.f32 %v17058_v16, %v10028_v43  ;;  %v11081_v8 = vunpack.c.l.b16 %v11007_v10  ;;  %v10442_v36 = vor.u32 %v10441_v58, %v17112_v24 }
 0x64a   : > { %v13603_v16 = vunpack.c.l.bf16 %v13659_v7  ;;  %v11580_v9 = vrot.slane %v13604_v20, 1  ;;  %v10870_v7 = vld [vmem:[#allocation2 + $0xd8] sm:$0x1]  ;;  %v10128_v20 = vld [vmem:[#allocation2 + $0xf0] sm:$0xf] }
 0x64b   : > { %v11683_v6 = vadd.f32 %v11576_v54, %v11490_v25  ;;  %v10428_v54 = vrot.slane %v10426_v37, 4  ;;  %v11578_v25 = vsel %vm11568_vm15, %v11575_v30, %v11577_v56  ;;  %v11102_v43 = vpack.c.b16 %v11081_v8, %v11080_v3  ;;  %v10868_v37 = vld [vmem:[#allocation2 + $0xd0] sm:$0xe] }
 0x64c   : > { %v10443_v58 = vrot.slane %v10442_v36, 4  ;;  %v11579_v56 = vrot.slane %v13603_v16, 1  ;;  %v10447_v3 = vrot.slane %v10445_v17, 5  ;;  %v13256_v12 = vrot.slane %v10868_v37, 9 }
 0x64d   : > { %v11715_v47 = vmax.f32 %v11683_v6, 0.0  ;;  %v17714_v6 = vld [vmem:[#allocation16_spill] sm:$0xff]  ;;  %v10432_v62 = vor.u32 %v10431_v28, %v10428_v54  ;;  %v17126_v30 = vpop.f32.mrf.mxu3  ;;  %v11013_v28 = vrot.slane %v10870_v7, 5  ;;  %v10463_v17 = vshrl.u32 %v10129_v55, 16 }
 0x64e   : > { %v11188_v40 = vpop.f32.mrf.mxu2  ;;  %v10448_v16 = vsel %vm14133_vm2, %v10443_v58, %v10447_v3  ;;  %v17715_v58 = vld [vmem:[#allocation42_spill] sm:$0xff] }
 0x64f   : > { %11747 = vst [vmem:[%s17078_s13 + $0x10] sm:$0xff] %v11715_v47  ;;  %v11296_v14 = vadd.f32 %v11188_v40, %v10774_v45  ;;  %v17119_v31 = vpop.f32.mrf.mxu1  ;;  %v10029_v45 = vadd.f32 %v17714_v6, %v16746_v23  ;;  %v13301_v40 = vld [vmem:[%s14109_s11 + $0x48] sm:$0x1]  ;;  %v11012_v23 = vrot.slane %v11010_v15, 4  ;;  %v10433_v36 = vrot.slane %v10432_v62, 4 }
 0x650   : > { %v10450_v62 = vshrl.u32 %v10128_v20, 16 }
 0x651   : > { %v11491_v10 = vadd.f32 %v17055_v27, %v11296_v14  ;;  %10713 = vmatmul.bf16.gmra.mxu1 %v10581_v57  ;;  %v10775_v14 = vadd.f32 %v17081_v63, %v10029_v45  ;;  %v11581_v63 = vsel %vm11568_vm15, %v11579_v56, %v11580_v9  ;;  %v11011_v45 = vsel %vm14226_vm5, %v13256_v12, %v11010_v15 }
 0x652   : > { %v10438_v37 = vsel %vm14133_vm2, %v10433_v36, %v17112_v24  ;;  %v10030_v56 = vadd.f32 %v17715_v58, %v16757_v33  ;;  %v13660_v24 = vld [vmem:[%s14109_s11 + $0x50] sm:$0xff]   ;;  %v11082_v33 = vunpack.c.l.b16 %v11011_v45 }
 0x653   : > { %v11684_v47 = vadd.f32 %v11578_v25, %v11491_v10  ;;  %11230 = vmatmul.bf16.gmra.mxu2 %v11102_v43  ;;  %v17130_v25 = vpop.f32.mrf.mxu0  ;;  %v11413_v10 = vunpack.c.l.bf16 %v13301_v40  ;;  %v10459_v43 = vshll.u32 %v10129_v55, 16  ;;  %v10453_v40 = vshll.u32 %v10128_v20, 16 }
 0x654   : > { %v10465_v55 = vrot.slane %v10463_v17, 4  ;;  %v13607_v58 = vunpack.c.l.bf16 %v13660_v24 }
 0x655   : > { %v11716_v8 = vmax.f32 %v11684_v47, 0.0  ;;  %v11014_v47 = vsel %vm14226_vm5, %v11012_v23, %v11013_v28  ;;  %v11582_v3 = vrot.slane %v11413_v10, 1  ;;  %v17150_v15 = vrot.slane %v10459_v43, 5  ;;  %v17154_v28 = vpop.f32.mrf.mxu3  ;;  %v10130_v10 = vld [vmem:[#allocation2 + $0xf8] sm:$0x1] }
 0x656   : > { %v11191_v34 = vpop.f32.mrf.mxu2  ;;  %v11083_v23 = vunpack.c.l.b16 %v11014_v47  ;;  %v10452_v43 = vrot.slane %v10450_v62, 4  ;;  %v10455_v17 = vrot.slane %v10453_v40, 5  ;;  %v13608_v47 = vunpack.c.h.bf16 %v13660_v24  ;;  %v10873_v62 = vld [vmem:[#allocation2 + $0xe8] sm:$0x1] }
 0x657   : > { %11748 = vst [vmem:[%s17078_s13 + $0x18] sm:$0xff] %v11716_v8  ;;  %v11297_v57 = vadd.f32 %v11191_v34, %v10775_v14  ;;  %v17133_v54 = vpop.f32.mrf.mxu1  ;;  %v10563_v14 = vunpack.c.l.b16 %v10448_v16  ;;  %v17148_v8 = vld [vmem:[#allocation2 + $0xe4] sm:$0xf]  ;;  %v10776_v34 = vadd.f32 %v17095_v38, %v10030_v56  ;;  %v11583_v38 = vsel %vm11568_vm15, %v11580_v9, %v11582_v3 }
 0x658   : > { %v10456_v9 = vor.u32 %v10455_v17, %v10452_v43  ;;  %v11584_v40 = vrot.slane %v13607_v58, 1  ;;  %v11585_v3 = vrot.slane %v13608_v47, 1  ;;  %v11416_v58 = vunpack.c.l.bf16 %v13304_v4 }
 0x659   : > { %v11492_v6 = vadd.f32 %v17055_v27, %v11297_v57  ;;  %v10562_v57 = vunpack.c.l.b16 %v10438_v37  ;;  %v10466_v37 = vor.u32 %v10465_v55, %v17150_v15 }
 0x65a   : > { %v11586_v17 = vsel %vm11568_vm15, %v11584_v40, %v11585_v3 }
 0x65b   : > { %v11685_v7 = vadd.f32 %v11581_v63, %v11492_v6  ;;  %v11017_v63 = vrot.slane %v17148_v8, 5  ;;  %v10582_v20 = vpack.c.b16 %v10563_v14, %v10562_v57  ;;  %v17162_v56 = vpop.f32.mrf.mxu0  ;;  %v10469_v8 = vshll.u32 %v10130_v10, 16  ;;  %v10871_v57 = vld [vmem:[#allocation2 + $0xe0] sm:$0xe]  ;;  %v10132_v10 = vld [vmem:[#allocation2 + $0x104] sm:$0xf] }
 0x65c   : > { %v10467_v24 = vrot.slane %v10466_v37, 4  ;;  %v10131_v37 = vld [vmem:[#allocation2 + $0x100] sm:$0xf] }
 0x65d   : > { %v11717_v12 = vmax.f32 %v11685_v7, 0.0  ;;  %v11103_v7 = vpack.c.b16 %v11083_v23, %v11082_v33  ;;  %v11019_v55 = vrot.slane %v11017_v63, 4  ;;  %v11020_v33 = vrot.slane %v10873_v62, 5  ;;  %v17172_v43 = vpop.f32.mrf.mxu3 }
 0x65e   : > { %v11193_v36 = vpop.f32.mrf.mxu2 }
 0x65f   : > { %11749 = vst [vmem:[%s17078_s13 + $0x20] sm:$0xff] %v11717_v12  ;;  %v11298_v16 = vadd.f32 %v11193_v36, %v10776_v34  ;;  %v17158_v6 = vpop.f32.mrf.mxu1  ;;  %v17716_v34 = vld [vmem:[#allocation32_spill] sm:$0xff] }
 0x660   : > { %v10031_v14 = vadd.f32 %v17716_v34, %v16768_v11 }
 0x661   : > { %v11493_v45 = vadd.f32 %v17055_v27, %v11298_v16  ;;  %10718 = vmatmul.bf16.gmra.mxu1 %v10582_v20  ;;  %v10471_v20 = vrot.slane %v10469_v8, 5 }
 0x662   : > { %v10777_v36 = vadd.f32 %v17119_v31, %v10031_v14  ;;  %v11021_v31 = vsel %vm14226_vm5, %v11019_v55, %v11020_v33  ;;  %v10483_v14 = vshll.u32 %v10132_v10, 16  ;;  %v10875_v33 = vld [vmem:[#allocation2 + $0xf4] sm:$0xf] }
 0x663   : > { %v11686_v12 = vadd.f32 %v11583_v38, %v11493_v45  ;;  %11235 = vmatmul.bf16.gmra.mxu2 %v11103_v7  ;;  %v13257_v45 = vrot.slane %v10871_v57, 9  ;;  %v10457_v7 = vrot.slane %v10456_v9, 4  ;;  %v10472_v47 = vsel %vm14133_vm2, %v10467_v24, %v10471_v20  ;;  %v17185_v4 = vpop.f32.mrf.mxu0  ;;  %v17717_v9 = vld [vmem:[#allocation36_spill] sm:$0xff] }
 0x664   : > { %v10032_v40 = vadd.f32 %v17717_v9, %v16779_v1  ;;  %v10565_v55 = vunpack.c.l.b16 %v10472_v47  ;;  %v10474_v24 = vshrl.u32 %v10131_v37, 16 }
 0x665   : > { %v11718_v16 = vmax.f32 %v11686_v12, 0.0  ;;  %v10462_v34 = vsel %vm14133_vm2, %v10457_v7, %v17150_v15  ;;  %v10487_v12 = vshrl.u32 %v10132_v10, 16  ;;  %v11018_v62 = vsel %vm14226_vm5, %v13257_v45, %v11017_v63 }
 0x666   : > { %v11196_v23 = vpop.f32.mrf.mxu2  ;;  %v10477_v15 = vshll.u32 %v10131_v37, 16  ;;  %v10778_v20 = vadd.f32 %v17133_v54, %v10032_v40  ;;  %v17191_v7 = vrot.slane %v10483_v14, 5  ;;  %v9654_v45 = vadd.f32 %v17083_v19, %v16786_v42  ;;  %v10133_v40 = vld [vmem:[#allocation2 + $0x108] sm:$0x1]  ;;  %v17201_v19 = vpop.f32.mrf.mxu3 }
 0x667   : > { %11750 = vst [vmem:[%s17078_s13 + $0x28] sm:$0xff] %v11718_v16  ;;  %v11299_v11 = vadd.f32 %v11196_v23, %v10777_v36  ;;  %v17170_v38 = vpop.f32.mrf.mxu1  ;;  %v11587_v36 = vrot.slane %v11416_v58, 1  ;;  %v11085_v16 = vunpack.c.l.b16 %v11021_v31  ;;  %v10564_v23 = vunpack.c.l.b16 %v10462_v34 }
 0x668   : > { %v10489_v63 = vrot.slane %v10487_v12, 4  ;;  %v11024_v31 = vrot.slane %v10875_v33, 5  ;;  %v10476_v34 = vrot.slane %v10474_v24, 4  ;;  %v10479_v14 = vrot.slane %v10477_v15, 5  ;;  %v10876_v24 = vld [vmem:[#allocation2 + $0xf8] sm:$0x1] }
 0x669   : > { %v11494_v8 = vadd.f32 %v17055_v27, %v11299_v11  ;;  %v13661_v11 = vld [vmem:[%s14109_s11 + $0x60] sm:$0xff]   ;;  %v10583_v58 = vpack.c.b16 %v10565_v55, %v10564_v23  ;;  %v11588_v37 = vsel %vm11568_vm15, %v11585_v3, %v11587_v36  ;;  %v10493_v3 = vshll.u32 %v10133_v40, 16  ;;  %v10874_v33 = vld [vmem:[#allocation2 + $0xf0] sm:$0xe] }
 0x66a   : > { %v13611_v54 = vunpack.c.l.bf16 %v13661_v11  ;;  %v13612_v9 = vunpack.c.h.bf16 %v13661_v11  ;;  %v10490_v42 = vor.u32 %v10489_v63, %v17191_v7  ;;  %v11026_v15 = vrot.slane %v11024_v31, 4  ;;  %v13307_v63 = vld [vmem:[%s14109_s11 + $0x68] sm:$0x1] }
 0x66b   : > { %v11687_v57 = vadd.f32 %v11586_v17, %v11494_v8  ;;  %v11084_v17 = vunpack.c.l.b16 %v11018_v62  ;;  %v10033_v62 = vadd.f32 %v17088_v59, %v9654_v45  ;;  %v10135_v59 = vld [vmem:[#allocation2 + $0x114] sm:$0xf]  ;;  %v9655_v45 = vadd.f32 %v17103_v51, %v16799_v26 }
 0x66c   : > { %v11589_v36 = vrot.slane %v13611_v54, 1  ;;  %v11590_v23 = vrot.slane %v13612_v9, 1  ;;  %v13258_v54 = vrot.slane %v10874_v33, 9  ;;  %v10495_v9 = vrot.slane %v10493_v3, 5 }
 0x66d   : > { %v11719_v10 = vmax.f32 %v11687_v57, 0.0  ;;  %v11104_v57 = vpack.c.b16 %v11085_v16, %v11084_v17  ;;  %v10779_v16 = vadd.f32 %v17158_v6, %v10033_v62  ;;  %v11419_v40 = vunpack.c.l.bf16 %v13307_v63 }
 0x66e   : > { %v11198_v1 = vpop.f32.mrf.mxu2  ;;  %v10507_v51 = vshll.u32 %v10135_v59, 16  ;;  %v11025_v62 = vsel %vm14226_vm5, %v13258_v54, %v11024_v31  ;;  %v9656_v54 = vadd.f32 %v17126_v30, %v16808_v60 }
 0x66f   : > { %11751 = vst [vmem:[%s17078_s13 + $0x30] sm:$0xff] %v11719_v10  ;;  %v11300_v47 = vadd.f32 %v11198_v1, %v10778_v20  ;;  %v17196_v8 = vpop.f32.mrf.mxu1  ;;  %v10480_v20 = vor.u32 %v10479_v14, %v10476_v34  ;;  %v17204_v10 = vpop.f32.mrf.mxu0  ;;  %v10491_v1 = vrot.slane %v10490_v42, 4  ;;  %v11591_v34 = vsel %vm11568_vm15, %v11589_v36, %v11590_v23 }
 0x670   : > { %v10511_v42 = vshrl.u32 %v10135_v59, 16  ;;  %v17229_v31 = vrot.slane %v10507_v51, 5  ;;  %v10035_v30 = vadd.f32 %v17130_v25, %v9656_v54  ;;  %v9657_v25 = vadd.f32 %v17154_v28, %v16825_v61 }
 0x671   : > { %v11495_v12 = vadd.f32 %v17055_v27, %v11300_v47  ;;  %10723 = vmatmul.bf16.gmra.mxu1 %v10583_v58  ;;  %v11027_v47 = vrot.slane %v10876_v24, 5  ;;  %v10481_v14 = vrot.slane %v10480_v20, 4  ;;  %v10496_v26 = vsel %vm14133_vm2, %v10491_v1, %v10495_v9 }
 0x672   : > { %v10034_v24 = vadd.f32 %v17114_v29, %v9655_v45  ;;  %v11592_v20 = vrot.slane %v11419_v40, 1  ;;  %v10136_v29 = vld [vmem:[#allocation2 + $0x118] sm:$0x1]  ;;  %v10878_v40 = vld [vmem:[#allocation2 + $0x104] sm:$0xf] }
 0x673   : > { %v11688_v55 = vadd.f32 %v11588_v37, %v11495_v12  ;;  %11240 = vmatmul.bf16.gmra.mxu2 %v11104_v57  ;;  %v11028_v6 = vsel %vm14226_vm5, %v11026_v15, %v11027_v47  ;;  %v10134_v12 = vld [vmem:[#allocation2 + $0x110] sm:$0xf]  ;;  %v17225_v15 = vpop.f32.mrf.mxu3  ;;  %v10513_v47 = vrot.slane %v10511_v42, 4  ;;  %v11031_v60 = vrot.slane %v10878_v40, 5 }
 0x674   : > { %v10498_v36 = vshrl.u32 %v10134_v12, 16  ;;  %v10501_v33 = vshll.u32 %v10134_v12, 16  ;;  %v10780_v63 = vadd.f32 %v17170_v38, %v10034_v24 }
 0x675   : > { %v11720_v11 = vmax.f32 %v11688_v55, 0.0  ;;  %v10486_v55 = vsel %vm14133_vm2, %v10481_v14, %v17191_v7  ;;  %v11086_v7 = vunpack.c.l.b16 %v11025_v62  ;;  %v11593_v14 = vsel %vm11568_vm15, %v11590_v23, %v11592_v20 }
 0x676   : > { %v11201_v17 = vpop.f32.mrf.mxu2  ;;  %v10500_v38 = vrot.slane %v10498_v36, 4  ;;  %v10514_v62 = vor.u32 %v10513_v47, %v17229_v31  ;;  %v10781_v20 = vadd.f32 %v17196_v8, %v10035_v30 }
 0x677   : > { %11752 = vst [vmem:[%s17078_s13 + $0x38] sm:$0xff] %v11720_v11  ;;  %v11301_v58 = vadd.f32 %v11201_v17, %v10779_v16  ;;  %v17211_v37 = vpop.f32.mrf.mxu1  ;;  %v11087_v16 = vunpack.c.l.b16 %v11028_v6  ;;  %v10567_v11 = vunpack.c.l.b16 %v10496_v26  ;;  %v13662_v17 = vld [vmem:[%s14109_s11 + $0x70] sm:$0xff]   ;;  %v17231_v45 = vpop.f32.mrf.mxu0  ;;  %v10503_v6 = vrot.slane %v10501_v33, 5  ;;  %v10879_v33 = vld [vmem:[#allocation2 + $0x108] sm:$0x1] }
 0x678   : > { %v13616_v26 = vunpack.c.h.bf16 %v13662_v17  ;;  %v11034_v40 = vrot.slane %v10879_v33, 5 }
 0x679   : > { %v11496_v57 = vadd.f32 %v17055_v27, %v11301_v58  ;;  %v10566_v58 = vunpack.c.l.b16 %v10486_v55  ;;  %v11105_v42 = vpack.c.b16 %v11087_v16, %v11086_v7  ;;  %v10517_v55 = vshll.u32 %v10136_v29, 16  ;;  %v10877_v29 = vld [vmem:[#allocation2 + $0x100] sm:$0xe] }
 0x67a   : > { %v11595_v23 = vrot.slane %v13616_v26, 1  ;;  %v13259_v61 = vrot.slane %v10877_v29, 9 }
 0x67b   : > { %v11689_v3 = vadd.f32 %v11591_v34, %v11496_v57  ;;  %v10584_v12 = vpack.c.b16 %v10567_v11, %v10566_v58  ;;  %v13615_v57 = vunpack.c.l.bf16 %v13662_v17  ;;  %v10519_v16 = vrot.slane %v10517_v55, 5  ;;  %v17244_v17 = vpop.f32.mrf.mxu3 }
 0x67d   : > { %v11721_v1 = vmax.f32 %v11689_v3, 0.0  ;;  %v10504_v3 = vor.u32 %v10503_v6, %v10500_v38  ;;  %v11594_v36 = vrot.slane %v13615_v57, 1 }
 0x67e   : > { %v11203_v59 = vpop.f32.mrf.mxu2 }
 0x67f   : > { %11753 = vst [vmem:[%s17078_s13 + $0x40] sm:$0xff] %v11721_v1  ;;  %v11302_v9 = vadd.f32 %v11203_v59, %v10780_v63  ;;  %v17236_v34 = vpop.f32.mrf.mxu1  ;;  %v13310_v63 = vld [vmem:[%s14109_s11 + $0x78] sm:$0x1]  ;;  %v10515_v1 = vrot.slane %v10514_v62, 4  ;;  %v11033_v59 = vrot.slane %v11031_v60, 4  ;;  %v10505_v54 = vrot.slane %v10504_v3, 4  ;;  %v17252_v38 = vpop.f32.mrf.mxu0 }
 0x680   : > { %v11422_v8 = vunpack.c.l.bf16 %v13310_v63  ;;  %v13663_v3 = vld [vmem:[%s14109_s11 + $0x80] sm:$0xff]  }
 0x681   : > { %v11497_v51 = vadd.f32 %v17055_v27, %v11302_v9  ;;  %10728 = vmatmul.bf16.gmra.mxu1 %v10584_v12  ;;  %v11596_v9 = vsel %vm11568_vm15, %v11594_v36, %v11595_v23  ;;  %v11035_v28 = vsel %vm14226_vm5, %v11033_v59, %v11034_v40  ;;  %v10036_v12 = vadd.f32 %v17162_v56, %v9657_v25  ;;  %v10881_v59 = vld [vmem:[#allocation2 + $0x114] sm:$0xf]  ;;  %v13313_v40 = vld [vmem:[%s14109_s11 + $0x88] sm:$0x1] }
 0x682   : > { %v10510_v26 = vsel %vm14133_vm2, %v10505_v54, %v17229_v31  ;;  %v9658_v56 = vadd.f32 %v17172_v43, %v16834_v21 }
 0x683   : > { %v11690_v24 = vadd.f32 %v11593_v14, %v11497_v51  ;;  %11245 = vmatmul.bf16.gmra.mxu2 %v11105_v42  ;;  %v10520_v14 = vsel %vm14133_vm2, %v10515_v1, %v10519_v16  ;;  %v11597_v51 = vrot.slane %v11422_v8, 1  ;;  %v11032_v42 = vsel %vm14226_vm5, %v13259_v61, %v11031_v60  ;;  %v17270_v31 = vpop.f32.mrf.mxu3 }
 0x684   : > { %v10569_v62 = vunpack.c.l.b16 %v10520_v14  ;;  %v10782_v55 = vadd.f32 %v17211_v37, %v10036_v12  ;;  %v10568_v33 = vunpack.c.l.b16 %v10510_v26  ;;  %v11088_v46 = vunpack.c.l.b16 %v11032_v42 }
 0x685   : > { %v11722_v11 = vmax.f32 %v11690_v24, 0.0  ;;  %v11089_v24 = vunpack.c.l.b16 %v11035_v28  ;;  %v11598_v63 = vsel %vm11568_vm15, %v11595_v23, %v11597_v51  ;;  %v13619_v1 = vunpack.c.l.bf16 %v13663_v3 }
 0x686   : > { %v11206_v47 = vpop.f32.mrf.mxu2  ;;  %v10585_v60 = vpack.c.b16 %v10569_v62, %v10568_v33  ;;  %v13620_v37 = vunpack.c.h.bf16 %v13663_v3  ;;  %v10037_v21 = vadd.f32 %v17185_v4, %v9658_v56  ;;  %v11038_v23 = vrot.slane %v10881_v59, 5 }
 0x687   : > { %11754 = vst [vmem:[%s17078_s13 + $0x48] sm:$0xff] %v11722_v11  ;;  %v11303_v7 = vadd.f32 %v11206_v47, %v10781_v20  ;;  %v17249_v58 = vpop.f32.mrf.mxu1  ;;  %v11106_v47 = vpack.c.b16 %v11089_v24, %v11088_v46  ;;  %v17274_v25 = vpop.f32.mrf.mxu0  ;;  %v11599_v29 = vrot.slane %v13619_v1, 1  ;;  %v9659_v12 = vadd.f32 %v17201_v19, %v16855_v5 }
 0x688   : > { %v11600_v54 = vrot.slane %v13620_v37, 1  ;;  %v11040_v61 = vrot.slane %v11038_v23, 4  ;;  %v11425_v51 = vunpack.c.l.bf16 %v13313_v40 }
 0x689   : > { %v11498_v6 = vadd.f32 %v17055_v27, %v11303_v7  ;;  %v10882_v7 = vld [vmem:[#allocation2 + $0x118] sm:$0x1] }
 0x68a   : > { %v11041_v28 = vrot.slane %v10882_v7, 5  ;;  %v11601_v26 = vsel %vm11568_vm15, %v11599_v29, %v11600_v54  ;;  %v11602_v5 = vrot.slane %v11425_v51, 1  ;;  %v13665_v51 = vld [vmem:[%s14109_s11 + $0xa0] sm:$0xff]  }
 0x68b   : > { %v11691_v57 = vadd.f32 %v11596_v9, %v11498_v6  ;;  %v10783_v9 = vadd.f32 %v17236_v34, %v10037_v21  ;;  %v10880_v6 = vld [vmem:[#allocation2 + $0x110] sm:$0xe]  ;;  %v17284_v62 = vpop.f32.mrf.mxu3 }
 0x68c   : > { %v13260_v42 = vrot.slane %v10880_v6, 9  ;;  %v11603_v37 = vsel %vm11568_vm15, %v11600_v54, %v11602_v5  ;;  %v9661_v54 = vadd.f32 %v17244_v17, %v16877_v41  ;;  %v9662_v41 = vadd.f32 %v17270_v31, %v16884_v32 }
 0x68d   : > { %v11723_v30 = vmax.f32 %v11691_v57, 0.0  ;;  %v13628_v5 = vunpack.c.h.bf16 %v13665_v51  ;;  %v9663_v31 = vadd.f32 %v17284_v62, %v16899_v39 }
 0x68e   : > { %v11208_v36 = vpop.f32.mrf.mxu2  ;;  %v11039_v19 = vsel %vm14226_vm5, %v13260_v42, %v11038_v23  ;;  %v13316_v23 = vld [vmem:[%s14109_s11 + $0x98] sm:$0x1] }
 0x68f   : > { %11755 = vst [vmem:[%s17078_s13 + $0x50] sm:$0xff] %v11723_v30  ;;  %v11304_v20 = vadd.f32 %v11208_v36, %v10782_v55  ;;  %v10694_v11 = vpop.f32.mrf.mxu1  ;;  %v11042_v55 = vsel %vm14226_vm5, %v11040_v61, %v11041_v28  ;;  %v10038_v30 = vadd.f32 %v17204_v10, %v9659_v12  ;;  %v17291_v3 = vpop.f32.mrf.mxu0  ;;  %v11090_v1 = vunpack.c.l.b16 %v11039_v19 }
 0x690   : > { %v11091_v56 = vunpack.c.l.b16 %v11042_v55  ;;  %v10040_v28 = vadd.f32 %v17252_v38, %v9661_v54 }
 0x691   : > { %v11499_v16 = vadd.f32 %v17055_v27, %v11304_v20  ;;  %10733 = vmatmul.bf16.gmra.mxu1 %v10585_v60  ;;  %v10784_v36 = vadd.f32 %v17249_v58, %v10038_v30  ;;  %v13664_v20 = vld [vmem:[%s14109_s11 + $0x90] sm:$0xff]  }
 0x692   : > { %v13623_v50 = vunpack.c.l.bf16 %v13664_v20  ;;  %v11107_v58 = vpack.c.b16 %v11091_v56, %v11090_v1  ;;  %v11610_v56 = vrot.slane %v13628_v5, 1 }
 0x693   : > { %v11692_v43 = vadd.f32 %v11598_v63, %v11499_v16  ;;  %11250 = vmatmul.bf16.gmra.mxu2 %v11106_v47  ;;  %v9660_v63 = vadd.f32 %v17225_v15, %v16862_v2  ;;  %v13624_v16 = vunpack.c.h.bf16 %v13664_v20 }
 0x694   : > { %v11604_v7 = vrot.slane %v13623_v50, 1 }
 0x695   : > { %v11724_v8 = vmax.f32 %v11692_v43, 0.0  ;;  %v10039_v59 = vadd.f32 %v17231_v45, %v9660_v63  ;;  %v9579_v43 = vpop.f32.mrf.mxu3  ;;  %v11605_v2 = vrot.slane %v13624_v16, 1  ;;  %v13319_v63 = vld [vmem:[%s14109_s11 + $0xa8] sm:$0x1] }
 0x696   : > { %v11211_v14 = vpop.f32.mrf.mxu2  ;;  %v11431_v16 = vunpack.c.l.bf16 %v13319_v63  ;;  %v9664_v39 = vadd.f32 %v9579_v43, %v16906_v0  ;;  %v13322_v0 = vld [vmem:[%s14109_s11 + $0xb8] sm:$0x1] }
 0x697   : > { %11756 = vst [vmem:[%s17078_s13 + $0x58] sm:$0xff] %v11724_v8  ;;  %v11305_v57 = vadd.f32 %v11211_v14, %v10783_v9  ;;  %v10696_v4 = vpop.f32.mrf.mxu1  ;;  %v10785_v15 = vadd.f32 %v10694_v11, %v10039_v59  ;;  %v9958_v8 = vpop.f32.mrf.mxu0  ;;  %v11606_v45 = vsel %vm11568_vm15, %v11604_v7, %v11605_v2  ;;  %v11428_v14 = vunpack.c.l.bf16 %v13316_v23 }
 0x698   : > { %v11612_v59 = vrot.slane %v11431_v16, 1 }
 0x699   : > { %v11500_v34 = vadd.f32 %v17055_v27, %v11305_v57  ;;  %v11607_v12 = vrot.slane %v11428_v14, 1  ;;  %v10786_v57 = vadd.f32 %v10696_v4, %v10040_v28  ;;  %v10041_v4 = vadd.f32 %v17274_v25, %v9662_v41 }
 0x69a   : > { %v11613_v23 = vsel %vm11568_vm15, %v11610_v56, %v11612_v59 }
 0x69b   : > { %v11693_v24 = vadd.f32 %v11601_v26, %v11500_v34  ;;  %v11608_v30 = vsel %vm11568_vm15, %v11605_v2, %v11607_v12  ;;  %v13666_v2 = vld [vmem:[%s14109_s11 + $0xb0] sm:$0xff]  }
 0x69c   : > { %v13632_v54 = vunpack.c.h.bf16 %v13666_v2 }
 0x69d   : > { %v11725_v33 = vmax.f32 %v11693_v24, 0.0  ;;  %v9581_v42 = vpop.f32.mrf.mxu3  ;;  %v13627_v24 = vunpack.c.l.bf16 %v13665_v51 }
 0x69e   : > { %v11213_v46 = vpop.f32.mrf.mxu2 }
 0x69f   : > { %11757 = vst [vmem:[%s17078_s13 + $0x60] sm:$0xff] %v11725_v33  ;;  %v11306_v60 = vadd.f32 %v11213_v46, %v10784_v36  ;;  %v10699_v10 = vpop.f32.mrf.mxu1  ;;  %v9960_v38 = vpop.f32.mrf.mxu0  ;;  %v11609_v33 = vrot.slane %v13627_v24, 1 }
 0x6a0   : > { %v10787_v20 = vadd.f32 %v10699_v10, %v10041_v4  ;;  %v10042_v10 = vadd.f32 %v17291_v3, %v9663_v31 }
 0x6a1   : > { %v11501_v47 = vadd.f32 %v17055_v27, %v11306_v60  ;;  %v11611_v50 = vsel %vm11568_vm15, %v11609_v33, %v11610_v56 }
 0x6a3   : > { %v11694_v21 = vadd.f32 %v11603_v37, %v11501_v47  ;;  %11255 = vmatmul.bf16.gmra.mxu2 %v11107_v58 }
 0x6a5   : > { %v11726_v29 = vmax.f32 %v11694_v21, 0.0  ;;  %v9584_v37 = vpop.f32.mrf.mxu3 }
 0x6a6   : > { %v11216_v9 = vpop.f32.mrf.mxu2 }
 0x6a7   : > { %11758 = vst [vmem:[%s17078_s13 + $0x68] sm:$0xff] %v11726_v29  ;;  %v11307_v40 = vadd.f32 %v11216_v9, %v10785_v15  ;;  %v10701_v6 = vpop.f32.mrf.mxu1  ;;  %v9963_v47 = vpop.f32.mrf.mxu0  ;;  %v13631_v9 = vunpack.c.l.bf16 %v13666_v2 }
 0x6a8   : > { %v10788_v21 = vadd.f32 %v10701_v6, %v10042_v10 }
 0x6a9   : > { %v11502_v61 = vadd.f32 %v17055_v27, %v11307_v40  ;;  %v11614_v6 = vrot.slane %v13631_v9, 1  ;;  %v13668_v9 = vld [vmem:[%s14109_s11 + $0xd0] sm:$0xff]  }
 0x6ab   : > { %v11695_v11 = vadd.f32 %v11606_v45, %v11502_v61  ;;  %v10043_v45 = vadd.f32 %v9958_v8, %v9664_v39  ;;  %v11615_v61 = vrot.slane %v13632_v54, 1  ;;  %v17334_v8 = vld [vmem:[%s17444_s4] ss:$0 sm:$0xff] }
 0x6ad   : > { %v11727_v26 = vmax.f32 %v11695_v11, 0.0  ;;  %v9586_v3 = vpop.f32.mrf.mxu3 }
 0x6ae   : > { %v11218_v34 = vpop.f32.mrf.mxu2 }
 0x6af   : > { %11759 = vst [vmem:[%s17078_s13 + $0x70] sm:$0xff] %v11727_v26  ;;  %v11308_v17 = vadd.f32 %v11218_v34, %v10786_v57  ;;  %v10704_v55 = vpop.f32.mrf.mxu1  ;;  %v9965_v28 = vpop.f32.mrf.mxu0  ;;  %v9665_v57 = vadd.f32 %v9581_v42, %v16921_v18  ;;  %v11616_v34 = vsel %vm11568_vm15, %v11614_v6, %v11615_v61  ;;  %v13667_v42 = vld [vmem:[%s14109_s11 + $0xc0] sm:$0xff]   ;;  %v13640_v6 = vunpack.c.h.bf16 %v13668_v9 }
 0x6b0   : > { %v10789_v11 = vadd.f32 %v10704_v55, %v10043_v45  ;;  %v13636_v63 = vunpack.c.h.bf16 %v13667_v42 }
 0x6b1   : > { %v11503_v19 = vadd.f32 %v17055_v27, %v11308_v17  ;;  %v10044_v17 = vadd.f32 %v9960_v38, %v9665_v57  ;;  %v11625_v57 = vrot.slane %v13640_v6, 1 }
 0x6b3   : > { %v11696_v36 = vadd.f32 %v11608_v30, %v11503_v19 }
 0x6b5   : > { %v11728_v46 = vmax.f32 %v11696_v36, 0.0  ;;  %v9589_v30 = vpop.f32.mrf.mxu3  ;;  %v9666_v36 = vadd.f32 %v9584_v37, %v16928_v52  ;;  %v9667_v37 = vadd.f32 %v9586_v3, %v16943_v48 }
 0x6b6   : > { %v11221_v32 = vpop.f32.mrf.mxu2 }
 0x6b7   : > { %11760 = vst [vmem:[%s17078_s13 + $0x78] sm:$0xff] %v11728_v46  ;;  %v11309_v60 = vadd.f32 %v11221_v32, %v10787_v20  ;;  %v10706_v1 = vpop.f32.mrf.mxu1  ;;  %v9968_v4 = vpop.f32.mrf.mxu0  ;;  %v13635_v46 = vunpack.c.l.bf16 %v13667_v42  ;;  %v10045_v32 = vadd.f32 %v9963_v47, %v9666_v36 }
 0x6b8   : > { %v10790_v5 = vadd.f32 %v10706_v1, %v10044_v17  ;;  %v11620_v1 = vrot.slane %v13636_v63, 1 }
 0x6b9   : > { %v11504_v25 = vadd.f32 %v17055_v27, %v11309_v60  ;;  %v11619_v60 = vrot.slane %v13635_v46, 1 }
 0x6bb   : > { %v11697_v58 = vadd.f32 %v11611_v50, %v11504_v25  ;;  %v13325_v25 = vld [vmem:[%s14109_s11 + $0xc8] sm:$0x1]  ;;  %v11621_v59 = vsel %vm11568_vm15, %v11619_v60, %v11620_v1 }
 0x6bd   : > { %v11729_v7 = vmax.f32 %v11697_v58, 0.0  ;;  %v9591_v10 = vpop.f32.mrf.mxu3 }
 0x6be   : > { %v11223_v15 = vpop.f32.mrf.mxu2 }
 0x6bf   : > { %11761 = vst [vmem:[%s17078_s13 + $0x80] sm:$0xff] %v11729_v7  ;;  %v11310_v62 = vadd.f32 %v11223_v15, %v10788_v21  ;;  %v10709_v29 = vpop.f32.mrf.mxu1  ;;  %v11437_v21 = vunpack.c.l.bf16 %v13325_v25  ;;  %v9970_v7 = vpop.f32.mrf.mxu0  ;;  %v10046_v15 = vadd.f32 %v9965_v28, %v9667_v37  ;;  %v13331_v37 = vld [vmem:[%s14109_s11 + $0xe8] sm:$0x1] }
 0x6c0   : > { %v10791_v50 = vadd.f32 %v10709_v29, %v10045_v32 }
 0x6c1   : > { %v11505_v40 = vadd.f32 %v17055_v27, %v11310_v62  ;;  %v11434_v27 = vunpack.c.l.bf16 %v13322_v0  ;;  %v11622_v62 = vrot.slane %v11437_v21, 1 }
 0x6c3   : > { %v11698_v14 = vadd.f32 %v11613_v23, %v11505_v40  ;;  %v11617_v24 = vrot.slane %v11434_v27, 1  ;;  %v9668_v40 = vadd.f32 %v9589_v30, %v16950_v13  ;;  %v11623_v45 = vsel %vm11568_vm15, %v11620_v1, %v11622_v62  ;;  %v13328_v13 = vld [vmem:[%s14109_s11 + $0xd8] sm:$0x1] }
 0x6c4   : > { %v9669_v27 = vadd.f32 %v9591_v10, %v16965_v44 }
 0x6c5   : > { %v11730_v12 = vmax.f32 %v11698_v14, 0.0  ;;  %v11618_v56 = vsel %vm11568_vm15, %v11615_v61, %v11617_v24  ;;  %v9594_v3 = vpop.f32.mrf.mxu3  ;;  %v13639_v14 = vunpack.c.l.bf16 %v13668_v9 }
 0x6c6   : > { %v11226_v43 = vpop.f32.mrf.mxu2  ;;  %v9670_v44 = vadd.f32 %v9594_v3, %v16972_v35 }
 0x6c7   : > { %11762 = vst [vmem:[%s17078_s13 + $0x88] sm:$0xff] %v11730_v12  ;;  %v11311_v26 = vadd.f32 %v11226_v43, %v10789_v11  ;;  %v10711_v51 = vpop.f32.mrf.mxu1  ;;  %v9973_v28 = vpop.f32.mrf.mxu0  ;;  %v10047_v11 = vadd.f32 %v9968_v4, %v9668_v40  ;;  %v11624_v43 = vrot.slane %v13639_v14, 1 }
 0x6c8   : > { %v10792_v29 = vadd.f32 %v10711_v51, %v10046_v15  ;;  %v10049_v60 = vadd.f32 %v9973_v28, %v9670_v44 }
 0x6c9   : > { %v11506_v41 = vadd.f32 %v17334_v8, %v11311_v26  ;;  %v11626_v17 = vsel %vm11568_vm15, %v11624_v43, %v11625_v57 }
 0x6cb   : > { %v11699_v55 = vadd.f32 %v11616_v34, %v11506_v41 }
 0x6cd   : > { %v11731_v18 = vmax.f32 %v11699_v55, 0.0  ;;  %v11440_v55 = vunpack.c.l.bf16 %v13328_v13  ;;  %v9596_v24 = vpop.f32.mrf.mxu3  ;;  %v13334_v13 = vld [vmem:[%s14109_s11 + $0xf8] sm:$0x1] }
 0x6ce   : > { %v11228_v19 = vpop.f32.mrf.mxu2 }
 0x6cf   : > { %11763 = vst [vmem:[%s17078_s13 + $0x90] sm:$0xff] %v11731_v18  ;;  %v11312_v33 = vadd.f32 %v11228_v19, %v10790_v5  ;;  %v10714_v20 = vpop.f32.mrf.mxu1  ;;  %v10048_v5 = vadd.f32 %v9970_v7, %v9669_v27  ;;  %v11627_v42 = vrot.slane %v11440_v55, 1  ;;  %v9975_v19 = vpop.f32.mrf.mxu0  ;;  %v11446_v55 = vunpack.c.l.bf16 %v13334_v13 }
 0x6d0   : > { %v10793_v26 = vadd.f32 %v10714_v20, %v10047_v11 }
 0x6d1   : > { %v11507_v38 = vadd.f32 %v17334_v8, %v11312_v33  ;;  %v13669_v33 = vld [vmem:[%s14109_s11 + $0xe0] sm:$0xff]   ;;  %v11628_v63 = vsel %vm11568_vm15, %v11625_v57, %v11627_v42 }
 0x6d2   : > { %v13644_v32 = vunpack.c.h.bf16 %v13669_v33 }
 0x6d3   : > { %v11700_v31 = vadd.f32 %v11618_v56, %v11507_v38  ;;  %v13643_v38 = vunpack.c.l.bf16 %v13669_v33  ;;  %v13671_v33 = vld [vmem:[%s14109_s11 + $0x100] sm:$0xff]  }
 0x6d4   : > { %v11630_v25 = vrot.slane %v13644_v32, 1 }
 0x6d5   : > { %v11732_v16 = vmax.f32 %v11700_v31, 0.0 }
 0x6d6   : > { %v11231_v52 = vpop.f32.mrf.mxu2 }
 0x6d7   : > { %11764 = vst [vmem:[%s17078_s13 + $0x98] sm:$0xff] %v11732_v16  ;;  %v11313_v58 = vadd.f32 %v11231_v52, %v10791_v50  ;;  %v10716_v2 = vpop.f32.mrf.mxu1  ;;  %v9599_v50 = vpop.f32.mrf.mxu3  ;;  %v11629_v16 = vrot.slane %v13643_v38, 1  ;;  %v13652_v38 = vunpack.c.h.bf16 %v13671_v33 }
 0x6d8   : > { %v10794_v4 = vadd.f32 %v10716_v2, %v10048_v5  ;;  %v9978_v35 = vpop.f32.mrf.mxu0  ;;  %v11443_v2 = vunpack.c.l.bf16 %v13331_v37  ;;  %v13337_v37 = vld [vmem:[%s14109_s11 + $0x108] sm:$0x1] }
 0x6d9   : > { %v11508_v47 = vadd.f32 %v17334_v8, %v11313_v58 }
 0x6db   : > { %v11701_v39 = vadd.f32 %v11621_v59, %v11508_v47  ;;  %v9671_v59 = vadd.f32 %v9596_v24, %v16987_v49  ;;  %v11631_v47 = vsel %vm11568_vm15, %v11629_v16, %v11630_v25  ;;  %v9672_v49 = vadd.f32 %v9599_v50, %v16994_v22 }
 0x6dc   : > { %v11640_v16 = vrot.slane %v13652_v38, 1 }
 0x6dd   : > { %v11733_v23 = vmax.f32 %v11701_v39, 0.0  ;;  %v10050_v39 = vadd.f32 %v9975_v19, %v9671_v59  ;;  %v11637_v19 = vrot.slane %v11446_v55, 1  ;;  %v17719_v59 = vld [vmem:[#allocation43_spill] sm:$0xff] }
 0x6de   : > { %v11233_v54 = vpop.f32.mrf.mxu2 }
 0x6df   : > { %11765 = vst [vmem:[%s17078_s13 + $0xa0] sm:$0xff] %v11733_v23  ;;  %v11314_v48 = vadd.f32 %v11233_v54, %v10792_v29  ;;  %v10719_v0 = vpop.f32.mrf.mxu1  ;;  %v11632_v29 = vrot.slane %v11443_v2, 1  ;;  %v13670_v54 = vld [vmem:[%s14109_s11 + $0xf0] sm:$0xff]   ;;  %v9601_v40 = vpop.f32.mrf.mxu3  ;;  %v11449_v2 = vunpack.c.l.bf16 %v13337_v37 }
 0x6e0   : > { %v10795_v10 = vadd.f32 %v10719_v0, %v10049_v60  ;;  %v13647_v14 = vunpack.c.l.bf16 %v13670_v54  ;;  %v13648_v6 = vunpack.c.h.bf16 %v13670_v54 }
 0x6e1   : > { %v11509_v61 = vadd.f32 %v17334_v8, %v11314_v48 }
 0x6e2   : > { %v11634_v43 = vrot.slane %v13647_v14, 1  ;;  %v11635_v57 = vrot.slane %v13648_v6, 1 }
 0x6e3   : > { %v11702_v12 = vadd.f32 %v11623_v45, %v11509_v61  ;;  %v11633_v45 = vsel %vm11568_vm15, %v11630_v25, %v11632_v29  ;;  %v9980_v61 = vpop.f32.mrf.mxu0 }
 0x6e5   : > { %v11734_v51 = vmax.f32 %v11702_v12, 0.0  ;;  %v10051_v12 = vadd.f32 %v9978_v35, %v9672_v49  ;;  %v17720_v49 = vld [vmem:[#allocation41_spill] sm:$0xff] }
 0x6e6   : > { %v11236_v34 = vpop.f32.mrf.mxu2 }
 0x6e7   : > { %11766 = vst [vmem:[%s17078_s13 + $0xa8] sm:$0xff] %v11734_v51  ;;  %v11315_v41 = vadd.f32 %v11236_v34, %v10793_v26  ;;  %v10721_v56 = vpop.f32.mrf.mxu1  ;;  %v9673_v34 = vadd.f32 %v9601_v40, %v17009_v53  ;;  %v13672_v40 = vld [vmem:[%s14109_s11 + $0x110] sm:$0xff]  }
 0x6e8   : > { %v10796_v23 = vadd.f32 %v10721_v56, %v10050_v39 }
 0x6e9   : > { %v11510_v30 = vadd.f32 %v17334_v8, %v11315_v41  ;;  %v9604_v41 = vpop.f32.mrf.mxu3  ;;  %v10052_v5 = vadd.f32 %v9980_v61, %v9673_v34 }
 0x6eb   : > { %v11703_v18 = vadd.f32 %v11626_v17, %v11510_v30  ;;  %v11636_v17 = vsel %vm11568_vm15, %v11634_v43, %v11635_v57  ;;  %v9983_v24 = vpop.f32.mrf.mxu0 }
 0x6ed   : > { %v11735_v36 = vmax.f32 %v11703_v18, 0.0 }
 0x6ee   : > { %v11238_v20 = vpop.f32.mrf.mxu2 }
 0x6ef   : > { %11767 = vst [vmem:[%s17078_s13 + $0xb0] sm:$0xff] %v11735_v36  ;;  %v11316_v46 = vadd.f32 %v11238_v20, %v10794_v4  ;;  %v10724_v7 = vpop.f32.mrf.mxu1  ;;  %v17718_v20 = vld [vmem:[#allocation40_spill] sm:$0xff] }
 0x6f0   : > { %v10797_v26 = vadd.f32 %v10724_v7, %v10051_v12  ;;  %v9674_v53 = vadd.f32 %v9604_v41, %v17718_v20  ;;  %v17721_v41 = vld [vmem:[#allocation53_spill] sm:$0xff] }
 0x6f1   : > { %v11511_v31 = vadd.f32 %v17334_v8, %v11316_v46  ;;  %v11638_v46 = vsel %vm11568_vm15, %v11635_v57, %v11637_v19 }
 0x6f2   : > { %v10053_v60 = vadd.f32 %v9983_v24, %v9674_v53 }
 0x6f3   : > { %v11704_v1 = vadd.f32 %v11628_v63, %v11511_v31  ;;  %v13651_v63 = vunpack.c.l.bf16 %v13671_v33  ;;  %v9606_v31 = vpop.f32.mrf.mxu3  ;;  %v9985_v25 = vpop.f32.mrf.mxu0 }
 0x6f5   : > { %v11736_v52 = vmax.f32 %v11704_v1, 0.0  ;;  %v11639_v50 = vrot.slane %v13651_v63, 1 }
 0x6f6   : > { %v11241_v58 = vpop.f32.mrf.mxu2 }
 0x6f7   : > { %11768 = vst [vmem:[%s17078_s13 + $0xb8] sm:$0xff] %v11736_v52  ;;  %v11317_v21 = vadd.f32 %v11241_v58, %v10795_v10  ;;  %v10726_v11 = vpop.f32.mrf.mxu1 }
 0x6f8   : > { %v10798_v4 = vadd.f32 %v10726_v11, %v10052_v5  ;;  %v13656_v11 = vunpack.c.h.bf16 %v13672_v40 }
 0x6f9   : > { %v11512_v15 = vadd.f32 %v17334_v8, %v11317_v21  ;;  %v9675_v21 = vadd.f32 %v9606_v31, %v17719_v59 }
 0x6fb   : > { %v11705_v62 = vadd.f32 %v11631_v47, %v11512_v15  ;;  %v11641_v47 = vsel %vm11568_vm15, %v11639_v50, %v11640_v16  ;;  %v10054_v39 = vadd.f32 %v9985_v25, %v9675_v21  ;;  %v9609_v29 = vpop.f32.mrf.mxu3  ;;  %v9988_v14 = vpop.f32.mrf.mxu0 }
 0x6fd   : > { %v11737_v9 = vmax.f32 %v11705_v62, 0.0 }
 0x6fe   : > { %v11243_v48 = vpop.f32.mrf.mxu2 }
 0x6ff   : > { %11769 = vst [vmem:[%s17078_s13 + $0xc0] sm:$0xff] %v11737_v9  ;;  %v11318_v3 = vadd.f32 %v11243_v48, %v10796_v23  ;;  %v10729_v42 = vpop.f32.mrf.mxu1  ;;  %v11642_v23 = vrot.slane %v11449_v2, 1 }
 0x700   : > { %v10799_v10 = vadd.f32 %v10729_v42, %v10053_v60 }
 0x701   : > { %v11513_v28 = vadd.f32 %v17334_v8, %v11318_v3  ;;  %v9676_v3 = vadd.f32 %v9609_v29, %v17720_v49  ;;  %v11643_v61 = vsel %vm11568_vm15, %v11640_v16, %v11642_v23 }
 0x703   : > { %v11706_v0 = vadd.f32 %v11633_v45, %v11513_v28  ;;  %v13655_v28 = vunpack.c.l.bf16 %v13672_v40  ;;  %v9611_v34 = vpop.f32.mrf.mxu3 }
 0x705   : > { %v11738_v51 = vmax.f32 %v11706_v0, 0.0  ;;  %v10055_v0 = vadd.f32 %v9988_v14, %v9676_v3  ;;  %v11644_v57 = vrot.slane %v13655_v28, 1 }
 0x706   : > { %v11246_v22 = vpop.f32.mrf.mxu2 }
 0x707   : > { %11770 = vst [vmem:[%s17078_s13 + $0xc8] sm:$0xff] %v11738_v51  ;;  %v11319_v27 = vadd.f32 %v11246_v22, %v10797_v26  ;;  %v10731_v58 = vpop.f32.mrf.mxu1  ;;  %v11645_v26 = vrot.slane %v13656_v11, 1  ;;  %v13340_v22 = vld [vmem:[%s14109_s11 + $0x118] sm:$0x1]  ;;  %s11791_s11 = scalar_lea.hbm %s17445_s5, %s13592_s27 }
 0x708   : > { %v10800_v9 = vadd.f32 %v10731_v58, %v10054_v39  ;;  %v11452_v24 = vunpack.c.l.bf16 %v13340_v22  ;;  %s11794_s3 = sshll.u32 %s11791_s11, 4  ;;  %s11795_s3 = int_to_ptr.hbm [resolvable:$true] %s11794_s3 }
 0x709   : > { %v11514_v30 = vadd.f32 %v17334_v8, %v11319_v27  ;;  %s13889_s26 = sshra.s32 %s11795_s3, 4  ;;  %s13890_s26 = int_to_ptr.hbm [resolvable:$true] %s13889_s26 }
 0x70a   : > { %s13891_s28 = scalar_lea.hbm %s13890_s26, 256  ;;  %p13896_p8 = scmp.lt.s32.totalorder %s13890_s26, %s17445_s5 }
 0x70b   : > { %v11707_v18 = vadd.f32 %v11636_v17, %v11514_v30  ;;  %v9677_v17 = vadd.f32 %v9611_v34, %v17721_v41  ;;  %v11646_v30 = vsel %vm11568_vm15, %v11644_v57, %v11645_v26  ;;  %p13892_p1 = scmp.ne.s32.totalorder %s13890_s26, %s13891_s28  ;;  %p13897_p12 = scmp.lt.s32.totalorder %s13895_s15, %s13891_s28 }
 0x70d   : > { %v11739_v36 = vmax.f32 %v11707_v18, 0.0  ;;  %v9990_v18 = vpop.f32.mrf.mxu0  ;;  %p13893_p2 = pnand %p13892_p1, %p14085_p7  ;;  %p13898_p13 = por %p13897_p12, %p13896_p8 }
 0x70e   : > { %v11248_v56 = vpop.f32.mrf.mxu2  ;;  %v10056_v19 = vadd.f32 %v9990_v18, %v9677_v17 }
 0x70f   : > { %11771 = vst [vmem:[%s17078_s13 + $0xd0] sm:$0xff] %v11739_v36  ;;  %v11320_v44 = vadd.f32 %v11248_v56, %v10798_v4  ;;  %v10734_v6 = vpop.f32.mrf.mxu1  ;;  %v11647_v36 = vrot.slane %v11452_v24, 1  ;;  %p13894_p4 = pneg %p13893_p2 }
 0x710   : > { %v10801_v51 = vadd.f32 %v10734_v6, %v10055_v0 }
 0x711   : > { %v11515_v32 = vadd.f32 %v17334_v8, %v11320_v44  ;;  %v11648_v44 = vsel %vm11568_vm15, %v11645_v26, %v11647_v36  ;;  %p13899_p0 = pnand %p13898_p13, %p13894_p4 }
 0x713   : > { %v11708_v1 = vadd.f32 %v11638_v46, %v11515_v32 }
 0x715   : > { %v11740_v52 = vmax.f32 %v11708_v1, 0.0 }
 0x716   : > { %v11251_v35 = vpop.f32.mrf.mxu2 }
 0x717   : > { %11772 = vst [vmem:[%s17078_s13 + $0xd8] sm:$0xff] %v11740_v52  ;;  %v11321_v7 = vadd.f32 %v11251_v35, %v10799_v10  ;;  %v10736_v42 = vpop.f32.mrf.mxu1 }
 0x718   : > { %v10802_v33 = vadd.f32 %v10736_v42, %v10056_v19 }
 0x719   : > { %v11516_v15 = vadd.f32 %v17334_v8, %v11321_v7 }
 0x71b   : > { %v11709_v62 = vadd.f32 %v11641_v47, %v11516_v15 }
 0x71d   : > { %v11741_v54 = vmax.f32 %v11709_v62, 0.0 }
 0x71e   : > { %v11253_v48 = vpop.f32.mrf.mxu2 }
 0x71f   : > { %11773 = vst [vmem:[%s17078_s13 + $0xe0] sm:$0xff] %v11741_v54  ;;  %v11322_v45 = vadd.f32 %v11253_v48, %v10800_v9 }
 0x721   : > { %v11517_v12 = vadd.f32 %v17334_v8, %v11322_v45 }
 0x723   : > { %v11710_v43 = vadd.f32 %v11643_v61, %v11517_v12 }
 0x725   : > { %v11742_v13 = vmax.f32 %v11710_v43, 0.0 }
 0x726   : > { %v11256_v27 = vpop.f32.mrf.mxu2 }
 0x727   : > { %11774 = vst [vmem:[%s17078_s13 + $0xe8] sm:$0xff] %v11742_v13  ;;  %v11323_v55 = vadd.f32 %v11256_v27, %v10801_v51 }
 0x729   : > { %v11518_v5 = vadd.f32 %v17334_v8, %v11323_v55 }
 0x72b   : > { %v11711_v4 = vadd.f32 %v11646_v30, %v11518_v5 }
 0x72d   : > { %v11743_v56 = vmax.f32 %v11711_v4, 0.0 }
 0x72e   : > { %v11258_v20 = vpop.f32.mrf.mxu2 }
 0x72f   : > { %11775 = vst [vmem:[%s17078_s13 + $0xf0] sm:$0xff] %v11743_v56  ;;  %v11324_v53 = vadd.f32 %v11258_v20, %v10802_v33 }
 0x731   : > { %v11519_v46 = vadd.f32 %v17334_v8, %v11324_v53 }
 0x733   : > { %v11712_v63 = vadd.f32 %v11648_v44, %v11519_v46 }
 0x735   : > { %v11744_v38 = vmax.f32 %v11712_v63, 0.0 }
 0x737   : > { %11776 = vst [vmem:[%s17078_s13 + $0xf8] sm:$0xff] %v11744_v38 }
 0x738   : > { %13902 = shalt.err (!%p13899_p0)
}
 0x739   : > { %s13968_s25 = smov 128   ;;  %s13969_s13 = smov 8  }
 0x73a   : > { %13702 = dma.vmem_to_hbm [thread:$0]  (%p14085_p7), %s11793_s1, 4096, %s11795_s3, %s11778_s21, %s13968_s25, %s13968_s25, %s13969_s13  }
 0x73b PF: > { %s11809_s16 = sand.u32 1, %s13941_s18   ;;  %p13716_p3 = pnand %p11913_p11, %p14049_p6 }
 0x73c   : > { %s11810_s17 = scalar_lea.sflag [#allocation6], %s11809_s16 }
 0x73d   : > { %p13717_p5 = pneg %p13716_p3 }
 0x73f   : > { %13936 = dma.done.wait (%p13717_p5), %s11810_s17, 4096  }
 0x740   : > { %13938 = vsyncadd (%p13717_p5), %s11810_s17, 4294963200  ;;  %s22_s23 = sadd.s32 1, %s13961_s23   ;;  %s17722_s18 = smov %s13945_s19 }
 0x741   : > { %p19_p9 = scmp.ge.s32.totalorder %s22_s23, 4   ;;  %s17723_s19 = smov %s13949_s20 }
 0x742   : > { %s17724_s20 = smov %s14093_s10  ;;  %s17725_s21 = smov %s13957_s22 }
 0x743   : > { %s17726_s22 = smov %s17728_s24  ;;  %21 = sbr.rel (!%p19_p9) target bundleno = 10 (0xa), region = 119 }
 0x748   :  { %11816 = vsyncpa [#allocation5], 1 }
 0x749   :  { %11818 = vsyncpa [#allocation5 + $0x1], 1 }
 0x74a   :  { %11819 = vsyncpa [#allocation8], 1 }
 0x74b   :  { %11820 = vsyncpa [#allocation6], 1 }
 0x74c   :  { %11822 = vsyncpa [#allocation6 + $0x1], 1 }

</bundles_post_ra>
